<compile_context>
chip_gen: v5e
topology: v5e:2x2
jax: 0.10.0
libtpu: 0.0.40
codegen_flags: <defaults>
</compile_context>

<pallas_src>
import functools
import math

import numpy as np
import jax
import jax.numpy as jnp
from jax.experimental import pallas as pl
from jax.experimental.pallas import tpu as pltpu

F32 = jnp.float32


def _rnd8(n):
    return (n + 7) // 8 * 8


# ----------------------------------------------------------------------------
# Parameter init (PyTorch-equivalent layouts / init_weights)
# ----------------------------------------------------------------------------
def init_params(key):
    ks = jax.random.split(key, 7)
    p = {}
    conv_shapes = {"conv1": (32, 1, 5, 5),
                   "conv2": (64, 32, 5, 5),   # see TODO above
                   "conv3": (32, 64, 5, 5)}
    for i, (name, shp) in enumerate(conv_shapes.items()):
        std = 1.0 / math.sqrt(5 * 5 * shp[1])
        p[name + "_w"] = std * jax.random.normal(ks[i], shp, F32)
        p[name + "_b"] = jnp.zeros((shp[0],), F32)
    fc_shapes = {"fc1": (512, 64), "fc2": (64, 32), "fc3": (32, 8), "fc4": (8, 1)}
    for j, (name, (fin, fout)) in enumerate(fc_shapes.items()):
        std = 1.0 / math.sqrt(fin)
        p[name + "_w"] = std * jax.random.normal(ks[3 + j], (fin, fout), F32)
        p[name + "_b"] = jnp.zeros((fout,), F32)
    return p


# ----------------------------------------------------------------------------
# One-time repack: every weight/bias + the row-permutation matrix -> ONE slab.
# All row offsets are multiples of 8 (sublane aligned), slab width >= 128.
# ----------------------------------------------------------------------------
def pack_params(p, batch):
    width = max(128, 64 * batch)
    blocks, layout = [], {}
    off = 0

    def add(name, mat):
        nonlocal off
        mat = np.asarray(mat, np.float32)
        r, c = mat.shape
        blk = np.zeros((_rnd8(r), width), np.float32)
        blk[:r, :c] = mat
        blocks.append(blk)
        layout[name] = (off, r, c)
        off += blk.shape[0]

    # conv1: (25 taps -> padded to 32, co=32); patch matrix is lane-padded to 32 too.
    w1 = np.asarray(p["conv1_w"])                       # (32, 1, 5, 5)
    w1c = np.zeros((32, 32), np.float32)
    w1c[:25, :] = w1[:, 0].reshape(32, 25).T            # rows t=(kh*5+kw), cols co
    add("w1c", w1c)
    add("b1c", np.asarray(p["conv1_b"]).reshape(1, -1))

    # conv2: per-tap (ci, co) blocks, rows t*32+ci
    w2 = np.asarray(p["conv2_w"])                       # (64, 32, 5, 5)
    add("w2c", np.transpose(w2, (2, 3, 1, 0)).reshape(25 * 32, 64))
    add("b2c", np.asarray(p["conv2_b"]).reshape(1, -1))

    # conv3: row-banded matrices, one per kh.  Rows = (jcol, ci), cols = (ow3, co);
    # the width taps / width zero-padding are folded into the band structure.
    w3 = np.asarray(p["conv3_w"])                       # (32, 64, 5, 5)
    band = np.zeros((5, 8 * 64, 4 * 32), np.float32)
    for kh in range(5):
        for ow in range(4):
            for jcol in range(8):
                kw = jcol - 2 * ow + 2
                if 0 <= kw < 5:
                    band[kh, jcol * 64:(jcol + 1) * 64,
                         ow * 32:(ow + 1) * 32] = w3[:, :, kh, kw].T   # (ci, co)
    add("w3band", band.reshape(5 * 512, 128))
    add("b3c", np.tile(np.asarray(p["conv3_b"]).reshape(1, 32), (1, 4)))

    # Row permutation that regroups conv2's output rows (b, oh2, ow2) into
    # (oh2%2, b, ow2, oh2//2) so the conv3 padded buffer can be filled with
    # contiguous (4, 64) stores.
    n = batch * 64
    P2 = np.zeros((n, n), np.float32)
    for b in range(batch):
        for oh in range(8):
            for ow in range(8):
                r_in = b * 64 + oh * 8 + ow
                r_out = (((oh % 2) * batch + b) * 8 + ow) * 4 + oh // 2
                P2[r_out, r_in] = 1.0
    add("p2", P2)

    # fc1: permute rows from the PyTorch NCHW flatten (c*16 + oh*4 + ow) to the
    # kernel's (oh*128 + ow*32 + c) column order.
    f1 = np.asarray(p["fc1_w"])                         # (512, 64) = (in, out)
    perm = np.zeros((512,), np.int64)
    for oh in range(4):
        for ow in range(4):
            for c in range(32):
                perm[oh * 128 + ow * 32 + c] = c * 16 + oh * 4 + ow
    add("w1f", f1[perm])
    add("b1f", np.asarray(p["fc1_b"]).reshape(1, -1))
    add("w2f", np.asarray(p["fc2_w"]))
    add("b2f", np.asarray(p["fc2_b"]).reshape(1, -1))
    add("w3f", np.asarray(p["fc3_w"]))
    add("b3f", np.asarray(p["fc3_b"]).reshape(1, -1))
    add("w4f", np.asarray(p["fc4_w"]))
    add("b4f", np.asarray(p["fc4_b"]).reshape(1, -1))

    slab = jnp.asarray(np.concatenate(blocks, axis=0))
    return slab, layout


# ----------------------------------------------------------------------------
# Wrapper-side conv1 im2col (only touches the tiny external input).
# Rows ordered (oh1%2, ow1%2, b, oh1//2, ow1//2) so the kernel can drop the
# conv1 output straight into the parity-grouped padded conv2 buffer.
# ----------------------------------------------------------------------------
def _conv1_patches(x):
    B = x.shape[0]
    xp = jnp.pad(x[:, 0].astype(F32), ((0, 0), (2, 2), (2, 2)))       # (B, 36, 36)
    groups = []
    for ph in range(2):
        for pw in range(2):
            taps = []
            for kh in range(5):
                for kw in range(5):
                    sh, sw = 2 * ph + kh, 2 * pw + kw
                    taps.append(xp[:, sh:sh + 29:4, sw:sw + 29:4])    # (B, 8, 8)
            groups.append(jnp.stack(taps, axis=-1).reshape(B * 64, 25))
    patches = jnp.concatenate(groups, axis=0)                          # (4*B*64, 25)
    return jnp.pad(patches, ((0, 0), (0, 7)))                          # lanes 25 -> 32


# ----------------------------------------------------------------------------
# The single fused kernel: conv1-3 + fc1-4, everything VMEM resident.
# ----------------------------------------------------------------------------
def _net_kernel(p1_ref, slab_ref, out_ref, pad2_ref, pad3_ref, fc1_ref,
                *, layout, batch):
    B = batch

    def ld(name):
        off, r, c = layout[name]
        return slab_ref[off:off + r, 0:c]

    def dot(a, b):
        return jnp.dot(a, b, preferred_element_type=F32)

    # Zero the padded scratch buffers (their borders implement conv padding).
    pad2_ref[...] = jnp.zeros(pad2_ref.shape, F32)
    pad3_ref[...] = jnp.zeros(pad3_ref.shape, F32)

    # ---- conv1: one GEMM on wrapper-built patches -------------------------
    a1 = jnp.maximum(dot(p1_ref[...], ld("w1c")) + ld("b1c"), 0.0)     # (4*B*64, 32)
    # Scatter the 4 parity groups into the padded conv2 input buffer.
    for g in range(4):
        blk = a1[g * B * 64:(g + 1) * B * 64, :].reshape(B, 8, 8, 32)
        pad2_ref[g * B:(g + 1) * B, 1:9, 1:9, :] = blk

    # ---- conv2: true im2col, one GEMM per 5x5 tap (exact FLOPs) -----------
    w2_off = layout["w2c"][0]
    acc2 = jnp.zeros((B * 64, 64), F32)
    for kh in range(5):
        for kw in range(5):
            g = (kh % 2) * 2 + (kw % 2)
            slab = pad2_ref[g * B:(g + 1) * B,
                            kh // 2:kh // 2 + 8,
                            kw // 2:kw // 2 + 8, :]                    # (B, 8, 8, 32)
            lhs = slab.reshape(B * 64, 32)                             # rows (b, oh2, ow2)
            t = kh * 5 + kw
            acc2 = acc2 + dot(lhs, slab_ref[w2_off + t * 32:
                                            w2_off + (t + 1) * 32, 0:64])
    a2 = jnp.maximum(acc2 + ld("b2c"), 0.0)                            # (B*64, 64)

    # Regroup rows with one permutation matmul, fill padded conv3 buffer.
    a2p = dot(ld("p2"), a2)                                            # rows (hg, b, ow2, u)
    for hg in range(2):
        for b in range(B):
            for ow in range(8):
                r0 = ((hg * B + b) * 8 + ow) * 4
                pad3_ref[hg, b, 1:5, ow * 64:(ow + 1) * 64] = a2p[r0:r0 + 4, :]

    # ---- conv3: row-banded GEMMs (width folded into K), then fc1 staging --
    w3_off = layout["w3band"][0]
    b3 = ld("b3c")
    for b in range(B):
        acc3 = jnp.zeros((4, 128), F32)
        for kh in range(5):
            lhs = pad3_ref[kh % 2, b, kh // 2:kh // 2 + 4, :]          # (4, 512)
            acc3 = acc3 + dot(lhs, slab_ref[w3_off + kh * 512:
                                            w3_off + (kh + 1) * 512, 0:128])
        act3 = jnp.maximum(acc3 + b3, 0.0)                             # (4, 128)=(oh3; ow3,c)
        for oh in range(4):
            fc1_ref[b:b + 1, oh * 128:(oh + 1) * 128] = act3[oh:oh + 1, :]

    # ---- fc stack: single GEMM each -----------------------------------------
    h = jnp.maximum(dot(fc1_ref[...], ld("w1f")) + ld("b1f"), 0.0)
    h = jnp.maximum(dot(h, ld("w2f")) + ld("b2f"), 0.0)
    h = jnp.maximum(dot(h, ld("w3f")) + ld("b3f"), 0.0)
    out_ref[...] = (dot(h, ld("w4f")) + ld("b4f")).astype(out_ref.dtype)


# ----------------------------------------------------------------------------
# pallas_call wrapper
# ----------------------------------------------------------------------------
def build_forward(layout, batch):
    kernel = functools.partial(_net_kernel, layout=layout, batch=batch)
    vmem = pl.BlockSpec(memory_space=pltpu.MemorySpace.VMEM)

    @jax.jit
    def forward(slab, x):
        p1 = _conv1_patches(x)
        return pl.pallas_call(
            kernel,
            out_shape=jax.ShapeDtypeStruct((batch, 1), F32),
            in_specs=[vmem, vmem],
            out_specs=vmem,
            scratch_shapes=[
                pltpu.VMEM((4 * batch, 10, 10, 32), F32),   # padded conv2 input (parity groups)
                pltpu.VMEM((2, batch, 6, 512), F32),        # padded conv3 input (row parity)
                pltpu.VMEM((batch, 512), F32),              # fc1 input staging
            ],
        )(p1, slab)

    return forward


# ----------------------------------------------------------------------------
# Pure-JAX reference (correctness check only)
# ----------------------------------------------------------------------------
def reference_forward(p, x):
    hi = jax.lax.Precision.HIGHEST

    def conv(x, w, b):
        y = jax.lax.conv_general_dilated(
            x, w, window_strides=(2, 2), padding=[(2, 2), (2, 2)],
            dimension_numbers=("NCHW", "OIHW", "NCHW"), precision=hi)
        return jax.nn.relu(y + b.reshape(1, -1, 1, 1))

    x = conv(x, p["conv1_w"], p["conv1_b"])
    x = conv(x, p["conv2_w"], p["conv2_b"])
    x = conv(x, p["conv3_w"], p["conv3_b"])
    x = x.reshape(x.shape[0], -1)                       # NCHW flatten -> (B, 512)
    mm = lambda a, w: jnp.dot(a, w, precision=hi)
    x = jax.nn.relu(mm(x, p["fc1_w"]) + p["fc1_b"])
    x = jax.nn.relu(mm(x, p["fc2_w"]) + p["fc2_b"])
    x = jax.nn.relu(mm(x, p["fc3_w"]) + p["fc3_b"])
    return mm(x, p["fc4_w"]) + p["fc4_b"]


if __name__ == "__main__":
    key = jax.random.PRNGKey(0)
    k_param, k_x = jax.random.split(key)
    params = init_params(k_param)

    B = 2
    slab, layout = pack_params(params, B)
    forward = build_forward(layout, B)

    # batch=2, 1 channel, 32x32 spatial (flatten gives 32*4*4 = 512 = fc1 in)
    x = jax.random.normal(k_x, (B, 1, 32, 32), F32)

    out = forward(slab, x)
    jax.block_until_ready(out)
    assert out.shape == (B, 1), out.shape

    ref = reference_forward(params, x)
    np.testing.assert_allclose(np.asarray(out), np.asarray(ref), rtol=2e-2, atol=2e-2)

    print("KERNEL_OK")
</pallas_src>

<mosaic_0001>
module attributes {stable_mosaic.version = 11 : i64} {
  func.func @_net_kernel(%arg0: memref<512x32xf32, #tpu.memory_space<vmem>>, %arg1: memref<4192x128xf32, #tpu.memory_space<vmem>>, %arg2: memref<2x1xf32, #tpu.memory_space<vmem>>, %arg3: memref<8x10x10x32xf32, #tpu.memory_space<vmem>>, %arg4: memref<2x2x6x512xf32, #tpu.memory_space<vmem>>, %arg5: memref<2x512xf32, #tpu.memory_space<vmem>>) attributes {dimension_semantics = [], scalar_prefetch = 0 : i64, scratch_operands = 3 : i64, tpu.core_type = #tpu.core_type<tc>} {
    %cst = arith.constant 0.000000e+00 : f32
    %0 = vector.broadcast %cst : f32 to vector<8x10x10x32xf32>
    %c0 = arith.constant 0 : index
    %c0_0 = arith.constant 0 : index
    %c0_1 = arith.constant 0 : index
    %c0_2 = arith.constant 0 : index
    %1 = vector.load %arg3[%c0, %c0_0, %c0_1, %c0_2] : memref<8x10x10x32xf32, #tpu.memory_space<vmem>>, vector<8x10x10x32xf32>
    tpu.vector_store %arg3[%c0, %c0_0, %c0_1, %c0_2], %0 {strides = array<i32>} : memref<8x10x10x32xf32, #tpu.memory_space<vmem>>, vector<8x10x10x32xf32>,
    %cst_3 = arith.constant 0.000000e+00 : f32
    %2 = vector.broadcast %cst_3 : f32 to vector<2x2x6x512xf32>
    %c0_4 = arith.constant 0 : index
    %c0_5 = arith.constant 0 : index
    %c0_6 = arith.constant 0 : index
    %c0_7 = arith.constant 0 : index
    %3 = vector.load %arg4[%c0_4, %c0_5, %c0_6, %c0_7] : memref<2x2x6x512xf32, #tpu.memory_space<vmem>>, vector<2x2x6x512xf32>
    tpu.vector_store %arg4[%c0_4, %c0_5, %c0_6, %c0_7], %2 {strides = array<i32>} : memref<2x2x6x512xf32, #tpu.memory_space<vmem>>, vector<2x2x6x512xf32>,
    %c0_8 = arith.constant 0 : index
    %c0_9 = arith.constant 0 : index
    %4 = vector.load %arg0[%c0_8, %c0_9] : memref<512x32xf32, #tpu.memory_space<vmem>>, vector<512x32xf32>
    %c0_10 = arith.constant 0 : index
    %c0_11 = arith.constant 0 : index
    %5 = vector.load %arg1[%c0_10, %c0_11] : memref<4192x128xf32, #tpu.memory_space<vmem>>, vector<32x32xf32>
    %cst_12 = arith.constant dense<0.000000e+00> : vector<512x32xf32>
    %6 = tpu.matmul %4, %5, %cst_12 {dimension_numbers = #tpu.dot_dimension_numbers<[1], [0], [0], [1], [0, 0, 1, 1], [], []>} : vector<512x32xf32>, vector<32x32xf32>, vector<512x32xf32> -> vector<512x32xf32>
    %c32 = arith.constant 32 : index
    %c0_13 = arith.constant 0 : index
    %7 = vector.load %arg1[%c32, %c0_13] : memref<4192x128xf32, #tpu.memory_space<vmem>>, vector<1x32xf32>
    %8 = vector.broadcast %7 : vector<1x32xf32> to vector<512x32xf32>
    %9 = arith.addf %6, %8 : vector<512x32xf32>
    %cst_14 = arith.constant 0.000000e+00 : f32
    %10 = vector.broadcast %cst_14 : f32 to vector<512x32xf32>
    %11 = arith.maximumf %9, %10 : vector<512x32xf32>
    %12 = vector.extract_strided_slice %11 {offsets = [0, 0], sizes = [128, 32], strides = [1, 1]} : vector<512x32xf32> to vector<128x32xf32>
    %13 = vector.shape_cast %12 : vector<128x32xf32> to vector<2x8x8x32xf32>
    %c0_15 = arith.constant 0 : index
    %c1 = arith.constant 1 : index
    %c1_16 = arith.constant 1 : index
    %c0_17 = arith.constant 0 : index
    %14 = vector.load %arg3[%c0_15, %c1, %c1_16, %c0_17] : memref<8x10x10x32xf32, #tpu.memory_space<vmem>>, vector<2x8x8x32xf32>
    tpu.vector_store %arg3[%c0_15, %c1, %c1_16, %c0_17], %13 {strides = array<i32>} : memref<8x10x10x32xf32, #tpu.memory_space<vmem>>, vector<2x8x8x32xf32>,
    %15 = vector.extract_strided_slice %11 {offsets = [128, 0], sizes = [128, 32], strides = [1, 1]} : vector<512x32xf32> to vector<128x32xf32>
    %16 = vector.shape_cast %15 : vector<128x32xf32> to vector<2x8x8x32xf32>
    %c2 = arith.constant 2 : index
    %c1_18 = arith.constant 1 : index
    %c1_19 = arith.constant 1 : index
    %c0_20 = arith.constant 0 : index
    %17 = vector.load %arg3[%c2, %c1_18, %c1_19, %c0_20] : memref<8x10x10x32xf32, #tpu.memory_space<vmem>>, vector<2x8x8x32xf32>
    tpu.vector_store %arg3[%c2, %c1_18, %c1_19, %c0_20], %16 {strides = array<i32>} : memref<8x10x10x32xf32, #tpu.memory_space<vmem>>, vector<2x8x8x32xf32>,
    %18 = vector.extract_strided_slice %11 {offsets = [256, 0], sizes = [128, 32], strides = [1, 1]} : vector<512x32xf32> to vector<128x32xf32>
    %19 = vector.shape_cast %18 : vector<128x32xf32> to vector<2x8x8x32xf32>
    %c4 = arith.constant 4 : index
    %c1_21 = arith.constant 1 : index
    %c1_22 = arith.constant 1 : index
    %c0_23 = arith.constant 0 : index
    %20 = vector.load %arg3[%c4, %c1_21, %c1_22, %c0_23] : memref<8x10x10x32xf32, #tpu.memory_space<vmem>>, vector<2x8x8x32xf32>
    tpu.vector_store %arg3[%c4, %c1_21, %c1_22, %c0_23], %19 {strides = array<i32>} : memref<8x10x10x32xf32, #tpu.memory_space<vmem>>, vector<2x8x8x32xf32>,
    %21 = vector.extract_strided_slice %11 {offsets = [384, 0], sizes = [128, 32], strides = [1, 1]} : vector<512x32xf32> to vector<128x32xf32>
    %22 = vector.shape_cast %21 : vector<128x32xf32> to vector<2x8x8x32xf32>
    %c6 = arith.constant 6 : index
    %c1_24 = arith.constant 1 : index
    %c1_25 = arith.constant 1 : index
    %c0_26 = arith.constant 0 : index
    %23 = vector.load %arg3[%c6, %c1_24, %c1_25, %c0_26] : memref<8x10x10x32xf32, #tpu.memory_space<vmem>>, vector<2x8x8x32xf32>
    tpu.vector_store %arg3[%c6, %c1_24, %c1_25, %c0_26], %22 {strides = array<i32>} : memref<8x10x10x32xf32, #tpu.memory_space<vmem>>, vector<2x8x8x32xf32>,
    %cst_27 = arith.constant 0.000000e+00 : f32
    %24 = vector.broadcast %cst_27 : f32 to vector<128x64xf32>
    %c0_28 = arith.constant 0 : index
    %c0_29 = arith.constant 0 : index
    %c0_30 = arith.constant 0 : index
    %c0_31 = arith.constant 0 : index
    %25 = vector.load %arg3[%c0_28, %c0_29, %c0_30, %c0_31] : memref<8x10x10x32xf32, #tpu.memory_space<vmem>>, vector<2x8x8x32xf32>
    %26 = vector.shape_cast %25 : vector<2x8x8x32xf32> to vector<128x32xf32>
    %c40 = arith.constant 40 : index
    %c0_32 = arith.constant 0 : index
    %27 = vector.load %arg1[%c40, %c0_32] : memref<4192x128xf32, #tpu.memory_space<vmem>>, vector<32x64xf32>
    %cst_33 = arith.constant dense<0.000000e+00> : vector<128x64xf32>
    %28 = tpu.matmul %26, %27, %cst_33 {dimension_numbers = #tpu.dot_dimension_numbers<[1], [0], [0], [1], [0, 0, 1, 1], [], []>} : vector<128x32xf32>, vector<32x64xf32>, vector<128x64xf32> -> vector<128x64xf32>
    %29 = arith.addf %24, %28 : vector<128x64xf32>
    %c2_34 = arith.constant 2 : index
    %c0_35 = arith.constant 0 : index
    %c0_36 = arith.constant 0 : index
    %c0_37 = arith.constant 0 : index
    %30 = vector.load %arg3[%c2_34, %c0_35, %c0_36, %c0_37] : memref<8x10x10x32xf32, #tpu.memory_space<vmem>>, vector<2x8x8x32xf32>
    %31 = vector.shape_cast %30 : vector<2x8x8x32xf32> to vector<128x32xf32>
    %c72 = arith.constant 72 : index
    %c0_38 = arith.constant 0 : index
    %32 = vector.load %arg1[%c72, %c0_38] : memref<4192x128xf32, #tpu.memory_space<vmem>>, vector<32x64xf32>
    %cst_39 = arith.constant dense<0.000000e+00> : vector<128x64xf32>
    %33 = tpu.matmul %31, %32, %cst_39 {dimension_numbers = #tpu.dot_dimension_numbers<[1], [0], [0], [1], [0, 0, 1, 1], [], []>} : vector<128x32xf32>, vector<32x64xf32>, vector<128x64xf32> -> vector<128x64xf32>
    %34 = arith.addf %29, %33 : vector<128x64xf32>
    %c0_40 = arith.constant 0 : index
    %c0_41 = arith.constant 0 : index
    %c1_42 = arith.constant 1 : index
    %c0_43 = arith.constant 0 : index
    %35 = vector.load %arg3[%c0_40, %c0_41, %c1_42, %c0_43] : memref<8x10x10x32xf32, #tpu.memory_space<vmem>>, vector<2x8x8x32xf32>
    %36 = vector.shape_cast %35 : vector<2x8x8x32xf32> to vector<128x32xf32>
    %c104 = arith.constant 104 : index
    %c0_44 = arith.constant 0 : index
    %37 = vector.load %arg1[%c104, %c0_44] : memref<4192x128xf32, #tpu.memory_space<vmem>>, vector<32x64xf32>
    %cst_45 = arith.constant dense<0.000000e+00> : vector<128x64xf32>
    %38 = tpu.matmul %36, %37, %cst_45 {dimension_numbers = #tpu.dot_dimension_numbers<[1], [0], [0], [1], [0, 0, 1, 1], [], []>} : vector<128x32xf32>, vector<32x64xf32>, vector<128x64xf32> -> vector<128x64xf32>
    %39 = arith.addf %34, %38 : vector<128x64xf32>
    %c2_46 = arith.constant 2 : index
    %c0_47 = arith.constant 0 : index
    %c1_48 = arith.constant 1 : index
    %c0_49 = arith.constant 0 : index
    %40 = vector.load %arg3[%c2_46, %c0_47, %c1_48, %c0_49] : memref<8x10x10x32xf32, #tpu.memory_space<vmem>>, vector<2x8x8x32xf32>
    %41 = vector.shape_cast %40 : vector<2x8x8x32xf32> to vector<128x32xf32>
    %c136 = arith.constant 136 : index
    %c0_50 = arith.constant 0 : index
    %42 = vector.load %arg1[%c136, %c0_50] : memref<4192x128xf32, #tpu.memory_space<vmem>>, vector<32x64xf32>
    %cst_51 = arith.constant dense<0.000000e+00> : vector<128x64xf32>
    %43 = tpu.matmul %41, %42, %cst_51 {dimension_numbers = #tpu.dot_dimension_numbers<[1], [0], [0], [1], [0, 0, 1, 1], [], []>} : vector<128x32xf32>, vector<32x64xf32>, vector<128x64xf32> -> vector<128x64xf32>
    %44 = arith.addf %39, %43 : vector<128x64xf32>
    %c0_52 = arith.constant 0 : index
    %c0_53 = arith.constant 0 : index
    %c2_54 = arith.constant 2 : index
    %c0_55 = arith.constant 0 : index
    %45 = vector.load %arg3[%c0_52, %c0_53, %c2_54, %c0_55] : memref<8x10x10x32xf32, #tpu.memory_space<vmem>>, vector<2x8x8x32xf32>
    %46 = vector.shape_cast %45 : vector<2x8x8x32xf32> to vector<128x32xf32>
    %c168 = arith.constant 168 : index
    %c0_56 = arith.constant 0 : index
    %47 = vector.load %arg1[%c168, %c0_56] : memref<4192x128xf32, #tpu.memory_space<vmem>>, vector<32x64xf32>
    %cst_57 = arith.constant dense<0.000000e+00> : vector<128x64xf32>
    %48 = tpu.matmul %46, %47, %cst_57 {dimension_numbers = #tpu.dot_dimension_numbers<[1], [0], [0], [1], [0, 0, 1, 1], [], []>} : vector<128x32xf32>, vector<32x64xf32>, vector<128x64xf32> -> vector<128x64xf32>
    %49 = arith.addf %44, %48 : vector<128x64xf32>
    %c4_58 = arith.constant 4 : index
    %c0_59 = arith.constant 0 : index
    %c0_60 = arith.constant 0 : index
    %c0_61 = arith.constant 0 : index
    %50 = vector.load %arg3[%c4_58, %c0_59, %c0_60, %c0_61] : memref<8x10x10x32xf32, #tpu.memory_space<vmem>>, vector<2x8x8x32xf32>
    %51 = vector.shape_cast %50 : vector<2x8x8x32xf32> to vector<128x32xf32>
    %c200 = arith.constant 200 : index
    %c0_62 = arith.constant 0 : index
    %52 = vector.load %arg1[%c200, %c0_62] : memref<4192x128xf32, #tpu.memory_space<vmem>>, vector<32x64xf32>
    %cst_63 = arith.constant dense<0.000000e+00> : vector<128x64xf32>
    %53 = tpu.matmul %51, %52, %cst_63 {dimension_numbers = #tpu.dot_dimension_numbers<[1], [0], [0], [1], [0, 0, 1, 1], [], []>} : vector<128x32xf32>, vector<32x64xf32>, vector<128x64xf32> -> vector<128x64xf32>
    %54 = arith.addf %49, %53 : vector<128x64xf32>
    %c6_64 = arith.constant 6 : index
    %c0_65 = arith.constant 0 : index
    %c0_66 = arith.constant 0 : index
    %c0_67 = arith.constant 0 : index
    %55 = vector.load %arg3[%c6_64, %c0_65, %c0_66, %c0_67] : memref<8x10x10x32xf32, #tpu.memory_space<vmem>>, vector<2x8x8x32xf32>
    %56 = vector.shape_cast %55 : vector<2x8x8x32xf32> to vector<128x32xf32>
    %c232 = arith.constant 232 : index
    %c0_68 = arith.constant 0 : index
    %57 = vector.load %arg1[%c232, %c0_68] : memref<4192x128xf32, #tpu.memory_space<vmem>>, vector<32x64xf32>
    %cst_69 = arith.constant dense<0.000000e+00> : vector<128x64xf32>
    %58 = tpu.matmul %56, %57, %cst_69 {dimension_numbers = #tpu.dot_dimension_numbers<[1], [0], [0], [1], [0, 0, 1, 1], [], []>} : vector<128x32xf32>, vector<32x64xf32>, vector<128x64xf32> -> vector<128x64xf32>
    %59 = arith.addf %54, %58 : vector<128x64xf32>
    %c4_70 = arith.constant 4 : index
    %c0_71 = arith.constant 0 : index
    %c1_72 = arith.constant 1 : index
    %c0_73 = arith.constant 0 : index
    %60 = vector.load %arg3[%c4_70, %c0_71, %c1_72, %c0_73] : memref<8x10x10x32xf32, #tpu.memory_space<vmem>>, vector<2x8x8x32xf32>
    %61 = vector.shape_cast %60 : vector<2x8x8x32xf32> to vector<128x32xf32>
    %c264 = arith.constant 264 : index
    %c0_74 = arith.constant 0 : index
    %62 = vector.load %arg1[%c264, %c0_74] : memref<4192x128xf32, #tpu.memory_space<vmem>>, vector<32x64xf32>
    %cst_75 = arith.constant dense<0.000000e+00> : vector<128x64xf32>
    %63 = tpu.matmul %61, %62, %cst_75 {dimension_numbers = #tpu.dot_dimension_numbers<[1], [0], [0], [1], [0, 0, 1, 1], [], []>} : vector<128x32xf32>, vector<32x64xf32>, vector<128x64xf32> -> vector<128x64xf32>
    %64 = arith.addf %59, %63 : vector<128x64xf32>
    %c6_76 = arith.constant 6 : index
    %c0_77 = arith.constant 0 : index
    %c1_78 = arith.constant 1 : index
    %c0_79 = arith.constant 0 : index
    %65 = vector.load %arg3[%c6_76, %c0_77, %c1_78, %c0_79] : memref<8x10x10x32xf32, #tpu.memory_space<vmem>>, vector<2x8x8x32xf32>
    %66 = vector.shape_cast %65 : vector<2x8x8x32xf32> to vector<128x32xf32>
    %c296 = arith.constant 296 : index
    %c0_80 = arith.constant 0 : index
    %67 = vector.load %arg1[%c296, %c0_80] : memref<4192x128xf32, #tpu.memory_space<vmem>>, vector<32x64xf32>
    %cst_81 = arith.constant dense<0.000000e+00> : vector<128x64xf32>
    %68 = tpu.matmul %66, %67, %cst_81 {dimension_numbers = #tpu.dot_dimension_numbers<[1], [0], [0], [1], [0, 0, 1, 1], [], []>} : vector<128x32xf32>, vector<32x64xf32>, vector<128x64xf32> -> vector<128x64xf32>
    %69 = arith.addf %64, %68 : vector<128x64xf32>
    %c4_82 = arith.constant 4 : index
    %c0_83 = arith.constant 0 : index
    %c2_84 = arith.constant 2 : index
    %c0_85 = arith.constant 0 : index
    %70 = vector.load %arg3[%c4_82, %c0_83, %c2_84, %c0_85] : memref<8x10x10x32xf32, #tpu.memory_space<vmem>>, vector<2x8x8x32xf32>
    %71 = vector.shape_cast %70 : vector<2x8x8x32xf32> to vector<128x32xf32>
    %c328 = arith.constant 328 : index
    %c0_86 = arith.constant 0 : index
    %72 = vector.load %arg1[%c328, %c0_86] : memref<4192x128xf32, #tpu.memory_space<vmem>>, vector<32x64xf32>
    %cst_87 = arith.constant dense<0.000000e+00> : vector<128x64xf32>
    %73 = tpu.matmul %71, %72, %cst_87 {dimension_numbers = #tpu.dot_dimension_numbers<[1], [0], [0], [1], [0, 0, 1, 1], [], []>} : vector<128x32xf32>, vector<32x64xf32>, vector<128x64xf32> -> vector<128x64xf32>
    %74 = arith.addf %69, %73 : vector<128x64xf32>
    %c0_88 = arith.constant 0 : index
    %c1_89 = arith.constant 1 : index
    %c0_90 = arith.constant 0 : index
    %c0_91 = arith.constant 0 : index
    %75 = vector.load %arg3[%c0_88, %c1_89, %c0_90, %c0_91] : memref<8x10x10x32xf32, #tpu.memory_space<vmem>>, vector<2x8x8x32xf32>
    %76 = vector.shape_cast %75 : vector<2x8x8x32xf32> to vector<128x32xf32>
    %c360 = arith.constant 360 : index
    %c0_92 = arith.constant 0 : index
    %77 = vector.load %arg1[%c360, %c0_92] : memref<4192x128xf32, #tpu.memory_space<vmem>>, vector<32x64xf32>
    %cst_93 = arith.constant dense<0.000000e+00> : vector<128x64xf32>
    %78 = tpu.matmul %76, %77, %cst_93 {dimension_numbers = #tpu.dot_dimension_numbers<[1], [0], [0], [1], [0, 0, 1, 1], [], []>} : vector<128x32xf32>, vector<32x64xf32>, vector<128x64xf32> -> vector<128x64xf32>
    %79 = arith.addf %74, %78 : vector<128x64xf32>
    %c2_94 = arith.constant 2 : index
    %c1_95 = arith.constant 1 : index
    %c0_96 = arith.constant 0 : index
    %c0_97 = arith.constant 0 : index
    %80 = vector.load %arg3[%c2_94, %c1_95, %c0_96, %c0_97] : memref<8x10x10x32xf32, #tpu.memory_space<vmem>>, vector<2x8x8x32xf32>
    %81 = vector.shape_cast %80 : vector<2x8x8x32xf32> to vector<128x32xf32>
    %c392 = arith.constant 392 : index
    %c0_98 = arith.constant 0 : index
    %82 = vector.load %arg1[%c392, %c0_98] : memref<4192x128xf32, #tpu.memory_space<vmem>>, vector<32x64xf32>
    %cst_99 = arith.constant dense<0.000000e+00> : vector<128x64xf32>
    %83 = tpu.matmul %81, %82, %cst_99 {dimension_numbers = #tpu.dot_dimension_numbers<[1], [0], [0], [1], [0, 0, 1, 1], [], []>} : vector<128x32xf32>, vector<32x64xf32>, vector<128x64xf32> -> vector<128x64xf32>
    %84 = arith.addf %79, %83 : vector<128x64xf32>
    %c0_100 = arith.constant 0 : index
    %c1_101 = arith.constant 1 : index
    %c1_102 = arith.constant 1 : index
    %c0_103 = arith.constant 0 : index
    %85 = vector.load %arg3[%c0_100, %c1_101, %c1_102, %c0_103] : memref<8x10x10x32xf32, #tpu.memory_space<vmem>>, vector<2x8x8x32xf32>
    %86 = vector.shape_cast %85 : vector<2x8x8x32xf32> to vector<128x32xf32>
    %c424 = arith.constant 424 : index
    %c0_104 = arith.constant 0 : index
    %87 = vector.load %arg1[%c424, %c0_104] : memref<4192x128xf32, #tpu.memory_space<vmem>>, vector<32x64xf32>
    %cst_105 = arith.constant dense<0.000000e+00> : vector<128x64xf32>
    %88 = tpu.matmul %86, %87, %cst_105 {dimension_numbers = #tpu.dot_dimension_numbers<[1], [0], [0], [1], [0, 0, 1, 1], [], []>} : vector<128x32xf32>, vector<32x64xf32>, vector<128x64xf32> -> vector<128x64xf32>
    %89 = arith.addf %84, %88 : vector<128x64xf32>
    %c2_106 = arith.constant 2 : index
    %c1_107 = arith.constant 1 : index
    %c1_108 = arith.constant 1 : index
    %c0_109 = arith.constant 0 : index
    %90 = vector.load %arg3[%c2_106, %c1_107, %c1_108, %c0_109] : memref<8x10x10x32xf32, #tpu.memory_space<vmem>>, vector<2x8x8x32xf32>
    %91 = vector.shape_cast %90 : vector<2x8x8x32xf32> to vector<128x32xf32>
    %c456 = arith.constant 456 : index
    %c0_110 = arith.constant 0 : index
    %92 = vector.load %arg1[%c456, %c0_110] : memref<4192x128xf32, #tpu.memory_space<vmem>>, vector<32x64xf32>
    %cst_111 = arith.constant dense<0.000000e+00> : vector<128x64xf32>
    %93 = tpu.matmul %91, %92, %cst_111 {dimension_numbers = #tpu.dot_dimension_numbers<[1], [0], [0], [1], [0, 0, 1, 1], [], []>} : vector<128x32xf32>, vector<32x64xf32>, vector<128x64xf32> -> vector<128x64xf32>
    %94 = arith.addf %89, %93 : vector<128x64xf32>
    %c0_112 = arith.constant 0 : index
    %c1_113 = arith.constant 1 : index
    %c2_114 = arith.constant 2 : index
    %c0_115 = arith.constant 0 : index
    %95 = vector.load %arg3[%c0_112, %c1_113, %c2_114, %c0_115] : memref<8x10x10x32xf32, #tpu.memory_space<vmem>>, vector<2x8x8x32xf32>
    %96 = vector.shape_cast %95 : vector<2x8x8x32xf32> to vector<128x32xf32>
    %c488 = arith.constant 488 : index
    %c0_116 = arith.constant 0 : index
    %97 = vector.load %arg1[%c488, %c0_116] : memref<4192x128xf32, #tpu.memory_space<vmem>>, vector<32x64xf32>
    %cst_117 = arith.constant dense<0.000000e+00> : vector<128x64xf32>
    %98 = tpu.matmul %96, %97, %cst_117 {dimension_numbers = #tpu.dot_dimension_numbers<[1], [0], [0], [1], [0, 0, 1, 1], [], []>} : vector<128x32xf32>, vector<32x64xf32>, vector<128x64xf32> -> vector<128x64xf32>
    %99 = arith.addf %94, %98 : vector<128x64xf32>
    %c4_118 = arith.constant 4 : index
    %c1_119 = arith.constant 1 : index
    %c0_120 = arith.constant 0 : index
    %c0_121 = arith.constant 0 : index
    %100 = vector.load %arg3[%c4_118, %c1_119, %c0_120, %c0_121] : memref<8x10x10x32xf32, #tpu.memory_space<vmem>>, vector<2x8x8x32xf32>
    %101 = vector.shape_cast %100 : vector<2x8x8x32xf32> to vector<128x32xf32>
    %c520 = arith.constant 520 : index
    %c0_122 = arith.constant 0 : index
    %102 = vector.load %arg1[%c520, %c0_122] : memref<4192x128xf32, #tpu.memory_space<vmem>>, vector<32x64xf32>
    %cst_123 = arith.constant dense<0.000000e+00> : vector<128x64xf32>
    %103 = tpu.matmul %101, %102, %cst_123 {dimension_numbers = #tpu.dot_dimension_numbers<[1], [0], [0], [1], [0, 0, 1, 1], [], []>} : vector<128x32xf32>, vector<32x64xf32>, vector<128x64xf32> -> vector<128x64xf32>
    %104 = arith.addf %99, %103 : vector<128x64xf32>
    %c6_124 = arith.constant 6 : index
    %c1_125 = arith.constant 1 : index
    %c0_126 = arith.constant 0 : index
    %c0_127 = arith.constant 0 : index
    %105 = vector.load %arg3[%c6_124, %c1_125, %c0_126, %c0_127] : memref<8x10x10x32xf32, #tpu.memory_space<vmem>>, vector<2x8x8x32xf32>
    %106 = vector.shape_cast %105 : vector<2x8x8x32xf32> to vector<128x32xf32>
    %c552 = arith.constant 552 : index
    %c0_128 = arith.constant 0 : index
    %107 = vector.load %arg1[%c552, %c0_128] : memref<4192x128xf32, #tpu.memory_space<vmem>>, vector<32x64xf32>
    %cst_129 = arith.constant dense<0.000000e+00> : vector<128x64xf32>
    %108 = tpu.matmul %106, %107, %cst_129 {dimension_numbers = #tpu.dot_dimension_numbers<[1], [0], [0], [1], [0, 0, 1, 1], [], []>} : vector<128x32xf32>, vector<32x64xf32>, vector<128x64xf32> -> vector<128x64xf32>
    %109 = arith.addf %104, %108 : vector<128x64xf32>
    %c4_130 = arith.constant 4 : index
    %c1_131 = arith.constant 1 : index
    %c1_132 = arith.constant 1 : index
    %c0_133 = arith.constant 0 : index
    %110 = vector.load %arg3[%c4_130, %c1_131, %c1_132, %c0_133] : memref<8x10x10x32xf32, #tpu.memory_space<vmem>>, vector<2x8x8x32xf32>
    %111 = vector.shape_cast %110 : vector<2x8x8x32xf32> to vector<128x32xf32>
    %c584 = arith.constant 584 : index
    %c0_134 = arith.constant 0 : index
    %112 = vector.load %arg1[%c584, %c0_134] : memref<4192x128xf32, #tpu.memory_space<vmem>>, vector<32x64xf32>
    %cst_135 = arith.constant dense<0.000000e+00> : vector<128x64xf32>
    %113 = tpu.matmul %111, %112, %cst_135 {dimension_numbers = #tpu.dot_dimension_numbers<[1], [0], [0], [1], [0, 0, 1, 1], [], []>} : vector<128x32xf32>, vector<32x64xf32>, vector<128x64xf32> -> vector<128x64xf32>
    %114 = arith.addf %109, %113 : vector<128x64xf32>
    %c6_136 = arith.constant 6 : index
    %c1_137 = arith.constant 1 : index
    %c1_138 = arith.constant 1 : index
    %c0_139 = arith.constant 0 : index
    %115 = vector.load %arg3[%c6_136, %c1_137, %c1_138, %c0_139] : memref<8x10x10x32xf32, #tpu.memory_space<vmem>>, vector<2x8x8x32xf32>
    %116 = vector.shape_cast %115 : vector<2x8x8x32xf32> to vector<128x32xf32>
    %c616 = arith.constant 616 : index
    %c0_140 = arith.constant 0 : index
    %117 = vector.load %arg1[%c616, %c0_140] : memref<4192x128xf32, #tpu.memory_space<vmem>>, vector<32x64xf32>
    %cst_141 = arith.constant dense<0.000000e+00> : vector<128x64xf32>
    %118 = tpu.matmul %116, %117, %cst_141 {dimension_numbers = #tpu.dot_dimension_numbers<[1], [0], [0], [1], [0, 0, 1, 1], [], []>} : vector<128x32xf32>, vector<32x64xf32>, vector<128x64xf32> -> vector<128x64xf32>
    %119 = arith.addf %114, %118 : vector<128x64xf32>
    %c4_142 = arith.constant 4 : index
    %c1_143 = arith.constant 1 : index
    %c2_144 = arith.constant 2 : index
    %c0_145 = arith.constant 0 : index
    %120 = vector.load %arg3[%c4_142, %c1_143, %c2_144, %c0_145] : memref<8x10x10x32xf32, #tpu.memory_space<vmem>>, vector<2x8x8x32xf32>
    %121 = vector.shape_cast %120 : vector<2x8x8x32xf32> to vector<128x32xf32>
    %c648 = arith.constant 648 : index
    %c0_146 = arith.constant 0 : index
    %122 = vector.load %arg1[%c648, %c0_146] : memref<4192x128xf32, #tpu.memory_space<vmem>>, vector<32x64xf32>
    %cst_147 = arith.constant dense<0.000000e+00> : vector<128x64xf32>
    %123 = tpu.matmul %121, %122, %cst_147 {dimension_numbers = #tpu.dot_dimension_numbers<[1], [0], [0], [1], [0, 0, 1, 1], [], []>} : vector<128x32xf32>, vector<32x64xf32>, vector<128x64xf32> -> vector<128x64xf32>
    %124 = arith.addf %119, %123 : vector<128x64xf32>
    %c0_148 = arith.constant 0 : index
    %c2_149 = arith.constant 2 : index
    %c0_150 = arith.constant 0 : index
    %c0_151 = arith.constant 0 : index
    %125 = vector.load %arg3[%c0_148, %c2_149, %c0_150, %c0_151] : memref<8x10x10x32xf32, #tpu.memory_space<vmem>>, vector<2x8x8x32xf32>
    %126 = vector.shape_cast %125 : vector<2x8x8x32xf32> to vector<128x32xf32>
    %c680 = arith.constant 680 : index
    %c0_152 = arith.constant 0 : index
    %127 = vector.load %arg1[%c680, %c0_152] : memref<4192x128xf32, #tpu.memory_space<vmem>>, vector<32x64xf32>
    %cst_153 = arith.constant dense<0.000000e+00> : vector<128x64xf32>
    %128 = tpu.matmul %126, %127, %cst_153 {dimension_numbers = #tpu.dot_dimension_numbers<[1], [0], [0], [1], [0, 0, 1, 1], [], []>} : vector<128x32xf32>, vector<32x64xf32>, vector<128x64xf32> -> vector<128x64xf32>
    %129 = arith.addf %124, %128 : vector<128x64xf32>
    %c2_154 = arith.constant 2 : index
    %c2_155 = arith.constant 2 : index
    %c0_156 = arith.constant 0 : index
    %c0_157 = arith.constant 0 : index
    %130 = vector.load %arg3[%c2_154, %c2_155, %c0_156, %c0_157] : memref<8x10x10x32xf32, #tpu.memory_space<vmem>>, vector<2x8x8x32xf32>
    %131 = vector.shape_cast %130 : vector<2x8x8x32xf32> to vector<128x32xf32>
    %c712 = arith.constant 712 : index
    %c0_158 = arith.constant 0 : index
    %132 = vector.load %arg1[%c712, %c0_158] : memref<4192x128xf32, #tpu.memory_space<vmem>>, vector<32x64xf32>
    %cst_159 = arith.constant dense<0.000000e+00> : vector<128x64xf32>
    %133 = tpu.matmul %131, %132, %cst_159 {dimension_numbers = #tpu.dot_dimension_numbers<[1], [0], [0], [1], [0, 0, 1, 1], [], []>} : vector<128x32xf32>, vector<32x64xf32>, vector<128x64xf32> -> vector<128x64xf32>
    %134 = arith.addf %129, %133 : vector<128x64xf32>
    %c0_160 = arith.constant 0 : index
    %c2_161 = arith.constant 2 : index
    %c1_162 = arith.constant 1 : index
    %c0_163 = arith.constant 0 : index
    %135 = vector.load %arg3[%c0_160, %c2_161, %c1_162, %c0_163] : memref<8x10x10x32xf32, #tpu.memory_space<vmem>>, vector<2x8x8x32xf32>
    %136 = vector.shape_cast %135 : vector<2x8x8x32xf32> to vector<128x32xf32>
    %c744 = arith.constant 744 : index
    %c0_164 = arith.constant 0 : index
    %137 = vector.load %arg1[%c744, %c0_164] : memref<4192x128xf32, #tpu.memory_space<vmem>>, vector<32x64xf32>
    %cst_165 = arith.constant dense<0.000000e+00> : vector<128x64xf32>
    %138 = tpu.matmul %136, %137, %cst_165 {dimension_numbers = #tpu.dot_dimension_numbers<[1], [0], [0], [1], [0, 0, 1, 1], [], []>} : vector<128x32xf32>, vector<32x64xf32>, vector<128x64xf32> -> vector<128x64xf32>
    %139 = arith.addf %134, %138 : vector<128x64xf32>
    %c2_166 = arith.constant 2 : index
    %c2_167 = arith.constant 2 : index
    %c1_168 = arith.constant 1 : index
    %c0_169 = arith.constant 0 : index
    %140 = vector.load %arg3[%c2_166, %c2_167, %c1_168, %c0_169] : memref<8x10x10x32xf32, #tpu.memory_space<vmem>>, vector<2x8x8x32xf32>
    %141 = vector.shape_cast %140 : vector<2x8x8x32xf32> to vector<128x32xf32>
    %c776 = arith.constant 776 : index
    %c0_170 = arith.constant 0 : index
    %142 = vector.load %arg1[%c776, %c0_170] : memref<4192x128xf32, #tpu.memory_space<vmem>>, vector<32x64xf32>
    %cst_171 = arith.constant dense<0.000000e+00> : vector<128x64xf32>
    %143 = tpu.matmul %141, %142, %cst_171 {dimension_numbers = #tpu.dot_dimension_numbers<[1], [0], [0], [1], [0, 0, 1, 1], [], []>} : vector<128x32xf32>, vector<32x64xf32>, vector<128x64xf32> -> vector<128x64xf32>
    %144 = arith.addf %139, %143 : vector<128x64xf32>
    %c0_172 = arith.constant 0 : index
    %c2_173 = arith.constant 2 : index
    %c2_174 = arith.constant 2 : index
    %c0_175 = arith.constant 0 : index
    %145 = vector.load %arg3[%c0_172, %c2_173, %c2_174, %c0_175] : memref<8x10x10x32xf32, #tpu.memory_space<vmem>>, vector<2x8x8x32xf32>
    %146 = vector.shape_cast %145 : vector<2x8x8x32xf32> to vector<128x32xf32>
    %c808 = arith.constant 808 : index
    %c0_176 = arith.constant 0 : index
    %147 = vector.load %arg1[%c808, %c0_176] : memref<4192x128xf32, #tpu.memory_space<vmem>>, vector<32x64xf32>
    %cst_177 = arith.constant dense<0.000000e+00> : vector<128x64xf32>
    %148 = tpu.matmul %146, %147, %cst_177 {dimension_numbers = #tpu.dot_dimension_numbers<[1], [0], [0], [1], [0, 0, 1, 1], [], []>} : vector<128x32xf32>, vector<32x64xf32>, vector<128x64xf32> -> vector<128x64xf32>
    %149 = arith.addf %144, %148 : vector<128x64xf32>
    %c840 = arith.constant 840 : index
    %c0_178 = arith.constant 0 : index
    %150 = vector.load %arg1[%c840, %c0_178] : memref<4192x128xf32, #tpu.memory_space<vmem>>, vector<1x64xf32>
    %151 = vector.broadcast %150 : vector<1x64xf32> to vector<128x64xf32>
    %152 = arith.addf %149, %151 : vector<128x64xf32>
    %cst_179 = arith.constant 0.000000e+00 : f32
    %153 = vector.broadcast %cst_179 : f32 to vector<128x64xf32>
    %154 = arith.maximumf %152, %153 : vector<128x64xf32>
    %c3416 = arith.constant 3416 : index
    %c0_180 = arith.constant 0 : index
    %155 = vector.load %arg1[%c3416, %c0_180] : memref<4192x128xf32, #tpu.memory_space<vmem>>, vector<128x128xf32>
    %cst_181 = arith.constant dense<0.000000e+00> : vector<128x64xf32>
    %156 = tpu.matmul %155, %154, %cst_181 {dimension_numbers = #tpu.dot_dimension_numbers<[1], [0], [0], [1], [0, 0, 1, 1], [], []>} : vector<128x128xf32>, vector<128x64xf32>, vector<128x64xf32> -> vector<128x64xf32>
    %157 = vector.extract_strided_slice %156 {offsets = [0, 0], sizes = [4, 64], strides = [1, 1]} : vector<128x64xf32> to vector<4x64xf32>
    %c0_182 = arith.constant 0 : index
    %c0_183 = arith.constant 0 : index
    %c1_184 = arith.constant 1 : index
    %c0_185 = arith.constant 0 : index
    %158 = vector.load %arg4[%c0_182, %c0_183, %c1_184, %c0_185] : memref<2x2x6x512xf32, #tpu.memory_space<vmem>>, vector<1x1x4x64xf32>
    %159 = vector.shape_cast %158 : vector<1x1x4x64xf32> to vector<4x64xf32>
    %160 = vector.shape_cast %157 : vector<4x64xf32> to vector<1x1x4x64xf32>
    tpu.vector_store %arg4[%c0_182, %c0_183, %c1_184, %c0_185], %160 {strides = array<i32>} : memref<2x2x6x512xf32, #tpu.memory_space<vmem>>, vector<1x1x4x64xf32>,
    %161 = vector.extract_strided_slice %156 {offsets = [4, 0], sizes = [4, 64], strides = [1, 1]} : vector<128x64xf32> to vector<4x64xf32>
    %c0_186 = arith.constant 0 : index
    %c0_187 = arith.constant 0 : index
    %c1_188 = arith.constant 1 : index
    %c64 = arith.constant 64 : index
    %162 = vector.load %arg4[%c0_186, %c0_187, %c1_188, %c64] : memref<2x2x6x512xf32, #tpu.memory_space<vmem>>, vector<1x1x4x64xf32>
    %163 = vector.shape_cast %162 : vector<1x1x4x64xf32> to vector<4x64xf32>
    %164 = vector.shape_cast %161 : vector<4x64xf32> to vector<1x1x4x64xf32>
    tpu.vector_store %arg4[%c0_186, %c0_187, %c1_188, %c64], %164 {strides = array<i32>} : memref<2x2x6x512xf32, #tpu.memory_space<vmem>>, vector<1x1x4x64xf32>,
    %165 = vector.extract_strided_slice %156 {offsets = [8, 0], sizes = [4, 64], strides = [1, 1]} : vector<128x64xf32> to vector<4x64xf32>
    %c0_189 = arith.constant 0 : index
    %c0_190 = arith.constant 0 : index
    %c1_191 = arith.constant 1 : index
    %c128 = arith.constant 128 : index
    %166 = vector.load %arg4[%c0_189, %c0_190, %c1_191, %c128] : memref<2x2x6x512xf32, #tpu.memory_space<vmem>>, vector<1x1x4x64xf32>
    %167 = vector.shape_cast %166 : vector<1x1x4x64xf32> to vector<4x64xf32>
    %168 = vector.shape_cast %165 : vector<4x64xf32> to vector<1x1x4x64xf32>
    tpu.vector_store %arg4[%c0_189, %c0_190, %c1_191, %c128], %168 {strides = array<i32>} : memref<2x2x6x512xf32, #tpu.memory_space<vmem>>, vector<1x1x4x64xf32>,
    %169 = vector.extract_strided_slice %156 {offsets = [12, 0], sizes = [4, 64], strides = [1, 1]} : vector<128x64xf32> to vector<4x64xf32>
    %c0_192 = arith.constant 0 : index
    %c0_193 = arith.constant 0 : index
    %c1_194 = arith.constant 1 : index
    %c192 = arith.constant 192 : index
    %170 = vector.load %arg4[%c0_192, %c0_193, %c1_194, %c192] : memref<2x2x6x512xf32, #tpu.memory_space<vmem>>, vector<1x1x4x64xf32>
    %171 = vector.shape_cast %170 : vector<1x1x4x64xf32> to vector<4x64xf32>
    %172 = vector.shape_cast %169 : vector<4x64xf32> to vector<1x1x4x64xf32>
    tpu.vector_store %arg4[%c0_192, %c0_193, %c1_194, %c192], %172 {strides = array<i32>} : memref<2x2x6x512xf32, #tpu.memory_space<vmem>>, vector<1x1x4x64xf32>,
    %173 = vector.extract_strided_slice %156 {offsets = [16, 0], sizes = [4, 64], strides = [1, 1]} : vector<128x64xf32> to vector<4x64xf32>
    %c0_195 = arith.constant 0 : index
    %c0_196 = arith.constant 0 : index
    %c1_197 = arith.constant 1 : index
    %c256 = arith.constant 256 : index
    %174 = vector.load %arg4[%c0_195, %c0_196, %c1_197, %c256] : memref<2x2x6x512xf32, #tpu.memory_space<vmem>>, vector<1x1x4x64xf32>
    %175 = vector.shape_cast %174 : vector<1x1x4x64xf32> to vector<4x64xf32>
    %176 = vector.shape_cast %173 : vector<4x64xf32> to vector<1x1x4x64xf32>
    tpu.vector_store %arg4[%c0_195, %c0_196, %c1_197, %c256], %176 {strides = array<i32>} : memref<2x2x6x512xf32, #tpu.memory_space<vmem>>, vector<1x1x4x64xf32>,
    %177 = vector.extract_strided_slice %156 {offsets = [20, 0], sizes = [4, 64], strides = [1, 1]} : vector<128x64xf32> to vector<4x64xf32>
    %c0_198 = arith.constant 0 : index
    %c0_199 = arith.constant 0 : index
    %c1_200 = arith.constant 1 : index
    %c320 = arith.constant 320 : index
    %178 = vector.load %arg4[%c0_198, %c0_199, %c1_200, %c320] : memref<2x2x6x512xf32, #tpu.memory_space<vmem>>, vector<1x1x4x64xf32>
    %179 = vector.shape_cast %178 : vector<1x1x4x64xf32> to vector<4x64xf32>
    %180 = vector.shape_cast %177 : vector<4x64xf32> to vector<1x1x4x64xf32>
    tpu.vector_store %arg4[%c0_198, %c0_199, %c1_200, %c320], %180 {strides = array<i32>} : memref<2x2x6x512xf32, #tpu.memory_space<vmem>>, vector<1x1x4x64xf32>,
    %181 = vector.extract_strided_slice %156 {offsets = [24, 0], sizes = [4, 64], strides = [1, 1]} : vector<128x64xf32> to vector<4x64xf32>
    %c0_201 = arith.constant 0 : index
    %c0_202 = arith.constant 0 : index
    %c1_203 = arith.constant 1 : index
    %c384 = arith.constant 384 : index
    %182 = vector.load %arg4[%c0_201, %c0_202, %c1_203, %c384] : memref<2x2x6x512xf32, #tpu.memory_space<vmem>>, vector<1x1x4x64xf32>
    %183 = vector.shape_cast %182 : vector<1x1x4x64xf32> to vector<4x64xf32>
    %184 = vector.shape_cast %181 : vector<4x64xf32> to vector<1x1x4x64xf32>
    tpu.vector_store %arg4[%c0_201, %c0_202, %c1_203, %c384], %184 {strides = array<i32>} : memref<2x2x6x512xf32, #tpu.memory_space<vmem>>, vector<1x1x4x64xf32>,
    %185 = vector.extract_strided_slice %156 {offsets = [28, 0], sizes = [4, 64], strides = [1, 1]} : vector<128x64xf32> to vector<4x64xf32>
    %c0_204 = arith.constant 0 : index
    %c0_205 = arith.constant 0 : index
    %c1_206 = arith.constant 1 : index
    %c448 = arith.constant 448 : index
    %186 = vector.load %arg4[%c0_204, %c0_205, %c1_206, %c448] : memref<2x2x6x512xf32, #tpu.memory_space<vmem>>, vector<1x1x4x64xf32>
    %187 = vector.shape_cast %186 : vector<1x1x4x64xf32> to vector<4x64xf32>
    %188 = vector.shape_cast %185 : vector<4x64xf32> to vector<1x1x4x64xf32>
    tpu.vector_store %arg4[%c0_204, %c0_205, %c1_206, %c448], %188 {strides = array<i32>} : memref<2x2x6x512xf32, #tpu.memory_space<vmem>>, vector<1x1x4x64xf32>,
    %189 = vector.extract_strided_slice %156 {offsets = [32, 0], sizes = [4, 64], strides = [1, 1]} : vector<128x64xf32> to vector<4x64xf32>
    %c0_207 = arith.constant 0 : index
    %c1_208 = arith.constant 1 : index
    %c1_209 = arith.constant 1 : index
    %c0_210 = arith.constant 0 : index
    %190 = vector.load %arg4[%c0_207, %c1_208, %c1_209, %c0_210] : memref<2x2x6x512xf32, #tpu.memory_space<vmem>>, vector<1x1x4x64xf32>
    %191 = vector.shape_cast %190 : vector<1x1x4x64xf32> to vector<4x64xf32>
    %192 = vector.shape_cast %189 : vector<4x64xf32> to vector<1x1x4x64xf32>
    tpu.vector_store %arg4[%c0_207, %c1_208, %c1_209, %c0_210], %192 {strides = array<i32>} : memref<2x2x6x512xf32, #tpu.memory_space<vmem>>, vector<1x1x4x64xf32>,
    %193 = vector.extract_strided_slice %156 {offsets = [36, 0], sizes = [4, 64], strides = [1, 1]} : vector<128x64xf32> to vector<4x64xf32>
    %c0_211 = arith.constant 0 : index
    %c1_212 = arith.constant 1 : index
    %c1_213 = arith.constant 1 : index
    %c64_214 = arith.constant 64 : index
    %194 = vector.load %arg4[%c0_211, %c1_212, %c1_213, %c64_214] : memref<2x2x6x512xf32, #tpu.memory_space<vmem>>, vector<1x1x4x64xf32>
    %195 = vector.shape_cast %194 : vector<1x1x4x64xf32> to vector<4x64xf32>
    %196 = vector.shape_cast %193 : vector<4x64xf32> to vector<1x1x4x64xf32>
    tpu.vector_store %arg4[%c0_211, %c1_212, %c1_213, %c64_214], %196 {strides = array<i32>} : memref<2x2x6x512xf32, #tpu.memory_space<vmem>>, vector<1x1x4x64xf32>,
    %197 = vector.extract_strided_slice %156 {offsets = [40, 0], sizes = [4, 64], strides = [1, 1]} : vector<128x64xf32> to vector<4x64xf32>
    %c0_215 = arith.constant 0 : index
    %c1_216 = arith.constant 1 : index
    %c1_217 = arith.constant 1 : index
    %c128_218 = arith.constant 128 : index
    %198 = vector.load %arg4[%c0_215, %c1_216, %c1_217, %c128_218] : memref<2x2x6x512xf32, #tpu.memory_space<vmem>>, vector<1x1x4x64xf32>
    %199 = vector.shape_cast %198 : vector<1x1x4x64xf32> to vector<4x64xf32>
    %200 = vector.shape_cast %197 : vector<4x64xf32> to vector<1x1x4x64xf32>
    tpu.vector_store %arg4[%c0_215, %c1_216, %c1_217, %c128_218], %200 {strides = array<i32>} : memref<2x2x6x512xf32, #tpu.memory_space<vmem>>, vector<1x1x4x64xf32>,
    %201 = vector.extract_strided_slice %156 {offsets = [44, 0], sizes = [4, 64], strides = [1, 1]} : vector<128x64xf32> to vector<4x64xf32>
    %c0_219 = arith.constant 0 : index
    %c1_220 = arith.constant 1 : index
    %c1_221 = arith.constant 1 : index
    %c192_222 = arith.constant 192 : index
    %202 = vector.load %arg4[%c0_219, %c1_220, %c1_221, %c192_222] : memref<2x2x6x512xf32, #tpu.memory_space<vmem>>, vector<1x1x4x64xf32>
    %203 = vector.shape_cast %202 : vector<1x1x4x64xf32> to vector<4x64xf32>
    %204 = vector.shape_cast %201 : vector<4x64xf32> to vector<1x1x4x64xf32>
    tpu.vector_store %arg4[%c0_219, %c1_220, %c1_221, %c192_222], %204 {strides = array<i32>} : memref<2x2x6x512xf32, #tpu.memory_space<vmem>>, vector<1x1x4x64xf32>,
    %205 = vector.extract_strided_slice %156 {offsets = [48, 0], sizes = [4, 64], strides = [1, 1]} : vector<128x64xf32> to vector<4x64xf32>
    %c0_223 = arith.constant 0 : index
    %c1_224 = arith.constant 1 : index
    %c1_225 = arith.constant 1 : index
    %c256_226 = arith.constant 256 : index
    %206 = vector.load %arg4[%c0_223, %c1_224, %c1_225, %c256_226] : memref<2x2x6x512xf32, #tpu.memory_space<vmem>>, vector<1x1x4x64xf32>
    %207 = vector.shape_cast %206 : vector<1x1x4x64xf32> to vector<4x64xf32>
    %208 = vector.shape_cast %205 : vector<4x64xf32> to vector<1x1x4x64xf32>
    tpu.vector_store %arg4[%c0_223, %c1_224, %c1_225, %c256_226], %208 {strides = array<i32>} : memref<2x2x6x512xf32, #tpu.memory_space<vmem>>, vector<1x1x4x64xf32>,
    %209 = vector.extract_strided_slice %156 {offsets = [52, 0], sizes = [4, 64], strides = [1, 1]} : vector<128x64xf32> to vector<4x64xf32>
    %c0_227 = arith.constant 0 : index
    %c1_228 = arith.constant 1 : index
    %c1_229 = arith.constant 1 : index
    %c320_230 = arith.constant 320 : index
    %210 = vector.load %arg4[%c0_227, %c1_228, %c1_229, %c320_230] : memref<2x2x6x512xf32, #tpu.memory_space<vmem>>, vector<1x1x4x64xf32>
    %211 = vector.shape_cast %210 : vector<1x1x4x64xf32> to vector<4x64xf32>
    %212 = vector.shape_cast %209 : vector<4x64xf32> to vector<1x1x4x64xf32>
    tpu.vector_store %arg4[%c0_227, %c1_228, %c1_229, %c320_230], %212 {strides = array<i32>} : memref<2x2x6x512xf32, #tpu.memory_space<vmem>>, vector<1x1x4x64xf32>,
    %213 = vector.extract_strided_slice %156 {offsets = [56, 0], sizes = [4, 64], strides = [1, 1]} : vector<128x64xf32> to vector<4x64xf32>
    %c0_231 = arith.constant 0 : index
    %c1_232 = arith.constant 1 : index
    %c1_233 = arith.constant 1 : index
    %c384_234 = arith.constant 384 : index
    %214 = vector.load %arg4[%c0_231, %c1_232, %c1_233, %c384_234] : memref<2x2x6x512xf32, #tpu.memory_space<vmem>>, vector<1x1x4x64xf32>
    %215 = vector.shape_cast %214 : vector<1x1x4x64xf32> to vector<4x64xf32>
    %216 = vector.shape_cast %213 : vector<4x64xf32> to vector<1x1x4x64xf32>
    tpu.vector_store %arg4[%c0_231, %c1_232, %c1_233, %c384_234], %216 {strides = array<i32>} : memref<2x2x6x512xf32, #tpu.memory_space<vmem>>, vector<1x1x4x64xf32>,
    %217 = vector.extract_strided_slice %156 {offsets = [60, 0], sizes = [4, 64], strides = [1, 1]} : vector<128x64xf32> to vector<4x64xf32>
    %c0_235 = arith.constant 0 : index
    %c1_236 = arith.constant 1 : index
    %c1_237 = arith.constant 1 : index
    %c448_238 = arith.constant 448 : index
    %218 = vector.load %arg4[%c0_235, %c1_236, %c1_237, %c448_238] : memref<2x2x6x512xf32, #tpu.memory_space<vmem>>, vector<1x1x4x64xf32>
    %219 = vector.shape_cast %218 : vector<1x1x4x64xf32> to vector<4x64xf32>
    %220 = vector.shape_cast %217 : vector<4x64xf32> to vector<1x1x4x64xf32>
    tpu.vector_store %arg4[%c0_235, %c1_236, %c1_237, %c448_238], %220 {strides = array<i32>} : memref<2x2x6x512xf32, #tpu.memory_space<vmem>>, vector<1x1x4x64xf32>,
    %221 = vector.extract_strided_slice %156 {offsets = [64, 0], sizes = [4, 64], strides = [1, 1]} : vector<128x64xf32> to vector<4x64xf32>
    %c1_239 = arith.constant 1 : index
    %c0_240 = arith.constant 0 : index
    %c1_241 = arith.constant 1 : index
    %c0_242 = arith.constant 0 : index
    %222 = vector.load %arg4[%c1_239, %c0_240, %c1_241, %c0_242] : memref<2x2x6x512xf32, #tpu.memory_space<vmem>>, vector<1x1x4x64xf32>
    %223 = vector.shape_cast %222 : vector<1x1x4x64xf32> to vector<4x64xf32>
    %224 = vector.shape_cast %221 : vector<4x64xf32> to vector<1x1x4x64xf32>
    tpu.vector_store %arg4[%c1_239, %c0_240, %c1_241, %c0_242], %224 {strides = array<i32>} : memref<2x2x6x512xf32, #tpu.memory_space<vmem>>, vector<1x1x4x64xf32>,
    %225 = vector.extract_strided_slice %156 {offsets = [68, 0], sizes = [4, 64], strides = [1, 1]} : vector<128x64xf32> to vector<4x64xf32>
    %c1_243 = arith.constant 1 : index
    %c0_244 = arith.constant 0 : index
    %c1_245 = arith.constant 1 : index
    %c64_246 = arith.constant 64 : index
    %226 = vector.load %arg4[%c1_243, %c0_244, %c1_245, %c64_246] : memref<2x2x6x512xf32, #tpu.memory_space<vmem>>, vector<1x1x4x64xf32>
    %227 = vector.shape_cast %226 : vector<1x1x4x64xf32> to vector<4x64xf32>
    %228 = vector.shape_cast %225 : vector<4x64xf32> to vector<1x1x4x64xf32>
    tpu.vector_store %arg4[%c1_243, %c0_244, %c1_245, %c64_246], %228 {strides = array<i32>} : memref<2x2x6x512xf32, #tpu.memory_space<vmem>>, vector<1x1x4x64xf32>,
    %229 = vector.extract_strided_slice %156 {offsets = [72, 0], sizes = [4, 64], strides = [1, 1]} : vector<128x64xf32> to vector<4x64xf32>
    %c1_247 = arith.constant 1 : index
    %c0_248 = arith.constant 0 : index
    %c1_249 = arith.constant 1 : index
    %c128_250 = arith.constant 128 : index
    %230 = vector.load %arg4[%c1_247, %c0_248, %c1_249, %c128_250] : memref<2x2x6x512xf32, #tpu.memory_space<vmem>>, vector<1x1x4x64xf32>
    %231 = vector.shape_cast %230 : vector<1x1x4x64xf32> to vector<4x64xf32>
    %232 = vector.shape_cast %229 : vector<4x64xf32> to vector<1x1x4x64xf32>
    tpu.vector_store %arg4[%c1_247, %c0_248, %c1_249, %c128_250], %232 {strides = array<i32>} : memref<2x2x6x512xf32, #tpu.memory_space<vmem>>, vector<1x1x4x64xf32>,
    %233 = vector.extract_strided_slice %156 {offsets = [76, 0], sizes = [4, 64], strides = [1, 1]} : vector<128x64xf32> to vector<4x64xf32>
    %c1_251 = arith.constant 1 : index
    %c0_252 = arith.constant 0 : index
    %c1_253 = arith.constant 1 : index
    %c192_254 = arith.constant 192 : index
    %234 = vector.load %arg4[%c1_251, %c0_252, %c1_253, %c192_254] : memref<2x2x6x512xf32, #tpu.memory_space<vmem>>, vector<1x1x4x64xf32>
    %235 = vector.shape_cast %234 : vector<1x1x4x64xf32> to vector<4x64xf32>
    %236 = vector.shape_cast %233 : vector<4x64xf32> to vector<1x1x4x64xf32>
    tpu.vector_store %arg4[%c1_251, %c0_252, %c1_253, %c192_254], %236 {strides = array<i32>} : memref<2x2x6x512xf32, #tpu.memory_space<vmem>>, vector<1x1x4x64xf32>,
    %237 = vector.extract_strided_slice %156 {offsets = [80, 0], sizes = [4, 64], strides = [1, 1]} : vector<128x64xf32> to vector<4x64xf32>
    %c1_255 = arith.constant 1 : index
    %c0_256 = arith.constant 0 : index
    %c1_257 = arith.constant 1 : index
    %c256_258 = arith.constant 256 : index
    %238 = vector.load %arg4[%c1_255, %c0_256, %c1_257, %c256_258] : memref<2x2x6x512xf32, #tpu.memory_space<vmem>>, vector<1x1x4x64xf32>
    %239 = vector.shape_cast %238 : vector<1x1x4x64xf32> to vector<4x64xf32>
    %240 = vector.shape_cast %237 : vector<4x64xf32> to vector<1x1x4x64xf32>
    tpu.vector_store %arg4[%c1_255, %c0_256, %c1_257, %c256_258], %240 {strides = array<i32>} : memref<2x2x6x512xf32, #tpu.memory_space<vmem>>, vector<1x1x4x64xf32>,
    %241 = vector.extract_strided_slice %156 {offsets = [84, 0], sizes = [4, 64], strides = [1, 1]} : vector<128x64xf32> to vector<4x64xf32>
    %c1_259 = arith.constant 1 : index
    %c0_260 = arith.constant 0 : index
    %c1_261 = arith.constant 1 : index
    %c320_262 = arith.constant 320 : index
    %242 = vector.load %arg4[%c1_259, %c0_260, %c1_261, %c320_262] : memref<2x2x6x512xf32, #tpu.memory_space<vmem>>, vector<1x1x4x64xf32>
    %243 = vector.shape_cast %242 : vector<1x1x4x64xf32> to vector<4x64xf32>
    %244 = vector.shape_cast %241 : vector<4x64xf32> to vector<1x1x4x64xf32>
    tpu.vector_store %arg4[%c1_259, %c0_260, %c1_261, %c320_262], %244 {strides = array<i32>} : memref<2x2x6x512xf32, #tpu.memory_space<vmem>>, vector<1x1x4x64xf32>,
    %245 = vector.extract_strided_slice %156 {offsets = [88, 0], sizes = [4, 64], strides = [1, 1]} : vector<128x64xf32> to vector<4x64xf32>
    %c1_263 = arith.constant 1 : index
    %c0_264 = arith.constant 0 : index
    %c1_265 = arith.constant 1 : index
    %c384_266 = arith.constant 384 : index
    %246 = vector.load %arg4[%c1_263, %c0_264, %c1_265, %c384_266] : memref<2x2x6x512xf32, #tpu.memory_space<vmem>>, vector<1x1x4x64xf32>
    %247 = vector.shape_cast %246 : vector<1x1x4x64xf32> to vector<4x64xf32>
    %248 = vector.shape_cast %245 : vector<4x64xf32> to vector<1x1x4x64xf32>
    tpu.vector_store %arg4[%c1_263, %c0_264, %c1_265, %c384_266], %248 {strides = array<i32>} : memref<2x2x6x512xf32, #tpu.memory_space<vmem>>, vector<1x1x4x64xf32>,
    %249 = vector.extract_strided_slice %156 {offsets = [92, 0], sizes = [4, 64], strides = [1, 1]} : vector<128x64xf32> to vector<4x64xf32>
    %c1_267 = arith.constant 1 : index
    %c0_268 = arith.constant 0 : index
    %c1_269 = arith.constant 1 : index
    %c448_270 = arith.constant 448 : index
    %250 = vector.load %arg4[%c1_267, %c0_268, %c1_269, %c448_270] : memref<2x2x6x512xf32, #tpu.memory_space<vmem>>, vector<1x1x4x64xf32>
    %251 = vector.shape_cast %250 : vector<1x1x4x64xf32> to vector<4x64xf32>
    %252 = vector.shape_cast %249 : vector<4x64xf32> to vector<1x1x4x64xf32>
    tpu.vector_store %arg4[%c1_267, %c0_268, %c1_269, %c448_270], %252 {strides = array<i32>} : memref<2x2x6x512xf32, #tpu.memory_space<vmem>>, vector<1x1x4x64xf32>,
    %253 = vector.extract_strided_slice %156 {offsets = [96, 0], sizes = [4, 64], strides = [1, 1]} : vector<128x64xf32> to vector<4x64xf32>
    %c1_271 = arith.constant 1 : index
    %c1_272 = arith.constant 1 : index
    %c1_273 = arith.constant 1 : index
    %c0_274 = arith.constant 0 : index
    %254 = vector.load %arg4[%c1_271, %c1_272, %c1_273, %c0_274] : memref<2x2x6x512xf32, #tpu.memory_space<vmem>>, vector<1x1x4x64xf32>
    %255 = vector.shape_cast %254 : vector<1x1x4x64xf32> to vector<4x64xf32>
    %256 = vector.shape_cast %253 : vector<4x64xf32> to vector<1x1x4x64xf32>
    tpu.vector_store %arg4[%c1_271, %c1_272, %c1_273, %c0_274], %256 {strides = array<i32>} : memref<2x2x6x512xf32, #tpu.memory_space<vmem>>, vector<1x1x4x64xf32>,
    %257 = vector.extract_strided_slice %156 {offsets = [100, 0], sizes = [4, 64], strides = [1, 1]} : vector<128x64xf32> to vector<4x64xf32>
    %c1_275 = arith.constant 1 : index
    %c1_276 = arith.constant 1 : index
    %c1_277 = arith.constant 1 : index
    %c64_278 = arith.constant 64 : index
    %258 = vector.load %arg4[%c1_275, %c1_276, %c1_277, %c64_278] : memref<2x2x6x512xf32, #tpu.memory_space<vmem>>, vector<1x1x4x64xf32>
    %259 = vector.shape_cast %258 : vector<1x1x4x64xf32> to vector<4x64xf32>
    %260 = vector.shape_cast %257 : vector<4x64xf32> to vector<1x1x4x64xf32>
    tpu.vector_store %arg4[%c1_275, %c1_276, %c1_277, %c64_278], %260 {strides = array<i32>} : memref<2x2x6x512xf32, #tpu.memory_space<vmem>>, vector<1x1x4x64xf32>,
    %261 = vector.extract_strided_slice %156 {offsets = [104, 0], sizes = [4, 64], strides = [1, 1]} : vector<128x64xf32> to vector<4x64xf32>
    %c1_279 = arith.constant 1 : index
    %c1_280 = arith.constant 1 : index
    %c1_281 = arith.constant 1 : index
    %c128_282 = arith.constant 128 : index
    %262 = vector.load %arg4[%c1_279, %c1_280, %c1_281, %c128_282] : memref<2x2x6x512xf32, #tpu.memory_space<vmem>>, vector<1x1x4x64xf32>
    %263 = vector.shape_cast %262 : vector<1x1x4x64xf32> to vector<4x64xf32>
    %264 = vector.shape_cast %261 : vector<4x64xf32> to vector<1x1x4x64xf32>
    tpu.vector_store %arg4[%c1_279, %c1_280, %c1_281, %c128_282], %264 {strides = array<i32>} : memref<2x2x6x512xf32, #tpu.memory_space<vmem>>, vector<1x1x4x64xf32>,
    %265 = vector.extract_strided_slice %156 {offsets = [108, 0], sizes = [4, 64], strides = [1, 1]} : vector<128x64xf32> to vector<4x64xf32>
    %c1_283 = arith.constant 1 : index
    %c1_284 = arith.constant 1 : index
    %c1_285 = arith.constant 1 : index
    %c192_286 = arith.constant 192 : index
    %266 = vector.load %arg4[%c1_283, %c1_284, %c1_285, %c192_286] : memref<2x2x6x512xf32, #tpu.memory_space<vmem>>, vector<1x1x4x64xf32>
    %267 = vector.shape_cast %266 : vector<1x1x4x64xf32> to vector<4x64xf32>
    %268 = vector.shape_cast %265 : vector<4x64xf32> to vector<1x1x4x64xf32>
    tpu.vector_store %arg4[%c1_283, %c1_284, %c1_285, %c192_286], %268 {strides = array<i32>} : memref<2x2x6x512xf32, #tpu.memory_space<vmem>>, vector<1x1x4x64xf32>,
    %269 = vector.extract_strided_slice %156 {offsets = [112, 0], sizes = [4, 64], strides = [1, 1]} : vector<128x64xf32> to vector<4x64xf32>
    %c1_287 = arith.constant 1 : index
    %c1_288 = arith.constant 1 : index
    %c1_289 = arith.constant 1 : index
    %c256_290 = arith.constant 256 : index
    %270 = vector.load %arg4[%c1_287, %c1_288, %c1_289, %c256_290] : memref<2x2x6x512xf32, #tpu.memory_space<vmem>>, vector<1x1x4x64xf32>
    %271 = vector.shape_cast %270 : vector<1x1x4x64xf32> to vector<4x64xf32>
    %272 = vector.shape_cast %269 : vector<4x64xf32> to vector<1x1x4x64xf32>
    tpu.vector_store %arg4[%c1_287, %c1_288, %c1_289, %c256_290], %272 {strides = array<i32>} : memref<2x2x6x512xf32, #tpu.memory_space<vmem>>, vector<1x1x4x64xf32>,
    %273 = vector.extract_strided_slice %156 {offsets = [116, 0], sizes = [4, 64], strides = [1, 1]} : vector<128x64xf32> to vector<4x64xf32>
    %c1_291 = arith.constant 1 : index
    %c1_292 = arith.constant 1 : index
    %c1_293 = arith.constant 1 : index
    %c320_294 = arith.constant 320 : index
    %274 = vector.load %arg4[%c1_291, %c1_292, %c1_293, %c320_294] : memref<2x2x6x512xf32, #tpu.memory_space<vmem>>, vector<1x1x4x64xf32>
    %275 = vector.shape_cast %274 : vector<1x1x4x64xf32> to vector<4x64xf32>
    %276 = vector.shape_cast %273 : vector<4x64xf32> to vector<1x1x4x64xf32>
    tpu.vector_store %arg4[%c1_291, %c1_292, %c1_293, %c320_294], %276 {strides = array<i32>} : memref<2x2x6x512xf32, #tpu.memory_space<vmem>>, vector<1x1x4x64xf32>,
    %277 = vector.extract_strided_slice %156 {offsets = [120, 0], sizes = [4, 64], strides = [1, 1]} : vector<128x64xf32> to vector<4x64xf32>
    %c1_295 = arith.constant 1 : index
    %c1_296 = arith.constant 1 : index
    %c1_297 = arith.constant 1 : index
    %c384_298 = arith.constant 384 : index
    %278 = vector.load %arg4[%c1_295, %c1_296, %c1_297, %c384_298] : memref<2x2x6x512xf32, #tpu.memory_space<vmem>>, vector<1x1x4x64xf32>
    %279 = vector.shape_cast %278 : vector<1x1x4x64xf32> to vector<4x64xf32>
    %280 = vector.shape_cast %277 : vector<4x64xf32> to vector<1x1x4x64xf32>
    tpu.vector_store %arg4[%c1_295, %c1_296, %c1_297, %c384_298], %280 {strides = array<i32>} : memref<2x2x6x512xf32, #tpu.memory_space<vmem>>, vector<1x1x4x64xf32>,
    %281 = vector.extract_strided_slice %156 {offsets = [124, 0], sizes = [4, 64], strides = [1, 1]} : vector<128x64xf32> to vector<4x64xf32>
    %c1_299 = arith.constant 1 : index
    %c1_300 = arith.constant 1 : index
    %c1_301 = arith.constant 1 : index
    %c448_302 = arith.constant 448 : index
    %282 = vector.load %arg4[%c1_299, %c1_300, %c1_301, %c448_302] : memref<2x2x6x512xf32, #tpu.memory_space<vmem>>, vector<1x1x4x64xf32>
    %283 = vector.shape_cast %282 : vector<1x1x4x64xf32> to vector<4x64xf32>
    %284 = vector.shape_cast %281 : vector<4x64xf32> to vector<1x1x4x64xf32>
    tpu.vector_store %arg4[%c1_299, %c1_300, %c1_301, %c448_302], %284 {strides = array<i32>} : memref<2x2x6x512xf32, #tpu.memory_space<vmem>>, vector<1x1x4x64xf32>,
    %c3408 = arith.constant 3408 : index
    %c0_303 = arith.constant 0 : index
    %285 = vector.load %arg1[%c3408, %c0_303] : memref<4192x128xf32, #tpu.memory_space<vmem>>, vector<1x128xf32>
    %cst_304 = arith.constant 0.000000e+00 : f32
    %286 = vector.broadcast %cst_304 : f32 to vector<4x128xf32>
    %c0_305 = arith.constant 0 : index
    %c0_306 = arith.constant 0 : index
    %c0_307 = arith.constant 0 : index
    %c0_308 = arith.constant 0 : index
    %287 = vector.load %arg4[%c0_305, %c0_306, %c0_307, %c0_308] : memref<2x2x6x512xf32, #tpu.memory_space<vmem>>, vector<1x1x4x512xf32>
    %288 = vector.shape_cast %287 : vector<1x1x4x512xf32> to vector<4x512xf32>
    %c848 = arith.constant 848 : index
    %c0_309 = arith.constant 0 : index
    %289 = vector.load %arg1[%c848, %c0_309] : memref<4192x128xf32, #tpu.memory_space<vmem>>, vector<512x128xf32>
    %cst_310 = arith.constant dense<0.000000e+00> : vector<4x128xf32>
    %290 = tpu.matmul %288, %289, %cst_310 {dimension_numbers = #tpu.dot_dimension_numbers<[1], [0], [0], [1], [0, 0, 1, 1], [], []>} : vector<4x512xf32>, vector<512x128xf32>, vector<4x128xf32> -> vector<4x128xf32>
    %291 = arith.addf %286, %290 : vector<4x128xf32>
    %c1_311 = arith.constant 1 : index
    %c0_312 = arith.constant 0 : index
    %c0_313 = arith.constant 0 : index
    %c0_314 = arith.constant 0 : index
    %292 = vector.load %arg4[%c1_311, %c0_312, %c0_313, %c0_314] : memref<2x2x6x512xf32, #tpu.memory_space<vmem>>, vector<1x1x4x512xf32>
    %293 = vector.shape_cast %292 : vector<1x1x4x512xf32> to vector<4x512xf32>
    %c1360 = arith.constant 1360 : index
    %c0_315 = arith.constant 0 : index
    %294 = vector.load %arg1[%c1360, %c0_315] : memref<4192x128xf32, #tpu.memory_space<vmem>>, vector<512x128xf32>
    %cst_316 = arith.constant dense<0.000000e+00> : vector<4x128xf32>
    %295 = tpu.matmul %293, %294, %cst_316 {dimension_numbers = #tpu.dot_dimension_numbers<[1], [0], [0], [1], [0, 0, 1, 1], [], []>} : vector<4x512xf32>, vector<512x128xf32>, vector<4x128xf32> -> vector<4x128xf32>
    %296 = arith.addf %291, %295 : vector<4x128xf32>
    %c0_317 = arith.constant 0 : index
    %c0_318 = arith.constant 0 : index
    %c1_319 = arith.constant 1 : index
    %c0_320 = arith.constant 0 : index
    %297 = vector.load %arg4[%c0_317, %c0_318, %c1_319, %c0_320] : memref<2x2x6x512xf32, #tpu.memory_space<vmem>>, vector<1x1x4x512xf32>
    %298 = vector.shape_cast %297 : vector<1x1x4x512xf32> to vector<4x512xf32>
    %c1872 = arith.constant 1872 : index
    %c0_321 = arith.constant 0 : index
    %299 = vector.load %arg1[%c1872, %c0_321] : memref<4192x128xf32, #tpu.memory_space<vmem>>, vector<512x128xf32>
    %cst_322 = arith.constant dense<0.000000e+00> : vector<4x128xf32>
    %300 = tpu.matmul %298, %299, %cst_322 {dimension_numbers = #tpu.dot_dimension_numbers<[1], [0], [0], [1], [0, 0, 1, 1], [], []>} : vector<4x512xf32>, vector<512x128xf32>, vector<4x128xf32> -> vector<4x128xf32>
    %301 = arith.addf %296, %300 : vector<4x128xf32>
    %c1_323 = arith.constant 1 : index
    %c0_324 = arith.constant 0 : index
    %c1_325 = arith.constant 1 : index
    %c0_326 = arith.constant 0 : index
    %302 = vector.load %arg4[%c1_323, %c0_324, %c1_325, %c0_326] : memref<2x2x6x512xf32, #tpu.memory_space<vmem>>, vector<1x1x4x512xf32>
    %303 = vector.shape_cast %302 : vector<1x1x4x512xf32> to vector<4x512xf32>
    %c2384 = arith.constant 2384 : index
    %c0_327 = arith.constant 0 : index
    %304 = vector.load %arg1[%c2384, %c0_327] : memref<4192x128xf32, #tpu.memory_space<vmem>>, vector<512x128xf32>
    %cst_328 = arith.constant dense<0.000000e+00> : vector<4x128xf32>
    %305 = tpu.matmul %303, %304, %cst_328 {dimension_numbers = #tpu.dot_dimension_numbers<[1], [0], [0], [1], [0, 0, 1, 1], [], []>} : vector<4x512xf32>, vector<512x128xf32>, vector<4x128xf32> -> vector<4x128xf32>
    %306 = arith.addf %301, %305 : vector<4x128xf32>
    %c0_329 = arith.constant 0 : index
    %c0_330 = arith.constant 0 : index
    %c2_331 = arith.constant 2 : index
    %c0_332 = arith.constant 0 : index
    %307 = vector.load %arg4[%c0_329, %c0_330, %c2_331, %c0_332] : memref<2x2x6x512xf32, #tpu.memory_space<vmem>>, vector<1x1x4x512xf32>
    %308 = vector.shape_cast %307 : vector<1x1x4x512xf32> to vector<4x512xf32>
    %c2896 = arith.constant 2896 : index
    %c0_333 = arith.constant 0 : index
    %309 = vector.load %arg1[%c2896, %c0_333] : memref<4192x128xf32, #tpu.memory_space<vmem>>, vector<512x128xf32>
    %cst_334 = arith.constant dense<0.000000e+00> : vector<4x128xf32>
    %310 = tpu.matmul %308, %309, %cst_334 {dimension_numbers = #tpu.dot_dimension_numbers<[1], [0], [0], [1], [0, 0, 1, 1], [], []>} : vector<4x512xf32>, vector<512x128xf32>, vector<4x128xf32> -> vector<4x128xf32>
    %311 = arith.addf %306, %310 : vector<4x128xf32>
    %312 = vector.broadcast %285 : vector<1x128xf32> to vector<4x128xf32>
    %313 = arith.addf %311, %312 : vector<4x128xf32>
    %cst_335 = arith.constant 0.000000e+00 : f32
    %314 = vector.broadcast %cst_335 : f32 to vector<4x128xf32>
    %315 = arith.maximumf %313, %314 : vector<4x128xf32>
    %316 = vector.extract_strided_slice %315 {offsets = [0, 0], sizes = [1, 128], strides = [1, 1]} : vector<4x128xf32> to vector<1x128xf32>
    %c0_336 = arith.constant 0 : index
    %c0_337 = arith.constant 0 : index
    %317 = vector.load %arg5[%c0_336, %c0_337] : memref<2x512xf32, #tpu.memory_space<vmem>>, vector<1x128xf32>
    tpu.vector_store %arg5[%c0_336, %c0_337], %316 {strides = array<i32>} : memref<2x512xf32, #tpu.memory_space<vmem>>, vector<1x128xf32>,
    %318 = vector.extract_strided_slice %315 {offsets = [1, 0], sizes = [1, 128], strides = [1, 1]} : vector<4x128xf32> to vector<1x128xf32>
    %c0_338 = arith.constant 0 : index
    %c128_339 = arith.constant 128 : index
    %319 = vector.load %arg5[%c0_338, %c128_339] : memref<2x512xf32, #tpu.memory_space<vmem>>, vector<1x128xf32>
    tpu.vector_store %arg5[%c0_338, %c128_339], %318 {strides = array<i32>} : memref<2x512xf32, #tpu.memory_space<vmem>>, vector<1x128xf32>,
    %320 = vector.extract_strided_slice %315 {offsets = [2, 0], sizes = [1, 128], strides = [1, 1]} : vector<4x128xf32> to vector<1x128xf32>
    %c0_340 = arith.constant 0 : index
    %c256_341 = arith.constant 256 : index
    %321 = vector.load %arg5[%c0_340, %c256_341] : memref<2x512xf32, #tpu.memory_space<vmem>>, vector<1x128xf32>
    tpu.vector_store %arg5[%c0_340, %c256_341], %320 {strides = array<i32>} : memref<2x512xf32, #tpu.memory_space<vmem>>, vector<1x128xf32>,
    %322 = vector.extract_strided_slice %315 {offsets = [3, 0], sizes = [1, 128], strides = [1, 1]} : vector<4x128xf32> to vector<1x128xf32>
    %c0_342 = arith.constant 0 : index
    %c384_343 = arith.constant 384 : index
    %323 = vector.load %arg5[%c0_342, %c384_343] : memref<2x512xf32, #tpu.memory_space<vmem>>, vector<1x128xf32>
    tpu.vector_store %arg5[%c0_342, %c384_343], %322 {strides = array<i32>} : memref<2x512xf32, #tpu.memory_space<vmem>>, vector<1x128xf32>,
    %cst_344 = arith.constant 0.000000e+00 : f32
    %324 = vector.broadcast %cst_344 : f32 to vector<4x128xf32>
    %c0_345 = arith.constant 0 : index
    %c1_346 = arith.constant 1 : index
    %c0_347 = arith.constant 0 : index
    %c0_348 = arith.constant 0 : index
    %325 = vector.load %arg4[%c0_345, %c1_346, %c0_347, %c0_348] : memref<2x2x6x512xf32, #tpu.memory_space<vmem>>, vector<1x1x4x512xf32>
    %326 = vector.shape_cast %325 : vector<1x1x4x512xf32> to vector<4x512xf32>
    %c848_349 = arith.constant 848 : index
    %c0_350 = arith.constant 0 : index
    %327 = vector.load %arg1[%c848_349, %c0_350] : memref<4192x128xf32, #tpu.memory_space<vmem>>, vector<512x128xf32>
    %cst_351 = arith.constant dense<0.000000e+00> : vector<4x128xf32>
    %328 = tpu.matmul %326, %327, %cst_351 {dimension_numbers = #tpu.dot_dimension_numbers<[1], [0], [0], [1], [0, 0, 1, 1], [], []>} : vector<4x512xf32>, vector<512x128xf32>, vector<4x128xf32> -> vector<4x128xf32>
    %329 = arith.addf %324, %328 : vector<4x128xf32>
    %c1_352 = arith.constant 1 : index
    %c1_353 = arith.constant 1 : index
    %c0_354 = arith.constant 0 : index
    %c0_355 = arith.constant 0 : index
    %330 = vector.load %arg4[%c1_352, %c1_353, %c0_354, %c0_355] : memref<2x2x6x512xf32, #tpu.memory_space<vmem>>, vector<1x1x4x512xf32>
    %331 = vector.shape_cast %330 : vector<1x1x4x512xf32> to vector<4x512xf32>
    %c1360_356 = arith.constant 1360 : index
    %c0_357 = arith.constant 0 : index
    %332 = vector.load %arg1[%c1360_356, %c0_357] : memref<4192x128xf32, #tpu.memory_space<vmem>>, vector<512x128xf32>
    %cst_358 = arith.constant dense<0.000000e+00> : vector<4x128xf32>
    %333 = tpu.matmul %331, %332, %cst_358 {dimension_numbers = #tpu.dot_dimension_numbers<[1], [0], [0], [1], [0, 0, 1, 1], [], []>} : vector<4x512xf32>, vector<512x128xf32>, vector<4x128xf32> -> vector<4x128xf32>
    %334 = arith.addf %329, %333 : vector<4x128xf32>
    %c0_359 = arith.constant 0 : index
    %c1_360 = arith.constant 1 : index
    %c1_361 = arith.constant 1 : index
    %c0_362 = arith.constant 0 : index
    %335 = vector.load %arg4[%c0_359, %c1_360, %c1_361, %c0_362] : memref<2x2x6x512xf32, #tpu.memory_space<vmem>>, vector<1x1x4x512xf32>
    %336 = vector.shape_cast %335 : vector<1x1x4x512xf32> to vector<4x512xf32>
    %c1872_363 = arith.constant 1872 : index
    %c0_364 = arith.constant 0 : index
    %337 = vector.load %arg1[%c1872_363, %c0_364] : memref<4192x128xf32, #tpu.memory_space<vmem>>, vector<512x128xf32>
    %cst_365 = arith.constant dense<0.000000e+00> : vector<4x128xf32>
    %338 = tpu.matmul %336, %337, %cst_365 {dimension_numbers = #tpu.dot_dimension_numbers<[1], [0], [0], [1], [0, 0, 1, 1], [], []>} : vector<4x512xf32>, vector<512x128xf32>, vector<4x128xf32> -> vector<4x128xf32>
    %339 = arith.addf %334, %338 : vector<4x128xf32>
    %c1_366 = arith.constant 1 : index
    %c1_367 = arith.constant 1 : index
    %c1_368 = arith.constant 1 : index
    %c0_369 = arith.constant 0 : index
    %340 = vector.load %arg4[%c1_366, %c1_367, %c1_368, %c0_369] : memref<2x2x6x512xf32, #tpu.memory_space<vmem>>, vector<1x1x4x512xf32>
    %341 = vector.shape_cast %340 : vector<1x1x4x512xf32> to vector<4x512xf32>
    %c2384_370 = arith.constant 2384 : index
    %c0_371 = arith.constant 0 : index
    %342 = vector.load %arg1[%c2384_370, %c0_371] : memref<4192x128xf32, #tpu.memory_space<vmem>>, vector<512x128xf32>
    %cst_372 = arith.constant dense<0.000000e+00> : vector<4x128xf32>
    %343 = tpu.matmul %341, %342, %cst_372 {dimension_numbers = #tpu.dot_dimension_numbers<[1], [0], [0], [1], [0, 0, 1, 1], [], []>} : vector<4x512xf32>, vector<512x128xf32>, vector<4x128xf32> -> vector<4x128xf32>
    %344 = arith.addf %339, %343 : vector<4x128xf32>
    %c0_373 = arith.constant 0 : index
    %c1_374 = arith.constant 1 : index
    %c2_375 = arith.constant 2 : index
    %c0_376 = arith.constant 0 : index
    %345 = vector.load %arg4[%c0_373, %c1_374, %c2_375, %c0_376] : memref<2x2x6x512xf32, #tpu.memory_space<vmem>>, vector<1x1x4x512xf32>
    %346 = vector.shape_cast %345 : vector<1x1x4x512xf32> to vector<4x512xf32>
    %c2896_377 = arith.constant 2896 : index
    %c0_378 = arith.constant 0 : index
    %347 = vector.load %arg1[%c2896_377, %c0_378] : memref<4192x128xf32, #tpu.memory_space<vmem>>, vector<512x128xf32>
    %cst_379 = arith.constant dense<0.000000e+00> : vector<4x128xf32>
    %348 = tpu.matmul %346, %347, %cst_379 {dimension_numbers = #tpu.dot_dimension_numbers<[1], [0], [0], [1], [0, 0, 1, 1], [], []>} : vector<4x512xf32>, vector<512x128xf32>, vector<4x128xf32> -> vector<4x128xf32>
    %349 = arith.addf %344, %348 : vector<4x128xf32>
    %350 = vector.broadcast %285 : vector<1x128xf32> to vector<4x128xf32>
    %351 = arith.addf %349, %350 : vector<4x128xf32>
    %cst_380 = arith.constant 0.000000e+00 : f32
    %352 = vector.broadcast %cst_380 : f32 to vector<4x128xf32>
    %353 = arith.maximumf %351, %352 : vector<4x128xf32>
    %354 = vector.extract_strided_slice %353 {offsets = [0, 0], sizes = [1, 128], strides = [1, 1]} : vector<4x128xf32> to vector<1x128xf32>
    %c1_381 = arith.constant 1 : index
    %c0_382 = arith.constant 0 : index
    %355 = vector.load %arg5[%c1_381, %c0_382] : memref<2x512xf32, #tpu.memory_space<vmem>>, vector<1x128xf32>
    tpu.vector_store %arg5[%c1_381, %c0_382], %354 {strides = array<i32>} : memref<2x512xf32, #tpu.memory_space<vmem>>, vector<1x128xf32>,
    %356 = vector.extract_strided_slice %353 {offsets = [1, 0], sizes = [1, 128], strides = [1, 1]} : vector<4x128xf32> to vector<1x128xf32>
    %c1_383 = arith.constant 1 : index
    %c128_384 = arith.constant 128 : index
    %357 = vector.load %arg5[%c1_383, %c128_384] : memref<2x512xf32, #tpu.memory_space<vmem>>, vector<1x128xf32>
    tpu.vector_store %arg5[%c1_383, %c128_384], %356 {strides = array<i32>} : memref<2x512xf32, #tpu.memory_space<vmem>>, vector<1x128xf32>,
    %358 = vector.extract_strided_slice %353 {offsets = [2, 0], sizes = [1, 128], strides = [1, 1]} : vector<4x128xf32> to vector<1x128xf32>
    %c1_385 = arith.constant 1 : index
    %c256_386 = arith.constant 256 : index
    %359 = vector.load %arg5[%c1_385, %c256_386] : memref<2x512xf32, #tpu.memory_space<vmem>>, vector<1x128xf32>
    tpu.vector_store %arg5[%c1_385, %c256_386], %358 {strides = array<i32>} : memref<2x512xf32, #tpu.memory_space<vmem>>, vector<1x128xf32>,
    %360 = vector.extract_strided_slice %353 {offsets = [3, 0], sizes = [1, 128], strides = [1, 1]} : vector<4x128xf32> to vector<1x128xf32>
    %c1_387 = arith.constant 1 : index
    %c384_388 = arith.constant 384 : index
    %361 = vector.load %arg5[%c1_387, %c384_388] : memref<2x512xf32, #tpu.memory_space<vmem>>, vector<1x128xf32>
    tpu.vector_store %arg5[%c1_387, %c384_388], %360 {strides = array<i32>} : memref<2x512xf32, #tpu.memory_space<vmem>>, vector<1x128xf32>,
    %c0_389 = arith.constant 0 : index
    %c0_390 = arith.constant 0 : index
    %362 = vector.load %arg5[%c0_389, %c0_390] : memref<2x512xf32, #tpu.memory_space<vmem>>, vector<2x512xf32>
    %c3544 = arith.constant 3544 : index
    %c0_391 = arith.constant 0 : index
    %363 = vector.load %arg1[%c3544, %c0_391] : memref<4192x128xf32, #tpu.memory_space<vmem>>, vector<512x64xf32>
    %cst_392 = arith.constant dense<0.000000e+00> : vector<2x64xf32>
    %364 = tpu.matmul %362, %363, %cst_392 {dimension_numbers = #tpu.dot_dimension_numbers<[1], [0], [0], [1], [0, 0, 1, 1], [], []>} : vector<2x512xf32>, vector<512x64xf32>, vector<2x64xf32> -> vector<2x64xf32>
    %c4056 = arith.constant 4056 : index
    %c0_393 = arith.constant 0 : index
    %365 = vector.load %arg1[%c4056, %c0_393] : memref<4192x128xf32, #tpu.memory_space<vmem>>, vector<1x64xf32>
    %366 = vector.broadcast %365 : vector<1x64xf32> to vector<2x64xf32>
    %367 = arith.addf %364, %366 : vector<2x64xf32>
    %cst_394 = arith.constant 0.000000e+00 : f32
    %368 = vector.broadcast %cst_394 : f32 to vector<2x64xf32>
    %369 = arith.maximumf %367, %368 : vector<2x64xf32>
    %c4064 = arith.constant 4064 : index
    %c0_395 = arith.constant 0 : index
    %370 = vector.load %arg1[%c4064, %c0_395] : memref<4192x128xf32, #tpu.memory_space<vmem>>, vector<64x32xf32>
    %cst_396 = arith.constant dense<0.000000e+00> : vector<2x32xf32>
    %371 = tpu.matmul %369, %370, %cst_396 {dimension_numbers = #tpu.dot_dimension_numbers<[1], [0], [0], [1], [0, 0, 1, 1], [], []>} : vector<2x64xf32>, vector<64x32xf32>, vector<2x32xf32> -> vector<2x32xf32>
    %c4128 = arith.constant 4128 : index
    %c0_397 = arith.constant 0 : index
    %372 = vector.load %arg1[%c4128, %c0_397] : memref<4192x128xf32, #tpu.memory_space<vmem>>, vector<1x32xf32>
    %373 = vector.broadcast %372 : vector<1x32xf32> to vector<2x32xf32>
    %374 = arith.addf %371, %373 : vector<2x32xf32>
    %cst_398 = arith.constant 0.000000e+00 : f32
    %375 = vector.broadcast %cst_398 : f32 to vector<2x32xf32>
    %376 = arith.maximumf %374, %375 : vector<2x32xf32>
    %c4136 = arith.constant 4136 : index
    %c0_399 = arith.constant 0 : index
    %377 = vector.load %arg1[%c4136, %c0_399] : memref<4192x128xf32, #tpu.memory_space<vmem>>, vector<32x8xf32>
    %cst_400 = arith.constant dense<0.000000e+00> : vector<2x8xf32>
    %378 = tpu.matmul %376, %377, %cst_400 {dimension_numbers = #tpu.dot_dimension_numbers<[1], [0], [0], [1], [0, 0, 1, 1], [], []>} : vector<2x32xf32>, vector<32x8xf32>, vector<2x8xf32> -> vector<2x8xf32>
    %c4168 = arith.constant 4168 : index
    %c0_401 = arith.constant 0 : index
    %379 = vector.load %arg1[%c4168, %c0_401] : memref<4192x128xf32, #tpu.memory_space<vmem>>, vector<1x8xf32>
    %380 = vector.broadcast %379 : vector<1x8xf32> to vector<2x8xf32>
    %381 = arith.addf %378, %380 : vector<2x8xf32>
    %cst_402 = arith.constant 0.000000e+00 : f32
    %382 = vector.broadcast %cst_402 : f32 to vector<2x8xf32>
    %383 = arith.maximumf %381, %382 : vector<2x8xf32>
    %c4176 = arith.constant 4176 : index
    %c0_403 = arith.constant 0 : index
    %384 = vector.load %arg1[%c4176, %c0_403] : memref<4192x128xf32, #tpu.memory_space<vmem>>, vector<8x1xf32>
    %cst_404 = arith.constant dense<0.000000e+00> : vector<2x1xf32>
    %385 = tpu.matmul %383, %384, %cst_404 {dimension_numbers = #tpu.dot_dimension_numbers<[1], [0], [0], [1], [0, 0, 1, 1], [], []>} : vector<2x8xf32>, vector<8x1xf32>, vector<2x1xf32> -> vector<2x1xf32>
    %c4184 = arith.constant 4184 : index
    %c0_405 = arith.constant 0 : index
    %386 = vector.load %arg1[%c4184, %c0_405] : memref<4192x128xf32, #tpu.memory_space<vmem>>, vector<1x1xf32>
    %387 = vector.broadcast %386 : vector<1x1xf32> to vector<2x1xf32>
    %388 = arith.addf %385, %387 : vector<2x1xf32>
    %c0_406 = arith.constant 0 : index
    %c0_407 = arith.constant 0 : index
    %389 = vector.load %arg2[%c0_406, %c0_407] : memref<2x1xf32, #tpu.memory_space<vmem>>, vector<2x1xf32>
    tpu.vector_store %arg2[%c0_406, %c0_407], %388 {strides = array<i32>} : memref<2x1xf32, #tpu.memory_space<vmem>>, vector<2x1xf32>,
    return
  }
}

</mosaic_0001>

<bundles_post_ra>
// kernel: forward.1
= control target key start
LH: loop header
LB: loop body
LE: loop exit
PB: predicated region body
PF: predicated region fallthrough
CT: control target
= control target key end

     0   :  { %vm11_vm0 = vcmask 261120   ;;  %vm13_vm1 = vcmask 254976   ;;  %v7095_v19 = vmov 0.0   ;;  %vm4608_vm2 = vcmask 520193   ;;  %s12061_s1 = inlined_call_operand.vmem [shape: f32[4192,128], index: 1, kind: input, shape index: {}]   ;;  %s12062_s0 = inlined_call_operand.vmem [shape: f32[512,32], index: 0, kind: input, shape index: {}]   ;;  %s12063_s2 = inlined_call_operand.vmem [shape: f32[2,1], index: 2, kind: output, shape index: {}]  }
   0x1   :  { %v256_v0 = vld [vmem:[%s12061_s1 + $0x18] sm:$0xff]  ;;  %v255_v1 = vld [vmem:[%s12061_s1 + $0x10] sm:$0xff]  ;;  %v254_v2 = vld [vmem:[%s12061_s1 + $0x8] sm:$0xff]  ;;  %15 = vst.msk [vmem:[#allocation2 + $0x10] sm:$0xff] %vm11_vm0, %v7095_v19  ;;  %vm4614_vm3 = vcmask 1044993   ;;  %vm6522_vm4 = vcmask 523264  }
   0x2   :  { %463 = vmatpush.msra.mxu0 %v256_v0  ;;  %7081 = vmatpush.msra.mxu3 %v256_v0  ;;  %v253_v3 = vld [vmem:[%s12061_s1] sm:$0xff]  ;;  %v190_v5 = vld [vmem:[%s12062_s0 + $0x8] sm:$0xff]  ;;  %v191_v6 = vld [vmem:[%s12062_s0 + $0x10] sm:$0xff]  ;;  %16 = vst.msk [vmem:[#allocation2 + $0x18] sm:$0x3] %vm13_vm1, %v7095_v19  ;;  %vm6580_vm5 = vcmask 64512  }
   0x3   :  { %v189_v4 = vld [vmem:[%s12062_s0] sm:$0xff]  ;;  %v192_v7 = vld [vmem:[%s12062_s0 + $0x18] sm:$0xff]  ;;  %v194_v9 = vld [vmem:[%s12062_s0 + $0x28] sm:$0xff]  ;;  %12 = vst.msk [vmem:[#allocation2] sm:$0xff] %vm11_vm0, %v7095_v19  ;;  %vm6604_vm6 = vcmask 1024  }
   0x4   :  { %464 = vmatpush.msra.mxu0 %v255_v1  ;;  %7082 = vmatpush.msra.mxu3 %v255_v1  ;;  %v193_v8 = vld [vmem:[%s12062_s0 + $0x20] sm:$0xff]  ;;  %v195_v10 = vld [vmem:[%s12062_s0 + $0x30] sm:$0xff]  ;;  %v196_v11 = vld [vmem:[%s12062_s0 + $0x38] sm:$0xff]  ;;  %14 = vst.msk [vmem:[#allocation2 + $0x8] sm:$0x3] %vm13_vm1, %v7095_v19 }
   0x5   :  { %v197_v12 = vld [vmem:[%s12062_s0 + $0x40] sm:$0xff]  ;;  %v198_v13 = vld [vmem:[%s12062_s0 + $0x48] sm:$0xff]  ;;  %v199_v14 = vld [vmem:[%s12062_s0 + $0x50] sm:$0xff]  ;;  %17 = vst.msk [vmem:[#allocation2 + $0x20] sm:$0xff] %vm11_vm0, %v7095_v19 }
   0x6   :  { %465 = vmatpush.msra.mxu0 %v254_v2  ;;  %7083 = vmatpush.msra.mxu3 %v254_v2  ;;  %v200_v15 = vld [vmem:[%s12062_s0 + $0x58] sm:$0xff]  ;;  %v811_v17 = vld [vmem:[%s12061_s1 + $0x40] sm:$0xff]  ;;  %v809_v23 = vld [vmem:[%s12061_s1 + $0x30] sm:$0xff]  ;;  %18 = vst.msk [vmem:[#allocation2 + $0x28] sm:$0x3] %vm13_vm1, %v7095_v19 }
   0x7   :  { %v252_v16 = vld [vmem:[%s12062_s0 + $0x1f8] sm:$0xff]  ;;  %v1078_v18 = vld [vmem:[%s12061_s1 + $0x80] sm:$0xff]  ;;  %1006 = vmatpush.msra.mxu2 %v811_v17  ;;  %v1076_v24 = vld [vmem:[%s12061_s1 + $0x70] sm:$0xff]  ;;  %19 = vst.msk [vmem:[#allocation2 + $0x30] sm:$0xff] %vm11_vm0, %v7095_v19 }
   0x8   :  { %466 = vmatpush.msra.mxu0 %v253_v3  ;;  %7084 = vmatpush.msra.mxu3 %v253_v3  ;;  %v810_v20 = vld [vmem:[%s12061_s1 + $0x38] sm:$0xff]  ;;  %v201_v22 = vld [vmem:[%s12062_s0 + $0x60] sm:$0xff]  ;;  %v808_v25 = vld [vmem:[%s12061_s1 + $0x28] sm:$0xff]  ;;  %20 = vst.msk [vmem:[#allocation2 + $0x38] sm:$0x3] %vm13_vm1, %v7095_v19 }
   0x9   :  { %6610 = vmatmul.msk.f32.vlgmr.msra.gmra.mxu0 %vm11_vm0, %v189_v4  ;;  %6673 = vmatmul.msk.f32.vlgmr.msra.gmra.mxu3 %vm11_vm0, %v252_v16  ;;  %v1077_v21 = vld [vmem:[%s12061_s1 + $0x78] sm:$0xff]  ;;  %v1075_v26 = vld [vmem:[%s12061_s1 + $0x68] sm:$0xff]  ;;  %21 = vst.msk [vmem:[#allocation2 + $0x40] sm:$0xff] %vm11_vm0, %v7095_v19  ;;  %v203_v30 = vld [vmem:[%s12062_s0 + $0x70] sm:$0xff] }
   0xa   :  { %1139 = vmatpush.msrb.mxu3 %v1078_v18  ;;  %1007 = vmatpush.msra.mxu2 %v810_v20  ;;  %v202_v27 = vld [vmem:[%s12062_s0 + $0x68] sm:$0xff]  ;;  %22 = vst.msk [vmem:[#allocation2 + $0x48] sm:$0x3] %vm13_vm1, %v7095_v19  ;;  %v204_v31 = vld [vmem:[%s12062_s0 + $0x78] sm:$0xff]  ;;  %v7271_v32 = vld [vmem:[%s12061_s1 + $0x20] ss:$0 sm:$0xff] }
   0xb   :  { %v792_v28 = vld [vmem:[#allocation2] sm:$0xff]  ;;  %23 = vst.msk [vmem:[#allocation2 + $0x50] sm:$0xff] %vm11_vm0, %v7095_v19  ;;  %v205_v34 = vld [vmem:[%s12062_s0 + $0x80] sm:$0xff]  ;;  %v207_v42 = vld [vmem:[%s12062_s0 + $0x90] sm:$0xff] }
   0xc   :  { %1140 = vmatpush.msrb.mxu3 %v1077_v21  ;;  %1008 = vmatpush.msra.mxu2 %v809_v23  ;;  %v1059_v29 = vld [vmem:[#allocation2 + $0x1] sm:$0xff]  ;;  %24 = vst.msk [vmem:[#allocation2 + $0x58] sm:$0x3] %vm13_vm1, %v7095_v19  ;;  %v208_v44 = vld [vmem:[%s12062_s0 + $0x98] sm:$0xff]  ;;  %v209_v46 = vld [vmem:[%s12062_s0 + $0xa0] sm:$0xff] }
   0xd   :  { %25 = vst.msk [vmem:[#allocation2 + $0x60] sm:$0xff] %vm11_vm0, %v7095_v19  ;;  %v206_v38 = vld [vmem:[%s12062_s0 + $0x88] sm:$0xff]  ;;  %v211_v62 = vld [vmem:[%s12062_s0 + $0xb0] sm:$0xff]  ;;  %v212_v4 = vld [vmem:[%s12062_s0 + $0xb8] sm:$0xff] }
   0xe   :  { %1141 = vmatpush.msrb.mxu3 %v1076_v24  ;;  %1009 = vmatpush.msra.mxu2 %v808_v25  ;;  %26 = vst.msk [vmem:[#allocation2 + $0x68] sm:$0x3] %vm13_vm1, %v7095_v19  ;;  %v210_v52 = vld [vmem:[%s12062_s0 + $0xa8] sm:$0xff] }
   0xf   :  { %6690 = vmatmul.msk.f32.vlgmr.msra.gmra.mxu2 %vm11_vm0, %v792_v28  ;;  %27 = vst.msk [vmem:[#allocation2 + $0x70] sm:$0xff] %vm11_vm0, %v7095_v19  ;;  %v214_v16 = vld [vmem:[%s12062_s0 + $0xc8] sm:$0xff]  ;;  %v216_v28 = vld [vmem:[%s12062_s0 + $0xd8] sm:$0xff] }
  0x10   :  { %1142 = vmatpush.msrb.mxu3 %v1075_v26  ;;  %28 = vst.msk [vmem:[#allocation2 + $0x78] sm:$0x3] %vm13_vm1, %v7095_v19 }
  0x11   :  { %6611 = vmatmul.msk.f32.gmra.mxu0 %vm11_vm0, %v190_v5  ;;  %6706 = vmatmul.msk.f32.vlgmr.msrb.gmra.mxu3 %vm11_vm0, %v1059_v29  ;;  %29 = vst.msk [vmem:[#allocation2 + $0x80] sm:$0xff] %vm11_vm0, %v7095_v19 }
  0x12   :  { %30 = vst.msk [vmem:[#allocation2 + $0x88] sm:$0x3] %vm13_vm1, %v7095_v19 }
  0x13   :  { %31 = vst.msk [vmem:[#allocation2 + $0x90] sm:$0xff] %vm11_vm0, %v7095_v19 }
  0x14   :  { %32 = vst.msk [vmem:[#allocation2 + $0x98] sm:$0x3] %vm13_vm1, %v7095_v19 }
  0x15   :  { %33 = vst.msk [vmem:[#allocation2 + $0xa0] sm:$0xff] %vm11_vm0, %v7095_v19 }
  0x16   :  { %34 = vst.msk [vmem:[#allocation2 + $0xa8] sm:$0x3] %vm13_vm1, %v7095_v19 }
  0x17   :  { %35 = vst.msk [vmem:[#allocation2 + $0xb0] sm:$0xff] %vm11_vm0, %v7095_v19 }
  0x18   :  { %36 = vst.msk [vmem:[#allocation2 + $0xb8] sm:$0x3] %vm13_vm1, %v7095_v19 }
  0x19   :  { %6612 = vmatmul.msk.f32.gmra.mxu0 %vm11_vm0, %v191_v6  ;;  %37 = vst.msk [vmem:[#allocation2 + $0xc0] sm:$0xff] %vm11_vm0, %v7095_v19 }
  0x1a   :  { %38 = vst.msk [vmem:[#allocation2 + $0xc8] sm:$0x3] %vm13_vm1, %v7095_v19 }
  0x1b   :  { %39 = vst.msk [vmem:[#allocation2 + $0xd0] sm:$0xff] %vm11_vm0, %v7095_v19 }
  0x1c   :  { %40 = vst.msk [vmem:[#allocation2 + $0xd8] sm:$0x3] %vm13_vm1, %v7095_v19 }
  0x1d   :  { %41 = vst.msk [vmem:[#allocation2 + $0xe0] sm:$0xff] %vm11_vm0, %v7095_v19 }
  0x1e   :  { %42 = vst.msk [vmem:[#allocation2 + $0xe8] sm:$0x3] %vm13_vm1, %v7095_v19 }
  0x1f   :  { %43 = vst.msk [vmem:[#allocation2 + $0xf0] sm:$0xff] %vm11_vm0, %v7095_v19 }
  0x20   :  { %44 = vst.msk [vmem:[#allocation2 + $0xf8] sm:$0x3] %vm13_vm1, %v7095_v19 }
  0x21   :  { %6613 = vmatmul.msk.f32.gmra.mxu0 %vm11_vm0, %v192_v7  ;;  %45 = vst.msk [vmem:[#allocation2 + $0x100] sm:$0xff] %vm11_vm0, %v7095_v19 }
  0x22   :  { %46 = vst.msk [vmem:[#allocation2 + $0x108] sm:$0x3] %vm13_vm1, %v7095_v19 }
  0x23   :  { %47 = vst.msk [vmem:[#allocation2 + $0x110] sm:$0xff] %vm11_vm0, %v7095_v19 }
  0x24   :  { %48 = vst.msk [vmem:[#allocation2 + $0x118] sm:$0x3] %vm13_vm1, %v7095_v19 }
  0x25   :  { %49 = vst.msk [vmem:[#allocation2 + $0x120] sm:$0xff] %vm11_vm0, %v7095_v19 }
  0x26   :  { %50 = vst.msk [vmem:[#allocation2 + $0x128] sm:$0x3] %vm13_vm1, %v7095_v19 }
  0x27   :  { %51 = vst.msk [vmem:[#allocation2 + $0x130] sm:$0xff] %vm11_vm0, %v7095_v19 }
  0x28   :  { %52 = vst.msk [vmem:[#allocation2 + $0x138] sm:$0x3] %vm13_vm1, %v7095_v19 }
  0x29   :  { %6614 = vmatmul.msk.f32.gmra.mxu0 %vm11_vm0, %v193_v8  ;;  %53 = vst.msk [vmem:[#allocation2 + $0x140] sm:$0xff] %vm11_vm0, %v7095_v19 }
  0x2a   :  { %54 = vst.msk [vmem:[#allocation2 + $0x148] sm:$0x3] %vm13_vm1, %v7095_v19 }
  0x2b   :  { %55 = vst.msk [vmem:[#allocation2 + $0x150] sm:$0xff] %vm11_vm0, %v7095_v19 }
  0x2c   :  { %56 = vst.msk [vmem:[#allocation2 + $0x158] sm:$0x3] %vm13_vm1, %v7095_v19 }
  0x2d   :  { %57 = vst.msk [vmem:[#allocation2 + $0x160] sm:$0xff] %vm11_vm0, %v7095_v19 }
  0x2e   :  { %58 = vst.msk [vmem:[#allocation2 + $0x168] sm:$0x3] %vm13_vm1, %v7095_v19 }
  0x2f   :  { %59 = vst.msk [vmem:[#allocation2 + $0x170] sm:$0xff] %vm11_vm0, %v7095_v19 }
  0x30   :  { %60 = vst.msk [vmem:[#allocation2 + $0x178] sm:$0x3] %vm13_vm1, %v7095_v19 }
  0x31   :  { %6615 = vmatmul.msk.f32.gmra.mxu0 %vm11_vm0, %v194_v9  ;;  %61 = vst.msk [vmem:[#allocation2 + $0x180] sm:$0xff] %vm11_vm0, %v7095_v19 }
  0x32   :  { %62 = vst.msk [vmem:[#allocation2 + $0x188] sm:$0x3] %vm13_vm1, %v7095_v19 }
  0x33   :  { %63 = vst.msk [vmem:[#allocation2 + $0x190] sm:$0xff] %vm11_vm0, %v7095_v19 }
  0x34   :  { %64 = vst.msk [vmem:[#allocation2 + $0x198] sm:$0x3] %vm13_vm1, %v7095_v19 }
  0x35   :  { %65 = vst.msk [vmem:[#allocation2 + $0x1a0] sm:$0xff] %vm11_vm0, %v7095_v19 }
  0x36   :  { %66 = vst.msk [vmem:[#allocation2 + $0x1a8] sm:$0x3] %vm13_vm1, %v7095_v19 }
  0x37   :  { %67 = vst.msk [vmem:[#allocation2 + $0x1b0] sm:$0xff] %vm11_vm0, %v7095_v19 }
  0x38   :  { %68 = vst.msk [vmem:[#allocation2 + $0x1b8] sm:$0x3] %vm13_vm1, %v7095_v19 }
  0x39   :  { %6616 = vmatmul.msk.f32.gmra.mxu0 %vm11_vm0, %v195_v10  ;;  %69 = vst.msk [vmem:[#allocation2 + $0x1c0] sm:$0xff] %vm11_vm0, %v7095_v19  ;;  %v213_v10 = vld [vmem:[%s12062_s0 + $0xc0] sm:$0xff] }
  0x3a   :  { %70 = vst.msk [vmem:[#allocation2 + $0x1c8] sm:$0x3] %vm13_vm1, %v7095_v19 }
  0x3b   :  { %71 = vst.msk [vmem:[#allocation2 + $0x1d0] sm:$0xff] %vm11_vm0, %v7095_v19 }
  0x3c   :  { %72 = vst.msk [vmem:[#allocation2 + $0x1d8] sm:$0x3] %vm13_vm1, %v7095_v19 }
  0x3d   :  { %73 = vst.msk [vmem:[#allocation2 + $0x1e0] sm:$0xff] %vm11_vm0, %v7095_v19 }
  0x3e   :  { %74 = vst.msk [vmem:[#allocation2 + $0x1e8] sm:$0x3] %vm13_vm1, %v7095_v19 }
  0x3f   :  { %75 = vst.msk [vmem:[#allocation2 + $0x1f0] sm:$0xff] %vm11_vm0, %v7095_v19 }
  0x40   :  { %76 = vst.msk [vmem:[#allocation2 + $0x1f8] sm:$0x3] %vm13_vm1, %v7095_v19 }
  0x41   :  { %6617 = vmatmul.msk.f32.gmra.mxu0 %vm11_vm0, %v196_v11  ;;  %77 = vst.msk [vmem:[#allocation2 + $0x200] sm:$0xff] %vm11_vm0, %v7095_v19 }
  0x42   :  { %78 = vst.msk [vmem:[#allocation2 + $0x208] sm:$0x3] %vm13_vm1, %v7095_v19 }
  0x43   :  { %79 = vst.msk [vmem:[#allocation2 + $0x210] sm:$0xff] %vm11_vm0, %v7095_v19 }
  0x44   :  { %80 = vst.msk [vmem:[#allocation2 + $0x218] sm:$0x3] %vm13_vm1, %v7095_v19 }
  0x45   :  { %81 = vst.msk [vmem:[#allocation2 + $0x220] sm:$0xff] %vm11_vm0, %v7095_v19 }
  0x46   :  { %82 = vst.msk [vmem:[#allocation2 + $0x228] sm:$0x3] %vm13_vm1, %v7095_v19 }
  0x47   :  { %83 = vst.msk [vmem:[#allocation2 + $0x230] sm:$0xff] %vm11_vm0, %v7095_v19 }
  0x48   :  { %84 = vst.msk [vmem:[#allocation2 + $0x238] sm:$0x3] %vm13_vm1, %v7095_v19 }
  0x49   :  { %6618 = vmatmul.msk.f32.gmra.mxu0 %vm11_vm0, %v197_v12  ;;  %85 = vst.msk [vmem:[#allocation2 + $0x240] sm:$0xff] %vm11_vm0, %v7095_v19 }
  0x4a   :  { %86 = vst.msk [vmem:[#allocation2 + $0x248] sm:$0x3] %vm13_vm1, %v7095_v19 }
  0x4b   :  { %87 = vst.msk [vmem:[#allocation2 + $0x250] sm:$0xff] %vm11_vm0, %v7095_v19 }
  0x4c   :  { %88 = vst.msk [vmem:[#allocation2 + $0x258] sm:$0x3] %vm13_vm1, %v7095_v19 }
  0x4d   :  { %89 = vst.msk [vmem:[#allocation2 + $0x260] sm:$0xff] %vm11_vm0, %v7095_v19 }
  0x4e   :  { %90 = vst.msk [vmem:[#allocation2 + $0x268] sm:$0x3] %vm13_vm1, %v7095_v19 }
  0x4f   :  { %91 = vst.msk [vmem:[#allocation2 + $0x270] sm:$0xff] %vm11_vm0, %v7095_v19 }
  0x50   :  { %92 = vst.msk [vmem:[#allocation2 + $0x278] sm:$0x3] %vm13_vm1, %v7095_v19 }
  0x51   :  { %6619 = vmatmul.msk.f32.gmra.mxu0 %vm11_vm0, %v198_v13  ;;  %93 = vst.msk [vmem:[#allocation2 + $0x280] sm:$0xff] %vm11_vm0, %v7095_v19 }
  0x52   :  { %94 = vst.msk [vmem:[#allocation2 + $0x288] sm:$0x3] %vm13_vm1, %v7095_v19 }
  0x53   :  { %95 = vst.msk [vmem:[#allocation2 + $0x290] sm:$0xff] %vm11_vm0, %v7095_v19 }
  0x54   :  { %96 = vst.msk [vmem:[#allocation2 + $0x298] sm:$0x3] %vm13_vm1, %v7095_v19 }
  0x55   :  { %97 = vst.msk [vmem:[#allocation2 + $0x2a0] sm:$0xff] %vm11_vm0, %v7095_v19 }
  0x56   :  { %98 = vst.msk [vmem:[#allocation2 + $0x2a8] sm:$0x3] %vm13_vm1, %v7095_v19 }
  0x57   :  { %99 = vst.msk [vmem:[#allocation2 + $0x2b0] sm:$0xff] %vm11_vm0, %v7095_v19 }
  0x58   :  { %100 = vst.msk [vmem:[#allocation2 + $0x2b8] sm:$0x3] %vm13_vm1, %v7095_v19 }
  0x59   :  { %6620 = vmatmul.msk.f32.gmra.mxu0 %vm11_vm0, %v199_v14  ;;  %101 = vst.msk [vmem:[#allocation2 + $0x2c0] sm:$0xff] %vm11_vm0, %v7095_v19 }
  0x5a   :  { %102 = vst.msk [vmem:[#allocation2 + $0x2c8] sm:$0x3] %vm13_vm1, %v7095_v19 }
  0x5b   :  { %103 = vst.msk [vmem:[#allocation2 + $0x2d0] sm:$0xff] %vm11_vm0, %v7095_v19 }
  0x5c   :  { %104 = vst.msk [vmem:[#allocation2 + $0x2d8] sm:$0x3] %vm13_vm1, %v7095_v19 }
  0x5d   :  { %105 = vst.msk [vmem:[#allocation2 + $0x2e0] sm:$0xff] %vm11_vm0, %v7095_v19 }
  0x5e   :  { %106 = vst.msk [vmem:[#allocation2 + $0x2e8] sm:$0x3] %vm13_vm1, %v7095_v19 }
  0x5f   :  { %107 = vst.msk [vmem:[#allocation2 + $0x2f0] sm:$0xff] %vm11_vm0, %v7095_v19 }
  0x60   :  { %108 = vst.msk [vmem:[#allocation2 + $0x2f8] sm:$0x3] %vm13_vm1, %v7095_v19 }
  0x61   :  { %6621 = vmatmul.msk.f32.gmra.mxu0 %vm11_vm0, %v200_v15  ;;  %109 = vst.msk [vmem:[#allocation2 + $0x300] sm:$0xff] %vm11_vm0, %v7095_v19 }
  0x62   :  { %110 = vst.msk [vmem:[#allocation2 + $0x308] sm:$0x3] %vm13_vm1, %v7095_v19 }
  0x63   :  { %113 = vst.msk [vmem:[#allocation2 + $0x320] sm:$0xff] %vm11_vm0, %v7095_v19 }
  0x64   :  { %114 = vst.msk [vmem:[#allocation2 + $0x328] sm:$0x3] %vm13_vm1, %v7095_v19 }
  0x65   :  { %115 = vst.msk [vmem:[#allocation2 + $0x330] sm:$0xff] %vm11_vm0, %v7095_v19 }
  0x66   :  { %116 = vst.msk [vmem:[#allocation2 + $0x338] sm:$0x3] %vm13_vm1, %v7095_v19 }
  0x67   :  { %117 = vst.msk [vmem:[#allocation2 + $0x340] sm:$0xff] %vm11_vm0, %v7095_v19 }
  0x68   :  { %118 = vst.msk [vmem:[#allocation2 + $0x348] sm:$0x3] %vm13_vm1, %v7095_v19 }
  0x69   :  { %6622 = vmatmul.msk.f32.gmra.mxu0 %vm11_vm0, %v201_v22  ;;  %119 = vst.msk [vmem:[#allocation2 + $0x350] sm:$0xff] %vm11_vm0, %v7095_v19  ;;  %v215_v22 = vld [vmem:[%s12062_s0 + $0xd0] sm:$0xff] }
  0x6a   :  { %120 = vst.msk [vmem:[#allocation2 + $0x358] sm:$0x3] %vm13_vm1, %v7095_v19 }
  0x6b   :  { %121 = vst.msk [vmem:[#allocation2 + $0x360] sm:$0xff] %vm11_vm0, %v7095_v19 }
  0x6c   :  { %122 = vst.msk [vmem:[#allocation2 + $0x368] sm:$0x3] %vm13_vm1, %v7095_v19 }
  0x6d   :  { %123 = vst.msk [vmem:[#allocation2 + $0x370] sm:$0xff] %vm11_vm0, %v7095_v19 }
  0x6e   :  { %124 = vst.msk [vmem:[#allocation2 + $0x378] sm:$0x3] %vm13_vm1, %v7095_v19 }
  0x6f   :  { %125 = vst.msk [vmem:[#allocation2 + $0x380] sm:$0xff] %vm11_vm0, %v7095_v19 }
  0x70   :  { %126 = vst.msk [vmem:[#allocation2 + $0x388] sm:$0x3] %vm13_vm1, %v7095_v19 }
  0x71   :  { %6623 = vmatmul.msk.f32.gmra.mxu0 %vm11_vm0, %v202_v27  ;;  %127 = vst.msk [vmem:[#allocation2 + $0x390] sm:$0xff] %vm11_vm0, %v7095_v19 }
  0x72   :  { %128 = vst.msk [vmem:[#allocation2 + $0x398] sm:$0x3] %vm13_vm1, %v7095_v19 }
  0x73   :  { %129 = vst.msk [vmem:[#allocation2 + $0x3a0] sm:$0xff] %vm11_vm0, %v7095_v19 }
  0x74   :  { %130 = vst.msk [vmem:[#allocation2 + $0x3a8] sm:$0x3] %vm13_vm1, %v7095_v19 }
  0x75   :  { %133 = vst.msk [vmem:[#allocation2 + $0x3c0] sm:$0xff] %vm11_vm0, %v7095_v19 }
  0x76   :  { %134 = vst.msk [vmem:[#allocation2 + $0x3c8] sm:$0x3] %vm13_vm1, %v7095_v19 }
  0x77   :  { %135 = vst.msk [vmem:[#allocation2 + $0x3d0] sm:$0xff] %vm11_vm0, %v7095_v19 }
  0x78   :  { %136 = vst.msk [vmem:[#allocation2 + $0x3d8] sm:$0x3] %vm13_vm1, %v7095_v19 }
  0x79   :  { %6624 = vmatmul.msk.f32.gmra.mxu0 %vm11_vm0, %v203_v30  ;;  %137 = vst.msk [vmem:[#allocation2 + $0x3e0] sm:$0xff] %vm11_vm0, %v7095_v19 }
  0x7a   :  { %138 = vst.msk [vmem:[#allocation2 + $0x3e8] sm:$0x3] %vm13_vm1, %v7095_v19 }
  0x7b   :  { %139 = vst.msk [vmem:[#allocation2 + $0x3f0] sm:$0xff] %vm11_vm0, %v7095_v19 }
  0x7c   :  { %140 = vst.msk [vmem:[#allocation2 + $0x3f8] sm:$0x3] %vm13_vm1, %v7095_v19 }
  0x7d   :  { %141 = vst.msk [vmem:[#allocation2 + $0x400] sm:$0xff] %vm11_vm0, %v7095_v19 }
  0x7e   :  { %142 = vst.msk [vmem:[#allocation2 + $0x408] sm:$0x3] %vm13_vm1, %v7095_v19 }
  0x7f   :  { %143 = vst.msk [vmem:[#allocation2 + $0x410] sm:$0xff] %vm11_vm0, %v7095_v19 }
  0x80   :  { %144 = vst.msk [vmem:[#allocation2 + $0x418] sm:$0x3] %vm13_vm1, %v7095_v19 }
  0x81   :  { %6625 = vmatmul.msk.f32.gmra.mxu0 %vm11_vm0, %v204_v31  ;;  %145 = vst.msk [vmem:[#allocation2 + $0x420] sm:$0xff] %vm11_vm0, %v7095_v19 }
  0x82   :  { %146 = vst.msk [vmem:[#allocation2 + $0x428] sm:$0x3] %vm13_vm1, %v7095_v19 }
  0x83   :  { %147 = vst.msk [vmem:[#allocation2 + $0x430] sm:$0xff] %vm11_vm0, %v7095_v19 }
  0x84   :  { %148 = vst.msk [vmem:[#allocation2 + $0x438] sm:$0x3] %vm13_vm1, %v7095_v19 }
  0x85   :  { %149 = vst.msk [vmem:[#allocation2 + $0x440] sm:$0xff] %vm11_vm0, %v7095_v19 }
  0x86   :  { %v468_v33 = vpop.f32.mrf.mxu0  ;;  %150 = vst.msk [vmem:[#allocation2 + $0x448] sm:$0x3] %vm13_vm1, %v7095_v19 }
  0x87   :  { %v469_v35 = vadd.f32 %v7271_v32, %v468_v33  ;;  %153 = vst.msk [vmem:[#allocation2 + $0x460] sm:$0xff] %vm11_vm0, %v7095_v19 }
  0x88   :  { %154 = vst.msk [vmem:[#allocation2 + $0x468] sm:$0x3] %vm13_vm1, %v7095_v19 }
  0x89   :  { %v660_v36 = vmax.f32 %v469_v35, 0.0  ;;  %6626 = vmatmul.msk.f32.gmra.mxu0 %vm11_vm0, %v205_v34  ;;  %155 = vst.msk [vmem:[#allocation2 + $0x470] sm:$0xff] %vm11_vm0, %v7095_v19  ;;  %v217_v35 = vld [vmem:[%s12062_s0 + $0xe0] sm:$0xff] }
  0x8a   :  { %156 = vst.msk [vmem:[#allocation2 + $0x478] sm:$0x3] %vm13_vm1, %v7095_v19 }
  0x8b   :  { %725 = vst.msk [vmem:[#allocation2 + $0x11] sm:$0xff] %vm11_vm0, %v660_v36  ;;  %v800_v36 = vld [vmem:[#allocation2 + $0xa0] sm:$0xff] }
  0x8c   :  { %157 = vst.msk [vmem:[#allocation2 + $0x480] sm:$0xff] %vm11_vm0, %v7095_v19 }
  0x8d   :  { %158 = vst.msk [vmem:[#allocation2 + $0x488] sm:$0x3] %vm13_vm1, %v7095_v19 }
  0x8e   :  { %v471_v37 = vpop.f32.mrf.mxu0  ;;  %159 = vst.msk [vmem:[#allocation2 + $0x490] sm:$0xff] %vm11_vm0, %v7095_v19 }
  0x8f   :  { %160 = vst.msk [vmem:[#allocation2 + $0x498] sm:$0x3] %vm13_vm1, %v7095_v19  ;;  %v472_v47 = vadd.f32 %v7271_v32, %v471_v37  ;;  %v1067_v37 = vld [vmem:[#allocation2 + $0xa1] sm:$0xff] }
  0x90   :  { %161 = vst.msk [vmem:[#allocation2 + $0x4a0] sm:$0xff] %vm11_vm0, %v7095_v19 }
  0x91   :  { %6627 = vmatmul.msk.f32.gmra.mxu0 %vm11_vm0, %v206_v38  ;;  %162 = vst.msk [vmem:[#allocation2 + $0x4a8] sm:$0x3] %vm13_vm1, %v7095_v19  ;;  %v661_v53 = vmax.f32 %v472_v47, 0.0  ;;  %v219_v47 = vld [vmem:[%s12062_s0 + $0xf0] sm:$0xff] }
  0x92   :  { %v793_v39 = vld [vmem:[#allocation2 + $0x10] sm:$0xff]  ;;  %163 = vst.msk [vmem:[#allocation2 + $0x4b0] sm:$0xff] %vm11_vm0, %v7095_v19 }
  0x93   :  { %v1060_v40 = vld [vmem:[#allocation2 + $0x11] sm:$0xff]  ;;  %6691 = vmatmul.msk.f32.gmra.mxu2 %vm11_vm0, %v793_v39  ;;  %164 = vst.msk [vmem:[#allocation2 + $0x4b8] sm:$0x3] %vm13_vm1, %v7095_v19 }
  0x94   :  { %6707 = vmatmul.msk.f32.gmra.mxu3 %vm11_vm0, %v1060_v40  ;;  %165 = vst.msk [vmem:[#allocation2 + $0x4c0] sm:$0xff] %vm11_vm0, %v7095_v19 }
  0x95   :  { %166 = vst.msk [vmem:[#allocation2 + $0x4c8] sm:$0x3] %vm13_vm1, %v7095_v19 }
  0x96   :  { %v474_v41 = vpop.f32.mrf.mxu0  ;;  %167 = vst.msk [vmem:[#allocation2 + $0x4d0] sm:$0xff] %vm11_vm0, %v7095_v19 }
  0x97   :  { %168 = vst.msk [vmem:[#allocation2 + $0x4d8] sm:$0x3] %vm13_vm1, %v7095_v19  ;;  %v475_v49 = vadd.f32 %v7271_v32, %v474_v41  ;;  %v218_v41 = vld [vmem:[%s12062_s0 + $0xe8] sm:$0xff] }
  0x98   :  { %169 = vst.msk [vmem:[#allocation2 + $0x4e0] sm:$0xff] %vm11_vm0, %v7095_v19 }
  0x99   :  { %6628 = vmatmul.msk.f32.gmra.mxu0 %vm11_vm0, %v207_v42  ;;  %170 = vst.msk [vmem:[#allocation2 + $0x4e8] sm:$0x3] %vm13_vm1, %v7095_v19  ;;  %v662_v55 = vmax.f32 %v475_v49, 0.0 }
  0x9a   :  { %173 = vst [vmem:[#allocation3] sm:$0x3f] %v7095_v19 }
  0x9b   :  { %174 = vst [vmem:[#allocation3 + $0x8] sm:$0x3f] %v7095_v19 }
  0x9c   :  { %175 = vst [vmem:[#allocation3 + $0x10] sm:$0x3f] %v7095_v19 }
  0x9d   :  { %176 = vst [vmem:[#allocation3 + $0x18] sm:$0x3f] %v7095_v19 }
  0x9e   :  { %v477_v43 = vpop.f32.mrf.mxu0  ;;  %177 = vst [vmem:[#allocation3 + $0x20] sm:$0x3f] %v7095_v19 }
  0x9f   :  { %178 = vst [vmem:[#allocation3 + $0x28] sm:$0x3f] %v7095_v19  ;;  %v478_v50 = vadd.f32 %v7271_v32, %v477_v43 }
  0xa0   :  { %179 = vst [vmem:[#allocation3 + $0x30] sm:$0x3f] %v7095_v19 }
  0xa1   :  { %6629 = vmatmul.msk.f32.gmra.mxu0 %vm11_vm0, %v208_v44  ;;  %180 = vst [vmem:[#allocation3 + $0x38] sm:$0x3f] %v7095_v19  ;;  %v663_v56 = vmax.f32 %v478_v50, 0.0 }
  0xa2   :  { %181 = vst [vmem:[#allocation3 + $0x40] sm:$0x3f] %v7095_v19 }
  0xa3   :  { %182 = vst [vmem:[#allocation3 + $0x48] sm:$0x3f] %v7095_v19 }
  0xa4   :  { %183 = vst [vmem:[#allocation3 + $0x50] sm:$0x3f] %v7095_v19 }
  0xa5   :  { %184 = vst [vmem:[#allocation3 + $0x58] sm:$0x3f] %v7095_v19 }
  0xa6   :  { %v480_v45 = vpop.f32.mrf.mxu0  ;;  %185 = vst [vmem:[#allocation3 + $0x60] sm:$0x3f] %v7095_v19 }
  0xa7   :  { %v481_v51 = vadd.f32 %v7271_v32, %v480_v45  ;;  %186 = vst [vmem:[#allocation3 + $0x68] sm:$0x3f] %v7095_v19 }
  0xa8   :  { %187 = vst [vmem:[#allocation3 + $0x70] sm:$0x3f] %v7095_v19 }
  0xa9   :  { %6630 = vmatmul.msk.f32.gmra.mxu0 %vm11_vm0, %v209_v46  ;;  %188 = vst [vmem:[#allocation3 + $0x78] sm:$0x3f] %v7095_v19  ;;  %v664_v57 = vmax.f32 %v481_v51, 0.0 }
  0xaa   :  { %726 = vst.msk [vmem:[#allocation2 + $0x21] sm:$0xff] %vm11_vm0, %v661_v53  ;;  %v220_v53 = vld [vmem:[%s12062_s0 + $0xf8] sm:$0xff] }
  0xab   :  { %727 = vst.msk [vmem:[#allocation2 + $0x31] sm:$0xff] %vm11_vm0, %v662_v55 }
  0xac   :  { %728 = vst.msk [vmem:[#allocation2 + $0x41] sm:$0xff] %vm11_vm0, %v663_v56  ;;  %v832_v56 = vld [vmem:[%s12061_s1 + $0x60] sm:$0xff] }
  0xad   :  { %729 = vst.msk [vmem:[#allocation2 + $0x51] sm:$0xff] %vm11_vm0, %v664_v57  ;;  %v1376_v57 = vld [vmem:[%s12061_s1 + $0xc0] sm:$0xff]  ;;  %893 = vmatpush.msra.mxu1 %v832_v56 }
  0xae   :  { %v483_v48 = vpop.f32.mrf.mxu0  ;;  %1437 = vmatpush.msrb.mxu2 %v1376_v57 }
  0xaf   :  { %v484_v54 = vadd.f32 %v7271_v32, %v483_v48 }
  0xb1   :  { %6631 = vmatmul.msk.f32.gmra.mxu0 %vm11_vm0, %v210_v52  ;;  %v665_v58 = vmax.f32 %v484_v54, 0.0  ;;  %v794_v63 = vld [vmem:[#allocation2 + $0x20] sm:$0xff] }
  0xb2   :  { %v1061_v0 = vld [vmem:[#allocation2 + $0x21] sm:$0xff]  ;;  %6692 = vmatmul.msk.f32.gmra.mxu2 %vm11_vm0, %v794_v63  ;;  %v795_v5 = vld [vmem:[#allocation2 + $0x30] sm:$0xff] }
  0xb3   :  { %730 = vst.msk [vmem:[#allocation2 + $0x61] sm:$0xff] %vm11_vm0, %v665_v58  ;;  %6708 = vmatmul.msk.f32.gmra.mxu3 %vm11_vm0, %v1061_v0  ;;  %v1062_v6 = vld [vmem:[#allocation2 + $0x31] sm:$0xff]  ;;  %v796_v11 = vld [vmem:[#allocation2 + $0x40] sm:$0xff]  ;;  %v830_v0 = vld [vmem:[%s12061_s1 + $0x50] sm:$0xff] }
  0xb4   :  { %v1063_v12 = vld [vmem:[#allocation2 + $0x41] sm:$0xff]  ;;  %v797_v17 = vld [vmem:[#allocation2 + $0x50] sm:$0xff] }
  0xb5   :  { %v1064_v18 = vld [vmem:[#allocation2 + $0x51] sm:$0xff] }
  0xb6   :  { %v486_v59 = vpop.f32.mrf.mxu0  ;;  %v1375_v63 = vld [vmem:[%s12061_s1 + $0xb8] sm:$0xff] }
  0xb7   :  { %v487_v60 = vadd.f32 %v7271_v32, %v486_v59  ;;  %v657_v59 = vpop.f32.mrf.mxu3  ;;  %1438 = vmatpush.msrb.mxu2 %v1375_v63  ;;  %v1360_v57 = vld [vmem:[#allocation2 + $0x32] sm:$0xff] }
  0xb9   :  { %v666_v61 = vmax.f32 %v487_v60, 0.0  ;;  %6632 = vmatmul.msk.f32.gmra.mxu0 %vm11_vm0, %v211_v62  ;;  %v831_v60 = vld [vmem:[%s12061_s1 + $0x58] sm:$0xff]  ;;  %v658_v62 = vadd.f32 %v7271_v32, %v657_v59 }
  0xba   :  { %6693 = vmatmul.msk.f32.gmra.mxu2 %vm11_vm0, %v795_v5  ;;  %v798_v23 = vld [vmem:[#allocation2 + $0x60] sm:$0xff]  ;;  %894 = vmatpush.msra.mxu1 %v831_v60 }
  0xbb   :  { %731 = vst.msk [vmem:[#allocation2 + $0x71] sm:$0xff] %vm11_vm0, %v666_v61  ;;  %6709 = vmatmul.msk.f32.gmra.mxu3 %vm11_vm0, %v1062_v6  ;;  %v1065_v24 = vld [vmem:[#allocation2 + $0x61] sm:$0xff] }
  0xbc   :  { %v829_v5 = vld [vmem:[%s12061_s1 + $0x48] sm:$0xff]  ;;  %895 = vmatpush.msra.mxu1 %v830_v0 }
  0xbd   :  { %v1373_v6 = vld [vmem:[%s12061_s1 + $0xa8] sm:$0xff] }
  0xbe   :  { %v489_v1 = vpop.f32.mrf.mxu0  ;;  %896 = vmatpush.msra.mxu1 %v829_v5  ;;  %v821_v0 = vld [vmem:[#allocation2 + $0x1e0] sm:$0xff] }
  0xbf   :  { %v490_v2 = vadd.f32 %v7271_v32, %v489_v1  ;;  %v1374_v1 = vld [vmem:[%s12061_s1 + $0xb0] sm:$0xff] }
  0xc0   :  { %1439 = vmatpush.msrb.mxu2 %v1374_v1  ;;  %v1361_v1 = vld [vmem:[#allocation2 + $0x42] sm:$0xff] }
  0xc1   :  { %v667_v3 = vmax.f32 %v490_v2, 0.0  ;;  %6633 = vmatmul.msk.f32.gmra.mxu0 %vm11_vm0, %v212_v4  ;;  %v221_v4 = vld [vmem:[%s12062_s0 + $0x100] sm:$0xff] }
  0xc2   :  { %6694 = vmatmul.msk.f32.gmra.mxu2 %vm11_vm0, %v796_v11  ;;  %v799_v29 = vld [vmem:[#allocation2 + $0x70] sm:$0xff]  ;;  %v222_v11 = vld [vmem:[%s12062_s0 + $0x108] sm:$0xff] }
  0xc3   :  { %732 = vst.msk [vmem:[#allocation2 + $0x81] sm:$0xff] %vm11_vm0, %v667_v3  ;;  %6710 = vmatmul.msk.f32.gmra.mxu3 %vm11_vm0, %v1063_v12  ;;  %v1066_v30 = vld [vmem:[#allocation2 + $0x71] sm:$0xff]  ;;  %v723_v3 = vmax.f32 %v658_v62, 0.0  ;;  %1440 = vmatpush.msrb.mxu2 %v1373_v6 }
  0xc5   :  { %791 = vst.msk [vmem:[#allocation2 + $0x4e1] sm:$0xff] %vm11_vm0, %v723_v3 }
  0xc6   :  { %v492_v7 = vpop.f32.mrf.mxu0 }
  0xc7   :  { %v493_v8 = vadd.f32 %v7271_v32, %v492_v7 }
  0xc9   :  { %v668_v9 = vmax.f32 %v493_v8, 0.0  ;;  %6634 = vmatmul.msk.f32.gmra.mxu0 %vm11_vm0, %v213_v10 }
  0xca   :  { %6695 = vmatmul.msk.f32.gmra.mxu2 %vm11_vm0, %v797_v17 }
  0xcb   :  { %733 = vst.msk [vmem:[#allocation2 + $0xb1] sm:$0xff] %vm11_vm0, %v668_v9  ;;  %6711 = vmatmul.msk.f32.gmra.mxu3 %vm11_vm0, %v1064_v18  ;;  %v813_v9 = vld [vmem:[#allocation2 + $0x140] sm:$0xff]  ;;  %v223_v18 = vld [vmem:[%s12062_s0 + $0x110] sm:$0xff] }
  0xcc   :  { %6674 = vmatmul.msk.f32.vlgmr.msra.gmra.mxu1 %vm11_vm0, %v813_v9 }
  0xce   :  { %v495_v13 = vpop.f32.mrf.mxu0 }
  0xcf   :  { %v496_v14 = vadd.f32 %v7271_v32, %v495_v13 }
  0xd1   :  { %v669_v15 = vmax.f32 %v496_v14, 0.0  ;;  %6635 = vmatmul.msk.f32.gmra.mxu0 %vm11_vm0, %v214_v16 }
  0xd2   :  { %6696 = vmatmul.msk.f32.gmra.mxu2 %vm11_vm0, %v798_v23  ;;  %v801_v42 = vld [vmem:[#allocation2 + $0xb0] sm:$0xff] }
  0xd3   :  { %734 = vst.msk [vmem:[#allocation2 + $0xc1] sm:$0xff] %vm11_vm0, %v669_v15  ;;  %6712 = vmatmul.msk.f32.gmra.mxu3 %vm11_vm0, %v1065_v24  ;;  %v1068_v43 = vld [vmem:[#allocation2 + $0xb1] sm:$0xff] }
  0xd6   :  { %v498_v19 = vpop.f32.mrf.mxu0 }
  0xd7   :  { %v499_v20 = vadd.f32 %v7271_v32, %v498_v19 }
  0xd9   :  { %v670_v21 = vmax.f32 %v499_v20, 0.0  ;;  %6636 = vmatmul.msk.f32.gmra.mxu0 %vm11_vm0, %v215_v22 }
  0xda   :  { %6697 = vmatmul.msk.f32.gmra.mxu2 %vm11_vm0, %v799_v29  ;;  %v802_v48 = vld [vmem:[#allocation2 + $0xc0] sm:$0xff] }
  0xdb   :  { %735 = vst.msk [vmem:[#allocation2 + $0xd1] sm:$0xff] %vm11_vm0, %v670_v21  ;;  %6713 = vmatmul.msk.f32.gmra.mxu3 %vm11_vm0, %v1066_v30  ;;  %v1069_v49 = vld [vmem:[#allocation2 + $0xc1] sm:$0xff] }
  0xde   :  { %v501_v25 = vpop.f32.mrf.mxu0 }
  0xdf   :  { %v502_v26 = vadd.f32 %v7271_v32, %v501_v25  ;;  %v224_v25 = vld [vmem:[%s12062_s0 + $0x118] sm:$0xff] }
  0xe1   :  { %v671_v27 = vmax.f32 %v502_v26, 0.0  ;;  %6637 = vmatmul.msk.f32.gmra.mxu0 %vm11_vm0, %v216_v28  ;;  %v2570_v26 = vld [vmem:[%s12061_s1 + $0x1c0] sm:$0xff] }
  0xe2   :  { %6698 = vmatmul.msk.f32.gmra.mxu2 %vm11_vm0, %v800_v36  ;;  %v803_v54 = vld [vmem:[#allocation2 + $0xd0] sm:$0xff]  ;;  %2631 = vmatpush.msrb.mxu0 %v2570_v26  ;;  %v1357_v36 = vld [vmem:[#allocation2 + $0x2] sm:$0xff] }
  0xe3   :  { %736 = vst.msk [vmem:[#allocation2 + $0xe1] sm:$0xff] %vm11_vm0, %v671_v27  ;;  %6714 = vmatmul.msk.f32.gmra.mxu3 %vm11_vm0, %v1067_v37  ;;  %v1070_v55 = vld [vmem:[#allocation2 + $0xd1] sm:$0xff] }
  0xe6   :  { %v504_v31 = vpop.f32.mrf.mxu0 }
  0xe7   :  { %v505_v33 = vadd.f32 %v7271_v32, %v504_v31 }
  0xe9   :  { %v672_v34 = vmax.f32 %v505_v33, 0.0  ;;  %6638 = vmatmul.msk.f32.gmra.mxu0 %vm11_vm0, %v217_v35 }
  0xea   :  { %6699 = vmatmul.msk.f32.gmra.mxu2 %vm11_vm0, %v801_v42  ;;  %v804_v7 = vld [vmem:[#allocation2 + $0xe0] sm:$0xff] }
  0xeb   :  { %737 = vst.msk [vmem:[#allocation2 + $0xf1] sm:$0xff] %vm11_vm0, %v672_v34  ;;  %6715 = vmatmul.msk.f32.gmra.mxu3 %vm11_vm0, %v1068_v43  ;;  %v1071_v8 = vld [vmem:[#allocation2 + $0xe1] sm:$0xff]  ;;  %v225_v34 = vld [vmem:[%s12062_s0 + $0x120] sm:$0xff] }
  0xee   :  { %v507_v38 = vpop.f32.mrf.mxu0 }
  0xef   :  { %v508_v39 = vadd.f32 %v7271_v32, %v507_v38  ;;  %v7731_v38 = vpop.f32.mrf.mxu2 }
  0xf1   :  { %v673_v40 = vmax.f32 %v508_v39, 0.0  ;;  %6639 = vmatmul.msk.f32.gmra.mxu0 %vm11_vm0, %v218_v41  ;;  %v226_v41 = vld [vmem:[%s12062_s0 + $0x128] sm:$0xff] }
  0xf2   :  { %6700 = vmatmul.msk.f32.gmra.mxu2 %vm11_vm0, %v802_v48  ;;  %v805_v13 = vld [vmem:[#allocation2 + $0xf0] sm:$0xff]  ;;  %v227_v48 = vld [vmem:[%s12062_s0 + $0x130] sm:$0xff] }
  0xf3   :  { %738 = vst.msk [vmem:[#allocation2 + $0x101] sm:$0xff] %vm11_vm0, %v673_v40  ;;  %6716 = vmatmul.msk.f32.gmra.mxu3 %vm11_vm0, %v1069_v49  ;;  %v1072_v14 = vld [vmem:[#allocation2 + $0xf1] sm:$0xff] }
  0xf6   :  { %v510_v44 = vpop.f32.mrf.mxu0 }
  0xf7   :  { %v511_v45 = vadd.f32 %v7271_v32, %v510_v44  ;;  %v1358_v44 = vld [vmem:[#allocation2 + $0x12] sm:$0xff] }
  0xf9   :  { %v674_v46 = vmax.f32 %v511_v45, 0.0  ;;  %6640 = vmatmul.msk.f32.gmra.mxu0 %vm11_vm0, %v219_v47 }
  0xfa   :  { %6701 = vmatmul.msk.f32.gmra.mxu2 %vm11_vm0, %v803_v54  ;;  %v806_v20 = vld [vmem:[#allocation2 + $0x100] sm:$0xff]  ;;  %v228_v54 = vld [vmem:[%s12062_s0 + $0x138] sm:$0xff] }
  0xfb   :  { %739 = vst.msk [vmem:[#allocation2 + $0x111] sm:$0xff] %vm11_vm0, %v674_v46  ;;  %6717 = vmatmul.msk.f32.gmra.mxu3 %vm11_vm0, %v1070_v55  ;;  %v1073_v21 = vld [vmem:[#allocation2 + $0x101] sm:$0xff] }
  0xfe   :  { %v513_v50 = vpop.f32.mrf.mxu0 }
  0xff   :  { %v514_v51 = vadd.f32 %v7271_v32, %v513_v50 }
 0x101   :  { %v675_v52 = vmax.f32 %v514_v51, 0.0  ;;  %6641 = vmatmul.msk.f32.gmra.mxu0 %vm11_vm0, %v220_v53  ;;  %v1359_v51 = vld [vmem:[#allocation2 + $0x22] sm:$0xff] }
 0x102   :  { %6702 = vmatmul.msk.f32.gmra.mxu2 %vm11_vm0, %v804_v7  ;;  %v807_v28 = vld [vmem:[#allocation2 + $0x110] sm:$0xff] }
 0x103   :  { %740 = vst.msk [vmem:[#allocation2 + $0x121] sm:$0xff] %vm11_vm0, %v675_v52  ;;  %6718 = vmatmul.msk.f32.gmra.mxu3 %vm11_vm0, %v1071_v8  ;;  %v1074_v29 = vld [vmem:[#allocation2 + $0x111] sm:$0xff] }
 0x104   :  { %v1362_v7 = vld [vmem:[#allocation2 + $0x52] sm:$0xff] }
 0x106   :  { %v516_v58 = vpop.f32.mrf.mxu0 }
 0x107   :  { %v517_v61 = vadd.f32 %v7271_v32, %v516_v58 }
 0x109   :  { %v676_v2 = vmax.f32 %v517_v61, 0.0  ;;  %6642 = vmatmul.msk.f32.gmra.mxu0 %vm11_vm0, %v221_v4  ;;  %v229_v61 = vld [vmem:[%s12062_s0 + $0x140] sm:$0xff]  ;;  %v230_v4 = vld [vmem:[%s12062_s0 + $0x148] sm:$0xff] }
 0x10a   :  { %6703 = vmatmul.msk.f32.gmra.mxu2 %vm11_vm0, %v805_v13 }
 0x10b   :  { %742 = vst.msk [vmem:[#allocation2 + $0x151] sm:$0xff] %vm11_vm0, %v676_v2  ;;  %6719 = vmatmul.msk.f32.gmra.mxu3 %vm11_vm0, %v1072_v14  ;;  %v1363_v14 = vld [vmem:[#allocation2 + $0x62] sm:$0xff] }
 0x10e   :  { %v519_v10 = vpop.f32.mrf.mxu0 }
 0x10f   :  { %v520_v12 = vadd.f32 %v7271_v32, %v519_v10 }
 0x111   :  { %v677_v15 = vmax.f32 %v520_v12, 0.0  ;;  %6643 = vmatmul.msk.f32.gmra.mxu0 %vm11_vm0, %v222_v11  ;;  %v231_v11 = vld [vmem:[%s12062_s0 + $0x150] sm:$0xff] }
 0x112   :  { %v814_v16 = vld [vmem:[#allocation2 + $0x150] sm:$0xff]  ;;  %6704 = vmatmul.msk.f32.gmra.mxu2 %vm11_vm0, %v806_v20 }
 0x113   :  { %743 = vst.msk [vmem:[#allocation2 + $0x161] sm:$0xff] %vm11_vm0, %v677_v15  ;;  %6675 = vmatmul.msk.f32.gmra.mxu1 %vm11_vm0, %v814_v16  ;;  %6720 = vmatmul.msk.f32.gmra.mxu3 %vm11_vm0, %v1073_v21  ;;  %v1364_v21 = vld [vmem:[#allocation2 + $0x72] sm:$0xff] }
 0x116   :  { %v522_v17 = vpop.f32.mrf.mxu0  ;;  %v7743_v46 = vpop.f32.mrf.mxu2 }
 0x117   :  { %v523_v19 = vadd.f32 %v7271_v32, %v522_v17 }
 0x119   :  { %v678_v22 = vmax.f32 %v523_v19, 0.0  ;;  %6644 = vmatmul.msk.f32.gmra.mxu0 %vm11_vm0, %v223_v18  ;;  %v232_v18 = vld [vmem:[%s12062_s0 + $0x158] sm:$0xff] }
 0x11a   :  { %v815_v23 = vld [vmem:[#allocation2 + $0x160] sm:$0xff]  ;;  %6705 = vmatmul.msk.f32.gmra.mxu2 %vm11_vm0, %v807_v28 }
 0x11b   :  { %744 = vst.msk [vmem:[#allocation2 + $0x171] sm:$0xff] %vm11_vm0, %v678_v22  ;;  %6676 = vmatmul.msk.f32.gmra.mxu1 %vm11_vm0, %v815_v23  ;;  %6721 = vmatmul.msk.f32.gmra.mxu3 %vm11_vm0, %v1074_v29 }
 0x11e   :  { %v525_v24 = vpop.f32.mrf.mxu0 }
 0x11f   :  { %v526_v27 = vadd.f32 %v7271_v32, %v525_v24 }
 0x121   :  { %v679_v30 = vmax.f32 %v526_v27, 0.0  ;;  %6645 = vmatmul.msk.f32.gmra.mxu0 %vm11_vm0, %v224_v25  ;;  %v233_v25 = vld [vmem:[%s12062_s0 + $0x160] sm:$0xff]  ;;  %v1365_v27 = vld [vmem:[#allocation2 + $0xa2] sm:$0xff] }
 0x122   :  { %v816_v31 = vld [vmem:[#allocation2 + $0x170] sm:$0xff]  ;;  %6738 = vmatmul.msk.f32.vlgmr.msrb.gmra.mxu2 %vm11_vm0, %v1357_v36  ;;  %v7820_v36 = vpop.f32.mrf.mxu3 }
 0x123   :  { %745 = vst.msk [vmem:[#allocation2 + $0x181] sm:$0xff] %vm11_vm0, %v679_v30  ;;  %6677 = vmatmul.msk.f32.gmra.mxu1 %vm11_vm0, %v816_v31 }
 0x126   :  { %v528_v33 = vpop.f32.mrf.mxu0 }
 0x127   :  { %v529_v35 = vadd.f32 %v7271_v32, %v528_v33  ;;  %v234_v33 = vld [vmem:[%s12062_s0 + $0x168] sm:$0xff] }
 0x129   :  { %v680_v37 = vmax.f32 %v529_v35, 0.0  ;;  %6646 = vmatmul.msk.f32.gmra.mxu0 %vm11_vm0, %v225_v34 }
 0x12a   :  { %v817_v39 = vld [vmem:[#allocation2 + $0x180] sm:$0xff]  ;;  %6739 = vmatmul.msk.f32.gmra.mxu2 %vm11_vm0, %v1358_v44 }
 0x12b   :  { %746 = vst.msk [vmem:[#allocation2 + $0x191] sm:$0xff] %vm11_vm0, %v680_v37  ;;  %6678 = vmatmul.msk.f32.gmra.mxu1 %vm11_vm0, %v817_v39  ;;  %v1366_v37 = vld [vmem:[#allocation2 + $0xb2] sm:$0xff] }
 0x12e   :  { %v531_v40 = vpop.f32.mrf.mxu0 }
 0x12f   :  { %v532_v42 = vadd.f32 %v7271_v32, %v531_v40 }
 0x131   :  { %v681_v43 = vmax.f32 %v532_v42, 0.0  ;;  %6647 = vmatmul.msk.f32.gmra.mxu0 %vm11_vm0, %v226_v41  ;;  %v235_v42 = vld [vmem:[%s12062_s0 + $0x170] sm:$0xff] }
 0x132   :  { %v818_v45 = vld [vmem:[#allocation2 + $0x190] sm:$0xff]  ;;  %6740 = vmatmul.msk.f32.gmra.mxu2 %vm11_vm0, %v1359_v51 }
 0x133   :  { %747 = vst.msk [vmem:[#allocation2 + $0x1a1] sm:$0xff] %vm11_vm0, %v681_v43  ;;  %6679 = vmatmul.msk.f32.gmra.mxu1 %vm11_vm0, %v818_v45  ;;  %v1367_v45 = vld [vmem:[#allocation2 + $0xc2] sm:$0xff]  ;;  %v236_v51 = vld [vmem:[%s12062_s0 + $0x178] sm:$0xff] }
 0x135   :  { %v7754_v53 = vpop.f32.mrf.mxu2 }
 0x136   :  { %v534_v47 = vpop.f32.mrf.mxu0 }
 0x137   :  { %v535_v49 = vadd.f32 %v7271_v32, %v534_v47 }
 0x139   :  { %v682_v50 = vmax.f32 %v535_v49, 0.0  ;;  %6648 = vmatmul.msk.f32.gmra.mxu0 %vm11_vm0, %v227_v48  ;;  %v7833_v48 = vpop.f32.mrf.mxu3 }
 0x13a   :  { %v819_v52 = vld [vmem:[#allocation2 + $0x1a0] sm:$0xff]  ;;  %6741 = vmatmul.msk.f32.gmra.mxu2 %vm11_vm0, %v1360_v57 }
 0x13b   :  { %748 = vst.msk [vmem:[#allocation2 + $0x1b1] sm:$0xff] %vm11_vm0, %v682_v50  ;;  %6680 = vmatmul.msk.f32.gmra.mxu1 %vm11_vm0, %v819_v52  ;;  %v1526_v52 = vld [vmem:[%s12061_s1 + $0xe0] sm:$0xff] }
 0x13c   :  { %1587 = vmatpush.msra.mxu3 %v1526_v52  ;;  %v240_v52 = vld [vmem:[%s12062_s0 + $0x198] sm:$0xff] }
 0x13d   :  { %v7764_v60 = vpop.f32.mrf.mxu2 }
 0x13e   :  { %v537_v55 = vpop.f32.mrf.mxu0 }
 0x13f   :  { %v538_v56 = vadd.f32 %v7271_v32, %v537_v55 }
 0x141   :  { %6649 = vmatmul.msk.f32.gmra.mxu0 %vm11_vm0, %v228_v54  ;;  %v683_v58 = vmax.f32 %v538_v56, 0.0  ;;  %v1368_v56 = vld [vmem:[#allocation2 + $0xd2] sm:$0xff] }
 0x142   :  { %v820_v59 = vld [vmem:[#allocation2 + $0x1b0] sm:$0xff]  ;;  %6742 = vmatmul.msk.f32.gmra.mxu2 %vm11_vm0, %v1361_v1  ;;  %v1524_v1 = vld [vmem:[%s12061_s1 + $0xd0] sm:$0xff] }
 0x143   :  { %749 = vst.msk [vmem:[#allocation2 + $0x1c1] sm:$0xff] %vm11_vm0, %v683_v58  ;;  %6681 = vmatmul.msk.f32.gmra.mxu1 %vm11_vm0, %v820_v59  ;;  %v1227_v59 = vld [vmem:[%s12061_s1 + $0xa0] sm:$0xff] }
 0x144   :  { %1288 = vmatpush.msrb.mxu1 %v1227_v59  ;;  %v1211_v59 = vld [vmem:[#allocation2 + $0x171] sm:$0xff] }
 0x145   :  { %v7774_v3 = vpop.f32.mrf.mxu2 }
 0x146   :  { %v540_v62 = vpop.f32.mrf.mxu0 }
 0x147   :  { %v541_v63 = vadd.f32 %v7271_v32, %v540_v62  ;;  %v1825_v62 = vld [vmem:[%s12061_s1 + $0x120] sm:$0xff] }
 0x148   :  { %1886 = vmatpush.msra.mxu2 %v1825_v62 }
 0x149   :  { %6650 = vmatmul.msk.f32.gmra.mxu0 %vm11_vm0, %v229_v61  ;;  %v684_v2 = vmax.f32 %v541_v63, 0.0  ;;  %v1525_v61 = vld [vmem:[%s12061_s1 + $0xd8] sm:$0xff]  ;;  %v7860_v63 = vpop.f32.mrf.mxu3 }
 0x14a   :  { %6743 = vmatmul.msk.f32.gmra.mxu2 %vm11_vm0, %v1362_v7  ;;  %1588 = vmatpush.msra.mxu3 %v1525_v61  ;;  %v1823_v7 = vld [vmem:[%s12061_s1 + $0x110] sm:$0xff] }
 0x14b   :  { %750 = vst.msk [vmem:[#allocation2 + $0x1f1] sm:$0xff] %vm11_vm0, %v684_v2  ;;  %6682 = vmatmul.msk.f32.gmra.mxu1 %vm11_vm0, %v821_v0  ;;  %v1226_v0 = vld [vmem:[%s12061_s1 + $0x98] sm:$0xff] }
 0x14c   :  { %v1824_v2 = vld [vmem:[%s12061_s1 + $0x118] sm:$0xff]  ;;  %1589 = vmatpush.msra.mxu3 %v1524_v1  ;;  %1289 = vmatpush.msrb.mxu1 %v1226_v0  ;;  %v241_v1 = vld [vmem:[%s12062_s0 + $0x1a0] sm:$0xff] }
 0x14d   :  { %v7784_v10 = vpop.f32.mrf.mxu2  ;;  %1887 = vmatpush.msra.mxu2 %v1824_v2  ;;  %v1806_v2 = vld [vmem:[#allocation2 + $0x281] sm:$0xff] }
 0x14e   :  { %v543_v5 = vpop.f32.mrf.mxu0 }
 0x14f   :  { %v544_v6 = vadd.f32 %v7271_v32, %v543_v5  ;;  %v1225_v5 = vld [vmem:[%s12061_s1 + $0x90] sm:$0xff]  ;;  %1888 = vmatpush.msra.mxu2 %v1823_v7 }
 0x150   :  { %1290 = vmatpush.msrb.mxu1 %v1225_v5 }
 0x151   :  { %6651 = vmatmul.msk.f32.gmra.mxu0 %vm11_vm0, %v230_v4  ;;  %v685_v8 = vmax.f32 %v544_v6, 0.0  ;;  %v1523_v6 = vld [vmem:[%s12061_s1 + $0xc8] sm:$0xff] }
 0x152   :  { %v822_v9 = vld [vmem:[#allocation2 + $0x1f0] sm:$0xff]  ;;  %6744 = vmatmul.msk.f32.gmra.mxu2 %vm11_vm0, %v1363_v14  ;;  %1590 = vmatpush.msra.mxu3 %v1523_v6  ;;  %v7889_v14 = vpop.f32.mrf.mxu1 }
 0x153   :  { %751 = vst.msk [vmem:[#allocation2 + $0x201] sm:$0xff] %vm11_vm0, %v685_v8  ;;  %6683 = vmatmul.msk.f32.gmra.mxu1 %vm11_vm0, %v822_v9  ;;  %v237_v9 = vld [vmem:[%s12062_s0 + $0x180] sm:$0xff] }
 0x155   :  { %v7794_v17 = vpop.f32.mrf.mxu2 }
 0x156   :  { %v546_v12 = vpop.f32.mrf.mxu0 }
 0x157   :  { %v547_v13 = vadd.f32 %v7271_v32, %v546_v12 }
 0x159   :  { %6652 = vmatmul.msk.f32.gmra.mxu0 %vm11_vm0, %v231_v11  ;;  %v686_v15 = vmax.f32 %v547_v13, 0.0  ;;  %v1507_v11 = vld [vmem:[#allocation2 + $0x280] sm:$0xff] }
 0x15a   :  { %v823_v16 = vld [vmem:[#allocation2 + $0x200] sm:$0xff]  ;;  %6745 = vmatmul.msk.f32.gmra.mxu2 %vm11_vm0, %v1364_v21  ;;  %6754 = vmatmul.msk.f32.vlgmr.msra.gmra.mxu3 %vm11_vm0, %v1507_v11 }
 0x15b   :  { %752 = vst.msk [vmem:[#allocation2 + $0x211] sm:$0xff] %vm11_vm0, %v686_v15  ;;  %6684 = vmatmul.msk.f32.gmra.mxu1 %vm11_vm0, %v823_v16  ;;  %v1224_v13 = vld [vmem:[%s12061_s1 + $0x88] sm:$0xff] }
 0x15c   :  { %v1822_v15 = vld [vmem:[%s12061_s1 + $0x108] sm:$0xff]  ;;  %1291 = vmatpush.msrb.mxu1 %v1224_v13 }
 0x15d   :  { %v7804_v24 = vpop.f32.mrf.mxu2  ;;  %v1208_v16 = vld [vmem:[#allocation2 + $0x141] sm:$0xff]  ;;  %1889 = vmatpush.msra.mxu2 %v1822_v15 }
 0x15e   :  { %v549_v19 = vpop.f32.mrf.mxu0  ;;  %12083 = vst [vmem:[#allocation5_spill] sm:$0xff] %v7804_v24  ;;  %v242_v15 = vld [vmem:[%s12062_s0 + $0x1a8] sm:$0xff] }
 0x15f   :  { %v550_v20 = vadd.f32 %v7271_v32, %v549_v19 }
 0x161   :  { %6653 = vmatmul.msk.f32.gmra.mxu0 %vm11_vm0, %v232_v18  ;;  %v687_v22 = vmax.f32 %v550_v20, 0.0  ;;  %v1369_v18 = vld [vmem:[#allocation2 + $0xe2] sm:$0xff]  ;;  %v7901_v20 = vpop.f32.mrf.mxu3 }
 0x162   :  { %v824_v23 = vld [vmem:[#allocation2 + $0x210] sm:$0xff]  ;;  %6746 = vmatmul.msk.f32.gmra.mxu2 %vm11_vm0, %v1365_v27 }
 0x163   :  { %753 = vst.msk [vmem:[#allocation2 + $0x221] sm:$0xff] %vm11_vm0, %v687_v22  ;;  %6685 = vmatmul.msk.f32.gmra.mxu1 %vm11_vm0, %v824_v23  ;;  %v238_v22 = vld [vmem:[%s12062_s0 + $0x188] sm:$0xff]  ;;  %v7909_v23 = vld [vmem:[%s12061_s1 + $0x20] ss:$0 sm:$0xff] }
 0x164   :  { %v1370_v27 = vld [vmem:[#allocation2 + $0xf2] sm:$0xff] }
 0x165   :  { %v7814_v31 = vpop.f32.mrf.mxu2 }
 0x166   :  { %v552_v26 = vpop.f32.mrf.mxu0  ;;  %12084 = vst [vmem:[#allocation6_spill] sm:$0xff] %v7814_v31 }
 0x167   :  { %v553_v28 = vadd.f32 %v7271_v32, %v552_v26 }
 0x169   :  { %6654 = vmatmul.msk.f32.gmra.mxu0 %vm11_vm0, %v233_v25  ;;  %v688_v29 = vmax.f32 %v553_v28, 0.0 }
 0x16a   :  { %v825_v30 = vld [vmem:[#allocation2 + $0x220] sm:$0xff]  ;;  %6747 = vmatmul.msk.f32.gmra.mxu2 %vm11_vm0, %v1366_v37 }
 0x16b   :  { %754 = vst.msk [vmem:[#allocation2 + $0x231] sm:$0xff] %vm11_vm0, %v688_v29  ;;  %6686 = vmatmul.msk.f32.gmra.mxu1 %vm11_vm0, %v825_v30  ;;  %v1209_v29 = vld [vmem:[#allocation2 + $0x151] sm:$0xff] }
 0x16d   :  { %v7826_v41 = vpop.f32.mrf.mxu2 }
 0x16e   :  { %v555_v34 = vpop.f32.mrf.mxu0  ;;  %12085 = vst [vmem:[#allocation7_spill] sm:$0xff] %v7826_v41 }
 0x16f   :  { %v556_v35 = vadd.f32 %v7271_v32, %v555_v34 }
 0x171   :  { %6655 = vmatmul.msk.f32.gmra.mxu0 %vm11_vm0, %v234_v33  ;;  %v689_v39 = vmax.f32 %v556_v35, 0.0  ;;  %v239_v35 = vld [vmem:[%s12062_s0 + $0x190] sm:$0xff] }
 0x172   :  { %v826_v40 = vld [vmem:[#allocation2 + $0x230] sm:$0xff]  ;;  %6748 = vmatmul.msk.f32.gmra.mxu2 %vm11_vm0, %v1367_v45 }
 0x173   :  { %755 = vst.msk [vmem:[#allocation2 + $0x241] sm:$0xff] %vm11_vm0, %v689_v39  ;;  %6687 = vmatmul.msk.f32.gmra.mxu1 %vm11_vm0, %v826_v40  ;;  %v7925_v39 = vpop.f32.mrf.mxu3 }
 0x175   :  { %v7838_v50 = vpop.f32.mrf.mxu2 }
 0x176   :  { %v558_v43 = vpop.f32.mrf.mxu0  ;;  %12086 = vst [vmem:[#allocation8_spill] sm:$0xff] %v7838_v50 }
 0x177   :  { %v559_v44 = vadd.f32 %v7271_v32, %v558_v43 }
 0x179   :  { %6656 = vmatmul.msk.f32.gmra.mxu0 %vm11_vm0, %v235_v42  ;;  %v690_v47 = vmax.f32 %v559_v44, 0.0  ;;  %v1371_v42 = vld [vmem:[#allocation2 + $0x102] sm:$0xff] }
 0x17a   :  { %v827_v49 = vld [vmem:[#allocation2 + $0x240] sm:$0xff]  ;;  %6749 = vmatmul.msk.f32.gmra.mxu2 %vm11_vm0, %v1368_v56  ;;  %v1372_v56 = vld [vmem:[#allocation2 + $0x112] sm:$0xff] }
 0x17b   :  { %756 = vst.msk [vmem:[#allocation2 + $0x251] sm:$0xff] %vm11_vm0, %v690_v47  ;;  %6688 = vmatmul.msk.f32.gmra.mxu1 %vm11_vm0, %v827_v49  ;;  %v1210_v44 = vld [vmem:[#allocation2 + $0x161] sm:$0xff]  ;;  %v2569_v49 = vld [vmem:[%s12061_s1 + $0x1b8] sm:$0xff] }
 0x17c   :  { %2632 = vmatpush.msrb.mxu0 %v2569_v49 }
 0x17d   :  { %v7871_v4 = vpop.f32.mrf.mxu2 }
 0x17e   :  { %v561_v54 = vpop.f32.mrf.mxu0  ;;  %12087 = vst [vmem:[#allocation9_spill] sm:$0xff] %v7871_v4 }
 0x17f   :  { %v562_v55 = vadd.f32 %v7271_v32, %v561_v54 }
 0x181   :  { %6657 = vmatmul.msk.f32.gmra.mxu0 %vm11_vm0, %v236_v51  ;;  %v691_v57 = vmax.f32 %v562_v55, 0.0 }
 0x182   :  { %v828_v58 = vld [vmem:[#allocation2 + $0x250] sm:$0xff]  ;;  %6750 = vmatmul.msk.f32.gmra.mxu2 %vm11_vm0, %v1369_v18 }
 0x183   :  { %757 = vst.msk [vmem:[#allocation2 + $0x261] sm:$0xff] %vm11_vm0, %v691_v57  ;;  %6689 = vmatmul.msk.f32.gmra.mxu1 %vm11_vm0, %v828_v58  ;;  %v7946_v58 = vpop.f32.mrf.mxu3 }
 0x186   :  { %v564_v8 = vpop.f32.mrf.mxu0 }
 0x187   :  { %v565_v12 = vadd.f32 %v7271_v32, %v564_v8  ;;  %v7899_v32 = vpop.f32.mrf.mxu2  ;;  %v1212_v8 = vld [vmem:[#allocation2 + $0x181] sm:$0xff] }
 0x188   :  { %12088 = vst [vmem:[#allocation10_spill] sm:$0xff] %v7899_v32  ;;  %v2552_v32 = vld [vmem:[#allocation2 + $0x21] sm:$0xff] }
 0x189   :  { %v692_v19 = vmax.f32 %v565_v12, 0.0  ;;  %6658 = vmatmul.msk.f32.gmra.mxu0 %vm11_vm0, %v237_v9 }
 0x18a   :  { %6751 = vmatmul.msk.f32.gmra.mxu2 %vm11_vm0, %v1370_v27 }
 0x18b   :  { %759 = vst.msk [vmem:[#allocation2 + $0x291] sm:$0xff] %vm11_vm0, %v692_v19  ;;  %6722 = vmatmul.msk.f32.vlgmr.msrb.gmra.mxu1 %vm11_vm0, %v1208_v16  ;;  %v7965_v11 = vpop.f32.mrf.mxu3 }
 0x18c   :  { %12091 = vst [vmem:[#allocation13_spill] sm:$0xff] %v7965_v11  ;;  %v1963_v11 = vld [vmem:[#allocation2 + $0x461] sm:$0xff] }
 0x18e   :  { %v567_v21 = vpop.f32.mrf.mxu0 }
 0x18f   :  { %v568_v25 = vadd.f32 %v7909_v23, %v567_v21  ;;  %v7919_v33 = vpop.f32.mrf.mxu2 }
 0x190   :  { %v7912_v26 = vpop.f32.mrf.mxu1  ;;  %12089 = vst [vmem:[#allocation11_spill] sm:$0xff] %v7919_v33  ;;  %v2270_v33 = vld [vmem:[%s12061_s1 + $0x170] sm:$0xff] }
 0x191   :  { %v693_v28 = vmax.f32 %v568_v25, 0.0  ;;  %6659 = vmatmul.msk.f32.gmra.mxu0 %vm11_vm0, %v238_v22  ;;  %v1213_v22 = vld [vmem:[#allocation2 + $0x191] sm:$0xff] }
 0x192   :  { %v1508_v30 = vld [vmem:[#allocation2 + $0x290] sm:$0xff]  ;;  %6752 = vmatmul.msk.f32.gmra.mxu2 %vm11_vm0, %v1371_v42 }
 0x193   :  { %760 = vst.msk [vmem:[#allocation2 + $0x2a1] sm:$0xff] %vm11_vm0, %v693_v28  ;;  %6723 = vmatmul.msk.f32.gmra.mxu1 %vm11_vm0, %v1209_v29  ;;  %6755 = vmatmul.msk.f32.gmra.mxu3 %vm11_vm0, %v1508_v30  ;;  %v1807_v16 = vld [vmem:[#allocation2 + $0x291] sm:$0xff]  ;;  %v7982_v28 = vpop.f32.mrf.mxu3  ;;  %v243_v30 = vld [vmem:[%s12062_s0 + $0x1b0] sm:$0xff] }
 0x194   :  { %12092 = vst [vmem:[#allocation14_spill] sm:$0xff] %v7982_v28 }
 0x196   :  { %v570_v34 = vpop.f32.mrf.mxu0 }
 0x197   :  { %v571_v37 = vadd.f32 %v7909_v23, %v570_v34  ;;  %v7934_v47 = vpop.f32.mrf.mxu2 }
 0x198   :  { %v7927_v40 = vpop.f32.mrf.mxu1  ;;  %12090 = vst [vmem:[#allocation12_spill] sm:$0xff] %v7934_v47 }
 0x199   :  { %v694_v43 = vmax.f32 %v571_v37, 0.0  ;;  %6660 = vmatmul.msk.f32.gmra.mxu0 %vm11_vm0, %v239_v35 }
 0x19a   :  { %v1509_v45 = vld [vmem:[#allocation2 + $0x2a0] sm:$0xff]  ;;  %6753 = vmatmul.msk.f32.gmra.mxu2 %vm11_vm0, %v1372_v56 }
 0x19b   :  { %761 = vst.msk [vmem:[#allocation2 + $0x2b1] sm:$0xff] %vm11_vm0, %v694_v43  ;;  %6724 = vmatmul.msk.f32.gmra.mxu1 %vm11_vm0, %v1210_v44  ;;  %6756 = vmatmul.msk.f32.gmra.mxu3 %vm11_vm0, %v1509_v45  ;;  %v1808_v34 = vld [vmem:[#allocation2 + $0x2a1] sm:$0xff]  ;;  %v8001_v56 = vpop.f32.mrf.mxu3 }
 0x19c   :  { %v1214_v43 = vld [vmem:[#allocation2 + $0x1a1] sm:$0xff]  ;;  %12093 = vst [vmem:[#allocation15_spill] sm:$0xff] %v8001_v56 }
 0x19e   :  { %v573_v51 = vpop.f32.mrf.mxu0 }
 0x19f   :  { %v574_v54 = vadd.f32 %v7909_v23, %v573_v51  ;;  %v7952_v62 = vpop.f32.mrf.mxu2  ;;  %v244_v51 = vld [vmem:[%s12062_s0 + $0x1b8] sm:$0xff] }
 0x1a0   :  { %v7943_v55 = vpop.f32.mrf.mxu1 }
 0x1a1   :  { %v695_v57 = vmax.f32 %v574_v54, 0.0  ;;  %6661 = vmatmul.msk.f32.gmra.mxu0 %vm11_vm0, %v240_v52 }
 0x1a2   :  { %v1510_v61 = vld [vmem:[#allocation2 + $0x2b0] sm:$0xff]  ;;  %6786 = vmatmul.msk.f32.vlgmr.msra.gmra.mxu2 %vm11_vm0, %v1806_v2 }
 0x1a3   :  { %762 = vst.msk [vmem:[#allocation2 + $0x2c1] sm:$0xff] %vm11_vm0, %v695_v57  ;;  %6725 = vmatmul.msk.f32.gmra.mxu1 %vm11_vm0, %v1211_v59  ;;  %6757 = vmatmul.msk.f32.gmra.mxu3 %vm11_vm0, %v1510_v61  ;;  %v1809_v52 = vld [vmem:[#allocation2 + $0x2b1] sm:$0xff] }
 0x1a4   :  { %v1215_v61 = vld [vmem:[#allocation2 + $0x1b1] sm:$0xff] }
 0x1a6   :  { %v576_v0 = vpop.f32.mrf.mxu0 }
 0x1a7   :  { %v577_v5 = vadd.f32 %v7909_v23, %v576_v0  ;;  %v7967_v12 = vpop.f32.mrf.mxu2 }
 0x1a8   :  { %v7958_v6 = vpop.f32.mrf.mxu1 }
 0x1a9   :  { %v696_v7 = vmax.f32 %v577_v5, 0.0  ;;  %6662 = vmatmul.msk.f32.gmra.mxu0 %vm11_vm0, %v241_v1  ;;  %v245_v5 = vld [vmem:[%s12062_s0 + $0x1c0] sm:$0xff] }
 0x1aa   :  { %v1511_v9 = vld [vmem:[#allocation2 + $0x2c0] sm:$0xff]  ;;  %6787 = vmatmul.msk.f32.gmra.mxu2 %vm11_vm0, %v1807_v16 }
 0x1ab   :  { %763 = vst.msk [vmem:[#allocation2 + $0x2d1] sm:$0xff] %vm11_vm0, %v696_v7  ;;  %6726 = vmatmul.msk.f32.gmra.mxu1 %vm11_vm0, %v1212_v8  ;;  %6758 = vmatmul.msk.f32.gmra.mxu3 %vm11_vm0, %v1511_v9  ;;  %v1810_v7 = vld [vmem:[#allocation2 + $0x2c1] sm:$0xff] }
 0x1ae   :  { %v579_v13 = vpop.f32.mrf.mxu0 }
 0x1af   :  { %v580_v18 = vadd.f32 %v7909_v23, %v579_v13  ;;  %v7980_v27 = vpop.f32.mrf.mxu2  ;;  %v1216_v13 = vld [vmem:[#allocation2 + $0x1e1] sm:$0xff] }
 0x1b0   :  { %v7973_v19 = vpop.f32.mrf.mxu1 }
 0x1b1   :  { %v697_v21 = vmax.f32 %v580_v18, 0.0  ;;  %6663 = vmatmul.msk.f32.gmra.mxu0 %vm11_vm0, %v242_v15  ;;  %v1515_v15 = vld [vmem:[#allocation2 + $0x320] sm:$0xff]  ;;  %v8019_v18 = vpop.f32.mrf.mxu3 }
 0x1b2   :  { %v1512_v25 = vld [vmem:[#allocation2 + $0x2d0] sm:$0xff]  ;;  %6788 = vmatmul.msk.f32.gmra.mxu2 %vm11_vm0, %v1808_v34  ;;  %12096 = vst [vmem:[#allocation18_spill] sm:$0xff] %v8019_v18 }
 0x1b3   :  { %764 = vst.msk [vmem:[#allocation2 + $0x2e1] sm:$0xff] %vm11_vm0, %v697_v21  ;;  %6727 = vmatmul.msk.f32.gmra.mxu1 %vm11_vm0, %v1213_v22  ;;  %6759 = vmatmul.msk.f32.gmra.mxu3 %vm11_vm0, %v1512_v25  ;;  %v246_v25 = vld [vmem:[%s12062_s0 + $0x1c8] sm:$0xff] }
 0x1b6   :  { %v582_v29 = vpop.f32.mrf.mxu0 }
 0x1b7   :  { %v583_v35 = vadd.f32 %v7909_v23, %v582_v29  ;;  %v7995_v45 = vpop.f32.mrf.mxu2  ;;  %v1811_v29 = vld [vmem:[#allocation2 + $0x2d1] sm:$0xff] }
 0x1b8   :  { %v7988_v37 = vpop.f32.mrf.mxu1 }
 0x1b9   :  { %v698_v42 = vmax.f32 %v583_v35, 0.0  ;;  %6664 = vmatmul.msk.f32.gmra.mxu0 %vm11_vm0, %v243_v30 }
 0x1ba   :  { %v1513_v44 = vld [vmem:[#allocation2 + $0x2e0] sm:$0xff]  ;;  %6789 = vmatmul.msk.f32.gmra.mxu2 %vm11_vm0, %v1809_v52  ;;  %v247_v52 = vld [vmem:[%s12062_s0 + $0x1d0] sm:$0xff] }
 0x1bb   :  { %765 = vst.msk [vmem:[#allocation2 + $0x2f1] sm:$0xff] %vm11_vm0, %v698_v42  ;;  %6728 = vmatmul.msk.f32.gmra.mxu1 %vm11_vm0, %v1214_v43  ;;  %6760 = vmatmul.msk.f32.gmra.mxu3 %vm11_vm0, %v1513_v44  ;;  %v1217_v42 = vld [vmem:[#allocation2 + $0x1f1] sm:$0xff]  ;;  %v8038_v44 = vpop.f32.mrf.mxu3 }
 0x1bc   :  { %12098 = vst [vmem:[#allocation20_spill] sm:$0xff] %v8038_v44 }
 0x1be   :  { %v585_v49 = vpop.f32.mrf.mxu0 }
 0x1bf   :  { %v586_v54 = vadd.f32 %v7909_v23, %v585_v49  ;;  %v8010_v1 = vpop.f32.mrf.mxu2 }
 0x1c0   :  { %v8003_v57 = vpop.f32.mrf.mxu1 }
 0x1c1   :  { %12094 = vst [vmem:[#allocation16_spill] sm:$0xff] %v8003_v57  ;;  %v699_v59 = vmax.f32 %v586_v54, 0.0  ;;  %6665 = vmatmul.msk.f32.gmra.mxu0 %vm11_vm0, %v244_v51  ;;  %v1812_v54 = vld [vmem:[#allocation2 + $0x2e1] sm:$0xff] }
 0x1c2   :  { %v1514_v0 = vld [vmem:[#allocation2 + $0x2f0] sm:$0xff]  ;;  %6790 = vmatmul.msk.f32.gmra.mxu2 %vm11_vm0, %v1810_v7 }
 0x1c3   :  { %766 = vst.msk [vmem:[#allocation2 + $0x301] sm:$0xff] %vm11_vm0, %v699_v59  ;;  %6729 = vmatmul.msk.f32.gmra.mxu1 %vm11_vm0, %v1215_v61  ;;  %6761 = vmatmul.msk.f32.gmra.mxu3 %vm11_vm0, %v1514_v0 }
 0x1c6   :  { %v588_v2 = vpop.f32.mrf.mxu0 }
 0x1c7   :  { %v589_v8 = vadd.f32 %v7909_v23, %v588_v2  ;;  %v8025_v21 = vpop.f32.mrf.mxu2  ;;  %v1218_v2 = vld [vmem:[#allocation2 + $0x201] sm:$0xff] }
 0x1c8   :  { %v8016_v9 = vpop.f32.mrf.mxu1 }
 0x1c9   :  { %12095 = vst [vmem:[#allocation17_spill] sm:$0xff] %v8016_v9  ;;  %v700_v16 = vmax.f32 %v589_v8, 0.0  ;;  %6666 = vmatmul.msk.f32.gmra.mxu0 %vm11_vm0, %v245_v5  ;;  %v8055_v8 = vpop.f32.mrf.mxu3 }
 0x1ca   :  { %6791 = vmatmul.msk.f32.gmra.mxu2 %vm11_vm0, %v1811_v29  ;;  %12101 = vst [vmem:[#allocation23_spill] sm:$0xff] %v8055_v8 }
 0x1cb   :  { %767 = vst.msk [vmem:[#allocation2 + $0x331] sm:$0xff] %vm11_vm0, %v700_v16  ;;  %6730 = vmatmul.msk.f32.gmra.mxu1 %vm11_vm0, %v1216_v13  ;;  %6762 = vmatmul.msk.f32.gmra.mxu3 %vm11_vm0, %v1515_v15  ;;  %v248_v15 = vld [vmem:[%s12062_s0 + $0x1d8] sm:$0xff] }
 0x1cc   :  { %v1813_v16 = vld [vmem:[#allocation2 + $0x2f1] sm:$0xff] }
 0x1ce   :  { %v591_v22 = vpop.f32.mrf.mxu0 }
 0x1cf   :  { %v592_v30 = vadd.f32 %v7909_v23, %v591_v22  ;;  %v8040_v49 = vpop.f32.mrf.mxu2 }
 0x1d0   :  { %v8031_v34 = vpop.f32.mrf.mxu1 }
 0x1d1   :  { %12097 = vst [vmem:[#allocation19_spill] sm:$0xff] %v8031_v34  ;;  %v701_v35 = vmax.f32 %v592_v30, 0.0  ;;  %6667 = vmatmul.msk.f32.gmra.mxu0 %vm11_vm0, %v246_v25  ;;  %v1219_v30 = vld [vmem:[#allocation2 + $0x211] sm:$0xff] }
 0x1d2   :  { %v1516_v43 = vld [vmem:[#allocation2 + $0x330] sm:$0xff]  ;;  %6792 = vmatmul.msk.f32.gmra.mxu2 %vm11_vm0, %v1812_v54 }
 0x1d3   :  { %768 = vst.msk [vmem:[#allocation2 + $0x341] sm:$0xff] %vm11_vm0, %v701_v35  ;;  %6731 = vmatmul.msk.f32.gmra.mxu1 %vm11_vm0, %v1217_v42  ;;  %6763 = vmatmul.msk.f32.gmra.mxu3 %vm11_vm0, %v1516_v43 }
 0x1d6   :  { %v594_v51 = vpop.f32.mrf.mxu0 }
 0x1d7   :  { %v595_v59 = vadd.f32 %v7909_v23, %v594_v51  ;;  %v8053_v7 = vpop.f32.mrf.mxu2  ;;  %v249_v51 = vld [vmem:[%s12062_s0 + $0x1e0] sm:$0xff] }
 0x1d8   :  { %v8046_v61 = vpop.f32.mrf.mxu1  ;;  %12100 = vst [vmem:[#allocation22_spill] sm:$0xff] %v8053_v7  ;;  %v2256_v7 = vld [vmem:[#allocation2 + $0x40] sm:$0xff] }
 0x1d9   :  { %12099 = vst [vmem:[#allocation21_spill] sm:$0xff] %v8046_v61  ;;  %v702_v0 = vmax.f32 %v595_v59, 0.0  ;;  %6668 = vmatmul.msk.f32.gmra.mxu0 %vm11_vm0, %v247_v52  ;;  %v1814_v52 = vld [vmem:[#allocation2 + $0x321] sm:$0xff]  ;;  %v8074_v59 = vpop.f32.mrf.mxu3 }
 0x1da   :  { %v1517_v5 = vld [vmem:[#allocation2 + $0x340] sm:$0xff]  ;;  %6793 = vmatmul.msk.f32.gmra.mxu2 %vm11_vm0, %v1813_v16  ;;  %12104 = vst [vmem:[#allocation26_spill] sm:$0xff] %v8074_v59 }
 0x1db   :  { %769 = vst.msk [vmem:[#allocation2 + $0x351] sm:$0xff] %vm11_vm0, %v702_v0  ;;  %6732 = vmatmul.msk.f32.gmra.mxu1 %vm11_vm0, %v1218_v2  ;;  %6764 = vmatmul.msk.f32.gmra.mxu3 %vm11_vm0, %v1517_v5  ;;  %v1220_v5 = vld [vmem:[#allocation2 + $0x221] sm:$0xff] }
 0x1dc   :  { %v1673_v59 = vld [vmem:[%s12061_s1 + $0xe8] sm:$0xff] }
 0x1de   :  { %v597_v13 = vpop.f32.mrf.mxu0 }
 0x1df   :  { %v598_v22 = vadd.f32 %v7909_v23, %v597_v13  ;;  %v8068_v42 = vpop.f32.mrf.mxu2 }
 0x1e0   :  { %v8061_v25 = vpop.f32.mrf.mxu1  ;;  %12103 = vst [vmem:[#allocation25_spill] sm:$0xff] %v8068_v42  ;;  %v2255_v42 = vld [vmem:[#allocation2 + $0x30] sm:$0xff] }
 0x1e1   :  { %12102 = vst [vmem:[#allocation24_spill] sm:$0xff] %v8061_v25  ;;  %v703_v29 = vmax.f32 %v598_v22, 0.0  ;;  %6669 = vmatmul.msk.f32.gmra.mxu0 %vm11_vm0, %v248_v15  ;;  %v250_v22 = vld [vmem:[%s12062_s0 + $0x1e8] sm:$0xff] }
 0x1e2   :  { %v1518_v35 = vld [vmem:[#allocation2 + $0x350] sm:$0xff]  ;;  %6794 = vmatmul.msk.f32.gmra.mxu2 %vm11_vm0, %v1814_v52 }
 0x1e3   :  { %770 = vst.msk [vmem:[#allocation2 + $0x361] sm:$0xff] %vm11_vm0, %v703_v29  ;;  %6733 = vmatmul.msk.f32.gmra.mxu1 %vm11_vm0, %v1219_v30  ;;  %6765 = vmatmul.msk.f32.gmra.mxu3 %vm11_vm0, %v1518_v35  ;;  %v1815_v29 = vld [vmem:[#allocation2 + $0x331] sm:$0xff] }
 0x1e4   :  { %v1221_v52 = vld [vmem:[#allocation2 + $0x231] sm:$0xff] }
 0x1e6   :  { %v600_v43 = vpop.f32.mrf.mxu0 }
 0x1e7   :  { %v601_v54 = vadd.f32 %v7909_v23, %v600_v43  ;;  %v8083_v15 = vpop.f32.mrf.mxu2 }
 0x1e8   :  { %v8076_v0 = vpop.f32.mrf.mxu1  ;;  %12106 = vst [vmem:[#allocation28_spill] sm:$0xff] %v8083_v15  ;;  %v2254_v15 = vld [vmem:[#allocation2 + $0x20] sm:$0xff] }
 0x1e9   :  { %12105 = vst [vmem:[#allocation27_spill] sm:$0xff] %v8076_v0  ;;  %v704_v2 = vmax.f32 %v601_v54, 0.0  ;;  %6670 = vmatmul.msk.f32.gmra.mxu0 %vm11_vm0, %v249_v51  ;;  %v8092_v51 = vpop.f32.mrf.mxu3 }
 0x1ea   :  { %v1519_v13 = vld [vmem:[#allocation2 + $0x360] sm:$0xff]  ;;  %12108 = vst [vmem:[#allocation30_spill] sm:$0xff] %v8092_v51  ;;  %6795 = vmatmul.msk.f32.gmra.mxu2 %vm11_vm0, %v1815_v29 }
 0x1eb   :  { %771 = vst.msk [vmem:[#allocation2 + $0x371] sm:$0xff] %vm11_vm0, %v704_v2  ;;  %6734 = vmatmul.msk.f32.gmra.mxu1 %vm11_vm0, %v1220_v5  ;;  %6766 = vmatmul.msk.f32.gmra.mxu3 %vm11_vm0, %v1519_v13  ;;  %v251_v13 = vld [vmem:[%s12062_s0 + $0x1f0] sm:$0xff]  ;;  %s7096_s0 = smov 64  }
 0x1ee   :  { %v603_v16 = vpop.f32.mrf.mxu0 }
 0x1ef   :  { %v604_v30 = vadd.f32 %v7909_v23, %v603_v16  ;;  %v8098_v2 = vpop.f32.mrf.mxu2  ;;  %v1816_v16 = vld [vmem:[#allocation2 + $0x341] sm:$0xff] }
 0x1f0   :  { %v8089_v35 = vpop.f32.mrf.mxu1  ;;  %12109 = vst [vmem:[#allocation31_spill] sm:$0xff] %v8098_v2  ;;  %v2253_v2 = vld [vmem:[#allocation2 + $0x10] sm:$0xff] }
 0x1f1   :  { %12107 = vst [vmem:[#allocation29_spill] sm:$0xff] %v8089_v35  ;;  %v705_v43 = vmax.f32 %v604_v30, 0.0  ;;  %6671 = vmatmul.msk.f32.gmra.mxu0 %vm11_vm0, %v250_v22  ;;  %v1818_v35 = vld [vmem:[#allocation2 + $0x361] sm:$0xff] }
 0x1f2   :  { %v1520_v54 = vld [vmem:[#allocation2 + $0x370] sm:$0xff]  ;;  %6796 = vmatmul.msk.f32.gmra.mxu2 %vm11_vm0, %v1816_v16 }
 0x1f3   :  { %772 = vst.msk [vmem:[#allocation2 + $0x381] sm:$0xff] %vm11_vm0, %v705_v43  ;;  %6735 = vmatmul.msk.f32.gmra.mxu1 %vm11_vm0, %v1221_v52  ;;  %6767 = vmatmul.msk.f32.gmra.mxu3 %vm11_vm0, %v1520_v54  ;;  %v1222_v43 = vld [vmem:[#allocation2 + $0x241] sm:$0xff]  ;;  %v8111_v54 = vpop.f32.mrf.mxu3 }
 0x1f4   :  { %12111 = vst [vmem:[#allocation33_spill] sm:$0xff] %v8111_v54 }
 0x1f6   :  { %v606_v5 = vpop.f32.mrf.mxu0 }
 0x1f7   :  { %v607_v22 = vadd.f32 %v7909_v23, %v606_v5  ;;  %v2568_v5 = vld [vmem:[%s12061_s1 + $0x1b0] sm:$0xff]  ;;  %v8116_v47 = vpop.f32.mrf.mxu2 }
 0x1f8   :  { %v8104_v30 = vpop.f32.mrf.mxu1  ;;  %12112 = vst [vmem:[#allocation34_spill] sm:$0xff] %v8116_v47  ;;  %2633 = vmatpush.msrb.mxu0 %v2568_v5  ;;  %v1676_v5 = vld [vmem:[%s12061_s1 + $0x100] sm:$0xff] }
 0x1f9   :  { %12110 = vst [vmem:[#allocation32_spill] sm:$0xff] %v8104_v30  ;;  %v706_v29 = vmax.f32 %v607_v22, 0.0  ;;  %6672 = vmatmul.msk.f32.gmra.mxu0 %vm11_vm0, %v251_v13  ;;  %v2567_v13 = vld [vmem:[%s12061_s1 + $0x1a8] sm:$0xff]  ;;  %v1817_v22 = vld [vmem:[#allocation2 + $0x351] sm:$0xff]  ;;  %1737 = vmatpush.msra.mxu1 %v1676_v5 }
 0x1fa   :  { %v1521_v52 = vld [vmem:[#allocation2 + $0x380] sm:$0xff]  ;;  %2634 = vmatpush.msrb.mxu0 %v2567_v13  ;;  %6797 = vmatmul.msk.f32.gmra.mxu2 %vm11_vm0, %v1817_v22  ;;  %v1223_v30 = vld [vmem:[#allocation2 + $0x251] sm:$0xff] }
 0x1fb   :  { %773 = vst.msk [vmem:[#allocation2 + $0x391] sm:$0xff] %vm11_vm0, %v706_v29  ;;  %6736 = vmatmul.msk.f32.gmra.mxu1 %vm11_vm0, %v1222_v43  ;;  %6768 = vmatmul.msk.f32.gmra.mxu3 %vm11_vm0, %v1521_v52  ;;  %v2551_v52 = vld [vmem:[#allocation2 + $0x11] sm:$0xff]  ;;  %v8155_v5 = vpop.f32.mrf.mxu3 }
 0x1fc   :  { %v1974_v13 = vld [vmem:[%s12061_s1 + $0x140] sm:$0xff]  ;;  %v1675_v22 = vld [vmem:[%s12061_s1 + $0xf8] sm:$0xff] }
 0x1fd   :  { %2035 = vmatpush.msrb.mxu3 %v1974_v13  ;;  %1738 = vmatpush.msra.mxu1 %v1675_v22  ;;  %v1971_v22 = vld [vmem:[%s12061_s1 + $0x128] sm:$0xff] }
 0x1fe   :  { %v609_v16 = vpop.f32.mrf.mxu0 }
 0x1ff   :  { %v610_v29 = vadd.f32 %v7909_v23, %v609_v16  ;;  %v2272_v16 = vld [vmem:[%s12061_s1 + $0x180] sm:$0xff] }
 0x200   :  { %v8122_v43 = vpop.f32.mrf.mxu1  ;;  %2333 = vmatpush.msrb.mxu2 %v2272_v16 }
 0x201   :  { %v707_v54 = vmax.f32 %v610_v29, 0.0  ;;  %6866 = vmatmul.msk.f32.vlgmr.msrb.gmra.mxu0 %vm11_vm0, %v2551_v52  ;;  %v1674_v29 = vld [vmem:[%s12061_s1 + $0xf0] sm:$0xff] }
 0x202   :  { %v1522_v51 = vld [vmem:[#allocation2 + $0x390] sm:$0xff]  ;;  %v1972_v52 = vld [vmem:[%s12061_s1 + $0x130] sm:$0xff]  ;;  %1739 = vmatpush.msra.mxu1 %v1674_v29  ;;  %6798 = vmatmul.msk.f32.gmra.mxu2 %vm11_vm0, %v1818_v35 }
 0x203   :  { %774 = vst.msk [vmem:[#allocation2 + $0x3a1] sm:$0xff] %vm11_vm0, %v707_v54  ;;  %6737 = vmatmul.msk.f32.gmra.mxu1 %vm11_vm0, %v1223_v30  ;;  %6769 = vmatmul.msk.f32.gmra.mxu3 %vm11_vm0, %v1522_v51  ;;  %v1973_v30 = vld [vmem:[%s12061_s1 + $0x138] sm:$0xff]  ;;  %v8147_v54 = vpop.f32.mrf.mxu2 }
 0x204   :  { %v2271_v51 = vld [vmem:[%s12061_s1 + $0x178] sm:$0xff]  ;;  %12113 = vst [vmem:[#allocation35_spill] sm:$0xff] %v8147_v54  ;;  %2036 = vmatpush.msrb.mxu3 %v1973_v30  ;;  %v2269_v30 = vld [vmem:[%s12061_s1 + $0x168] sm:$0xff]  ;;  %1740 = vmatpush.msra.mxu1 %v1673_v59 }
 0x205   :  { %2334 = vmatpush.msrb.mxu2 %v2271_v51  ;;  %v1657_v51 = vld [vmem:[#allocation2 + $0x3c0] sm:$0xff]  ;;  %v2553_v35 = vld [vmem:[#allocation2 + $0x31] sm:$0xff] }
 0x206   :  { %v612_v13 = vpop.f32.mrf.mxu0  ;;  %2037 = vmatpush.msrb.mxu3 %v1972_v52  ;;  %v8179_v52 = vpop.f32.mrf.mxu3 }
 0x207   :  { %v613_v16 = vadd.f32 %v7909_v23, %v612_v13  ;;  %2335 = vmatpush.msrb.mxu2 %v2270_v33  ;;  %v1955_v13 = vld [vmem:[#allocation2 + $0x3c1] sm:$0xff] }
 0x208   :  { %v8164_v54 = vpop.f32.mrf.mxu1  ;;  %2038 = vmatpush.msrb.mxu3 %v1971_v22 }
 0x209   :  { %v708_v0 = vmax.f32 %v613_v16, 0.0  ;;  %6867 = vmatmul.msk.f32.gmra.mxu0 %vm11_vm0, %v2552_v32  ;;  %2336 = vmatpush.msrb.mxu2 %v2269_v30  ;;  %v1819_v16 = vld [vmem:[#allocation2 + $0x371] sm:$0xff] }
 0x20a   :  { %6799 = vmatmul.msk.f32.gmra.mxu2 %vm11_vm0, %v1819_v16  ;;  %v2554_v16 = vld [vmem:[#allocation2 + $0x41] sm:$0xff] }
 0x20b   :  { %776 = vst.msk [vmem:[#allocation2 + $0x3d1] sm:$0xff] %vm11_vm0, %v708_v0  ;;  %6770 = vmatmul.msk.f32.vlgmr.msra.gmra.mxu1 %vm11_vm0, %v1657_v51  ;;  %6802 = vmatmul.msk.f32.vlgmr.msrb.gmra.mxu3 %vm11_vm0, %v1955_v13  ;;  %v8177_v29 = vpop.f32.mrf.mxu2 }
 0x20c   :  { %12114 = vst [vmem:[#allocation36_spill] sm:$0xff] %v8177_v29 }
 0x20e   :  { %v615_v33 = vpop.f32.mrf.mxu0 }
 0x20f   :  { %v616_v32 = vadd.f32 %v7909_v23, %v615_v33  ;;  %v1820_v33 = vld [vmem:[#allocation2 + $0x381] sm:$0xff] }
 0x210   :  { %v8182_v8 = vpop.f32.mrf.mxu1 }
 0x211   :  { %v709_v59 = vmax.f32 %v616_v32, 0.0  ;;  %6868 = vmatmul.msk.f32.gmra.mxu0 %vm11_vm0, %v2553_v35 }
 0x212   :  { %v8186_v0 = vld [vmem:[#allocation2 + $0x3d0] sm:$0xff]  ;;  %6800 = vmatmul.msk.f32.gmra.mxu2 %vm11_vm0, %v1820_v33 }
 0x213   :  { %v1956_v22 = vld [vmem:[#allocation2 + $0x3d1] sm:$0xff]  ;;  %777 = vst.msk [vmem:[#allocation2 + $0x3e1] sm:$0xff] %vm11_vm0, %v709_v59  ;;  %6771 = vmatmul.msk.f32.gmra.mxu1 %vm11_vm0, %v8186_v0  ;;  %v8192_v30 = vpop.f32.mrf.mxu2 }
 0x214   :  { %6803 = vmatmul.msk.f32.gmra.mxu3 %vm11_vm0, %v1956_v22  ;;  %12115 = vst [vmem:[#allocation37_spill] sm:$0xff] %v8192_v30  ;;  %v2555_v33 = vld [vmem:[#allocation2 + $0x51] sm:$0xff] }
 0x216   :  { %v618_v51 = vpop.f32.mrf.mxu0  ;;  %v8194_v13 = vpop.f32.mrf.mxu3 }
 0x217   :  { %v619_v32 = vadd.f32 %v7909_v23, %v618_v51 }
 0x218   :  { %v8197_v35 = vpop.f32.mrf.mxu1 }
 0x219   :  { %v710_v29 = vmax.f32 %v619_v32, 0.0  ;;  %6869 = vmatmul.msk.f32.gmra.mxu0 %vm11_vm0, %v2554_v16  ;;  %v1821_v32 = vld [vmem:[#allocation2 + $0x391] sm:$0xff] }
 0x21a   :  { %v8201_v59 = vld [vmem:[#allocation2 + $0x3e0] sm:$0xff]  ;;  %6801 = vmatmul.msk.f32.gmra.mxu2 %vm11_vm0, %v1821_v32 }
 0x21b   :  { %v1957_v47 = vld [vmem:[#allocation2 + $0x3e1] sm:$0xff]  ;;  %778 = vst.msk [vmem:[#allocation2 + $0x3f1] sm:$0xff] %vm11_vm0, %v710_v29  ;;  %6772 = vmatmul.msk.f32.gmra.mxu1 %vm11_vm0, %v8201_v59  ;;  %v8207_v22 = vpop.f32.mrf.mxu2 }
 0x21c   :  { %6804 = vmatmul.msk.f32.gmra.mxu3 %vm11_vm0, %v1957_v47  ;;  %12116 = vst [vmem:[#allocation38_spill] sm:$0xff] %v8207_v22  ;;  %v2556_v32 = vld [vmem:[#allocation2 + $0x61] sm:$0xff] }
 0x21e   :  { %v621_v51 = vpop.f32.mrf.mxu0  ;;  %v8209_v30 = vpop.f32.mrf.mxu3 }
 0x21f   :  { %v622_v16 = vadd.f32 %v7909_v23, %v621_v51 }
 0x220   :  { %v8212_v4 = vpop.f32.mrf.mxu1 }
 0x221   :  { %v711_v25 = vmax.f32 %v622_v16, 0.0  ;;  %6870 = vmatmul.msk.f32.gmra.mxu0 %vm11_vm0, %v2555_v33 }
 0x222   :  { %v8216_v29 = vld [vmem:[#allocation2 + $0x3f0] sm:$0xff]  ;;  %6834 = vmatmul.msk.f32.vlgmr.msrb.gmra.mxu2 %vm11_vm0, %v2253_v2 }
 0x223   :  { %v1958_v44 = vld [vmem:[#allocation2 + $0x3f1] sm:$0xff]  ;;  %779 = vst.msk [vmem:[#allocation2 + $0x401] sm:$0xff] %vm11_vm0, %v711_v25  ;;  %6773 = vmatmul.msk.f32.gmra.mxu1 %vm11_vm0, %v8216_v29  ;;  %v8222_v47 = vpop.f32.mrf.mxu2 }
 0x224   :  { %6805 = vmatmul.msk.f32.gmra.mxu3 %vm11_vm0, %v1958_v44  ;;  %v2557_v2 = vld [vmem:[#allocation2 + $0x71] sm:$0xff] }
 0x226   :  { %v624_v51 = vpop.f32.mrf.mxu0  ;;  %v8224_v22 = vpop.f32.mrf.mxu3 }
 0x227   :  { %v625_v16 = vadd.f32 %v7909_v23, %v624_v51 }
 0x228   :  { %v8227_v33 = vpop.f32.mrf.mxu1 }
 0x229   :  { %v712_v50 = vmax.f32 %v625_v16, 0.0  ;;  %6871 = vmatmul.msk.f32.gmra.mxu0 %vm11_vm0, %v2556_v32 }
 0x22a   :  { %v8231_v25 = vld [vmem:[#allocation2 + $0x400] sm:$0xff]  ;;  %6835 = vmatmul.msk.f32.gmra.mxu2 %vm11_vm0, %v2254_v15 }
 0x22b   :  { %v1959_v61 = vld [vmem:[#allocation2 + $0x401] sm:$0xff]  ;;  %780 = vst.msk [vmem:[#allocation2 + $0x411] sm:$0xff] %vm11_vm0, %v712_v50  ;;  %6774 = vmatmul.msk.f32.gmra.mxu1 %vm11_vm0, %v8231_v25  ;;  %v8237_v44 = vpop.f32.mrf.mxu2 }
 0x22c   :  { %6806 = vmatmul.msk.f32.gmra.mxu3 %vm11_vm0, %v1959_v61  ;;  %v2558_v15 = vld [vmem:[#allocation2 + $0x81] sm:$0xff] }
 0x22e   :  { %v627_v51 = vpop.f32.mrf.mxu0  ;;  %v8239_v18 = vpop.f32.mrf.mxu3 }
 0x22f   :  { %v628_v16 = vadd.f32 %v7909_v23, %v627_v51 }
 0x230   :  { %v8242_v32 = vpop.f32.mrf.mxu1 }
 0x231   :  { %v713_v41 = vmax.f32 %v628_v16, 0.0  ;;  %6872 = vmatmul.msk.f32.gmra.mxu0 %vm11_vm0, %v2557_v2 }
 0x232   :  { %v8246_v50 = vld [vmem:[#allocation2 + $0x410] sm:$0xff]  ;;  %6836 = vmatmul.msk.f32.gmra.mxu2 %vm11_vm0, %v2255_v42 }
 0x233   :  { %v1960_v34 = vld [vmem:[#allocation2 + $0x411] sm:$0xff]  ;;  %781 = vst.msk [vmem:[#allocation2 + $0x421] sm:$0xff] %vm11_vm0, %v713_v41  ;;  %6775 = vmatmul.msk.f32.gmra.mxu1 %vm11_vm0, %v8246_v50  ;;  %v8252_v61 = vpop.f32.mrf.mxu2 }
 0x234   :  { %6807 = vmatmul.msk.f32.gmra.mxu3 %vm11_vm0, %v1960_v34  ;;  %v2559_v42 = vld [vmem:[#allocation2 + $0xb1] sm:$0xff] }
 0x236   :  { %v630_v51 = vpop.f32.mrf.mxu0  ;;  %v8254_v56 = vpop.f32.mrf.mxu3 }
 0x237   :  { %12117 = vst [vmem:[#allocation39_spill] sm:$0xff] %v8254_v56  ;;  %v631_v16 = vadd.f32 %v7909_v23, %v630_v51 }
 0x238   :  { %v8257_v2 = vpop.f32.mrf.mxu1 }
 0x239   :  { %12118 = vst [vmem:[#allocation40_spill] sm:$0xff] %v8257_v2  ;;  %v714_v31 = vmax.f32 %v631_v16, 0.0  ;;  %6873 = vmatmul.msk.f32.gmra.mxu0 %vm11_vm0, %v2558_v15 }
 0x23a   :  { %v8261_v41 = vld [vmem:[#allocation2 + $0x420] sm:$0xff]  ;;  %6837 = vmatmul.msk.f32.gmra.mxu2 %vm11_vm0, %v2256_v7 }
 0x23b   :  { %v1961_v9 = vld [vmem:[#allocation2 + $0x421] sm:$0xff]  ;;  %782 = vst.msk [vmem:[#allocation2 + $0x431] sm:$0xff] %vm11_vm0, %v714_v31  ;;  %6776 = vmatmul.msk.f32.gmra.mxu1 %vm11_vm0, %v8261_v41  ;;  %v8267_v34 = vpop.f32.mrf.mxu2 }
 0x23c   :  { %6808 = vmatmul.msk.f32.gmra.mxu3 %vm11_vm0, %v1961_v9  ;;  %v2560_v7 = vld [vmem:[#allocation2 + $0xc1] sm:$0xff] }
 0x23e   :  { %v633_v51 = vpop.f32.mrf.mxu0  ;;  %v8269_v28 = vpop.f32.mrf.mxu3 }
 0x23f   :  { %12119 = vst [vmem:[#allocation41_spill] sm:$0xff] %v8269_v28  ;;  %v634_v16 = vadd.f32 %v7909_v23, %v633_v51  ;;  %v2257_v28 = vld [vmem:[#allocation2 + $0x50] sm:$0xff] }
 0x240   :  { %v8272_v15 = vpop.f32.mrf.mxu1 }
 0x241   :  { %12120 = vst [vmem:[#allocation42_spill] sm:$0xff] %v8272_v15  ;;  %v715_v24 = vmax.f32 %v634_v16, 0.0  ;;  %6874 = vmatmul.msk.f32.gmra.mxu0 %vm11_vm0, %v2559_v42 }
 0x242   :  { %v8276_v31 = vld [vmem:[#allocation2 + $0x430] sm:$0xff]  ;;  %6838 = vmatmul.msk.f32.gmra.mxu2 %vm11_vm0, %v2257_v28 }
 0x243   :  { %12121 = vst [vmem:[#allocation43_spill] sm:$0xff] %v8276_v31  ;;  %v1962_v57 = vld [vmem:[#allocation2 + $0x431] sm:$0xff]  ;;  %6777 = vmatmul.msk.f32.gmra.mxu1 %vm11_vm0, %v8276_v31  ;;  %v8282_v9 = vpop.f32.mrf.mxu2  ;;  %v2258_v31 = vld [vmem:[#allocation2 + $0x60] sm:$0xff] }
 0x244   :  { %783 = vst.msk [vmem:[#allocation2 + $0x441] sm:$0xff] %vm11_vm0, %v715_v24  ;;  %6809 = vmatmul.msk.f32.gmra.mxu3 %vm11_vm0, %v1962_v57  ;;  %v1665_v24 = vld [vmem:[#allocation2 + $0x460] sm:$0xff] }
 0x246   :  { %v636_v51 = vpop.f32.mrf.mxu0  ;;  %v8284_v15 = vpop.f32.mrf.mxu3 }
 0x247   :  { %12122 = vst [vmem:[#allocation44_spill] sm:$0xff] %v8284_v15  ;;  %v637_v16 = vadd.f32 %v7909_v23, %v636_v51 }
 0x248   :  { %v8287_v42 = vpop.f32.mrf.mxu1 }
 0x249   :  { %12123 = vst [vmem:[#allocation45_spill] sm:$0xff] %v8287_v42  ;;  %v716_v2 = vmax.f32 %v637_v16, 0.0  ;;  %6875 = vmatmul.msk.f32.gmra.mxu0 %vm11_vm0, %v2560_v7  ;;  %v2561_v7 = vld [vmem:[#allocation2 + $0xd1] sm:$0xff] }
 0x24a   :  { %6839 = vmatmul.msk.f32.gmra.mxu2 %vm11_vm0, %v2258_v31  ;;  %v2562_v31 = vld [vmem:[#allocation2 + $0xe1] sm:$0xff] }
 0x24b   :  { %784 = vst.msk [vmem:[#allocation2 + $0x471] sm:$0xff] %vm11_vm0, %v716_v2  ;;  %6778 = vmatmul.msk.f32.gmra.mxu1 %vm11_vm0, %v1665_v24  ;;  %v8294_v57 = vpop.f32.mrf.mxu2 }
 0x24c   :  { %6810 = vmatmul.msk.f32.gmra.mxu3 %vm11_vm0, %v1963_v11 }
 0x24e   :  { %v639_v51 = vpop.f32.mrf.mxu0  ;;  %v8296_v15 = vpop.f32.mrf.mxu3 }
 0x24f   :  { %12124 = vst [vmem:[#allocation46_spill] sm:$0xff] %v8296_v15  ;;  %v640_v42 = vadd.f32 %v7909_v23, %v639_v51 }
 0x250   :  { %v8299_v16 = vpop.f32.mrf.mxu1 }
 0x251   :  { %12125 = vst [vmem:[#allocation47_spill] sm:$0xff] %v8299_v16  ;;  %v717_v56 = vmax.f32 %v640_v42, 0.0  ;;  %6876 = vmatmul.msk.f32.gmra.mxu0 %vm11_vm0, %v2561_v7  ;;  %v2259_v16 = vld [vmem:[#allocation2 + $0x70] sm:$0xff] }
 0x252   :  { %v8303_v28 = vld [vmem:[#allocation2 + $0x470] sm:$0xff]  ;;  %6840 = vmatmul.msk.f32.gmra.mxu2 %vm11_vm0, %v2259_v16 }
 0x253   :  { %12126 = vst [vmem:[#allocation48_spill] sm:$0xff] %v8303_v28  ;;  %v1964_v2 = vld [vmem:[#allocation2 + $0x471] sm:$0xff]  ;;  %6779 = vmatmul.msk.f32.gmra.mxu1 %vm11_vm0, %v8303_v28  ;;  %v8309_v11 = vpop.f32.mrf.mxu2 }
 0x254   :  { %785 = vst.msk [vmem:[#allocation2 + $0x481] sm:$0xff] %vm11_vm0, %v717_v56  ;;  %6811 = vmatmul.msk.f32.gmra.mxu3 %vm11_vm0, %v1964_v2  ;;  %v2563_v16 = vld [vmem:[#allocation2 + $0xf1] sm:$0xff] }
 0x255   :  { %12127 = vst [vmem:[#allocation49_spill] sm:$0xff] %v8309_v11 }
 0x256   :  { %v642_v24 = vpop.f32.mrf.mxu0  ;;  %v8311_v51 = vpop.f32.mrf.mxu3 }
 0x257   :  { %12128 = vst [vmem:[#allocation50_spill] sm:$0xff] %v8311_v51  ;;  %v643_v42 = vadd.f32 %v7909_v23, %v642_v24  ;;  %v2260_v51 = vld [vmem:[#allocation2 + $0x80] sm:$0xff] }
 0x258   :  { %v8314_v7 = vpop.f32.mrf.mxu1 }
 0x259   :  { %12129 = vst [vmem:[#allocation51_spill] sm:$0xff] %v8314_v7  ;;  %v718_v15 = vmax.f32 %v643_v42, 0.0  ;;  %6877 = vmatmul.msk.f32.gmra.mxu0 %vm11_vm0, %v2562_v31 }
 0x25a   :  { %6841 = vmatmul.msk.f32.gmra.mxu2 %vm11_vm0, %v2260_v51  ;;  %v2564_v51 = vld [vmem:[#allocation2 + $0x101] sm:$0xff] }
 0x25b   :  { %v8318_v56 = vld [vmem:[#allocation2 + $0x480] sm:$0xff]  ;;  %786 = vst.msk [vmem:[#allocation2 + $0x491] sm:$0xff] %vm11_vm0, %v718_v15  ;;  %v8324_v2 = vpop.f32.mrf.mxu2 }
 0x25c   :  { %12130 = vst [vmem:[#allocation52_spill] sm:$0xff] %v8318_v56  ;;  %v1965_v28 = vld [vmem:[#allocation2 + $0x481] sm:$0xff]  ;;  %6780 = vmatmul.msk.f32.gmra.mxu1 %vm11_vm0, %v8318_v56 }
 0x25d   :  { %6812 = vmatmul.msk.f32.gmra.mxu3 %vm11_vm0, %v1965_v28  ;;  %12131 = vst [vmem:[#allocation53_spill] sm:$0xff] %v8324_v2 }
 0x25e   :  { %v645_v24 = vpop.f32.mrf.mxu0  ;;  %v8326_v7 = vpop.f32.mrf.mxu3 }
 0x25f   :  { %12132 = vst [vmem:[#allocation54_spill] sm:$0xff] %v8326_v7  ;;  %v646_v42 = vadd.f32 %v7909_v23, %v645_v24  ;;  %v2261_v7 = vld [vmem:[#allocation2 + $0xb0] sm:$0xff] }
 0x260   :  { %v8329_v31 = vpop.f32.mrf.mxu1 }
 0x261   :  { %12133 = vst [vmem:[#allocation55_spill] sm:$0xff] %v8329_v31  ;;  %v719_v11 = vmax.f32 %v646_v42, 0.0  ;;  %6878 = vmatmul.msk.f32.gmra.mxu0 %vm11_vm0, %v2563_v16 }
 0x262   :  { %v8333_v15 = vld [vmem:[#allocation2 + $0x490] sm:$0xff]  ;;  %6842 = vmatmul.msk.f32.gmra.mxu2 %vm11_vm0, %v2261_v7 }
 0x263   :  { %12134 = vst [vmem:[#allocation56_spill] sm:$0xff] %v8333_v15  ;;  %v1966_v56 = vld [vmem:[#allocation2 + $0x491] sm:$0xff]  ;;  %v8339_v28 = vpop.f32.mrf.mxu2 }
 0x264   :  { %787 = vst.msk [vmem:[#allocation2 + $0x4a1] sm:$0xff] %vm11_vm0, %v719_v11  ;;  %6781 = vmatmul.msk.f32.gmra.mxu1 %vm11_vm0, %v8333_v15  ;;  %v2565_v7 = vld [vmem:[#allocation2 + $0x111] sm:$0xff] }
 0x265   :  { %6813 = vmatmul.msk.f32.gmra.mxu3 %vm11_vm0, %v1966_v56  ;;  %12135 = vst [vmem:[#allocation57_spill] sm:$0xff] %v8339_v28 }
 0x266   :  { %v648_v24 = vpop.f32.mrf.mxu0  ;;  %v8341_v31 = vpop.f32.mrf.mxu3 }
 0x267   :  { %12136 = vst [vmem:[#allocation58_spill] sm:$0xff] %v8341_v31  ;;  %v649_v42 = vadd.f32 %v7909_v23, %v648_v24  ;;  %v2262_v31 = vld [vmem:[#allocation2 + $0xc0] sm:$0xff] }
 0x268   :  { %v8344_v16 = vpop.f32.mrf.mxu1 }
 0x269   :  { %12137 = vst [vmem:[#allocation59_spill] sm:$0xff] %v8344_v16  ;;  %v720_v2 = vmax.f32 %v649_v42, 0.0  ;;  %6879 = vmatmul.msk.f32.gmra.mxu0 %vm11_vm0, %v2564_v51 }
 0x26a   :  { %6843 = vmatmul.msk.f32.gmra.mxu2 %vm11_vm0, %v2262_v31 }
 0x26b   :  { %v8348_v11 = vld [vmem:[#allocation2 + $0x4a0] sm:$0xff]  ;;  %788 = vst.msk [vmem:[#allocation2 + $0x4b1] sm:$0xff] %vm11_vm0, %v720_v2  ;;  %v8354_v56 = vpop.f32.mrf.mxu2 }
 0x26c   :  { %12138 = vst [vmem:[#allocation60_spill] sm:$0xff] %v8348_v11  ;;  %v1967_v15 = vld [vmem:[#allocation2 + $0x4a1] sm:$0xff]  ;;  %6782 = vmatmul.msk.f32.gmra.mxu1 %vm11_vm0, %v8348_v11 }
 0x26d   :  { %6814 = vmatmul.msk.f32.gmra.mxu3 %vm11_vm0, %v1967_v15  ;;  %12139 = vst [vmem:[#allocation61_spill] sm:$0xff] %v8354_v56 }
 0x26e   :  { %v651_v24 = vpop.f32.mrf.mxu0  ;;  %v8356_v16 = vpop.f32.mrf.mxu3 }
 0x26f   :  { %12140 = vst [vmem:[#allocation62_spill] sm:$0xff] %v8356_v16  ;;  %v652_v42 = vadd.f32 %v7909_v23, %v651_v24  ;;  %v3166_v24 = vld [vmem:[%s12061_s1 + $0x240] sm:$0xff]  ;;  %v2263_v16 = vld [vmem:[#allocation2 + $0xd0] sm:$0xff] }
 0x270   :  { %v8359_v51 = vpop.f32.mrf.mxu1  ;;  %3227 = vmatpush.msra.mxu0 %v3166_v24  ;;  %v3165_v24 = vld [vmem:[%s12061_s1 + $0x238] sm:$0xff] }
 0x271   :  { %12141 = vst [vmem:[#allocation63_spill] sm:$0xff] %v8359_v51  ;;  %v721_v28 = vmax.f32 %v652_v42, 0.0  ;;  %6880 = vmatmul.msk.f32.gmra.mxu0 %vm11_vm0, %v2565_v7 }
 0x272   :  { %v8363_v2 = vld [vmem:[#allocation2 + $0x4b0] sm:$0xff]  ;;  %6844 = vmatmul.msk.f32.gmra.mxu2 %vm11_vm0, %v2263_v16  ;;  %3228 = vmatpush.msra.mxu0 %v3165_v24  ;;  %v3163_v16 = vld [vmem:[%s12061_s1 + $0x228] sm:$0xff] }
 0x273   :  { %12142 = vst [vmem:[#allocation64_spill] sm:$0xff] %v8363_v2  ;;  %v1968_v11 = vld [vmem:[#allocation2 + $0x4b1] sm:$0xff]  ;;  %v8369_v15 = vpop.f32.mrf.mxu2 }
 0x274   :  { %789 = vst.msk [vmem:[#allocation2 + $0x4c1] sm:$0xff] %vm11_vm0, %v721_v28  ;;  %6783 = vmatmul.msk.f32.gmra.mxu1 %vm11_vm0, %v8363_v2  ;;  %v2566_v28 = vld [vmem:[#allocation2 + $0x121] sm:$0xff] }
 0x275   :  { %6815 = vmatmul.msk.f32.gmra.mxu3 %vm11_vm0, %v1968_v11  ;;  %12143 = vst [vmem:[#allocation65_spill] sm:$0xff] %v8369_v15  ;;  %v1012_v11 = vadd.f32 %v7731_v38, %v7889_v14  ;;  %v3164_v14 = vld [vmem:[%s12061_s1 + $0x230] sm:$0xff] }
 0x276   :  { %v654_v42 = vpop.f32.mrf.mxu0  ;;  %v8374_v7 = vpop.f32.mrf.mxu3  ;;  %3229 = vmatpush.msra.mxu0 %v3164_v14 }
 0x277   :  { %v655_v31 = vadd.f32 %v7909_v23, %v654_v42  ;;  %v1057_v23 = vadd.f32 %v7952_v62, %v8122_v43  ;;  %v1192_v62 = vadd.f32 %v7820_v36, %v1012_v11  ;;  %v2123_v11 = vld [vmem:[%s12061_s1 + $0x160] sm:$0xff] }
 0x278   :  { %v8377_v51 = vpop.f32.mrf.mxu1  ;;  %3230 = vmatpush.msra.mxu0 %v3163_v16  ;;  %2184 = vmatpush.msrb.mxu1 %v2123_v11  ;;  %v2120_v11 = vld [vmem:[%s12061_s1 + $0x148] sm:$0xff] }
 0x279   :  { %12144 = vst [vmem:[#allocation66_spill] sm:$0xff] %v8377_v51  ;;  %v722_v56 = vmax.f32 %v655_v31, 0.0  ;;  %6881 = vmatmul.msk.f32.gmra.mxu0 %vm11_vm0, %v2566_v28  ;;  %v1207_v42 = vadd.f32 %v8155_v5, %v1057_v23  ;;  %v2264_v28 = vld [vmem:[#allocation2 + $0xe0] sm:$0xff]  ;;  %v2868_v5 = vld [vmem:[%s12061_s1 + $0x200] sm:$0xff] }
 0x27a   :  { %6845 = vmatmul.msk.f32.gmra.mxu2 %vm11_vm0, %v2264_v28 }
 0x27b   :  { %v8383_v2 = vld [vmem:[#allocation2 + $0x4c0] sm:$0xff]  ;;  %790 = vst.msk [vmem:[#allocation2 + $0x4d1] sm:$0xff] %vm11_vm0, %v722_v56  ;;  %v8394_v38 = vpop.f32.mrf.mxu2  ;;  %2929 = vmatpush.msra.mxu2 %v2868_v5  ;;  %v2265_v5 = vld [vmem:[#allocation2 + $0xf0] sm:$0xff] }
 0x27c   :  { %v1969_v15 = vld [vmem:[#allocation2 + $0x4c1] sm:$0xff]  ;;  %6784 = vmatmul.msk.f32.gmra.mxu1 %vm11_vm0, %v8383_v2 }
 0x27d   :  { %6816 = vmatmul.msk.f32.gmra.mxu3 %vm11_vm0, %v1969_v15  ;;  %v1341_v15 = vadd.f32 %v8164_v54, %v1192_v62  ;;  %v2421_v54 = vld [vmem:[%s12061_s1 + $0x1a0] sm:$0xff]  ;;  %v2122_v62 = vld [vmem:[%s12061_s1 + $0x158] sm:$0xff] }
 0x27e   :  { %v8403_v43 = vpop.f32.mrf.mxu3  ;;  %v8405_v56 = vpop.f32.mrf.mxu0  ;;  %2482 = vmatpush.msra.mxu3 %v2421_v54  ;;  %2185 = vmatpush.msrb.mxu1 %v2122_v62  ;;  %v2418_v54 = vld [vmem:[%s12061_s1 + $0x188] sm:$0xff] }
 0x27f   :  { %v1490_v23 = vadd.f32 %v7967_v12, %v1341_v15  ;;  %v2419_v15 = vld [vmem:[%s12061_s1 + $0x190] sm:$0xff] }
 0x280   :  { %v1338_v31 = vpop.f32.mrf.mxu1 }
 0x281   :  { %v1356_v24 = vadd.f32 %v1338_v31, %v1207_v42  ;;  %6930 = vmatmul.msk.f32.vlgmr.msra.gmra.mxu0 %vm11_vm0, %v8186_v0  ;;  %v1015_v0 = vadd.f32 %v7743_v46, %v7912_v26  ;;  %v2420_v46 = vld [vmem:[%s12061_s1 + $0x198] sm:$0xff]  ;;  %v2866_v31 = vld [vmem:[%s12061_s1 + $0x1f0] sm:$0xff] }
 0x282   :  { %v8412_v51 = vld [vmem:[#allocation2 + $0x4d0] sm:$0xff]  ;;  %2483 = vmatpush.msra.mxu3 %v2420_v46  ;;  %6846 = vmatmul.msk.f32.gmra.mxu2 %vm11_vm0, %v2265_v5 }
 0x283   :  { %v1970_v36 = vld [vmem:[#allocation2 + $0x4d1] sm:$0xff]  ;;  %v8429_v14 = vpop.f32.mrf.mxu2  ;;  %v1505_v16 = vadd.f32 %v8222_v47, %v1356_v24  ;;  %v2121_v47 = vld [vmem:[%s12061_s1 + $0x150] sm:$0xff]  ;;  %v1640_v24 = vadd.f32 %v8179_v52, %v1490_v23  ;;  %v1018_v23 = vadd.f32 %v7754_v53, %v7927_v40  ;;  %v2266_v40 = vld [vmem:[#allocation2 + $0x100] sm:$0xff] }
 0x284   :  { %6785 = vmatmul.msk.f32.gmra.mxu1 %vm11_vm0, %v8412_v51  ;;  %v2867_v26 = vld [vmem:[%s12061_s1 + $0x1f8] sm:$0xff]  ;;  %2484 = vmatpush.msra.mxu3 %v2419_v15  ;;  %v2104_v52 = vld [vmem:[#allocation2 + $0x282] sm:$0xff] }
 0x285   :  { %6817 = vmatmul.msk.f32.gmra.mxu3 %vm11_vm0, %v1970_v36  ;;  %2930 = vmatpush.msra.mxu2 %v2867_v26  ;;  %v1193_v36 = vadd.f32 %v7833_v48, %v1015_v0  ;;  %v2402_v46 = vld [vmem:[#allocation2 + $0x150] sm:$0xff] }
 0x286   :  { %v1637_v12 = vpop.f32.mrf.mxu3  ;;  %v8441_v42 = vpop.f32.mrf.mxu0  ;;  %2186 = vmatpush.msrb.mxu1 %v2121_v47  ;;  %2485 = vmatpush.msra.mxu3 %v2418_v54 }
 0x287   :  { %v8452_v28 = vadd.f32 %v1637_v12, %v1505_v16  ;;  %2931 = vmatpush.msra.mxu2 %v2866_v31  ;;  %v2865_v16 = vld [vmem:[%s12061_s1 + $0x1e8] sm:$0xff]  ;;  %v1342_v48 = vadd.f32 %v8182_v8, %v1193_v36  ;;  %v1194_v31 = vadd.f32 %v7860_v63, %v1018_v23 }
 0x288   :  { %v1742_v62 = vpop.f32.mrf.mxu1  ;;  %2187 = vmatpush.msrb.mxu1 %v2120_v11 }
 0x289   :  { %v1790_v0 = vadd.f32 %v1742_v62, %v1640_v24  ;;  %6931 = vmatmul.msk.f32.gmra.mxu0 %vm11_vm0, %v8201_v59  ;;  %2932 = vmatpush.msra.mxu2 %v2865_v16  ;;  %v1491_v8 = vadd.f32 %v7980_v27, %v1342_v48  ;;  %v1343_v36 = vadd.f32 %v8197_v35, %v1194_v31  ;;  %v2105_v27 = vld [vmem:[#allocation2 + $0x292] sm:$0xff] }
 0x28a   :  { %6847 = vmatmul.msk.f32.gmra.mxu2 %vm11_vm0, %v2266_v40 }
 0x28b   :  { %v8472_v26 = vpop.f32.mrf.mxu2  ;;  %v1939_v12 = vadd.f32 %v8237_v44, %v1790_v0  ;;  %v1641_v15 = vadd.f32 %v8194_v13, %v1491_v8  ;;  %v1021_v44 = vadd.f32 %v7764_v60, %v7943_v55  ;;  %v2403_v13 = vld [vmem:[#allocation2 + $0x160] sm:$0xff]  ;;  %v1492_v54 = vadd.f32 %v7995_v45, %v1343_v36  ;;  %v8501_v60 = vld [vmem:[#allocation2 + $0x110] sm:$0xff] }
 0x28c   :  { %6818 = vmatmul.msk.f32.vlgmr.msrb.gmra.mxu1 %vm11_vm0, %v2104_v52 }
 0x28d   :  { %6850 = vmatmul.msk.f32.vlgmr.msra.gmra.mxu3 %vm11_vm0, %v2402_v46  ;;  %v1195_v16 = vadd.f32 %v7901_v20, %v1021_v44  ;;  %v2404_v20 = vld [vmem:[#allocation2 + $0x170] sm:$0xff] }
 0x28e   :  { %v8477_v47 = vpop.f32.mrf.mxu0  ;;  %v2040_v59 = vpop.f32.mrf.mxu3 }
 0x28f   :  { %v8481_v53 = vadd.f32 %v2040_v59, %v1939_v12  ;;  %v1344_v48 = vadd.f32 %v8212_v4, %v1195_v16  ;;  %v12146_v16 = vld [vmem:[#allocation13_spill] sm:$0xff] }
 0x290   :  { %v1745_v24 = vpop.f32.mrf.mxu1 }
 0x291   :  { %v1791_v11 = vadd.f32 %v1745_v24, %v1641_v15  ;;  %6932 = vmatmul.msk.f32.gmra.mxu0 %vm11_vm0, %v8216_v29  ;;  %v1642_v29 = vadd.f32 %v8209_v30, %v1492_v54  ;;  %v1024_v30 = vadd.f32 %v7774_v3, %v7958_v6  ;;  %v1493_v4 = vadd.f32 %v8010_v1, %v1344_v48  ;;  %v8522_v3 = vld [vmem:[#allocation2 + $0x120] sm:$0xff] }
 0x292   :  { %6848 = vmatmul.msk.f32.gmra.mxu2 %vm11_vm0, %v8501_v60  ;;  %v8559_v48 = vld [vmem:[#allocation2 + $0x22] sm:$0xff] }
 0x293   :  { %v8490_v63 = vpop.f32.mrf.mxu2  ;;  %v1940_v35 = vadd.f32 %v8252_v61, %v1791_v11  ;;  %v2106_v61 = vld [vmem:[#allocation2 + $0x2a2] sm:$0xff]  ;;  %v1196_v12 = vadd.f32 %v7925_v39, %v1024_v30  ;;  %v12148_v30 = vld [vmem:[#allocation43_spill] sm:$0xff] }
 0x294   :  { %6819 = vmatmul.msk.f32.gmra.mxu1 %vm11_vm0, %v2105_v27  ;;  %v2405_v39 = vld [vmem:[#allocation2 + $0x180] sm:$0xff] }
 0x295   :  { %6851 = vmatmul.msk.f32.gmra.mxu3 %vm11_vm0, %v2403_v13  ;;  %v1345_v15 = vadd.f32 %v8227_v33, %v1196_v12  ;;  %v12151_v12 = vld [vmem:[#allocation22_spill] sm:$0xff] }
 0x296   :  { %v8495_v5 = vpop.f32.mrf.mxu0 }
 0x297   :  { %v2043_v62 = vpop.f32.mrf.mxu3  ;;  %v1494_v33 = vadd.f32 %v8025_v21, %v1345_v15  ;;  %v2108_v21 = vld [vmem:[#allocation2 + $0x2c2] sm:$0xff] }
 0x298   :  { %v8499_v52 = vadd.f32 %v2043_v62, %v1940_v35  ;;  %v1748_v55 = vpop.f32.mrf.mxu1  ;;  %v12145_v62 = vld [vmem:[#allocation39_spill] sm:$0xff]  ;;  %v12152_v15 = vld [vmem:[#allocation49_spill] sm:$0xff] }
 0x299   :  { %v1792_v45 = vadd.f32 %v1748_v55, %v1642_v29  ;;  %6933 = vmatmul.msk.f32.gmra.mxu0 %vm11_vm0, %v8231_v25  ;;  %v1643_v25 = vadd.f32 %v8224_v22, %v1493_v4  ;;  %v1027_v22 = vadd.f32 %v7784_v10, %v7973_v19  ;;  %v1644_v36 = vadd.f32 %v8239_v18, %v1494_v33  ;;  %v2849_v10 = vld [vmem:[#allocation2 + $0x12] sm:$0xff]  ;;  %v12150_v4 = vld [vmem:[#allocation5_spill] sm:$0xff] }
 0x29a   :  { %6849 = vmatmul.msk.f32.gmra.mxu2 %vm11_vm0, %v8522_v3  ;;  %v1030_v18 = vadd.f32 %v7794_v17, %v7988_v37  ;;  %v12147_v37 = vld [vmem:[#allocation40_spill] sm:$0xff]  ;;  %v12154_v33 = vld [vmem:[#allocation14_spill] sm:$0xff] }
 0x29b   :  { %v8511_v0 = vpop.f32.mrf.mxu2  ;;  %v1941_v23 = vadd.f32 %v8267_v34, %v1792_v45  ;;  %v2107_v34 = vld [vmem:[#allocation2 + $0x2b2] sm:$0xff] }
 0x29c   :  { %6820 = vmatmul.msk.f32.gmra.mxu1 %vm11_vm0, %v2106_v61 }
 0x29d   :  { %6852 = vmatmul.msk.f32.gmra.mxu3 %vm11_vm0, %v2404_v20  ;;  %v12149_v20 = vld [vmem:[#allocation16_spill] sm:$0xff] }
 0x29e   :  { %v8516_v46 = vpop.f32.mrf.mxu0 }
 0x29f   :  { %v2046_v8 = vpop.f32.mrf.mxu3 }
 0x2a0   :  { %v8520_v59 = vadd.f32 %v2046_v8, %v1941_v23  ;;  %v1751_v6 = vpop.f32.mrf.mxu1  ;;  %v1033_v23 = vadd.f32 %v12150_v4, %v12149_v20  ;;  %v2407_v8 = vld [vmem:[#allocation2 + $0x1a0] sm:$0xff] }
 0x2a1   :  { %v1793_v1 = vadd.f32 %v1751_v6, %v1643_v25  ;;  %6934 = vmatmul.msk.f32.gmra.mxu0 %vm11_vm0, %v8246_v50  ;;  %v1197_v50 = vadd.f32 %v7946_v58, %v1027_v22  ;;  %v2406_v58 = vld [vmem:[#allocation2 + $0x190] sm:$0xff]  ;;  %v12153_v22 = vld [vmem:[#allocation41_spill] sm:$0xff] }
 0x2a2   :  { %6898 = vmatmul.msk.f32.vlgmr.msra.gmra.mxu2 %vm11_vm0, %v2849_v10  ;;  %v3154_v10 = vld [vmem:[#allocation2 + $0x440] sm:$0xff] }
 0x2a3   :  { %v8532_v31 = vpop.f32.mrf.mxu2  ;;  %v1942_v40 = vadd.f32 %v8282_v9, %v1793_v1  ;;  %v1346_v44 = vadd.f32 %v8242_v32, %v1197_v50  ;;  %v8600_v4 = vld [vmem:[#allocation2 + $0x42] sm:$0xff] }
 0x2a4   :  { %6821 = vmatmul.msk.f32.gmra.mxu1 %vm11_vm0, %v2107_v34 }
 0x2a5   :  { %6853 = vmatmul.msk.f32.gmra.mxu3 %vm11_vm0, %v2405_v39  ;;  %v1495_v54 = vadd.f32 %v8040_v49, %v1346_v44 }
 0x2a6   :  { %v8541_v27 = vpop.f32.mrf.mxu0 }
 0x2a7   :  { %v2049_v24 = vpop.f32.mrf.mxu3  ;;  %v1645_v29 = vadd.f32 %v12145_v62, %v1495_v54 }
 0x2a8   :  { %v8539_v11 = vadd.f32 %v2049_v24, %v1942_v40  ;;  %v1754_v19 = vpop.f32.mrf.mxu1  ;;  %v1199_v40 = vadd.f32 %v12154_v33, %v1033_v23  ;;  %v2409_v33 = vld [vmem:[#allocation2 + $0x1c0] sm:$0xff] }
 0x2a9   :  { %v1794_v13 = vadd.f32 %v1754_v19, %v1644_v36  ;;  %6935 = vmatmul.msk.f32.gmra.mxu0 %vm11_vm0, %v8261_v41  ;;  %v1198_v41 = vadd.f32 %v12146_v16, %v1030_v18  ;;  %v8580_v36 = vld [vmem:[#allocation2 + $0x32] sm:$0xff]  ;;  %v12156_v18 = vld [vmem:[#allocation17_spill] sm:$0xff] }
 0x2aa   :  { %6899 = vmatmul.msk.f32.gmra.mxu2 %vm11_vm0, %v8559_v48  ;;  %v12155_v19 = vld [vmem:[#allocation42_spill] sm:$0xff] }
 0x2ab   :  { %v8550_v9 = vpop.f32.mrf.mxu2  ;;  %v1943_v32 = vadd.f32 %v8294_v57, %v1794_v13  ;;  %v1347_v45 = vadd.f32 %v12147_v37, %v1198_v41  ;;  %v2109_v57 = vld [vmem:[#allocation2 + $0x2d2] sm:$0xff]  ;;  %v1348_v44 = vadd.f32 %v12155_v19, %v1199_v40  ;;  %v12159_v41 = vld [vmem:[#allocation53_spill] sm:$0xff] }
 0x2ac   :  { %6822 = vmatmul.msk.f32.gmra.mxu1 %vm11_vm0, %v2108_v21  ;;  %v2110_v21 = vld [vmem:[#allocation2 + $0x2e2] sm:$0xff] }
 0x2ad   :  { %6854 = vmatmul.msk.f32.gmra.mxu3 %vm11_vm0, %v2406_v58  ;;  %v1496_v6 = vadd.f32 %v12151_v12, %v1347_v45  ;;  %v12157_v58 = vld [vmem:[#allocation6_spill] sm:$0xff]  ;;  %v12160_v45 = vld [vmem:[#allocation44_spill] sm:$0xff] }
 0x2ae   :  { %v8564_v61 = vpop.f32.mrf.mxu0  ;;  %v1036_v54 = vadd.f32 %v12157_v58, %v12156_v18  ;;  %v12168_v18 = vld [vmem:[#allocation46_spill] sm:$0xff] }
 0x2af   :  { %v2052_v35 = vpop.f32.mrf.mxu3  ;;  %v1646_v39 = vadd.f32 %v12153_v22, %v1496_v6  ;;  %v12165_v22 = vld [vmem:[#allocation7_spill] sm:$0xff] }
 0x2b0   :  { %v8557_v55 = vadd.f32 %v2052_v35, %v1943_v32  ;;  %v1757_v17 = vpop.f32.mrf.mxu1  ;;  %v2408_v35 = vld [vmem:[#allocation2 + $0x1b0] sm:$0xff] }
 0x2b1   :  { %v1795_v49 = vadd.f32 %v1757_v17, %v1645_v29  ;;  %6936 = vmatmul.msk.f32.gmra.mxu0 %vm11_vm0, %v12148_v30  ;;  %v12158_v29 = vld [vmem:[#allocation25_spill] sm:$0xff]  ;;  %v12161_v30 = vld [vmem:[#allocation15_spill] sm:$0xff] }
 0x2b2   :  { %6900 = vmatmul.msk.f32.gmra.mxu2 %vm11_vm0, %v8580_v36  ;;  %v1497_v16 = vadd.f32 %v12158_v29, %v1348_v44  ;;  %v12167_v44 = vld [vmem:[#allocation57_spill] sm:$0xff] }
 0x2b3   :  { %v8571_v25 = vpop.f32.mrf.mxu2  ;;  %v1944_v1 = vadd.f32 %v12152_v15, %v1795_v49  ;;  %v12163_v15 = vld [vmem:[#allocation48_spill] sm:$0xff] }
 0x2b4   :  { %6823 = vmatmul.msk.f32.gmra.mxu1 %vm11_vm0, %v2109_v57  ;;  %v1647_v49 = vadd.f32 %v12160_v45, %v1497_v16  ;;  %v1200_v57 = vadd.f32 %v12161_v30, %v1036_v54  ;;  %v12169_v54 = vld [vmem:[#allocation18_spill] sm:$0xff]  ;;  %v12171_v30 = vld [vmem:[#allocation52_spill] sm:$0xff] }
 0x2b5   :  { %6855 = vmatmul.msk.f32.gmra.mxu3 %vm11_vm0, %v2407_v8  ;;  %v12162_v8 = vld [vmem:[#allocation45_spill] sm:$0xff]  ;;  %v8621_v16 = vld [vmem:[#allocation2 + $0x52] sm:$0xff] }
 0x2b6   :  { %v8588_v32 = vpop.f32.mrf.mxu0  ;;  %v1349_v12 = vadd.f32 %v12162_v8, %v1200_v57  ;;  %v12172_v57 = vld [vmem:[#allocation21_spill] sm:$0xff] }
 0x2b7   :  { %v2055_v34 = vpop.f32.mrf.mxu3 }
 0x2b8   :  { %v8578_v24 = vadd.f32 %v2055_v34, %v1944_v1  ;;  %v1760_v50 = vpop.f32.mrf.mxu1  ;;  %v2111_v1 = vld [vmem:[#allocation2 + $0x2f2] sm:$0xff] }
 0x2b9   :  { %v1796_v13 = vadd.f32 %v1760_v50, %v1646_v39  ;;  %6937 = vmatmul.msk.f32.gmra.mxu0 %vm11_vm0, %v3154_v10  ;;  %v12164_v34 = vld [vmem:[#allocation19_spill] sm:$0xff]  ;;  %v12166_v50 = vld [vmem:[#allocation28_spill] sm:$0xff] }
 0x2ba   :  { %6901 = vmatmul.msk.f32.gmra.mxu2 %vm11_vm0, %v8600_v4  ;;  %v1039_v39 = vadd.f32 %v12165_v22, %v12164_v34  ;;  %v1498_v10 = vadd.f32 %v12166_v50, %v1349_v12  ;;  %v2410_v12 = vld [vmem:[#allocation2 + $0x1f0] sm:$0xff]  ;;  %v12175_v34 = vld [vmem:[#allocation61_spill] sm:$0xff] }
 0x2bb   :  { %v8591_v62 = vpop.f32.mrf.mxu2  ;;  %v1945_v17 = vadd.f32 %v12159_v41, %v1796_v13 }
 0x2bc   :  { %6824 = vmatmul.msk.f32.gmra.mxu1 %vm11_vm0, %v2110_v21  ;;  %v1648_v58 = vadd.f32 %v12168_v18, %v1498_v10  ;;  %v12177_v10 = vld [vmem:[#allocation20_spill] sm:$0xff] }
 0x2bd   :  { %6856 = vmatmul.msk.f32.gmra.mxu3 %vm11_vm0, %v2408_v35  ;;  %v1201_v35 = vadd.f32 %v12169_v54, %v1039_v39  ;;  %v8642_v18 = vld [vmem:[#allocation2 + $0x62] sm:$0xff]  ;;  %v12178_v54 = vld [vmem:[#allocation51_spill] sm:$0xff] }
 0x2be   :  { %v8614_v19 = vpop.f32.mrf.mxu0 }
 0x2bf   :  { %v2058_v37 = vpop.f32.mrf.mxu3 }
 0x2c0   :  { %v8598_v20 = vadd.f32 %v2058_v37, %v1945_v17  ;;  %v1763_v23 = vpop.f32.mrf.mxu1  ;;  %v2112_v17 = vld [vmem:[#allocation2 + $0x322] sm:$0xff]  ;;  %v12170_v37 = vld [vmem:[#allocation47_spill] sm:$0xff] }
 0x2c1   :  { %v1797_v6 = vadd.f32 %v1763_v23, %v1647_v49  ;;  %6938 = vmatmul.msk.f32.gmra.mxu0 %vm11_vm0, %v12163_v15  ;;  %v1350_v45 = vadd.f32 %v12170_v37, %v1201_v35  ;;  %v12173_v23 = vld [vmem:[#allocation8_spill] sm:$0xff]  ;;  %v12174_v15 = vld [vmem:[#allocation31_spill] sm:$0xff] }
 0x2c2   :  { %6902 = vmatmul.msk.f32.gmra.mxu2 %vm11_vm0, %v8621_v16  ;;  %v1042_v8 = vadd.f32 %v12173_v23, %v12172_v57  ;;  %v2113_v37 = vld [vmem:[#allocation2 + $0x332] sm:$0xff]  ;;  %v2411_v57 = vld [vmem:[#allocation2 + $0x200] sm:$0xff] }
 0x2c3   :  { %v8610_v40 = vpop.f32.mrf.mxu2  ;;  %v1946_v13 = vadd.f32 %v12167_v44, %v1797_v6 }
 0x2c4   :  { %6825 = vmatmul.msk.f32.gmra.mxu1 %vm11_vm0, %v2111_v1  ;;  %v1499_v1 = vadd.f32 %v12174_v15, %v1350_v45  ;;  %v1202_v44 = vadd.f32 %v12177_v10, %v1042_v8  ;;  %v12180_v45 = vld [vmem:[#allocation24_spill] sm:$0xff]  ;;  %v12182_v8 = vld [vmem:[#allocation34_spill] sm:$0xff]  ;;  %v12183_v15 = vld [vmem:[#allocation65_spill] sm:$0xff] }
 0x2c5   :  { %6857 = vmatmul.msk.f32.gmra.mxu3 %vm11_vm0, %v2409_v33  ;;  %v12176_v33 = vld [vmem:[#allocation50_spill] sm:$0xff] }
 0x2c6   :  { %v1649_v50 = vadd.f32 %v12176_v33, %v1499_v1  ;;  %v1351_v35 = vadd.f32 %v12178_v54, %v1202_v44  ;;  %v12185_v33 = vld [vmem:[#allocation23_spill] sm:$0xff] }
 0x2c7   :  { %v2061_v21 = vpop.f32.mrf.mxu3  ;;  %v2855_v44 = vld [vmem:[#allocation2 + $0x72] sm:$0xff] }
 0x2c8   :  { %v8619_v29 = vadd.f32 %v2061_v21, %v1946_v13  ;;  %v1766_v41 = vpop.f32.mrf.mxu1  ;;  %v8638_v13 = vpop.f32.mrf.mxu0  ;;  %v12186_v54 = vld [vmem:[#allocation55_spill] sm:$0xff] }
 0x2c9   :  { %v1798_v49 = vadd.f32 %v1766_v41, %v1648_v58  ;;  %6939 = vmatmul.msk.f32.gmra.mxu0 %vm11_vm0, %v12171_v30 }
 0x2ca   :  { %6903 = vmatmul.msk.f32.gmra.mxu2 %vm11_vm0, %v8642_v18 }
 0x2cb   :  { %v8631_v6 = vpop.f32.mrf.mxu2  ;;  %v1947_v22 = vadd.f32 %v12175_v34, %v1798_v49  ;;  %v12181_v49 = vld [vmem:[#allocation9_spill] sm:$0xff] }
 0x2cc   :  { %6826 = vmatmul.msk.f32.gmra.mxu1 %vm11_vm0, %v2112_v17  ;;  %v12179_v17 = vld [vmem:[#allocation56_spill] sm:$0xff]  ;;  %v1045_v30 = vadd.f32 %v12181_v49, %v12180_v45 }
 0x2cd   :  { %6858 = vmatmul.msk.f32.gmra.mxu3 %vm11_vm0, %v2410_v12  ;;  %v1500_v12 = vadd.f32 %v12182_v8, %v1351_v35  ;;  %v12188_v49 = vld [vmem:[#allocation60_spill] sm:$0xff] }
 0x2ce   :  { %v2114_v35 = vld [vmem:[#allocation2 + $0x342] sm:$0xff] }
 0x2cf   :  { %v2064_v39 = vpop.f32.mrf.mxu3 }
 0x2d0   :  { %v8640_v21 = vadd.f32 %v2064_v39, %v1947_v22  ;;  %v1769_v58 = vpop.f32.mrf.mxu1  ;;  %v12184_v22 = vld [vmem:[#allocation54_spill] sm:$0xff] }
 0x2d1   :  { %v1799_v41 = vadd.f32 %v1769_v58, %v1649_v50  ;;  %6940 = vmatmul.msk.f32.gmra.mxu0 %vm11_vm0, %v12179_v17  ;;  %v1650_v39 = vadd.f32 %v12184_v22, %v1500_v12  ;;  %v1203_v50 = vadd.f32 %v12185_v33, %v1045_v30  ;;  %v2412_v30 = vld [vmem:[#allocation2 + $0x210] sm:$0xff] }
 0x2d2   :  { %6904 = vmatmul.msk.f32.gmra.mxu2 %vm11_vm0, %v2855_v44 }
 0x2d3   :  { %v8652_v23 = vpop.f32.mrf.mxu2  ;;  %v1948_v1 = vadd.f32 %v12183_v15, %v1799_v41  ;;  %v1352_v17 = vadd.f32 %v12186_v54, %v1203_v50  ;;  %v12189_v41 = vld [vmem:[#allocation27_spill] sm:$0xff]  ;;  %v12193_v50 = vld [vmem:[#allocation26_spill] sm:$0xff]  ;;  %v2856_v54 = vld [vmem:[#allocation2 + $0x82] sm:$0xff] }
 0x2d4   :  { %6827 = vmatmul.msk.f32.gmra.mxu1 %vm11_vm0, %v2113_v37  ;;  %v8663_v37 = vpop.f32.mrf.mxu0  ;;  %v12191_v15 = vld [vmem:[#allocation35_spill] sm:$0xff] }
 0x2d5   :  { %6859 = vmatmul.msk.f32.gmra.mxu3 %vm11_vm0, %v2411_v57  ;;  %12187 = vst [vmem:[#allocation39_spill] sm:$0xff] %v8663_v37  ;;  %v12190_v57 = vld [vmem:[#allocation10_spill] sm:$0xff]  ;;  %v12195_v37 = vld [vmem:[#allocation64_spill] sm:$0xff] }
 0x2d6   :  { %v1048_v8 = vadd.f32 %v12190_v57, %v12189_v41  ;;  %v12194_v41 = vld [vmem:[#allocation59_spill] sm:$0xff] }
 0x2d7   :  { %v2067_v34 = vpop.f32.mrf.mxu3 }
 0x2d8   :  { %v8659_v10 = vadd.f32 %v2067_v34, %v1948_v1  ;;  %v1501_v1 = vadd.f32 %v12191_v15, %v1352_v17  ;;  %v1204_v44 = vadd.f32 %v12193_v50, %v1048_v8  ;;  %v2115_v17 = vld [vmem:[#allocation2 + $0x352] sm:$0xff]  ;;  %v2413_v8 = vld [vmem:[#allocation2 + $0x220] sm:$0xff] }
 0x2d9   :  { %v1772_v58 = vpop.f32.mrf.mxu1  ;;  %6941 = vmatmul.msk.f32.gmra.mxu0 %vm11_vm0, %v12188_v49  ;;  %v12200_v50 = vld [vmem:[#allocation62_spill] sm:$0xff] }
 0x2da   :  { %v1800_v45 = vadd.f32 %v1772_v58, %v1650_v39  ;;  %v12192_v39 = vld [vmem:[#allocation58_spill] sm:$0xff]  ;;  %6905 = vmatmul.msk.f32.gmra.mxu2 %vm11_vm0, %v2856_v54 }
 0x2db   :  { %v8670_v12 = vpop.f32.mrf.mxu2  ;;  %v1651_v33 = vadd.f32 %v12192_v39, %v1501_v1 }
 0x2dc   :  { %6828 = vmatmul.msk.f32.gmra.mxu1 %vm11_vm0, %v2114_v35  ;;  %v1949_v34 = vadd.f32 %v8394_v38, %v1800_v45  ;;  %v1353_v35 = vadd.f32 %v12194_v41, %v1204_v44  ;;  %v12197_v38 = vld [vmem:[#allocation11_spill] sm:$0xff]  ;;  %v8685_v15 = vpop.f32.mrf.mxu0  ;;  %v12201_v44 = vld [vmem:[#allocation30_spill] sm:$0xff] }
 0x2dd   :  { %6860 = vmatmul.msk.f32.gmra.mxu3 %vm11_vm0, %v2412_v30  ;;  %v12196_v30 = vld [vmem:[#allocation29_spill] sm:$0xff]  ;;  %12198 = vst [vmem:[#allocation13_spill] sm:$0xff] %v8685_v15  ;;  %v2857_v41 = vld [vmem:[#allocation2 + $0xb2] sm:$0xff] }
 0x2de   :  { %v1051_v45 = vadd.f32 %v12197_v38, %v12196_v30  ;;  %v12202_v38 = vld [vmem:[#allocation63_spill] sm:$0xff] }
 0x2e0   :  { %v2070_v22 = vpop.f32.mrf.mxu3  ;;  %v1205_v54 = vadd.f32 %v12201_v44, %v1051_v45  ;;  %v12206_v44 = vld [vmem:[#allocation33_spill] sm:$0xff] }
 0x2e1   :  { %v8677_v58 = vadd.f32 %v2070_v22, %v1949_v34  ;;  %v1775_v49 = vpop.f32.mrf.mxu1  ;;  %6942 = vmatmul.msk.f32.gmra.mxu0 %vm11_vm0, %v12195_v37  ;;  %v12199_v34 = vld [vmem:[#allocation36_spill] sm:$0xff] }
 0x2e2   :  { %v1801_v57 = vadd.f32 %v1775_v49, %v1651_v33  ;;  %v1502_v22 = vadd.f32 %v12199_v34, %v1353_v35  ;;  %6906 = vmatmul.msk.f32.gmra.mxu2 %vm11_vm0, %v2857_v41  ;;  %v2116_v35 = vld [vmem:[#allocation2 + $0x362] sm:$0xff]  ;;  %v2414_v34 = vld [vmem:[#allocation2 + $0x230] sm:$0xff] }
 0x2e3   :  { %v8688_v1 = vpop.f32.mrf.mxu2 }
 0x2e4   :  { %6829 = vmatmul.msk.f32.gmra.mxu1 %vm11_vm0, %v2115_v17  ;;  %v1950_v39 = vadd.f32 %v8429_v14, %v1801_v57  ;;  %v1652_v37 = vadd.f32 %v12200_v50, %v1502_v22  ;;  %v1354_v17 = vadd.f32 %v12202_v38, %v1205_v54  ;;  %v12204_v14 = vld [vmem:[#allocation12_spill] sm:$0xff]  ;;  %v12205_v22 = vld [vmem:[#allocation37_spill] sm:$0xff] }
 0x2e5   :  { %6861 = vmatmul.msk.f32.gmra.mxu3 %vm11_vm0, %v2413_v8  ;;  %v12203_v8 = vld [vmem:[#allocation32_spill] sm:$0xff] }
 0x2e6   :  { %v1054_v57 = vadd.f32 %v12204_v14, %v12203_v8 }
 0x2e8   :  { %v2073_v33 = vpop.f32.mrf.mxu3  ;;  %v1206_v54 = vadd.f32 %v12206_v44, %v1054_v57  ;;  %v12208_v57 = vld [vmem:[#allocation38_spill] sm:$0xff] }
 0x2e9   :  { %v8695_v49 = vadd.f32 %v2073_v33, %v1950_v39  ;;  %v1778_v30 = vpop.f32.mrf.mxu1  ;;  %6943 = vmatmul.msk.f32.gmra.mxu0 %vm11_vm0, %v8383_v2  ;;  %v1503_v39 = vadd.f32 %v12205_v22, %v1354_v17  ;;  %v8708_v33 = vpop.f32.mrf.mxu0  ;;  %v2117_v17 = vld [vmem:[#allocation2 + $0x372] sm:$0xff] }
 0x2ea   :  { %v1802_v15 = vadd.f32 %v1778_v30, %v1652_v37  ;;  %v2858_v30 = vld [vmem:[#allocation2 + $0xc2] sm:$0xff] }
 0x2eb   :  { %v8704_v45 = vpop.f32.mrf.mxu2  ;;  %v1653_v2 = vadd.f32 %v8374_v7, %v1503_v39  ;;  %6907 = vmatmul.msk.f32.gmra.mxu2 %vm11_vm0, %v2858_v30  ;;  %v3763_v7 = vld [vmem:[%s12061_s1 + $0x2c0] sm:$0xff] }
 0x2ec   :  { %6830 = vmatmul.msk.f32.gmra.mxu1 %vm11_vm0, %v2116_v35  ;;  %v1951_v50 = vadd.f32 %v8472_v26, %v1802_v15  ;;  %v12207_v35 = vld [vmem:[#allocation66_spill] sm:$0xff]  ;;  %v2415_v26 = vld [vmem:[#allocation2 + $0x240] sm:$0xff]  ;;  %3824 = vmatpush.msrb.mxu0 %v3763_v7 }
 0x2ed   :  { %6862 = vmatmul.msk.f32.gmra.mxu3 %vm11_vm0, %v2414_v34  ;;  %v1355_v8 = vadd.f32 %v12207_v35, %v1206_v54  ;;  %v3162_v54 = vld [vmem:[#allocation2 + $0x4e0] sm:$0xff] }
 0x2ef   :  { %v1504_v34 = vadd.f32 %v12208_v57, %v1355_v8  ;;  %v3761_v8 = vld [vmem:[%s12061_s1 + $0x2b0] sm:$0xff] }
 0x2f0   :  { %v2076_v37 = vpop.f32.mrf.mxu3  ;;  %v2860_v57 = vld [vmem:[#allocation2 + $0xe2] sm:$0xff] }
 0x2f1   :  { %v8713_v41 = vadd.f32 %v2076_v37, %v1951_v50  ;;  %v1781_v38 = vpop.f32.mrf.mxu1  ;;  %6944 = vmatmul.msk.f32.gmra.mxu0 %vm11_vm0, %v8412_v51  ;;  %v1654_v51 = vadd.f32 %v8403_v43, %v1504_v34  ;;  %v8729_v50 = vpop.f32.mrf.mxu0  ;;  %v2416_v43 = vld [vmem:[#allocation2 + $0x250] sm:$0xff] }
 0x2f2   :  { %v1803_v14 = vadd.f32 %v1781_v38, %v1653_v2  ;;  %v2859_v2 = vld [vmem:[#allocation2 + $0xd2] sm:$0xff]  ;;  %v2118_v38 = vld [vmem:[#allocation2 + $0x382] sm:$0xff] }
 0x2f3   :  { %v8720_v15 = vpop.f32.mrf.mxu2  ;;  %6908 = vmatmul.msk.f32.gmra.mxu2 %vm11_vm0, %v2859_v2  ;;  %v3017_v2 = vld [vmem:[%s12061_s1 + $0x220] sm:$0xff] }
 0x2f4   :  { %6831 = vmatmul.msk.f32.gmra.mxu1 %vm11_vm0, %v2117_v17  ;;  %v1952_v22 = vadd.f32 %v8490_v63, %v1803_v14  ;;  %v3762_v63 = vld [vmem:[%s12061_s1 + $0x2b8] sm:$0xff]  ;;  %v3760_v14 = vld [vmem:[%s12061_s1 + $0x2a8] sm:$0xff]  ;;  %3078 = vmatpush.msrb.mxu3 %v3017_v2 }
 0x2f5   :  { %6863 = vmatmul.msk.f32.gmra.mxu3 %vm11_vm0, %v2415_v26  ;;  %3825 = vmatpush.msrb.mxu0 %v3762_v63  ;;  %v2718_v63 = vld [vmem:[%s12061_s1 + $0x1d8] sm:$0xff] }
 0x2f6   :  { %v3745_v2 = vld [vmem:[#allocation2 + $0x30] sm:$0xff] }
 0x2f7   :  { %3826 = vmatpush.msrb.mxu0 %v3761_v8 }
 0x2f8   :  { %v2079_v39 = vpop.f32.mrf.mxu3 }
 0x2f9   :  { %v8731_v37 = vadd.f32 %v2079_v39, %v1952_v22  ;;  %v1784_v44 = vpop.f32.mrf.mxu1  ;;  %6945 = vmatmul.msk.f32.gmra.mxu0 %vm11_vm0, %v3162_v54  ;;  %v3744_v22 = vld [vmem:[#allocation2 + $0x20] sm:$0xff]  ;;  %v8752_v39 = vpop.f32.mrf.mxu0  ;;  %v2119_v54 = vld [vmem:[#allocation2 + $0x392] sm:$0xff] }
 0x2fa   :  { %v1804_v30 = vadd.f32 %v1784_v44, %v1654_v51  ;;  %3827 = vmatpush.msrb.mxu0 %v3760_v14  ;;  %v3464_v44 = vld [vmem:[%s12061_s1 + $0x280] sm:$0xff]  ;;  %v2717_v14 = vld [vmem:[%s12061_s1 + $0x1d0] sm:$0xff] }
 0x2fb   :  { %v8739_v35 = vpop.f32.mrf.mxu2  ;;  %6909 = vmatmul.msk.f32.gmra.mxu2 %vm11_vm0, %v2860_v57 }
 0x2fc   :  { %6832 = vmatmul.msk.f32.gmra.mxu1 %vm11_vm0, %v2118_v38  ;;  %v1953_v17 = vadd.f32 %v8511_v0, %v1804_v30  ;;  %v2719_v0 = vld [vmem:[%s12061_s1 + $0x1e0] sm:$0xff]  ;;  %3525 = vmatpush.msrb.mxu2 %v3464_v44  ;;  %v3016_v38 = vld [vmem:[%s12061_s1 + $0x218] sm:$0xff]  ;;  %v3461_v44 = vld [vmem:[%s12061_s1 + $0x268] sm:$0xff] }
 0x2fd   :  { %6864 = vmatmul.msk.f32.gmra.mxu3 %vm11_vm0, %v2416_v43  ;;  %2780 = vmatpush.msra.mxu1 %v2719_v0  ;;  %v3463_v43 = vld [vmem:[%s12061_s1 + $0x278] sm:$0xff] }
 0x2fe   :  { %3079 = vmatpush.msrb.mxu3 %v3016_v38  ;;  %3526 = vmatpush.msrb.mxu2 %v3463_v43  ;;  %v2998_v38 = vld [vmem:[#allocation2 + $0x290] sm:$0xff] }
 0x2ff   :  { %2781 = vmatpush.msra.mxu1 %v2718_v63 }
 0x300   :  { %v2082_v26 = vpop.f32.mrf.mxu3 }
 0x301   :  { %v8749_v7 = vadd.f32 %v2082_v26, %v1953_v17  ;;  %v1787_v34 = vpop.f32.mrf.mxu1  ;;  %6994 = vmatmul.msk.f32.vlgmr.msrb.gmra.mxu0 %vm11_vm0, %v3744_v22  ;;  %v3015_v17 = vld [vmem:[%s12061_s1 + $0x210] sm:$0xff]  ;;  %2782 = vmatpush.msra.mxu1 %v2717_v14  ;;  %v3014_v22 = vld [vmem:[%s12061_s1 + $0x208] sm:$0xff]  ;;  %v8802_v63 = vpop.f32.mrf.mxu0 }
 0x302   :  { %v1805_v51 = vadd.f32 %v1787_v34, %v8452_v28  ;;  %v2417_v28 = vld [vmem:[#allocation2 + $0x260] sm:$0xff]  ;;  %v3462_v26 = vld [vmem:[%s12061_s1 + $0x270] sm:$0xff]  ;;  %3080 = vmatpush.msrb.mxu3 %v3015_v17 }
 0x303   :  { %v8766_v30 = vpop.f32.mrf.mxu2  ;;  %3527 = vmatpush.msrb.mxu2 %v3462_v26  ;;  %v2862_v17 = vld [vmem:[#allocation2 + $0x102] sm:$0xff] }
 0x304   :  { %6833 = vmatmul.msk.f32.gmra.mxu1 %vm11_vm0, %v2119_v54  ;;  %v1954_v8 = vadd.f32 %v8532_v31, %v1805_v51  ;;  %v2716_v31 = vld [vmem:[%s12061_s1 + $0x1c8] sm:$0xff]  ;;  %v2861_v51 = vld [vmem:[#allocation2 + $0xf2] sm:$0xff]  ;;  %3081 = vmatpush.msrb.mxu3 %v3014_v22 }
 0x305   :  { %6865 = vmatmul.msk.f32.gmra.mxu3 %vm11_vm0, %v2417_v28  ;;  %6910 = vmatmul.msk.f32.gmra.mxu2 %vm11_vm0, %v2861_v51  ;;  %v2700_v28 = vld [vmem:[#allocation2 + $0x151] sm:$0xff]  ;;  %v2701_v22 = vld [vmem:[#allocation2 + $0x161] sm:$0xff] }
 0x306   :  { %2783 = vmatpush.msra.mxu1 %v2716_v31  ;;  %3528 = vmatpush.msrb.mxu2 %v3461_v44  ;;  %v2999_v51 = vld [vmem:[#allocation2 + $0x2a0] sm:$0xff] }
 0x308   :  { %v2085_v57 = vpop.f32.mrf.mxu3 }
 0x309   :  { %v8788_v34 = vadd.f32 %v2085_v57, %v1954_v8  ;;  %v2189_v0 = vpop.f32.mrf.mxu1  ;;  %6995 = vmatmul.msk.f32.gmra.mxu0 %vm11_vm0, %v3745_v2  ;;  %v3746_v57 = vld [vmem:[#allocation2 + $0x40] sm:$0xff] }
 0x30a   :  { %v2237_v54 = vadd.f32 %v2189_v0, %v8481_v53 }
 0x30b   :  { %v8805_v43 = vpop.f32.mrf.mxu2 }
 0x30c   :  { %6882 = vmatmul.msk.f32.vlgmr.msra.gmra.mxu1 %vm11_vm0, %v2700_v28  ;;  %v2386_v8 = vadd.f32 %v8550_v9, %v2237_v54  ;;  %v8818_v9 = vpop.f32.mrf.mxu0  ;;  %v2863_v54 = vld [vmem:[#allocation2 + $0x112] sm:$0xff] }
 0x30d   :  { %6914 = vmatmul.msk.f32.vlgmr.msrb.gmra.mxu3 %vm11_vm0, %v2998_v38  ;;  %6911 = vmatmul.msk.f32.gmra.mxu2 %vm11_vm0, %v2862_v17  ;;  %v3000_v17 = vld [vmem:[#allocation2 + $0x2b0] sm:$0xff] }
 0x310   :  { %v2487_v14 = vpop.f32.mrf.mxu3 }
 0x311   :  { %v8809_v26 = vadd.f32 %v2487_v14, %v2386_v8  ;;  %v2192_v53 = vpop.f32.mrf.mxu1  ;;  %6996 = vmatmul.msk.f32.gmra.mxu0 %vm11_vm0, %v3746_v57  ;;  %v3747_v8 = vld [vmem:[#allocation2 + $0x50] sm:$0xff] }
 0x312   :  { %v2238_v31 = vadd.f32 %v2192_v53, %v8499_v52  ;;  %v2702_v14 = vld [vmem:[#allocation2 + $0x171] sm:$0xff] }
 0x313   :  { %v8815_v0 = vpop.f32.mrf.mxu2 }
 0x314   :  { %6883 = vmatmul.msk.f32.gmra.mxu1 %vm11_vm0, %v2701_v22  ;;  %v2387_v2 = vadd.f32 %v8571_v25, %v2238_v31  ;;  %v8831_v57 = vpop.f32.mrf.mxu0  ;;  %v2864_v22 = vld [vmem:[#allocation2 + $0x122] sm:$0xff] }
 0x315   :  { %6915 = vmatmul.msk.f32.gmra.mxu3 %vm11_vm0, %v2999_v51  ;;  %6912 = vmatmul.msk.f32.gmra.mxu2 %vm11_vm0, %v2863_v54  ;;  %v2703_v54 = vld [vmem:[#allocation2 + $0x181] sm:$0xff] }
 0x318   :  { %v2490_v44 = vpop.f32.mrf.mxu3 }
 0x319   :  { %v8821_v28 = vadd.f32 %v2490_v44, %v2387_v2  ;;  %v2195_v38 = vpop.f32.mrf.mxu1  ;;  %6997 = vmatmul.msk.f32.gmra.mxu0 %vm11_vm0, %v3747_v8  ;;  %v3748_v44 = vld [vmem:[#allocation2 + $0x60] sm:$0xff] }
 0x31a   :  { %v2239_v52 = vadd.f32 %v2195_v38, %v8520_v59  ;;  %v3001_v38 = vld [vmem:[#allocation2 + $0x2c0] sm:$0xff] }
 0x31b   :  { %v8827_v53 = vpop.f32.mrf.mxu2 }
 0x31c   :  { %6884 = vmatmul.msk.f32.gmra.mxu1 %vm11_vm0, %v2702_v14  ;;  %v2388_v25 = vadd.f32 %v8591_v62, %v2239_v52  ;;  %v3445_v14 = vld [vmem:[#allocation2 + $0x3d1] sm:$0xff] }
 0x31d   :  { %6916 = vmatmul.msk.f32.gmra.mxu3 %vm11_vm0, %v3000_v17  ;;  %6913 = vmatmul.msk.f32.gmra.mxu2 %vm11_vm0, %v2864_v22  ;;  %v8846_v22 = vpop.f32.mrf.mxu0 }
 0x320   :  { %v2493_v31 = vpop.f32.mrf.mxu3 }
 0x321   :  { %v8833_v51 = vadd.f32 %v2493_v31, %v2388_v25  ;;  %v2198_v2 = vpop.f32.mrf.mxu1  ;;  %6998 = vmatmul.msk.f32.gmra.mxu0 %vm11_vm0, %v3748_v44  ;;  %v3749_v31 = vld [vmem:[#allocation2 + $0x70] sm:$0xff] }
 0x322   :  { %v2240_v59 = vadd.f32 %v2198_v2, %v8539_v11  ;;  %v2704_v2 = vld [vmem:[#allocation2 + $0x191] sm:$0xff] }
 0x323   :  { %v8840_v62 = vpop.f32.mrf.mxu2  ;;  %v3002_v44 = vld [vmem:[#allocation2 + $0x2d0] sm:$0xff] }
 0x324   :  { %6885 = vmatmul.msk.f32.gmra.mxu1 %vm11_vm0, %v2703_v54  ;;  %v2389_v8 = vadd.f32 %v8610_v40, %v2240_v59 }
 0x325   :  { %6917 = vmatmul.msk.f32.gmra.mxu3 %vm11_vm0, %v3001_v38  ;;  %6962 = vmatmul.msk.f32.vlgmr.msrb.gmra.mxu2 %vm11_vm0, %v3445_v14  ;;  %v3446_v38 = vld [vmem:[#allocation2 + $0x3e1] sm:$0xff] }
 0x326   :  { %v3750_v14 = vld [vmem:[#allocation2 + $0x80] sm:$0xff] }
 0x328   :  { %v2496_v52 = vpop.f32.mrf.mxu3 }
 0x329   :  { %v8843_v17 = vadd.f32 %v2496_v52, %v2389_v8  ;;  %v2201_v25 = vpop.f32.mrf.mxu1  ;;  %6999 = vmatmul.msk.f32.gmra.mxu0 %vm11_vm0, %v3749_v31  ;;  %v8862_v31 = vpop.f32.mrf.mxu0 }
 0x32a   :  { %v2241_v11 = vadd.f32 %v2201_v25, %v8557_v55  ;;  %v8860_v25 = vld [vmem:[#allocation2 + $0x1a1] sm:$0xff]  ;;  %12210 = vst [vmem:[#allocation43_spill] sm:$0xff] %v8862_v31 }
 0x32b   :  { %v8853_v59 = vpop.f32.mrf.mxu2  ;;  %12209 = vst [vmem:[#allocation40_spill] sm:$0xff] %v8860_v25 }
 0x32c   :  { %6886 = vmatmul.msk.f32.gmra.mxu1 %vm11_vm0, %v2704_v2  ;;  %v2390_v40 = vadd.f32 %v8631_v6, %v2241_v11  ;;  %v3003_v6 = vld [vmem:[#allocation2 + $0x2e0] sm:$0xff]  ;;  %v3751_v2 = vld [vmem:[#allocation2 + $0x90] sm:$0xff] }
 0x32d   :  { %6918 = vmatmul.msk.f32.gmra.mxu3 %vm11_vm0, %v3002_v44  ;;  %6963 = vmatmul.msk.f32.gmra.mxu2 %vm11_vm0, %v3446_v38 }
 0x330   :  { %v2499_v54 = vpop.f32.mrf.mxu3 }
 0x331   :  { %v8855_v8 = vadd.f32 %v2499_v54, %v2390_v40  ;;  %v2204_v52 = vpop.f32.mrf.mxu1  ;;  %7000 = vmatmul.msk.f32.gmra.mxu0 %vm11_vm0, %v3750_v14  ;;  %v3447_v40 = vld [vmem:[#allocation2 + $0x3f1] sm:$0xff] }
 0x332   :  { %v2242_v55 = vadd.f32 %v2204_v52, %v8578_v24  ;;  %v8875_v52 = vld [vmem:[#allocation2 + $0x1b1] sm:$0xff] }
 0x333   :  { %v8870_v14 = vpop.f32.mrf.mxu2  ;;  %12211 = vst [vmem:[#allocation16_spill] sm:$0xff] %v8875_v52 }
 0x334   :  { %6887 = vmatmul.msk.f32.gmra.mxu1 %vm11_vm0, %v8860_v25  ;;  %v2391_v11 = vadd.f32 %v8652_v23, %v2242_v55  ;;  %v3004_v23 = vld [vmem:[#allocation2 + $0x2f0] sm:$0xff]  ;;  %v8880_v55 = vpop.f32.mrf.mxu0 }
 0x335   :  { %6919 = vmatmul.msk.f32.gmra.mxu3 %vm11_vm0, %v3003_v6  ;;  %6964 = vmatmul.msk.f32.gmra.mxu2 %vm11_vm0, %v3447_v40  ;;  %12212 = vst [vmem:[#allocation5_spill] sm:$0xff] %v8880_v55 }
 0x338   :  { %v2502_v44 = vpop.f32.mrf.mxu3 }
 0x339   :  { %v8868_v54 = vadd.f32 %v2502_v44, %v2391_v11  ;;  %v2207_v38 = vpop.f32.mrf.mxu1  ;;  %7001 = vmatmul.msk.f32.gmra.mxu0 %vm11_vm0, %v3751_v2  ;;  %v3448_v44 = vld [vmem:[#allocation2 + $0x401] sm:$0xff] }
 0x33a   :  { %v2243_v24 = vadd.f32 %v2207_v38, %v8598_v20  ;;  %v3752_v2 = vld [vmem:[#allocation2 + $0xc0] sm:$0xff] }
 0x33b   :  { %v8888_v38 = vld [vmem:[#allocation2 + $0x1c1] sm:$0xff] }
 0x33c   :  { %6888 = vmatmul.msk.f32.gmra.mxu1 %vm11_vm0, %v8875_v52  ;;  %v2392_v6 = vadd.f32 %v8670_v12, %v2243_v24  ;;  %12213 = vst [vmem:[#allocation22_spill] sm:$0xff] %v8888_v38  ;;  %v8890_v52 = vpop.f32.mrf.mxu2  ;;  %v3005_v12 = vld [vmem:[#allocation2 + $0x300] sm:$0xff] }
 0x33d   :  { %6920 = vmatmul.msk.f32.gmra.mxu3 %vm11_vm0, %v3004_v23  ;;  %6965 = vmatmul.msk.f32.gmra.mxu2 %vm11_vm0, %v3448_v44  ;;  %v8896_v23 = vpop.f32.mrf.mxu0 }
 0x33e   :  { %12214 = vst [vmem:[#allocation49_spill] sm:$0xff] %v8896_v23 }
 0x340   :  { %v2505_v11 = vpop.f32.mrf.mxu3 }
 0x341   :  { %v8883_v25 = vadd.f32 %v2505_v11, %v2392_v6  ;;  %v2210_v40 = vpop.f32.mrf.mxu1  ;;  %7002 = vmatmul.msk.f32.gmra.mxu0 %vm11_vm0, %v3752_v2  ;;  %v3449_v11 = vld [vmem:[#allocation2 + $0x411] sm:$0xff] }
 0x342   :  { %v2244_v20 = vadd.f32 %v2210_v40, %v8619_v29  ;;  %v3753_v29 = vld [vmem:[#allocation2 + $0xd0] sm:$0xff] }
 0x344   :  { %6889 = vmatmul.msk.f32.gmra.mxu1 %vm11_vm0, %v8888_v38  ;;  %v2393_v24 = vadd.f32 %v8688_v1, %v2244_v20  ;;  %v2708_v38 = vld [vmem:[#allocation2 + $0x1f1] sm:$0xff]  ;;  %v8905_v1 = vpop.f32.mrf.mxu2 }
 0x345   :  { %6921 = vmatmul.msk.f32.gmra.mxu3 %vm11_vm0, %v3005_v12  ;;  %6966 = vmatmul.msk.f32.gmra.mxu2 %vm11_vm0, %v3449_v11  ;;  %v3006_v12 = vld [vmem:[#allocation2 + $0x330] sm:$0xff]  ;;  %v3754_v11 = vld [vmem:[#allocation2 + $0xe0] sm:$0xff]  ;;  %v8910_v31 = vpop.f32.mrf.mxu0 }
 0x348   :  { %v2508_v6 = vpop.f32.mrf.mxu3 }
 0x349   :  { %v8898_v44 = vadd.f32 %v2508_v6, %v2393_v24  ;;  %v2213_v2 = vpop.f32.mrf.mxu1  ;;  %7003 = vmatmul.msk.f32.gmra.mxu0 %vm11_vm0, %v3753_v29  ;;  %v3450_v6 = vld [vmem:[#allocation2 + $0x421] sm:$0xff] }
 0x34a   :  { %v2245_v40 = vadd.f32 %v2213_v2, %v8640_v21 }
 0x34c   :  { %6890 = vmatmul.msk.f32.gmra.mxu1 %vm11_vm0, %v2708_v38  ;;  %v2394_v20 = vadd.f32 %v8704_v45, %v2245_v40  ;;  %v8915_v38 = vld [vmem:[#allocation2 + $0x201] sm:$0xff]  ;;  %v8921_v29 = vpop.f32.mrf.mxu2 }
 0x34d   :  { %6922 = vmatmul.msk.f32.gmra.mxu3 %vm11_vm0, %v3006_v12  ;;  %6967 = vmatmul.msk.f32.gmra.mxu2 %vm11_vm0, %v3450_v6  ;;  %12215 = vst [vmem:[#allocation41_spill] sm:$0xff] %v8915_v38  ;;  %v3007_v45 = vld [vmem:[#allocation2 + $0x340] sm:$0xff]  ;;  %v3451_v12 = vld [vmem:[#allocation2 + $0x431] sm:$0xff] }
 0x34e   :  { %v3755_v6 = vld [vmem:[#allocation2 + $0xf0] sm:$0xff] }
 0x350   :  { %v2511_v24 = vpop.f32.mrf.mxu3 }
 0x351   :  { %v8908_v23 = vadd.f32 %v2511_v24, %v2394_v20  ;;  %v2216_v55 = vpop.f32.mrf.mxu1  ;;  %7004 = vmatmul.msk.f32.gmra.mxu0 %vm11_vm0, %v3754_v11  ;;  %v8930_v11 = vpop.f32.mrf.mxu0 }
 0x352   :  { %v2246_v21 = vadd.f32 %v2216_v55, %v8659_v10  ;;  %v8928_v55 = vld [vmem:[#allocation2 + $0x211] sm:$0xff] }
 0x353   :  { %12216 = vst [vmem:[#allocation14_spill] sm:$0xff] %v8928_v55 }
 0x354   :  { %6891 = vmatmul.msk.f32.gmra.mxu1 %vm11_vm0, %v8915_v38  ;;  %v2395_v2 = vadd.f32 %v8720_v15, %v2246_v21  ;;  %v3008_v15 = vld [vmem:[#allocation2 + $0x350] sm:$0xff]  ;;  %v8938_v38 = vpop.f32.mrf.mxu2 }
 0x355   :  { %6923 = vmatmul.msk.f32.gmra.mxu3 %vm11_vm0, %v3007_v45  ;;  %6968 = vmatmul.msk.f32.gmra.mxu2 %vm11_vm0, %v3451_v12 }
 0x358   :  { %v2514_v40 = vpop.f32.mrf.mxu3 }
 0x359   :  { %v8923_v20 = vadd.f32 %v2514_v40, %v2395_v2  ;;  %v2219_v24 = vpop.f32.mrf.mxu1  ;;  %7005 = vmatmul.msk.f32.gmra.mxu0 %vm11_vm0, %v3755_v6  ;;  %v3452_v2 = vld [vmem:[#allocation2 + $0x441] sm:$0xff] }
 0x35a   :  { %v2247_v10 = vadd.f32 %v2219_v24, %v8677_v58  ;;  %v3756_v6 = vld [vmem:[#allocation2 + $0x100] sm:$0xff] }
 0x35b   :  { %v8943_v24 = vld [vmem:[#allocation2 + $0x221] sm:$0xff] }
 0x35c   :  { %6892 = vmatmul.msk.f32.gmra.mxu1 %vm11_vm0, %v8928_v55  ;;  %v2396_v21 = vadd.f32 %v8739_v35, %v2247_v10  ;;  %v3009_v35 = vld [vmem:[#allocation2 + $0x360] sm:$0xff]  ;;  %v8948_v10 = vpop.f32.mrf.mxu0 }
 0x35d   :  { %6924 = vmatmul.msk.f32.gmra.mxu3 %vm11_vm0, %v3008_v15  ;;  %6969 = vmatmul.msk.f32.gmra.mxu2 %vm11_vm0, %v3452_v2  ;;  %12217 = vst [vmem:[#allocation42_spill] sm:$0xff] %v8948_v10  ;;  %v8994_v10 = vld [vmem:[#allocation2 + $0x251] sm:$0xff] }
 0x35e   :  { %12220 = vst [vmem:[#allocation25_spill] sm:$0xff] %v8994_v10 }
 0x360   :  { %v2517_v45 = vpop.f32.mrf.mxu3 }
 0x361   :  { %v8936_v40 = vadd.f32 %v2517_v45, %v2396_v21  ;;  %v2222_v12 = vpop.f32.mrf.mxu1  ;;  %7006 = vmatmul.msk.f32.gmra.mxu0 %vm11_vm0, %v3756_v6  ;;  %v3453_v45 = vld [vmem:[#allocation2 + $0x471] sm:$0xff]  ;;  %v8959_v6 = vpop.f32.mrf.mxu2 }
 0x362   :  { %v2248_v58 = vadd.f32 %v2222_v12, %v8695_v49  ;;  %v8957_v12 = vld [vmem:[#allocation2 + $0x231] sm:$0xff] }
 0x364   :  { %6893 = vmatmul.msk.f32.gmra.mxu1 %vm11_vm0, %v8943_v24  ;;  %v2397_v15 = vadd.f32 %v8766_v30, %v2248_v58  ;;  %v3010_v30 = vld [vmem:[#allocation2 + $0x370] sm:$0xff] }
 0x365   :  { %6925 = vmatmul.msk.f32.gmra.mxu3 %vm11_vm0, %v3009_v35  ;;  %6970 = vmatmul.msk.f32.gmra.mxu2 %vm11_vm0, %v3453_v45  ;;  %v8965_v35 = vpop.f32.mrf.mxu0 }
 0x366   :  { %12218 = vst [vmem:[#allocation17_spill] sm:$0xff] %v8965_v35 }
 0x368   :  { %v2520_v21 = vpop.f32.mrf.mxu3 }
 0x369   :  { %v8951_v55 = vadd.f32 %v2520_v21, %v2397_v15  ;;  %v2225_v2 = vpop.f32.mrf.mxu1  ;;  %7007 = vmatmul.msk.f32.gmra.mxu0 %vm11_vm0, %v8501_v60  ;;  %v3454_v21 = vld [vmem:[#allocation2 + $0x481] sm:$0xff] }
 0x36a   :  { %v2249_v49 = vadd.f32 %v2225_v2, %v8713_v41  ;;  %v8973_v2 = vld [vmem:[#allocation2 + $0x241] sm:$0xff] }
 0x36c   :  { %6894 = vmatmul.msk.f32.gmra.mxu1 %vm11_vm0, %v8957_v12  ;;  %v2398_v58 = vadd.f32 %v8805_v43, %v2249_v49  ;;  %v3011_v43 = vld [vmem:[#allocation2 + $0x380] sm:$0xff]  ;;  %v4360_v49 = vld [vmem:[%s12061_s1 + $0x340] sm:$0xff] }
 0x36d   :  { %6926 = vmatmul.msk.f32.gmra.mxu3 %vm11_vm0, %v3010_v30  ;;  %6971 = vmatmul.msk.f32.gmra.mxu2 %vm11_vm0, %v3454_v21  ;;  %v8981_v30 = vpop.f32.mrf.mxu2  ;;  %v8986_v35 = vpop.f32.mrf.mxu0 }
 0x36e   :  { %4421 = vmatpush.msra.mxu0 %v4360_v49  ;;  %12219 = vst [vmem:[#allocation6_spill] sm:$0xff] %v8986_v35  ;;  %v3457_v35 = vld [vmem:[#allocation2 + $0x4b1] sm:$0xff] }
 0x370   :  { %v2523_v15 = vpop.f32.mrf.mxu3 }
 0x371   :  { %v8967_v45 = vadd.f32 %v2523_v15, %v2398_v58  ;;  %v2228_v60 = vpop.f32.mrf.mxu1  ;;  %7008 = vmatmul.msk.f32.gmra.mxu0 %vm11_vm0, %v8522_v3  ;;  %v3759_v3 = vld [vmem:[#allocation2 + $0x130] sm:$0xff] }
 0x372   :  { %v2250_v41 = vadd.f32 %v2228_v60, %v8731_v37  ;;  %v3455_v37 = vld [vmem:[#allocation2 + $0x491] sm:$0xff] }
 0x374   :  { %6895 = vmatmul.msk.f32.gmra.mxu1 %vm11_vm0, %v8973_v2  ;;  %v2399_v58 = vadd.f32 %v8815_v0, %v2250_v41  ;;  %v3012_v0 = vld [vmem:[#allocation2 + $0x390] sm:$0xff]  ;;  %v4358_v41 = vld [vmem:[%s12061_s1 + $0x330] sm:$0xff] }
 0x375   :  { %6927 = vmatmul.msk.f32.gmra.mxu3 %vm11_vm0, %v3011_v43  ;;  %6972 = vmatmul.msk.f32.gmra.mxu2 %vm11_vm0, %v3455_v37  ;;  %v4359_v43 = vld [vmem:[%s12061_s1 + $0x338] sm:$0xff]  ;;  %v3456_v37 = vld [vmem:[#allocation2 + $0x4a1] sm:$0xff] }
 0x376   :  { %4422 = vmatpush.msra.mxu0 %v4359_v43 }
 0x378   :  { %v2526_v15 = vpop.f32.mrf.mxu3  ;;  %4423 = vmatpush.msra.mxu0 %v4358_v41 }
 0x379   :  { %v8984_v21 = vadd.f32 %v2526_v15, %v2399_v58  ;;  %v2231_v60 = vpop.f32.mrf.mxu1  ;;  %7009 = vmatmul.msk.f32.gmra.mxu0 %vm11_vm0, %v3759_v3  ;;  %v4357_v58 = vld [vmem:[%s12061_s1 + $0x328] sm:$0xff]  ;;  %v9006_v3 = vpop.f32.mrf.mxu2 }
 0x37a   :  { %v2251_v49 = vadd.f32 %v2231_v60, %v8749_v7  ;;  %4424 = vmatpush.msra.mxu0 %v4357_v58  ;;  %v9023_v58 = vld [vmem:[#allocation2 + $0x261] sm:$0xff] }
 0x37b   :  { %12221 = vst [vmem:[#allocation53_spill] sm:$0xff] %v9023_v58 }
 0x37c   :  { %6896 = vmatmul.msk.f32.gmra.mxu1 %vm11_vm0, %v8994_v10  ;;  %v2400_v7 = vadd.f32 %v8827_v53, %v2251_v49  ;;  %v3613_v53 = vld [vmem:[%s12061_s1 + $0x2a0] sm:$0xff] }
 0x37d   :  { %6928 = vmatmul.msk.f32.gmra.mxu3 %vm11_vm0, %v3012_v0  ;;  %6973 = vmatmul.msk.f32.gmra.mxu2 %vm11_vm0, %v3456_v37  ;;  %v3315_v0 = vld [vmem:[%s12061_s1 + $0x260] sm:$0xff]  ;;  %v4061_v37 = vld [vmem:[%s12061_s1 + $0x2f8] sm:$0xff] }
 0x37e   :  { %v4062_v49 = vld [vmem:[%s12061_s1 + $0x300] sm:$0xff]  ;;  %3376 = vmatpush.msrb.mxu1 %v3315_v0  ;;  %3674 = vmatpush.msra.mxu3 %v3613_v53  ;;  %v3611_v0 = vld [vmem:[%s12061_s1 + $0x290] sm:$0xff] }
 0x37f   :  { %4123 = vmatpush.msra.mxu2 %v4062_v49  ;;  %v4060_v53 = vld [vmem:[%s12061_s1 + $0x2f0] sm:$0xff] }
 0x380   :  { %v2529_v15 = vpop.f32.mrf.mxu3 }
 0x381   :  { %v9008_v60 = vadd.f32 %v2529_v15, %v2400_v7  ;;  %v2234_v43 = vpop.f32.mrf.mxu1  ;;  %7058 = vmatmul.msk.f32.vlgmr.msra.gmra.mxu0 %vm11_vm0, %v8559_v48  ;;  %v9025_v7 = vpop.f32.mrf.mxu0  ;;  %v3013_v48 = vld [vmem:[#allocation2 + $0x3a0] sm:$0xff]  ;;  %v3314_v15 = vld [vmem:[%s12061_s1 + $0x258] sm:$0xff]  ;;  %4124 = vmatpush.msra.mxu2 %v4061_v37 }
 0x382   :  { %v2252_v41 = vadd.f32 %v2234_v43, %v8788_v34  ;;  %12222 = vst [vmem:[#allocation44_spill] sm:$0xff] %v9025_v7  ;;  %v3612_v34 = vld [vmem:[%s12061_s1 + $0x298] sm:$0xff]  ;;  %3377 = vmatpush.msrb.mxu1 %v3314_v15  ;;  %v3313_v43 = vld [vmem:[%s12061_s1 + $0x250] sm:$0xff]  ;;  %v3312_v15 = vld [vmem:[%s12061_s1 + $0x248] sm:$0xff] }
 0x383   :  { %3675 = vmatpush.msra.mxu3 %v3612_v34  ;;  %v3610_v34 = vld [vmem:[%s12061_s1 + $0x288] sm:$0xff]  ;;  %4125 = vmatpush.msra.mxu2 %v4060_v53 }
 0x384   :  { %6897 = vmatmul.msk.f32.gmra.mxu1 %vm11_vm0, %v9023_v58  ;;  %v2401_v49 = vadd.f32 %v8840_v62, %v2252_v41  ;;  %v2684_v58 = vadd.f32 %v8405_v56, %v8809_v26  ;;  %v4059_v62 = vld [vmem:[%s12061_s1 + $0x2e8] sm:$0xff]  ;;  %v9062_v41 = vpop.f32.mrf.mxu2  ;;  %v3594_v56 = vld [vmem:[#allocation2 + $0x292] sm:$0xff] }
 0x385   :  { %6929 = vmatmul.msk.f32.gmra.mxu3 %vm11_vm0, %v3013_v48  ;;  %3378 = vmatpush.msrb.mxu1 %v3313_v43  ;;  %v3296_v43 = vld [vmem:[#allocation2 + $0x291] sm:$0xff] }
 0x386   :  { %3676 = vmatpush.msra.mxu3 %v3611_v0  ;;  %6974 = vmatmul.msk.f32.gmra.mxu2 %vm11_vm0, %v3457_v35 }
 0x387   :  { %3379 = vmatpush.msrb.mxu1 %v3312_v15  ;;  %4126 = vmatpush.msra.mxu2 %v4059_v62 }
 0x388   :  { %v2532_v48 = vpop.f32.mrf.mxu3  ;;  %3677 = vmatpush.msra.mxu3 %v3610_v34 }
 0x389   :  { %v9055_v7 = vadd.f32 %v2532_v48, %v2401_v49  ;;  %v2785_v10 = vpop.f32.mrf.mxu1  ;;  %7059 = vmatmul.msk.f32.gmra.mxu0 %vm11_vm0, %v8580_v36  ;;  %v9069_v26 = vpop.f32.mrf.mxu0  ;;  %v3458_v49 = vld [vmem:[#allocation2 + $0x4c1] sm:$0xff]  ;;  %v2685_v36 = vadd.f32 %v8441_v42, %v8821_v28  ;;  %v3459_v28 = vld [vmem:[#allocation2 + $0x4d1] sm:$0xff] }
 0x38a   :  { %v2833_v37 = vadd.f32 %v2785_v10, %v2684_v58  ;;  %v3297_v48 = vld [vmem:[#allocation2 + $0x2a1] sm:$0xff] }
 0x38c   :  { %6946 = vmatmul.msk.f32.vlgmr.msrb.gmra.mxu1 %vm11_vm0, %v3296_v43  ;;  %v2982_v0 = vadd.f32 %v8853_v59, %v2833_v37  ;;  %v9079_v15 = vpop.f32.mrf.mxu2  ;;  %v3595_v59 = vld [vmem:[#allocation2 + $0x2a2] sm:$0xff] }
 0x38d   :  { %6978 = vmatmul.msk.f32.vlgmr.msra.gmra.mxu3 %vm11_vm0, %v3594_v56 }
 0x38e   :  { %6975 = vmatmul.msk.f32.gmra.mxu2 %vm11_vm0, %v3458_v49 }
 0x390   :  { %v3083_v53 = vpop.f32.mrf.mxu3 }
 0x391   :  { %v9072_v35 = vadd.f32 %v3083_v53, %v2982_v0  ;;  %v2788_v10 = vpop.f32.mrf.mxu1  ;;  %7060 = vmatmul.msk.f32.gmra.mxu0 %vm11_vm0, %v8600_v4  ;;  %v9084_v62 = vpop.f32.mrf.mxu0  ;;  %v2686_v4 = vadd.f32 %v8477_v47, %v8833_v51  ;;  %v3298_v0 = vld [vmem:[#allocation2 + $0x2b1] sm:$0xff]  ;;  %v2687_v51 = vadd.f32 %v8495_v5, %v8843_v17  ;;  %v4043_v17 = vld [vmem:[#allocation2 + $0x21] sm:$0xff] }
 0x392   :  { %v2834_v58 = vadd.f32 %v2788_v10, %v2685_v36  ;;  %v3460_v10 = vld [vmem:[#allocation2 + $0x4e1] sm:$0xff] }
 0x394   :  { %6947 = vmatmul.msk.f32.gmra.mxu1 %vm11_vm0, %v3297_v48  ;;  %v2983_v34 = vadd.f32 %v8870_v14, %v2834_v58  ;;  %v3596_v14 = vld [vmem:[#allocation2 + $0x2b2] sm:$0xff]  ;;  %v9095_v53 = vpop.f32.mrf.mxu2 }
 0x395   :  { %6979 = vmatmul.msk.f32.gmra.mxu3 %vm11_vm0, %v3595_v59  ;;  %v3299_v59 = vld [vmem:[#allocation2 + $0x2c1] sm:$0xff] }
 0x396   :  { %6976 = vmatmul.msk.f32.gmra.mxu2 %vm11_vm0, %v3459_v28 }
 0x398   :  { %v3086_v42 = vpop.f32.mrf.mxu3 }
 0x399   :  { %v9086_v37 = vadd.f32 %v3086_v42, %v2983_v34  ;;  %v2791_v43 = vpop.f32.mrf.mxu1  ;;  %7061 = vmatmul.msk.f32.gmra.mxu0 %vm11_vm0, %v8621_v16  ;;  %v9102_v16 = vpop.f32.mrf.mxu0 }
 0x39a   :  { %v2835_v56 = vadd.f32 %v2791_v43, %v2686_v4  ;;  %v2688_v4 = vadd.f32 %v8516_v46, %v8855_v8  ;;  %v2689_v8 = vadd.f32 %v8541_v27, %v8868_v54  ;;  %v4348_v27 = vld [vmem:[#allocation2 + $0x92] sm:$0xff] }
 0x39c   :  { %6948 = vmatmul.msk.f32.gmra.mxu1 %vm11_vm0, %v3298_v0  ;;  %v2984_v49 = vadd.f32 %v8890_v52, %v2835_v56  ;;  %v3597_v52 = vld [vmem:[#allocation2 + $0x2c2] sm:$0xff]  ;;  %v9110_v42 = vpop.f32.mrf.mxu2  ;;  %v3300_v0 = vld [vmem:[#allocation2 + $0x2d1] sm:$0xff] }
 0x39d   :  { %6980 = vmatmul.msk.f32.gmra.mxu3 %vm11_vm0, %v3596_v14 }
 0x39e   :  { %6977 = vmatmul.msk.f32.gmra.mxu2 %vm11_vm0, %v3460_v10  ;;  %v4044_v10 = vld [vmem:[#allocation2 + $0x31] sm:$0xff] }
 0x3a0   :  { %v3089_v36 = vpop.f32.mrf.mxu3 }
 0x3a1   :  { %v9098_v47 = vadd.f32 %v3089_v36, %v2984_v49  ;;  %v2794_v58 = vpop.f32.mrf.mxu1  ;;  %7062 = vmatmul.msk.f32.gmra.mxu0 %vm11_vm0, %v8642_v18  ;;  %v4346_v18 = vld [vmem:[#allocation2 + $0x72] sm:$0xff]  ;;  %v9118_v14 = vpop.f32.mrf.mxu0 }
 0x3a2   :  { %v2836_v48 = vadd.f32 %v2794_v58, %v2687_v51  ;;  %v4347_v58 = vld [vmem:[#allocation2 + $0x82] sm:$0xff] }
 0x3a4   :  { %6949 = vmatmul.msk.f32.gmra.mxu1 %vm11_vm0, %v3299_v59  ;;  %v2985_v34 = vadd.f32 %v8905_v1, %v2836_v48  ;;  %v3598_v1 = vld [vmem:[#allocation2 + $0x2d2] sm:$0xff]  ;;  %v9127_v48 = vpop.f32.mrf.mxu2 }
 0x3a5   :  { %6981 = vmatmul.msk.f32.gmra.mxu3 %vm11_vm0, %v3597_v52  ;;  %v3301_v52 = vld [vmem:[#allocation2 + $0x2e1] sm:$0xff] }
 0x3a6   :  { %7026 = vmatmul.msk.f32.vlgmr.msra.gmra.mxu2 %vm11_vm0, %v4043_v17  ;;  %v4045_v17 = vld [vmem:[#allocation2 + $0x41] sm:$0xff] }
 0x3a8   :  { %v3092_v5 = vpop.f32.mrf.mxu3 }
 0x3a9   :  { %v9112_v28 = vadd.f32 %v3092_v5, %v2985_v34  ;;  %v2797_v43 = vpop.f32.mrf.mxu1  ;;  %7063 = vmatmul.msk.f32.gmra.mxu0 %vm11_vm0, %v4346_v18  ;;  %v9133_v34 = vpop.f32.mrf.mxu0 }
 0x3aa   :  { %v2837_v56 = vadd.f32 %v2797_v43, %v2688_v4  ;;  %12223 = vst [vmem:[#allocation15_spill] sm:$0xff] %v9133_v34  ;;  %v2690_v43 = vadd.f32 %v8564_v61, %v8883_v25  ;;  %v4046_v61 = vld [vmem:[#allocation2 + $0x51] sm:$0xff] }
 0x3ac   :  { %6950 = vmatmul.msk.f32.gmra.mxu1 %vm11_vm0, %v3300_v0  ;;  %v2986_v49 = vadd.f32 %v8921_v29, %v2837_v56  ;;  %v3599_v29 = vld [vmem:[#allocation2 + $0x2e2] sm:$0xff]  ;;  %v3302_v0 = vld [vmem:[#allocation2 + $0x2f1] sm:$0xff] }
 0x3ad   :  { %6982 = vmatmul.msk.f32.gmra.mxu3 %vm11_vm0, %v3598_v1  ;;  %v9142_v1 = vpop.f32.mrf.mxu2 }
 0x3ae   :  { %7027 = vmatmul.msk.f32.gmra.mxu2 %vm11_vm0, %v4044_v10 }
 0x3b0   :  { %v3095_v36 = vpop.f32.mrf.mxu3 }
 0x3b1   :  { %v9123_v46 = vadd.f32 %v3095_v36, %v2986_v49  ;;  %v2800_v51 = vpop.f32.mrf.mxu1  ;;  %7064 = vmatmul.msk.f32.gmra.mxu0 %vm11_vm0, %v4347_v58  ;;  %v9147_v36 = vpop.f32.mrf.mxu0  ;;  %v4349_v58 = vld [vmem:[#allocation2 + $0xc2] sm:$0xff] }
 0x3b2   :  { %v2838_v59 = vadd.f32 %v2800_v51, %v2689_v8  ;;  %12224 = vst [vmem:[#allocation45_spill] sm:$0xff] %v9147_v36  ;;  %v2691_v8 = vadd.f32 %v8588_v32, %v8898_v44  ;;  %v2692_v44 = vadd.f32 %v8614_v19, %v8908_v23  ;;  %v4048_v23 = vld [vmem:[#allocation2 + $0x71] sm:$0xff] }
 0x3b4   :  { %6951 = vmatmul.msk.f32.gmra.mxu1 %vm11_vm0, %v3301_v52  ;;  %v2987_v5 = vadd.f32 %v8938_v38, %v2838_v59  ;;  %v3600_v38 = vld [vmem:[#allocation2 + $0x2f2] sm:$0xff]  ;;  %v3303_v52 = vld [vmem:[#allocation2 + $0x301] sm:$0xff] }
 0x3b5   :  { %6983 = vmatmul.msk.f32.gmra.mxu3 %vm11_vm0, %v3599_v29  ;;  %v9157_v29 = vpop.f32.mrf.mxu2 }
 0x3b6   :  { %7028 = vmatmul.msk.f32.gmra.mxu2 %vm11_vm0, %v4045_v17 }
 0x3b8   :  { %v3098_v54 = vpop.f32.mrf.mxu3 }
 0x3b9   :  { %v9136_v4 = vadd.f32 %v3098_v54, %v2987_v5  ;;  %v2803_v18 = vpop.f32.mrf.mxu1  ;;  %7065 = vmatmul.msk.f32.gmra.mxu0 %vm11_vm0, %v4348_v27  ;;  %v4047_v54 = vld [vmem:[#allocation2 + $0x61] sm:$0xff] }
 0x3ba   :  { %v2839_v56 = vadd.f32 %v2803_v18, %v2690_v43  ;;  %v4350_v43 = vld [vmem:[#allocation2 + $0xd2] sm:$0xff]  ;;  %v9164_v18 = vpop.f32.mrf.mxu0 }
 0x3bb   :  { %12225 = vst [vmem:[#allocation48_spill] sm:$0xff] %v9164_v18 }
 0x3bc   :  { %6952 = vmatmul.msk.f32.gmra.mxu1 %vm11_vm0, %v3302_v0  ;;  %v2988_v49 = vadd.f32 %v8959_v6, %v2839_v56  ;;  %v3601_v6 = vld [vmem:[#allocation2 + $0x302] sm:$0xff]  ;;  %v3304_v0 = vld [vmem:[#allocation2 + $0x331] sm:$0xff] }
 0x3bd   :  { %6984 = vmatmul.msk.f32.gmra.mxu3 %vm11_vm0, %v3600_v38 }
 0x3be   :  { %7029 = vmatmul.msk.f32.gmra.mxu2 %vm11_vm0, %v4046_v61  ;;  %v2693_v61 = vadd.f32 %v8638_v13, %v8923_v20  ;;  %v12227_v20 = vld [vmem:[#allocation39_spill] sm:$0xff] }
 0x3c0   :  { %v3101_v10 = vpop.f32.mrf.mxu3 }
 0x3c1   :  { %v9149_v25 = vadd.f32 %v3101_v10, %v2988_v49  ;;  %v2806_v51 = vpop.f32.mrf.mxu1  ;;  %7066 = vmatmul.msk.f32.gmra.mxu0 %vm11_vm0, %v4349_v58  ;;  %v9171_v49 = vpop.f32.mrf.mxu2 }
 0x3c2   :  { %v2840_v59 = vadd.f32 %v2806_v51, %v2691_v8  ;;  %v4351_v51 = vld [vmem:[#allocation2 + $0xe2] sm:$0xff] }
 0x3c4   :  { %6953 = vmatmul.msk.f32.gmra.mxu1 %vm11_vm0, %v3303_v52  ;;  %v2989_v5 = vadd.f32 %v8981_v30, %v2840_v59  ;;  %v3602_v30 = vld [vmem:[#allocation2 + $0x332] sm:$0xff]  ;;  %v3305_v59 = vld [vmem:[#allocation2 + $0x341] sm:$0xff]  ;;  %v9179_v52 = vpop.f32.mrf.mxu0 }
 0x3c5   :  { %6985 = vmatmul.msk.f32.gmra.mxu3 %vm11_vm0, %v3601_v6  ;;  %12226 = vst [vmem:[#allocation19_spill] sm:$0xff] %v9179_v52 }
 0x3c6   :  { %7030 = vmatmul.msk.f32.gmra.mxu2 %vm11_vm0, %v4047_v54  ;;  %v2694_v54 = vadd.f32 %v12227_v20, %v8936_v40  ;;  %v4051_v20 = vld [vmem:[#allocation2 + $0xc1] sm:$0xff] }
 0x3c8   :  { %v3104_v27 = vpop.f32.mrf.mxu3 }
 0x3c9   :  { %v9160_v32 = vadd.f32 %v3104_v27, %v2989_v5  ;;  %v2809_v17 = vpop.f32.mrf.mxu1  ;;  %7067 = vmatmul.msk.f32.gmra.mxu0 %vm11_vm0, %v4350_v43  ;;  %v4049_v27 = vld [vmem:[#allocation2 + $0x81] sm:$0xff]  ;;  %v9188_v43 = vpop.f32.mrf.mxu2 }
 0x3ca   :  { %v2841_v56 = vadd.f32 %v2809_v17, %v2692_v44  ;;  %v4352_v17 = vld [vmem:[#allocation2 + $0xf2] sm:$0xff] }
 0x3cc   :  { %6954 = vmatmul.msk.f32.gmra.mxu1 %vm11_vm0, %v3304_v0  ;;  %v2990_v38 = vadd.f32 %v9006_v3, %v2841_v56  ;;  %v3603_v3 = vld [vmem:[#allocation2 + $0x342] sm:$0xff]  ;;  %v3306_v0 = vld [vmem:[#allocation2 + $0x351] sm:$0xff] }
 0x3cd   :  { %6986 = vmatmul.msk.f32.gmra.mxu3 %vm11_vm0, %v3602_v30  ;;  %v9194_v30 = vpop.f32.mrf.mxu0 }
 0x3ce   :  { %7031 = vmatmul.msk.f32.gmra.mxu2 %vm11_vm0, %v4048_v23  ;;  %12228 = vst [vmem:[#allocation7_spill] sm:$0xff] %v9194_v30 }
 0x3d0   :  { %v3107_v19 = vpop.f32.mrf.mxu3 }
 0x3d1   :  { %v9173_v10 = vadd.f32 %v3107_v19, %v2990_v38  ;;  %v2812_v8 = vpop.f32.mrf.mxu1  ;;  %7068 = vmatmul.msk.f32.gmra.mxu0 %vm11_vm0, %v4351_v51  ;;  %v4050_v38 = vld [vmem:[#allocation2 + $0x91] sm:$0xff] }
 0x3d2   :  { %v2842_v58 = vadd.f32 %v2812_v8, %v2693_v61  ;;  %v12229_v61 = vld [vmem:[#allocation13_spill] sm:$0xff] }
 0x3d3   :  { %v2695_v8 = vadd.f32 %v12229_v61, %v8951_v55  ;;  %v4052_v61 = vld [vmem:[#allocation2 + $0xd1] sm:$0xff] }
 0x3d4   :  { %6955 = vmatmul.msk.f32.gmra.mxu1 %vm11_vm0, %v3305_v59  ;;  %v2991_v6 = vadd.f32 %v9062_v41, %v2842_v58  ;;  %v3604_v41 = vld [vmem:[#allocation2 + $0x352] sm:$0xff]  ;;  %v4353_v58 = vld [vmem:[#allocation2 + $0x102] sm:$0xff] }
 0x3d5   :  { %6987 = vmatmul.msk.f32.gmra.mxu3 %vm11_vm0, %v3603_v3  ;;  %v3307_v3 = vld [vmem:[#allocation2 + $0x361] sm:$0xff] }
 0x3d6   :  { %7032 = vmatmul.msk.f32.gmra.mxu2 %vm11_vm0, %v4049_v27  ;;  %v9208_v27 = vpop.f32.mrf.mxu0 }
 0x3d8   :  { %v3110_v5 = vpop.f32.mrf.mxu3 }
 0x3d9   :  { %v9184_v13 = vadd.f32 %v3110_v5, %v2991_v6  ;;  %v2815_v44 = vpop.f32.mrf.mxu1  ;;  %7069 = vmatmul.msk.f32.gmra.mxu0 %vm11_vm0, %v4352_v17  ;;  %v9203_v6 = vpop.f32.mrf.mxu2  ;;  %v3605_v5 = vld [vmem:[#allocation2 + $0x362] sm:$0xff] }
 0x3da   :  { %v2843_v56 = vadd.f32 %v2815_v44, %v2694_v54  ;;  %v2696_v44 = vadd.f32 %v8708_v33, %v8967_v45  ;;  %v2697_v45 = vadd.f32 %v8729_v50, %v8984_v21  ;;  %v4053_v21 = vld [vmem:[#allocation2 + $0xe1] sm:$0xff] }
 0x3dc   :  { %6956 = vmatmul.msk.f32.gmra.mxu1 %vm11_vm0, %v3306_v0  ;;  %v2992_v40 = vadd.f32 %v9079_v15, %v2843_v56  ;;  %v4354_v56 = vld [vmem:[#allocation2 + $0x112] sm:$0xff] }
 0x3dd   :  { %6988 = vmatmul.msk.f32.gmra.mxu3 %vm11_vm0, %v3604_v41  ;;  %v3308_v41 = vld [vmem:[#allocation2 + $0x371] sm:$0xff] }
 0x3de   :  { %7033 = vmatmul.msk.f32.gmra.mxu2 %vm11_vm0, %v4050_v38 }
 0x3e0   :  { %v3113_v19 = vpop.f32.mrf.mxu3 }
 0x3e1   :  { %v9197_v23 = vadd.f32 %v3113_v19, %v2992_v40  ;;  %v2818_v51 = vpop.f32.mrf.mxu1  ;;  %7070 = vmatmul.msk.f32.gmra.mxu0 %vm11_vm0, %v4353_v58  ;;  %v9218_v38 = vpop.f32.mrf.mxu2 }
 0x3e2   :  { %v2844_v59 = vadd.f32 %v2818_v51, %v2695_v8  ;;  %v4355_v51 = vld [vmem:[#allocation2 + $0x122] sm:$0xff]  ;;  %v9225_v58 = vpop.f32.mrf.mxu0 }
 0x3e4   :  { %6957 = vmatmul.msk.f32.gmra.mxu1 %vm11_vm0, %v3307_v3  ;;  %v2993_v15 = vadd.f32 %v9095_v53, %v2844_v59  ;;  %v3606_v53 = vld [vmem:[#allocation2 + $0x372] sm:$0xff]  ;;  %v3309_v3 = vld [vmem:[#allocation2 + $0x381] sm:$0xff] }
 0x3e5   :  { %6989 = vmatmul.msk.f32.gmra.mxu3 %vm11_vm0, %v3605_v5 }
 0x3e6   :  { %7034 = vmatmul.msk.f32.gmra.mxu2 %vm11_vm0, %v4051_v20  ;;  %v2698_v20 = vadd.f32 %v8752_v39, %v9008_v60 }
 0x3e8   :  { %v3116_v55 = vpop.f32.mrf.mxu3 }
 0x3e9   :  { %v9210_v54 = vadd.f32 %v3116_v55, %v2993_v15  ;;  %v2821_v17 = vpop.f32.mrf.mxu1  ;;  %7071 = vmatmul.msk.f32.gmra.mxu0 %vm11_vm0, %v4354_v56  ;;  %v9232_v15 = vpop.f32.mrf.mxu2  ;;  %v3310_v56 = vld [vmem:[#allocation2 + $0x391] sm:$0xff] }
 0x3ea   :  { %v2845_v0 = vadd.f32 %v2821_v17, %v2696_v44 }
 0x3ec   :  { %6958 = vmatmul.msk.f32.gmra.mxu1 %vm11_vm0, %v3308_v41  ;;  %v2994_v40 = vadd.f32 %v9110_v42, %v2845_v0  ;;  %v3607_v42 = vld [vmem:[#allocation2 + $0x382] sm:$0xff]  ;;  %v3608_v0 = vld [vmem:[#allocation2 + $0x392] sm:$0xff] }
 0x3ed   :  { %6990 = vmatmul.msk.f32.gmra.mxu3 %vm11_vm0, %v3606_v53  ;;  %v4211_v41 = vld [vmem:[%s12061_s1 + $0x320] sm:$0xff] }
 0x3ee   :  { %7035 = vmatmul.msk.f32.gmra.mxu2 %vm11_vm0, %v4052_v61  ;;  %4272 = vmatpush.msrb.mxu3 %v4211_v41  ;;  %v4054_v53 = vld [vmem:[#allocation2 + $0xf1] sm:$0xff]  ;;  %v4192_v41 = vld [vmem:[#allocation2 + $0x161] sm:$0xff] }
 0x3f0   :  { %v3119_v19 = vpop.f32.mrf.mxu3 }
 0x3f1   :  { %v9221_v33 = vadd.f32 %v3119_v19, %v2994_v40  ;;  %v2824_v8 = vpop.f32.mrf.mxu1  ;;  %7072 = vmatmul.msk.f32.gmra.mxu0 %vm11_vm0, %v4355_v51  ;;  %v2699_v19 = vadd.f32 %v8802_v63, %v9055_v7  ;;  %v3311_v51 = vld [vmem:[#allocation2 + $0x3a1] sm:$0xff]  ;;  %v4210_v63 = vld [vmem:[%s12061_s1 + $0x318] sm:$0xff] }
 0x3f2   :  { %v2846_v59 = vadd.f32 %v2824_v8, %v2697_v45  ;;  %v9252_v45 = vpop.f32.mrf.mxu2  ;;  %v3911_v7 = vld [vmem:[%s12061_s1 + $0x2d0] sm:$0xff]  ;;  %4273 = vmatpush.msrb.mxu3 %v4210_v63 }
 0x3f3   :  { %v4057_v63 = vld [vmem:[#allocation2 + $0x121] sm:$0xff] }
 0x3f4   :  { %6959 = vmatmul.msk.f32.gmra.mxu1 %vm11_vm0, %v3309_v3  ;;  %v2995_v5 = vadd.f32 %v9127_v48, %v2846_v59  ;;  %v3913_v48 = vld [vmem:[%s12061_s1 + $0x2e0] sm:$0xff]  ;;  %v3609_v59 = vld [vmem:[#allocation2 + $0x3a2] sm:$0xff] }
 0x3f5   :  { %6991 = vmatmul.msk.f32.gmra.mxu3 %vm11_vm0, %v3607_v42  ;;  %3974 = vmatpush.msra.mxu1 %v3913_v48  ;;  %v4209_v3 = vld [vmem:[%s12061_s1 + $0x310] sm:$0xff] }
 0x3f6   :  { %7036 = vmatmul.msk.f32.gmra.mxu2 %vm11_vm0, %v4053_v21  ;;  %4274 = vmatpush.msrb.mxu3 %v4209_v3  ;;  %v4208_v21 = vld [vmem:[%s12061_s1 + $0x308] sm:$0xff]  ;;  %v9300_v3 = vpop.f32.mrf.mxu0 }
 0x3f8   :  { %v3122_v50 = vpop.f32.mrf.mxu3  ;;  %4275 = vmatpush.msrb.mxu3 %v4208_v21 }
 0x3f9   :  { %v9234_v55 = vadd.f32 %v3122_v50, %v2995_v5  ;;  %v2827_v44 = vpop.f32.mrf.mxu1  ;;  %v3910_v5 = vld [vmem:[%s12061_s1 + $0x2c8] sm:$0xff] }
 0x3fa   :  { %v2847_v17 = vadd.f32 %v2827_v44, %v2698_v20  ;;  %v4055_v20 = vld [vmem:[#allocation2 + $0x101] sm:$0xff]  ;;  %v9281_v48 = vpop.f32.mrf.mxu2 }
 0x3fc   :  { %6960 = vmatmul.msk.f32.gmra.mxu1 %vm11_vm0, %v3310_v56  ;;  %v2996_v39 = vadd.f32 %v9142_v1, %v2847_v17  ;;  %v3912_v1 = vld [vmem:[%s12061_s1 + $0x2d8] sm:$0xff]  ;;  %v3280_v17 = vadd.f32 %v8818_v9, %v9072_v35  ;;  %v3281_v9 = vadd.f32 %v8831_v57, %v9086_v37  ;;  %v3282_v57 = vadd.f32 %v8846_v22, %v9098_v47  ;;  %v12233_v22 = vld [vmem:[#allocation43_spill] sm:$0xff] }
 0x3fd   :  { %6992 = vmatmul.msk.f32.gmra.mxu3 %vm11_vm0, %v3608_v0  ;;  %3975 = vmatpush.msra.mxu1 %v3912_v1  ;;  %v3894_v0 = vld [vmem:[#allocation2 + $0x160] sm:$0xff]  ;;  %v3283_v47 = vadd.f32 %v12233_v22, %v9112_v28 }
 0x3fe   :  { %7037 = vmatmul.msk.f32.gmra.mxu2 %vm11_vm0, %v4054_v53  ;;  %v4056_v53 = vld [vmem:[#allocation2 + $0x111] sm:$0xff] }
 0x3ff   :  { %3976 = vmatpush.msra.mxu1 %v3911_v7 }
 0x400   :  { %v3125_v60 = vpop.f32.mrf.mxu3 }
 0x401   :  { %v9248_v40 = vadd.f32 %v3125_v60, %v2996_v39  ;;  %v2830_v61 = vpop.f32.mrf.mxu1  ;;  %3977 = vmatpush.msra.mxu1 %v3910_v5  ;;  %v3896_v5 = vld [vmem:[#allocation2 + $0x180] sm:$0xff] }
 0x402   :  { %v2848_v8 = vadd.f32 %v2830_v61, %v2699_v19 }
 0x404   :  { %6961 = vmatmul.msk.f32.gmra.mxu1 %vm11_vm0, %v3311_v51  ;;  %v2997_v42 = vadd.f32 %v9157_v29, %v2848_v8  ;;  %v3895_v8 = vld [vmem:[#allocation2 + $0x170] sm:$0xff] }
 0x405   :  { %6993 = vmatmul.msk.f32.gmra.mxu3 %vm11_vm0, %v3609_v59  ;;  %v4193_v51 = vld [vmem:[#allocation2 + $0x171] sm:$0xff]  ;;  %v9293_v59 = vpop.f32.mrf.mxu2 }
 0x406   :  { %7038 = vmatmul.msk.f32.gmra.mxu2 %vm11_vm0, %v4055_v20 }
 0x408   :  { %v3128_v50 = vpop.f32.mrf.mxu3 }
 0x409   :  { %v9276_v44 = vadd.f32 %v3128_v50, %v2997_v42  ;;  %v3381_v56 = vpop.f32.mrf.mxu1  ;;  %v4194_v50 = vld [vmem:[#allocation2 + $0x181] sm:$0xff] }
 0x40a   :  { %v3429_v29 = vadd.f32 %v3381_v56, %v3280_v17 }
 0x40c   :  { %7010 = vmatmul.msk.f32.vlgmr.msra.gmra.mxu1 %vm11_vm0, %v3894_v0  ;;  %v3578_v39 = vadd.f32 %v9171_v49, %v3429_v29  ;;  %v3897_v0 = vld [vmem:[#allocation2 + $0x190] sm:$0xff] }
 0x40d   :  { %7042 = vmatmul.msk.f32.vlgmr.msrb.gmra.mxu3 %vm11_vm0, %v4192_v41  ;;  %v9306_v21 = vpop.f32.mrf.mxu2  ;;  %v9312_v41 = vpop.f32.mrf.mxu0 }
 0x40e   :  { %7039 = vmatmul.msk.f32.gmra.mxu2 %vm11_vm0, %v4056_v53 }
 0x410   :  { %v3679_v60 = vpop.f32.mrf.mxu3 }
 0x411   :  { %v9286_v19 = vadd.f32 %v3679_v60, %v3578_v39  ;;  %v3384_v35 = vpop.f32.mrf.mxu1  ;;  %v4195_v39 = vld [vmem:[#allocation2 + $0x191] sm:$0xff] }
 0x412   :  { %v3430_v61 = vadd.f32 %v3384_v35, %v3281_v9  ;;  %v12235_v9 = vld [vmem:[#allocation5_spill] sm:$0xff] }
 0x413   :  { %12230 = vst [vmem:[#allocation28_spill] sm:$0xff] %v9286_v19  ;;  %v3284_v35 = vadd.f32 %v12235_v9, %v9123_v46  ;;  %v3909_v19 = vld [vmem:[#allocation2 + $0x270] sm:$0xff] }
 0x414   :  { %7011 = vmatmul.msk.f32.gmra.mxu1 %vm11_vm0, %v3895_v8  ;;  %v3579_v49 = vadd.f32 %v9188_v43, %v3430_v61 }
 0x415   :  { %7043 = vmatmul.msk.f32.gmra.mxu3 %vm11_vm0, %v4193_v51  ;;  %v9321_v28 = vpop.f32.mrf.mxu2  ;;  %v3898_v51 = vld [vmem:[#allocation2 + $0x1a0] sm:$0xff] }
 0x416   :  { %7040 = vmatmul.msk.f32.gmra.mxu2 %vm11_vm0, %v4057_v63 }
 0x418   :  { %v3682_v1 = vpop.f32.mrf.mxu3 }
 0x419   :  { %v9296_v7 = vadd.f32 %v3682_v1, %v3579_v49  ;;  %v3387_v37 = vpop.f32.mrf.mxu1  ;;  %v12236_v49 = vld [vmem:[#allocation40_spill] sm:$0xff]  ;;  %v9326_v1 = vpop.f32.mrf.mxu0 }
 0x41a   :  { %v3431_v42 = vadd.f32 %v3387_v37, %v3282_v57  ;;  %12237 = vst [vmem:[#allocation47_spill] sm:$0xff] %v9326_v1  ;;  %v12239_v37 = vld [vmem:[#allocation49_spill] sm:$0xff] }
 0x41b   :  { %12231 = vst [vmem:[#allocation57_spill] sm:$0xff] %v9296_v7  ;;  %v3285_v46 = vadd.f32 %v12239_v37, %v9136_v4  ;;  %v3286_v4 = vadd.f32 %v8910_v31, %v9149_v25  ;;  %v3901_v31 = vld [vmem:[#allocation2 + $0x1d0] sm:$0xff] }
 0x41c   :  { %7012 = vmatmul.msk.f32.gmra.mxu1 %vm11_vm0, %v3896_v5  ;;  %v3580_v43 = vadd.f32 %v9203_v6, %v3431_v42 }
 0x41d   :  { %7044 = vmatmul.msk.f32.gmra.mxu3 %vm11_vm0, %v4194_v50  ;;  %v3899_v50 = vld [vmem:[#allocation2 + $0x1b0] sm:$0xff] }
 0x420   :  { %v3685_v20 = vpop.f32.mrf.mxu3 }
 0x421   :  { %v9308_v17 = vadd.f32 %v3685_v20, %v3580_v43  ;;  %v3390_v56 = vpop.f32.mrf.mxu1  ;;  %v9333_v43 = vpop.f32.mrf.mxu2  ;;  %v12240_v20 = vld [vmem:[#allocation16_spill] sm:$0xff] }
 0x422   :  { %v3432_v29 = vadd.f32 %v3390_v56, %v3283_v47  ;;  %v9339_v47 = vpop.f32.mrf.mxu0 }
 0x423   :  { %12232 = vst [vmem:[#allocation46_spill] sm:$0xff] %v9308_v17 }
 0x424   :  { %7013 = vmatmul.msk.f32.gmra.mxu1 %vm11_vm0, %v3897_v0  ;;  %v3581_v6 = vadd.f32 %v9218_v38, %v3432_v29  ;;  %12241 = vst [vmem:[#allocation21_spill] sm:$0xff] %v9339_v47 }
 0x425   :  { %7045 = vmatmul.msk.f32.gmra.mxu3 %vm11_vm0, %v4195_v39  ;;  %v3900_v39 = vld [vmem:[#allocation2 + $0x1c0] sm:$0xff] }
 0x428   :  { %v3688_v60 = vpop.f32.mrf.mxu3 }
 0x429   :  { %v9317_v53 = vadd.f32 %v3688_v60, %v3581_v6  ;;  %v3393_v61 = vpop.f32.mrf.mxu1  ;;  %v12242_v6 = vld [vmem:[#allocation22_spill] sm:$0xff]  ;;  %v9348_v60 = vpop.f32.mrf.mxu2 }
 0x42a   :  { %v3433_v8 = vadd.f32 %v3393_v61, %v3284_v35  ;;  %v3287_v61 = vadd.f32 %v8930_v11, %v9160_v32  ;;  %v9355_v25 = vpop.f32.mrf.mxu0  ;;  %v3902_v11 = vld [vmem:[#allocation2 + $0x200] sm:$0xff] }
 0x42b   :  { %12234 = vst [vmem:[#allocation18_spill] sm:$0xff] %v9317_v53 }
 0x42c   :  { %7014 = vmatmul.msk.f32.gmra.mxu1 %vm11_vm0, %v3898_v51  ;;  %v3582_v38 = vadd.f32 %v9232_v15, %v3433_v8  ;;  %v4199_v51 = vld [vmem:[#allocation2 + $0x1d1] sm:$0xff] }
 0x42d   :  { %7046 = vmatmul.msk.f32.gmra.mxu3 %vm11_vm0, %v12236_v49 }
 0x430   :  { %v3691_v63 = vpop.f32.mrf.mxu3 }
 0x431   :  { %v9329_v57 = vadd.f32 %v3691_v63, %v3582_v38  ;;  %v3396_v42 = vpop.f32.mrf.mxu1  ;;  %v9360_v63 = vpop.f32.mrf.mxu2 }
 0x432   :  { %v3434_v5 = vadd.f32 %v3396_v42, %v3285_v46  ;;  %v9366_v32 = vpop.f32.mrf.mxu0  ;;  %v12243_v42 = vld [vmem:[#allocation41_spill] sm:$0xff] }
 0x433   :  { %12238 = vst [vmem:[#allocation52_spill] sm:$0xff] %v9329_v57 }
 0x434   :  { %7015 = vmatmul.msk.f32.gmra.mxu1 %vm11_vm0, %v3899_v50  ;;  %v3583_v22 = vadd.f32 %v9252_v45, %v3434_v5 }
 0x435   :  { %7047 = vmatmul.msk.f32.gmra.mxu3 %vm11_vm0, %v12240_v20  ;;  %v3903_v20 = vld [vmem:[#allocation2 + $0x210] sm:$0xff] }
 0x438   :  { %v3694_v15 = vpop.f32.mrf.mxu3 }
 0x439   :  { %v9341_v56 = vadd.f32 %v3694_v15, %v3583_v22  ;;  %v3399_v29 = vpop.f32.mrf.mxu1  ;;  %v12244_v22 = vld [vmem:[#allocation14_spill] sm:$0xff] }
 0x43a   :  { %v3435_v0 = vadd.f32 %v3399_v29, %v3286_v4  ;;  %v9380_v15 = vpop.f32.mrf.mxu0 }
 0x43c   :  { %7016 = vmatmul.msk.f32.gmra.mxu1 %vm11_vm0, %v3900_v39  ;;  %v3584_v45 = vadd.f32 %v9281_v48, %v3435_v0  ;;  %v3904_v0 = vld [vmem:[#allocation2 + $0x220] sm:$0xff] }
 0x43d   :  { %7048 = vmatmul.msk.f32.gmra.mxu3 %vm11_vm0, %v12242_v6 }
 0x440   :  { %v3697_v9 = vpop.f32.mrf.mxu3 }
 0x441   :  { %v9351_v35 = vadd.f32 %v3697_v9, %v3584_v45  ;;  %v3402_v8 = vpop.f32.mrf.mxu1 }
 0x442   :  { %v3436_v49 = vadd.f32 %v3402_v8, %v3287_v61  ;;  %v9391_v6 = vpop.f32.mrf.mxu0  ;;  %v3905_v61 = vld [vmem:[#allocation2 + $0x230] sm:$0xff] }
 0x444   :  { %7017 = vmatmul.msk.f32.gmra.mxu1 %vm11_vm0, %v3901_v31  ;;  %v3585_v38 = vadd.f32 %v9293_v59, %v3436_v49  ;;  %v9375_v59 = vpop.f32.mrf.mxu2 }
 0x445   :  { %7049 = vmatmul.msk.f32.gmra.mxu3 %vm11_vm0, %v4199_v51 }
 0x448   :  { %v3700_v48 = vpop.f32.mrf.mxu3 }
 0x449   :  { %v9362_v37 = vadd.f32 %v3700_v48, %v3585_v38  ;;  %v9364_v46 = vpop.f32.mrf.mxu1 }
 0x44a   :  { %v9406_v49 = vpop.f32.mrf.mxu0 }
 0x44c   :  { %7018 = vmatmul.msk.f32.gmra.mxu1 %vm11_vm0, %v3902_v11  ;;  %v9386_v39 = vpop.f32.mrf.mxu2 }
 0x44d   :  { %7050 = vmatmul.msk.f32.gmra.mxu3 %vm11_vm0, %v12243_v42 }
 0x450   :  { %v9371_v5 = vpop.f32.mrf.mxu3 }
 0x451   :  { %v9373_v50 = vpop.f32.mrf.mxu1 }
 0x452   :  { %v9417_v42 = vpop.f32.mrf.mxu0 }
 0x453   :  { %12246 = vst [vmem:[#allocation31_spill] sm:$0xff] %v9417_v42 }
 0x454   :  { %7019 = vmatmul.msk.f32.gmra.mxu1 %vm11_vm0, %v3903_v20  ;;  %v9400_v8 = vpop.f32.mrf.mxu2  ;;  %v12247_v20 = vld [vmem:[#allocation25_spill] sm:$0xff] }
 0x455   :  { %7051 = vmatmul.msk.f32.gmra.mxu3 %vm11_vm0, %v12244_v22 }
 0x458   :  { %v9382_v4 = vpop.f32.mrf.mxu3 }
 0x459   :  { %v9384_v29 = vpop.f32.mrf.mxu1 }
 0x45a   :  { %v9431_v34 = vpop.f32.mrf.mxu0 }
 0x45b   :  { %12250 = vst [vmem:[#allocation50_spill] sm:$0xff] %v9431_v34 }
 0x45c   :  { %7020 = vmatmul.msk.f32.gmra.mxu1 %vm11_vm0, %v3904_v0  ;;  %v9411_v38 = vpop.f32.mrf.mxu2 }
 0x45d   :  { %7052 = vmatmul.msk.f32.gmra.mxu3 %vm11_vm0, %v8943_v24  ;;  %v3906_v24 = vld [vmem:[#allocation2 + $0x240] sm:$0xff]  ;;  %12245 = vst [vmem:[#allocation8_spill] sm:$0xff] %v9411_v38  ;;  %v4058_v38 = vld [vmem:[#allocation2 + $0x131] sm:$0xff] }
 0x45e   :  { %7041 = vmatmul.msk.f32.gmra.mxu2 %vm11_vm0, %v4058_v38 }
 0x460   :  { %v9393_v45 = vpop.f32.mrf.mxu3 }
 0x461   :  { %v9395_v9 = vpop.f32.mrf.mxu1 }
 0x464   :  { %7021 = vmatmul.msk.f32.gmra.mxu1 %vm11_vm0, %v3905_v61  ;;  %v9426_v61 = vpop.f32.mrf.mxu2 }
 0x465   :  { %7053 = vmatmul.msk.f32.gmra.mxu3 %vm11_vm0, %v8957_v12  ;;  %v3907_v12 = vld [vmem:[#allocation2 + $0x250] sm:$0xff]  ;;  %12248 = vst [vmem:[#allocation61_spill] sm:$0xff] %v9426_v61 }
 0x466   :  { %v4207_v61 = vld [vmem:[#allocation2 + $0x271] sm:$0xff] }
 0x468   :  { %v9402_v31 = vpop.f32.mrf.mxu3 }
 0x469   :  { %v9404_v51 = vpop.f32.mrf.mxu1 }
 0x46c   :  { %7022 = vmatmul.msk.f32.gmra.mxu1 %vm11_vm0, %v3906_v24  ;;  %v12249_v24 = vld [vmem:[#allocation53_spill] sm:$0xff]  ;;  %v9439_v36 = vpop.f32.mrf.mxu2 }
 0x46d   :  { %7054 = vmatmul.msk.f32.gmra.mxu3 %vm11_vm0, %v8973_v2  ;;  %v3908_v2 = vld [vmem:[#allocation2 + $0x260] sm:$0xff]  ;;  %12251 = vst [vmem:[#allocation20_spill] sm:$0xff] %v9439_v36 }
 0x470   :  { %v9413_v48 = vpop.f32.mrf.mxu3 }
 0x471   :  { %v9415_v11 = vpop.f32.mrf.mxu1 }
 0x474   :  { %7023 = vmatmul.msk.f32.gmra.mxu1 %vm11_vm0, %v3907_v12  ;;  %v4356_v12 = vld [vmem:[#allocation2 + $0x132] sm:$0xff]  ;;  %v9449_v34 = vpop.f32.mrf.mxu2 }
 0x475   :  { %7055 = vmatmul.msk.f32.gmra.mxu3 %vm11_vm0, %v12247_v20  ;;  %7073 = vmatmul.msk.f32.gmra.mxu0 %vm11_vm0, %v4356_v12  ;;  %12254 = vst [vmem:[#allocation24_spill] sm:$0xff] %v9449_v34 }
 0x478   :  { %v9422_v22 = vpop.f32.mrf.mxu3 }
 0x479   :  { %v9424_v0 = vpop.f32.mrf.mxu1 }
 0x47c   :  { %7024 = vmatmul.msk.f32.gmra.mxu1 %vm11_vm0, %v3908_v2  ;;  %v9443_v2 = vpop.f32.mrf.mxu0  ;;  %v9457_v17 = vpop.f32.mrf.mxu2 }
 0x47d   :  { %7056 = vmatmul.msk.f32.gmra.mxu3 %vm11_vm0, %v12249_v24  ;;  %12252 = vst [vmem:[#allocation51_spill] sm:$0xff] %v9443_v2 }
 0x47e   :  { %12258 = vst [vmem:[#allocation54_spill] sm:$0xff] %v9457_v17 }
 0x480   :  { %v9435_v20 = vpop.f32.mrf.mxu3 }
 0x481   :  { %v9437_v42 = vpop.f32.mrf.mxu1 }
 0x484   :  { %7025 = vmatmul.msk.f32.gmra.mxu1 %vm11_vm0, %v3909_v19  ;;  %v9455_v18 = vpop.f32.mrf.mxu0 }
 0x485   :  { %7057 = vmatmul.msk.f32.gmra.mxu3 %vm11_vm0, %v4207_v61  ;;  %12257 = vst [vmem:[#allocation65_spill] sm:$0xff] %v9455_v18 }
 0x488   :  { %v9445_v24 = vpop.f32.mrf.mxu3 }
 0x489   :  { %v9447_v38 = vpop.f32.mrf.mxu1 }
 0x48a   :  { %12253 = vst [vmem:[#allocation56_spill] sm:$0xff] %v9447_v38  ;;  %v4143_v38 = vpop.f32.mrf.mxu2 }
 0x48c   :  { %v9463_v61 = vpop.f32.mrf.mxu0 }
 0x48d   :  { %12261 = vst [vmem:[#allocation60_spill] sm:$0xff] %v9463_v61 }
 0x490   :  { %v9451_v12 = vpop.f32.mrf.mxu3 }
 0x491   :  { %12255 = vst [vmem:[#allocation9_spill] sm:$0xff] %v9451_v12  ;;  %v9453_v7 = vpop.f32.mrf.mxu1 }
 0x492   :  { %12256 = vst [vmem:[#allocation34_spill] sm:$0xff] %v9453_v7  ;;  %v4146_v18 = vpop.f32.mrf.mxu2 }
 0x494   :  { %v9469_v34 = vpop.f32.mrf.mxu0 }
 0x495   :  { %12264 = vst [vmem:[#allocation35_spill] sm:$0xff] %v9469_v34  ;;  %v3883_v34 = vadd.f32 %v9225_v58, %v9351_v35 }
 0x498   :  { %v9459_v36 = vpop.f32.mrf.mxu3 }
 0x499   :  { %12259 = vst [vmem:[#allocation23_spill] sm:$0xff] %v9459_v36  ;;  %v9461_v19 = vpop.f32.mrf.mxu1  ;;  %v3882_v36 = vadd.f32 %v9208_v27, %v9341_v56 }
 0x49a   :  { %12260 = vst [vmem:[#allocation55_spill] sm:$0xff] %v9461_v19 }
 0x49c   :  { %v9475_v53 = vpop.f32.mrf.mxu0 }
 0x49d   :  { %12267 = vst [vmem:[#allocation59_spill] sm:$0xff] %v9475_v53  ;;  %v12271_v53 = vld [vmem:[#allocation42_spill] sm:$0xff] }
 0x4a0   :  { %v9465_v2 = vpop.f32.mrf.mxu3 }
 0x4a1   :  { %12262 = vst [vmem:[#allocation27_spill] sm:$0xff] %v9465_v2  ;;  %v9467_v52 = vpop.f32.mrf.mxu1  ;;  %v4149_v2 = vpop.f32.mrf.mxu2 }
 0x4a2   :  { %12263 = vst [vmem:[#allocation10_spill] sm:$0xff] %v9467_v52 }
 0x4a8   :  { %v9471_v12 = vpop.f32.mrf.mxu3 }
 0x4a9   :  { %12265 = vst [vmem:[#allocation58_spill] sm:$0xff] %v9471_v12  ;;  %v9473_v7 = vpop.f32.mrf.mxu1  ;;  %v4152_v56 = vpop.f32.mrf.mxu2 }
 0x4aa   :  { %12266 = vst [vmem:[#allocation26_spill] sm:$0xff] %v9473_v7  ;;  %v9485_v7 = vpop.f32.mrf.mxu0 }
 0x4ab   :  { %12270 = vst [vmem:[#allocation11_spill] sm:$0xff] %v9485_v7  ;;  %v12275_v7 = vld [vmem:[#allocation44_spill] sm:$0xff] }
 0x4b0   :  { %v9477_v17 = vpop.f32.mrf.mxu3 }
 0x4b1   :  { %12268 = vst [vmem:[#allocation64_spill] sm:$0xff] %v9477_v17  ;;  %v3994_v61 = vpop.f32.mrf.mxu1  ;;  %v3288_v17 = vadd.f32 %v12271_v53, %v9173_v10  ;;  %v9499_v53 = vpop.f32.mrf.mxu2 }
 0x4b2   :  { %v4032_v19 = vadd.f32 %v3994_v61, %v3882_v36 }
 0x4b3   :  { %v3437_v47 = vadd.f32 %v9364_v46, %v3288_v17 }
 0x4b4   :  { %v4181_v30 = vadd.f32 %v4143_v38, %v4032_v19  ;;  %v4450_v38 = vpop.f32.mrf.mxu0 }
 0x4b5   :  { %v3586_v58 = vadd.f32 %v9306_v21, %v3437_v47 }
 0x4b8   :  { %v4292_v52 = vpop.f32.mrf.mxu3 }
 0x4b9   :  { %v9481_v57 = vadd.f32 %v4292_v52, %v4181_v30  ;;  %v3997_v12 = vpop.f32.mrf.mxu1  ;;  %v3884_v52 = vadd.f32 %v9300_v3, %v9362_v37 }
 0x4ba   :  { %v4033_v1 = vadd.f32 %v3997_v12, %v3883_v34  ;;  %v3735_v34 = vadd.f32 %v9371_v5, %v3586_v58  ;;  %v9507_v5 = vpop.f32.mrf.mxu2 }
 0x4bb   :  { %12269 = vst [vmem:[#allocation29_spill] sm:$0xff] %v9481_v57 }
 0x4bc   :  { %v4182_v27 = vadd.f32 %v4146_v18, %v4033_v1  ;;  %v3885_v10 = vadd.f32 %v9312_v41, %v3735_v34 }
 0x4c0   :  { %v4295_v36 = vpop.f32.mrf.mxu3 }
 0x4c1   :  { %v9490_v61 = vadd.f32 %v4295_v36, %v4182_v27  ;;  %v4000_v30 = vpop.f32.mrf.mxu1  ;;  %v9501_v27 = vpop.f32.mrf.mxu0 }
 0x4c2   :  { %v4034_v35 = vadd.f32 %v4000_v30, %v3884_v52  ;;  %v9515_v52 = vpop.f32.mrf.mxu2 }
 0x4c3   :  { %12272 = vst [vmem:[#allocation36_spill] sm:$0xff] %v9490_v61 }
 0x4c4   :  { %v4183_v12 = vadd.f32 %v4149_v2, %v4034_v35 }
 0x4c8   :  { %v4298_v19 = vpop.f32.mrf.mxu3 }
 0x4c9   :  { %v9497_v17 = vadd.f32 %v4298_v19, %v4183_v12  ;;  %v4003_v18 = vpop.f32.mrf.mxu1  ;;  %v9509_v2 = vpop.f32.mrf.mxu0 }
 0x4ca   :  { %v4035_v1 = vadd.f32 %v4003_v18, %v3885_v10  ;;  %v4164_v35 = vpop.f32.mrf.mxu2  ;;  %v3294_v10 = vadd.f32 %v9102_v16, %v9248_v40 }
 0x4cb   :  { %12273 = vst [vmem:[#allocation62_spill] sm:$0xff] %v9497_v17  ;;  %v3291_v17 = vadd.f32 %v12275_v7, %v9210_v54 }
 0x4cc   :  { %v4184_v46 = vadd.f32 %v4152_v56, %v4035_v1 }
 0x4d0   :  { %v4301_v3 = vpop.f32.mrf.mxu3 }
 0x4d1   :  { %v4333_v37 = vadd.f32 %v4301_v3, %v4184_v46  ;;  %v9503_v21 = vpop.f32.mrf.mxu1  ;;  %v9519_v58 = vpop.f32.mrf.mxu0  ;;  %v3293_v46 = vadd.f32 %v9084_v62, %v9234_v55  ;;  %v3443_v3 = vadd.f32 %v9424_v0, %v3294_v10  ;;  %v12276_v0 = vld [vmem:[#allocation6_spill] sm:$0xff] }
 0x4d2   :  { %v4167_v1 = vpop.f32.mrf.mxu2  ;;  %v3290_v10 = vadd.f32 %v12276_v0, %v9197_v23 }
 0x4d3   :  { %v9505_v47 = vadd.f32 %v4450_v38, %v4333_v37  ;;  %v3292_v37 = vadd.f32 %v9069_v26, %v9221_v33  ;;  %v3442_v57 = vadd.f32 %v9415_v11, %v3293_v46  ;;  %v3592_v40 = vadd.f32 %v9386_v39, %v3443_v3  ;;  %v12277_v11 = vld [vmem:[#allocation17_spill] sm:$0xff] }
 0x4d4   :  { %v3440_v26 = vadd.f32 %v9395_v9, %v3291_v17  ;;  %v3289_v54 = vadd.f32 %v12277_v11, %v9184_v13  ;;  %v3439_v7 = vadd.f32 %v9384_v29, %v3290_v10 }
 0x4d5   :  { %12274 = vst [vmem:[#allocation30_spill] sm:$0xff] %v9505_v47  ;;  %v3295_v47 = vadd.f32 %v9118_v14, %v9276_v44  ;;  %v3441_v16 = vadd.f32 %v9404_v51, %v3292_v37  ;;  %v3591_v33 = vadd.f32 %v9375_v59, %v3442_v57  ;;  %v3741_v14 = vadd.f32 %v9435_v20, %v3592_v40  ;;  %v12278_v40 = vld [vmem:[#allocation21_spill] sm:$0xff] }
 0x4d6   :  { %v3438_v23 = vadd.f32 %v9373_v50, %v3289_v54  ;;  %v3589_v9 = vadd.f32 %v9348_v60, %v3440_v26  ;;  %v3588_v13 = vadd.f32 %v9333_v43, %v3439_v7 }
 0x4d7   :  { %v3444_v62 = vadd.f32 %v9437_v42, %v3295_v47  ;;  %v3590_v39 = vadd.f32 %v9360_v63, %v3441_v16  ;;  %v3740_v51 = vadd.f32 %v9422_v22, %v3591_v33  ;;  %v3891_v20 = vadd.f32 %v9391_v6, %v3741_v14 }
 0x4d8   :  { %v9511_v41 = vpop.f32.mrf.mxu3  ;;  %v3738_v29 = vadd.f32 %v9402_v31, %v3589_v9  ;;  %v3737_v46 = vadd.f32 %v9393_v45, %v3588_v13  ;;  %v12279_v45 = vld [vmem:[#allocation47_spill] sm:$0xff]  ;;  %v12282_v9 = vld [vmem:[#allocation18_spill] sm:$0xff] }
 0x4d9   :  { %v9513_v36 = vpop.f32.mrf.mxu1  ;;  %v9523_v12 = vpop.f32.mrf.mxu0  ;;  %v3593_v42 = vadd.f32 %v9400_v8, %v3444_v62  ;;  %v3739_v57 = vadd.f32 %v9413_v48, %v3590_v39  ;;  %v3890_v63 = vadd.f32 %v9380_v15, %v3740_v51  ;;  %v3587_v8 = vadd.f32 %v9321_v28, %v3438_v23  ;;  %v12281_v23 = vld [vmem:[#allocation7_spill] sm:$0xff] }
 0x4da   :  { %v4170_v47 = vpop.f32.mrf.mxu2  ;;  %v3888_v43 = vadd.f32 %v9355_v25, %v3738_v29  ;;  %v3887_v28 = vadd.f32 %v12278_v40, %v3737_v46 }
 0x4db   :  { %v3742_v59 = vadd.f32 %v9445_v24, %v3593_v42  ;;  %v3889_v60 = vadd.f32 %v9366_v32, %v3739_v57  ;;  %v3736_v6 = vadd.f32 %v9382_v4, %v3587_v8  ;;  %v12280_v42 = vld [vmem:[#allocation52_spill] sm:$0xff]  ;;  %v12283_v57 = vld [vmem:[#allocation19_spill] sm:$0xff] }
 0x4dc   :  { %v4037_v32 = vadd.f32 %v9513_v36, %v3887_v28  ;;  %v9575_v36 = vld [vmem:[%s12061_s1 + $0x348] ss:$0 sm:$0xff] }
 0x4dd   :  { %v3892_v24 = vadd.f32 %v9406_v49, %v3742_v59  ;;  %v3886_v26 = vadd.f32 %v12279_v45, %v3736_v6  ;;  %v3880_v59 = vadd.f32 %v12283_v57, %v12282_v9  ;;  %v12294_v28 = vld [vmem:[#allocation28_spill] sm:$0xff]  ;;  %v12311_v9 = vld [vmem:[#allocation23_spill] sm:$0xff] }
 0x4df   :  { %v4036_v4 = vadd.f32 %v9503_v21, %v3886_v26  ;;  %v12297_v26 = vld [vmem:[#allocation24_spill] sm:$0xff] }
 0x4e0   :  { %v9517_v30 = vpop.f32.mrf.mxu3 }
 0x4e1   :  { %v4012_v56 = vpop.f32.mrf.mxu1  ;;  %v4465_v61 = vpop.f32.mrf.mxu0  ;;  %v4185_v21 = vadd.f32 %v9499_v53, %v4036_v4  ;;  %v12300_v4 = vld [vmem:[#allocation59_spill] sm:$0xff] }
 0x4e2   :  { %v4173_v16 = vpop.f32.mrf.mxu2  ;;  %v4038_v62 = vadd.f32 %v4012_v56, %v3888_v43  ;;  %v4186_v56 = vadd.f32 %v9507_v5, %v4037_v32  ;;  %v12291_v43 = vld [vmem:[#allocation54_spill] sm:$0xff] }
 0x4e3   :  { %v4334_v5 = vadd.f32 %v9511_v41, %v4185_v21  ;;  %v12305_v21 = vld [vmem:[#allocation29_spill] sm:$0xff] }
 0x4e5   :  { %v4483_v41 = vadd.f32 %v9501_v27, %v4334_v5  ;;  %v12307_v5 = vld [vmem:[#allocation61_spill] sm:$0xff] }
 0x4e7   :  { %v4501_v40 = vadd.f32 %v9575_v36, %v4483_v41 }
 0x4e8   :  { %v9521_v34 = vpop.f32.mrf.mxu3 }
 0x4e9   :  { %v4015_v38 = vpop.f32.mrf.mxu1  ;;  %v4468_v17 = vpop.f32.mrf.mxu0 }
 0x4ea   :  { %v4039_v31 = vadd.f32 %v4015_v38, %v3889_v60  ;;  %v4187_v38 = vadd.f32 %v9515_v52, %v4038_v62  ;;  %v12288_v60 = vld [vmem:[#allocation57_spill] sm:$0xff]  ;;  %v12295_v62 = vld [vmem:[#allocation15_spill] sm:$0xff] }
 0x4f0   :  { %v4313_v19 = vpop.f32.mrf.mxu3 }
 0x4f1   :  { %v4018_v18 = vpop.f32.mrf.mxu1 }
 0x4f2   :  { %v4040_v48 = vadd.f32 %v4018_v18, %v3890_v63  ;;  %v4188_v18 = vadd.f32 %v4164_v35, %v4039_v31  ;;  %v4471_v25 = vpop.f32.mrf.mxu0  ;;  %v4335_v35 = vadd.f32 %v9517_v30, %v4186_v56  ;;  %v12285_v63 = vld [vmem:[#allocation46_spill] sm:$0xff]  ;;  %v12303_v56 = vld [vmem:[#allocation20_spill] sm:$0xff] }
 0x4f3   :  { %v12292_v31 = vld [vmem:[#allocation62_spill] sm:$0xff] }
 0x4f4   :  { %v4189_v0 = vadd.f32 %v4167_v1, %v4040_v48  ;;  %v4336_v1 = vadd.f32 %v9521_v34, %v4187_v38  ;;  %v4484_v53 = vadd.f32 %v9509_v2, %v4335_v35  ;;  %v12289_v48 = vld [vmem:[#allocation45_spill] sm:$0xff]  ;;  %v12301_v38 = vld [vmem:[#allocation30_spill] sm:$0xff]  ;;  %v12306_v35 = vld [vmem:[#allocation35_spill] sm:$0xff] }
 0x4f6   :  { %v4502_v46 = vadd.f32 %v9575_v36, %v4484_v53 }
 0x4f8   :  { %v4316_v55 = vpop.f32.mrf.mxu3 }
 0x4f9   :  { %v4021_v44 = vpop.f32.mrf.mxu1  ;;  %v4338_v49 = vadd.f32 %v4316_v55, %v4189_v0  ;;  %v3877_v0 = vadd.f32 %v12295_v62, %v12294_v28  ;;  %v4525_v28 = vld [vmem:[%s12061_s1 + $0xd60] sm:$0xff]  ;;  %v4526_v62 = vld [vmem:[%s12061_s1 + $0xd68] sm:$0xff] }
 0x4fa   :  { %v4041_v22 = vadd.f32 %v4021_v44, %v3891_v20  ;;  %v4337_v44 = vadd.f32 %v4313_v19, %v4188_v18  ;;  %v12284_v20 = vld [vmem:[#allocation26_spill] sm:$0xff]  ;;  %v12298_v18 = vld [vmem:[#allocation64_spill] sm:$0xff] }
 0x4fb   :  { %v4487_v7 = vadd.f32 %v4465_v61, %v4338_v49  ;;  %v4485_v61 = vadd.f32 %v9519_v58, %v4336_v1 }
 0x4fc   :  { %v4190_v37 = vadd.f32 %v4170_v47, %v4041_v22  ;;  %v4486_v52 = vadd.f32 %v9523_v12, %v4337_v44  ;;  %v3881_v47 = vadd.f32 %v12281_v23, %v12280_v42  ;;  %v12286_v22 = vld [vmem:[#allocation48_spill] sm:$0xff]  ;;  %v4500_v44 = vadd.f32 %v9575_v36, %v12301_v38  ;;  %v4539_v38 = vld [vmem:[%s12061_s1 + $0xdd0] sm:$0xff] }
 0x4fd   :  { %v4505_v51 = vadd.f32 %v9575_v36, %v4487_v7  ;;  %v4503_v29 = vadd.f32 %v9575_v36, %v4485_v61  ;;  %v3879_v8 = vadd.f32 %v12286_v22, %v12285_v63  ;;  %v12304_v7 = vld [vmem:[#allocation58_spill] sm:$0xff]  ;;  %v12309_v42 = vld [vmem:[#allocation60_spill] sm:$0xff]  ;;  %v12314_v63 = vld [vmem:[#allocation51_spill] sm:$0xff] }
 0x4fe   :  { %v4504_v12 = vadd.f32 %v9575_v36, %v4486_v52  ;;  %v4031_v13 = vadd.f32 %v12284_v20, %v3881_v47  ;;  %v4479_v52 = vadd.f32 %v12306_v35, %v12305_v21  ;;  %v4516_v47 = vmax.f32 %v4500_v44, 0.0 }
 0x4ff   :  { %v4521_v58 = vmax.f32 %v4505_v51, 0.0 }
 0x500   :  { %v4319_v50 = vpop.f32.mrf.mxu3  ;;  %v4180_v27 = vadd.f32 %v12291_v43, %v4031_v13  ;;  %v4497_v41 = vadd.f32 %v9575_v36, %v4479_v52 }
 0x501   :  { %v4024_v3 = vpop.f32.mrf.mxu1  ;;  %v4339_v10 = vadd.f32 %v4319_v50, %v4190_v37  ;;  %v4520_v50 = vmax.f32 %v4504_v12, 0.0  ;;  %v12293_v37 = vld [vmem:[#allocation11_spill] sm:$0xff] }
 0x502   :  { %v4042_v15 = vadd.f32 %v4024_v3, %v3892_v24  ;;  %v3878_v24 = vadd.f32 %v12289_v48, %v12288_v60  ;;  %v12290_v3 = vld [vmem:[#allocation55_spill] sm:$0xff]  ;;  %v4329_v49 = vadd.f32 %v12298_v18, %v4180_v27 }
 0x503   :  { %v4488_v11 = vadd.f32 %v4468_v17, %v4339_v10  ;;  %v12287_v17 = vld [vmem:[#allocation10_spill] sm:$0xff]  ;;  %v4029_v6 = vadd.f32 %v12290_v3, %v3879_v8  ;;  %v12316_v48 = vld [vmem:[#allocation31_spill] sm:$0xff] }
 0x504   :  { %v4191_v33 = vadd.f32 %v4173_v16, %v4042_v15  ;;  %v4030_v2 = vadd.f32 %v12287_v17, %v3880_v59  ;;  %v4481_v15 = vadd.f32 %v12293_v37, %v12292_v31  ;;  %v4519_v16 = vmax.f32 %v4503_v29, 0.0  ;;  %v12296_v10 = vld [vmem:[#allocation34_spill] sm:$0xff]  ;;  %v12312_v59 = vld [vmem:[#allocation65_spill] sm:$0xff]  ;;  %v4533_v18 = vld [vmem:[%s12061_s1 + $0xda0] sm:$0xff] }
 0x505   :  { %v4506_v55 = vadd.f32 %v9575_v36, %v4488_v11  ;;  %v4028_v45 = vadd.f32 %v12296_v10, %v3878_v24  ;;  %v12302_v11 = vld [vmem:[#allocation56_spill] sm:$0xff]  ;;  %v4178_v1 = vadd.f32 %v12303_v56, %v4029_v6  ;;  %v4478_v23 = vadd.f32 %v12309_v42, %v4329_v49  ;;  %v4529_v10 = vld [vmem:[%s12061_s1 + $0xd80] sm:$0xff]  ;;  %v5068_v42 = vld [vmem:[%s12061_s1 + $0x7b8] sm:$0xff] }
 0x506   :  { %v4179_v32 = vadd.f32 %v12297_v26, %v4030_v2  ;;  %v12315_v2 = vld [vmem:[#allocation50_spill] sm:$0xff]  ;;  %v4531_v26 = vld [vmem:[%s12061_s1 + $0xd90] sm:$0xff]  ;;  %v4534_v49 = vld [vmem:[%s12061_s1 + $0xda8] sm:$0xff] }
 0x507   :  { %v4522_v30 = vmax.f32 %v4506_v55, 0.0  ;;  %v4499_v55 = vadd.f32 %v9575_v36, %v4481_v15  ;;  %v4177_v61 = vadd.f32 %v12307_v5, %v4028_v45  ;;  %v4496_v17 = vadd.f32 %v9575_v36, %v4478_v23  ;;  %v4530_v45 = vld [vmem:[%s12061_s1 + $0xd88] sm:$0xff]  ;;  %v5067_v23 = vld [vmem:[%s12061_s1 + $0x7b0] sm:$0xff] }
 0x508   :  { %v4322_v14 = vpop.f32.mrf.mxu3 }
 0x509   :  { %v4340_v54 = vadd.f32 %v4322_v14, %v4191_v33  ;;  %v12299_v33 = vld [vmem:[#allocation36_spill] sm:$0xff]  ;;  %v4326_v57 = vadd.f32 %v12311_v9, %v4177_v61  ;;  %v4515_v13 = vmax.f32 %v4499_v55, 0.0  ;;  %v4512_v3 = vmax.f32 %v4496_v17, 0.0  ;;  %v5065_v9 = vld [vmem:[%s12061_s1 + $0x7a0] sm:$0xff] }
 0x50a   :  { %v4480_v14 = vadd.f32 %v12300_v4, %v12299_v33  ;;  %v4535_v33 = vld [vmem:[%s12061_s1 + $0xdb0] sm:$0xff]  ;;  %v4536_v4 = vld [vmem:[%s12061_s1 + $0xdb8] sm:$0xff]  ;;  %v5081_v17 = vld [vmem:[%s12061_s1 + $0x820] sm:$0xff] }
 0x50b   :  { %v4489_v39 = vadd.f32 %v4471_v25, %v4340_v54  ;;  %v4518_v25 = vmax.f32 %v4502_v46, 0.0  ;;  %v4027_v54 = vadd.f32 %v12302_v11, %v3877_v0  ;;  %v4513_v46 = vmax.f32 %v4497_v41, 0.0  ;;  %v4528_v0 = vld [vmem:[%s12061_s1 + $0xd78] sm:$0xff]  ;;  %v5083_v41 = vld [vmem:[%s12061_s1 + $0x830] sm:$0xff] }
 0x50c   :  { %v4498_v53 = vadd.f32 %v9575_v36, %v4480_v14  ;;  %v4537_v14 = vld [vmem:[%s12061_s1 + $0xdc0] sm:$0xff] }
 0x50d   :  { %v4507_v19 = vadd.f32 %v9575_v36, %v4489_v39  ;;  %v4328_v39 = vadd.f32 %v12304_v7, %v4179_v32  ;;  %v4532_v32 = vld [vmem:[%s12061_s1 + $0xd98] sm:$0xff] }
 0x50e   :  { %v4514_v8 = vmax.f32 %v4498_v53, 0.0 }
 0x50f   :  { %v4523_v34 = vmax.f32 %v4507_v19, 0.0  ;;  %v4517_v19 = vmax.f32 %v4501_v40, 0.0  ;;  %v4477_v20 = vadd.f32 %v12312_v59, %v4328_v39  ;;  %v4524_v40 = vld [vmem:[%s12061_s1 + $0xd58] sm:$0xff] }
 0x510   :  { %v5064_v59 = vld [vmem:[%s12061_s1 + $0x798] sm:$0xff] }
 0x511   :  { %4540 = vmatpush.msrb.mxu1 %v4523_v34  ;;  %v12308_v34 = vld [vmem:[#allocation27_spill] sm:$0xff]  ;;  %v4495_v60 = vadd.f32 %v9575_v36, %v4477_v20  ;;  %v5084_v20 = vld [vmem:[%s12061_s1 + $0x838] sm:$0xff] }
 0x512   :  { %v4327_v51 = vadd.f32 %v12308_v34, %v4178_v1  ;;  %v5070_v34 = vld [vmem:[%s12061_s1 + $0x7c8] sm:$0xff] }
 0x513   :  { %4541 = vmatpush.msrb.mxu1 %v4522_v30  ;;  %v12310_v30 = vld [vmem:[#allocation8_spill] sm:$0xff]  ;;  %v4511_v43 = vmax.f32 %v4495_v60, 0.0  ;;  %5131 = vmatpush.msrb.mxu0 %v5070_v34  ;;  %v5079_v60 = vld [vmem:[%s12061_s1 + $0x810] sm:$0xff] }
 0x514   :  { %v4176_v12 = vadd.f32 %v12310_v30, %v4027_v54  ;;  %v4476_v22 = vadd.f32 %v12314_v63, %v4327_v51  ;;  %v5069_v51 = vld [vmem:[%s12061_s1 + $0x7c0] sm:$0xff]  ;;  %v5066_v30 = vld [vmem:[%s12061_s1 + $0x7a8] sm:$0xff] }
 0x515   :  { %4542 = vmatpush.msrb.mxu1 %v4521_v58  ;;  %v12313_v58 = vld [vmem:[#allocation9_spill] sm:$0xff]  ;;  %5132 = vmatpush.msrb.mxu0 %v5069_v51  ;;  %v5062_v63 = vld [vmem:[%s12061_s1 + $0x788] sm:$0xff] }
 0x516   :  { %v4325_v29 = vadd.f32 %v12313_v58, %v4176_v12  ;;  %v4494_v6 = vadd.f32 %v9575_v36, %v4476_v22  ;;  %v5086_v12 = vld [vmem:[%s12061_s1 + $0x848] sm:$0xff] }
 0x517   :  { %4543 = vmatpush.msrb.mxu1 %v4520_v50  ;;  %v4475_v50 = vadd.f32 %v12315_v2, %v4326_v57  ;;  %5133 = vmatpush.msrb.mxu0 %v5068_v42  ;;  %v5085_v57 = vld [vmem:[%s12061_s1 + $0x840] sm:$0xff]  ;;  %v5082_v22 = vld [vmem:[%s12061_s1 + $0x828] sm:$0xff]  ;;  %v5060_v2 = vld [vmem:[%s12061_s1 + $0x778] sm:$0xff] }
 0x518   :  { %v4474_v24 = vadd.f32 %v12316_v48, %v4325_v29  ;;  %v4510_v31 = vmax.f32 %v4494_v6, 0.0  ;;  %v5058_v6 = vld [vmem:[%s12061_s1 + $0x768] sm:$0xff] }
 0x519   :  { %4544 = vmatpush.msrb.mxu1 %v4519_v16  ;;  %v4493_v27 = vadd.f32 %v9575_v36, %v4475_v50  ;;  %5134 = vmatpush.msrb.mxu0 %v5067_v23  ;;  %v5080_v50 = vld [vmem:[%s12061_s1 + $0x818] sm:$0xff]  ;;  %v9863_v51 = vld [vmem:[%s12061_s1 + $0x5a8] sm:$0xff]  ;;  %v5228_v23 = vld [vmem:[%s12061_s1 + $0x9b0] sm:$0xff] }
 0x51a   :  { %v4492_v37 = vadd.f32 %v9575_v36, %v4474_v24  ;;  %v4527_v36 = vld [vmem:[%s12061_s1 + $0xd70] sm:$0xff] }
 0x51b   :  { %4545 = vmatpush.msrb.mxu1 %v4518_v25  ;;  %v4509_v15 = vmax.f32 %v4493_v27, 0.0  ;;  %v4538_v25 = vld [vmem:[%s12061_s1 + $0xdc8] sm:$0xff]  ;;  %5135 = vmatpush.msrb.mxu0 %v5066_v30  ;;  %v5057_v27 = vld [vmem:[%s12061_s1 + $0x760] sm:$0xff] }
 0x51c   :  { %v4508_v16 = vmax.f32 %v4492_v37, 0.0  ;;  %v5056_v37 = vld [vmem:[%s12061_s1 + $0x758] sm:$0xff]  ;;  %v5247_v30 = vld [vmem:[%s12061_s1 + $0xa48] sm:$0xff] }
 0x51d   :  { %4546 = vmatpush.msrb.mxu1 %v4517_v19  ;;  %5136 = vmatpush.msrb.mxu0 %v5065_v9  ;;  %v9882_v9 = vld [vmem:[%s12061_s1 + $0x5a0] sm:$0xff] }
 0x51f   :  { %4547 = vmatpush.msrb.mxu1 %v4516_v47  ;;  %5137 = vmatpush.msrb.mxu0 %v5064_v59  ;;  %v5227_v59 = vld [vmem:[%s12061_s1 + $0x9a8] sm:$0xff] }
 0x521   :  { %4548 = vmatpush.msrb.mxu1 %v4515_v13  ;;  %v5063_v13 = vld [vmem:[%s12061_s1 + $0x790] sm:$0xff] }
 0x522   :  { %5138 = vmatpush.msrb.mxu0 %v5063_v13  ;;  %v9898_v13 = vld [vmem:[%s12061_s1 + $0x598] sm:$0xff] }
 0x523   :  { %4549 = vmatpush.msrb.mxu1 %v4514_v8  ;;  %v5061_v8 = vld [vmem:[%s12061_s1 + $0x780] sm:$0xff] }
 0x524   :  { %5139 = vmatpush.msrb.mxu0 %v5062_v63  ;;  %v5246_v63 = vld [vmem:[%s12061_s1 + $0xa40] sm:$0xff] }
 0x525   :  { %4550 = vmatpush.msrb.mxu1 %v4513_v46  ;;  %v5059_v46 = vld [vmem:[%s12061_s1 + $0x770] sm:$0xff] }
 0x526   :  { %5140 = vmatpush.msrb.mxu0 %v5061_v8  ;;  %v9921_v8 = vld [vmem:[%s12061_s1 + $0x630] sm:$0xff] }
 0x527   :  { %4551 = vmatpush.msrb.mxu1 %v4512_v3 }
 0x528   :  { %5141 = vmatpush.msrb.mxu0 %v5060_v2  ;;  %v5225_v2 = vld [vmem:[%s12061_s1 + $0x998] sm:$0xff] }
 0x529   :  { %4552 = vmatpush.msrb.mxu1 %v4511_v43  ;;  %v5078_v43 = vld [vmem:[%s12061_s1 + $0x808] sm:$0xff] }
 0x52a   :  { %5142 = vmatpush.msrb.mxu0 %v5059_v46 }
 0x52b   :  { %4553 = vmatpush.msrb.mxu1 %v4510_v31  ;;  %v5077_v31 = vld [vmem:[%s12061_s1 + $0x800] sm:$0xff] }
 0x52c   :  { %5143 = vmatpush.msrb.mxu0 %v5058_v6  ;;  %v9950_v6 = vld [vmem:[%s12061_s1 + $0x580] sm:$0xff] }
 0x52d   :  { %4554 = vmatpush.msrb.mxu1 %v4509_v15  ;;  %v5076_v15 = vld [vmem:[%s12061_s1 + $0x7f8] sm:$0xff] }
 0x52e   :  { %5144 = vmatpush.msrb.mxu0 %v5057_v27 }
 0x52f   :  { %4555 = vmatpush.msrb.mxu1 %v4508_v16  ;;  %v5055_v16 = vld [vmem:[%s12061_s1 + $0x750] sm:$0xff] }
 0x530   :  { %4556 = vmatmul.f32.vlgmr.msrb.gmra.mxu1 %v4524_v40  ;;  %v5075_v40 = vld [vmem:[%s12061_s1 + $0x7f0] sm:$0xff]  ;;  %5145 = vmatpush.msrb.mxu0 %v5056_v37 }
 0x531   :  { %5151 = vmatpush.msra.mxu1 %v5086_v12 }
 0x532   :  { %5146 = vmatpush.msrb.mxu0 %v5055_v16  ;;  %v5223_v16 = vld [vmem:[%s12061_s1 + $0x988] sm:$0xff] }
 0x533   :  { %5152 = vmatpush.msra.mxu1 %v5085_v57 }
 0x535   :  { %5153 = vmatpush.msra.mxu1 %v5084_v20 }
 0x537   :  { %5154 = vmatpush.msra.mxu1 %v5083_v41  ;;  %v9903_v41 = vld [vmem:[%s12061_s1 + $0x638] sm:$0xff] }
 0x538   :  { %4559 = vmatmul.f32.gmra.mxu1 %v4525_v28 }
 0x539   :  { %5155 = vmatpush.msra.mxu1 %v5082_v22  ;;  %v9916_v22 = vld [vmem:[%s12061_s1 + $0x590] sm:$0xff] }
 0x53b   :  { %5156 = vmatpush.msra.mxu1 %v5081_v17 }
 0x53d   :  { %5157 = vmatpush.msra.mxu1 %v5080_v50  ;;  %v5245_v50 = vld [vmem:[%s12061_s1 + $0xa38] sm:$0xff] }
 0x53f   :  { %5158 = vmatpush.msra.mxu1 %v5079_v60  ;;  %v9934_v60 = vld [vmem:[%s12061_s1 + $0x588] sm:$0xff] }
 0x540   :  { %4562 = vmatmul.f32.gmra.mxu1 %v4526_v62 }
 0x541   :  { %5159 = vmatpush.msra.mxu1 %v5078_v43 }
 0x543   :  { %5160 = vmatpush.msra.mxu1 %v5077_v31 }
 0x545   :  { %5161 = vmatpush.msra.mxu1 %v5076_v15  ;;  %v9958_v15 = vld [vmem:[%s12061_s1 + $0x620] sm:$0xff] }
 0x547   :  { %5162 = vmatpush.msra.mxu1 %v5075_v40  ;;  %v9970_v40 = vld [vmem:[%s12061_s1 + $0x578] sm:$0xff] }
 0x548   :  { %4565 = vmatmul.f32.gmra.mxu1 %v4527_v36 }
 0x550   :  { %4568 = vmatmul.f32.gmra.mxu1 %v4528_v0  ;;  %v5074_v0 = vld [vmem:[%s12061_s1 + $0x7e8] sm:$0xff] }
 0x551   :  { %5163 = vmatpush.msra.mxu1 %v5074_v0  ;;  %v9990_v0 = vld [vmem:[%s12061_s1 + $0x570] sm:$0xff] }
 0x558   :  { %4571 = vmatmul.f32.gmra.mxu1 %v4529_v10  ;;  %v5073_v10 = vld [vmem:[%s12061_s1 + $0x7e0] sm:$0xff] }
 0x559   :  { %5164 = vmatpush.msra.mxu1 %v5073_v10  ;;  %v9996_v10 = vld [vmem:[%s12061_s1 + $0x610] sm:$0xff] }
 0x560   :  { %4574 = vmatmul.f32.gmra.mxu1 %v4530_v45  ;;  %v5072_v45 = vld [vmem:[%s12061_s1 + $0x7d8] sm:$0xff] }
 0x561   :  { %5165 = vmatpush.msra.mxu1 %v5072_v45  ;;  %v5221_v45 = vld [vmem:[%s12061_s1 + $0x978] sm:$0xff] }
 0x568   :  { %4577 = vmatmul.f32.gmra.mxu1 %v4531_v26  ;;  %v5071_v26 = vld [vmem:[%s12061_s1 + $0x7d0] sm:$0xff] }
 0x569   :  { %5166 = vmatpush.msra.mxu1 %v5071_v26  ;;  %v5241_v26 = vld [vmem:[%s12061_s1 + $0xa18] sm:$0xff] }
 0x56b   :  { %5312 = vmatpush.msrb.mxu1 %v5247_v30  ;;  %v5217_v30 = vld [vmem:[%s12061_s1 + $0x958] sm:$0xff] }
 0x56d   :  { %5313 = vmatpush.msrb.mxu1 %v5246_v63  ;;  %v5216_v63 = vld [vmem:[%s12061_s1 + $0x950] sm:$0xff] }
 0x56f   :  { %5314 = vmatpush.msrb.mxu1 %v5245_v50  ;;  %v5235_v50 = vld [vmem:[%s12061_s1 + $0x9e8] sm:$0xff] }
 0x570   :  { %4580 = vmatmul.f32.gmra.mxu1 %v4532_v32 }
 0x578   :  { %4583 = vmatmul.f32.gmra.mxu1 %v4533_v18 }
 0x580   :  { %4586 = vmatmul.f32.gmra.mxu1 %v4534_v49 }
 0x588   :  { %4589 = vmatmul.f32.gmra.mxu1 %v4535_v33 }
 0x590   :  { %4592 = vmatmul.f32.gmra.mxu1 %v4536_v4 }
 0x598   :  { %4595 = vmatmul.f32.gmra.mxu1 %v4537_v14 }
 0x5a0   :  { %4598 = vmatmul.f32.gmra.mxu1 %v4538_v25 }
 0x5a8   :  { %4601 = vmatmul.f32.gmra.mxu1 %v4539_v38  ;;  %v9822_v38 = vld [vmem:[%s12061_s1 + $0x5c8] sm:$0xff] }
 0x5a9   :  { %4891 = vmatpush.msrb.mxu2 %v9822_v38 }
 0x5ad   :  { %v4557_v44 = vpop.f32.mrf.mxu1 }
 0x5ae   :  { %v4610_v11 = vrot.slane %v4557_v44, 3  ;;  %v4606_v56 = vrot.slane %v4557_v44, 7  ;;  %v9827_v44 = vld [vmem:[%s12061_s1 + $0x5c0] sm:$0xff] }
 0x5af   :  { %4892 = vmatpush.msrb.mxu2 %v9827_v44 }
 0x5b0   :  { %4611 = vrot.lane.b32.xlu2 %v4610_v11, %s7096_s0  ;;  %4609 = vst.msk [vmem:[#allocation3] sm:$0x1e] %vm4608_vm2, %v4606_v56  ;;  %v5231_v11 = vld [vmem:[%s12061_s1 + $0x9c8] sm:$0xff] }
 0x5b1   :  { %5292 = vmatpush.msra.mxu0 %v5231_v11  ;;  %v5240_v11 = vld [vmem:[%s12061_s1 + $0xa10] sm:$0xff] }
 0x5b5   :  { %v4560_v54 = vpop.f32.mrf.mxu1 }
 0x5b6   :  { %v4620_v1 = vrot.slane %v4560_v54, 3  ;;  %v4617_v7 = vrot.slane %v4560_v54, 7 }
 0x5b8   :  { %4621 = vrot.lane.b32.xlu2 %v4620_v1, %s7096_s0  ;;  %4619 = vst.msk [vmem:[#allocation3 + $0x8] sm:$0x1e] %vm4608_vm2, %v4617_v7 }
 0x5bd   :  { %v9689_v39 = vpop.f32.mrf.mxu1 }
 0x5be   :  { %v4626_v21 = vrot.slane %v9689_v39, 7  ;;  %v4629_v18 = vrot.slane %v9689_v39, 3  ;;  %v9841_v39 = vld [vmem:[%s12061_s1 + $0x5b8] sm:$0xff] }
 0x5bf   :  { %4893 = vmatpush.msrb.mxu2 %v9841_v39 }
 0x5c0   :  { %4628 = vst.msk [vmem:[#allocation3 + $0x10] sm:$0x1e] %vm4608_vm2, %v4626_v21  ;;  %v5230_v21 = vld [vmem:[%s12061_s1 + $0x9c0] sm:$0xff] }
 0x5c1   :  { %5293 = vmatpush.msra.mxu0 %v5230_v21  ;;  %v10048_v21 = vld [vmem:[%s12061_s1 + $0x558] sm:$0xff] }
 0x5c5   :  { %v9693_v35 = vpop.f32.mrf.mxu1 }
 0x5c6   :  { %v4635_v52 = vrot.slane %v9693_v35, 7  ;;  %v4638_v1 = vrot.slane %v9693_v35, 3  ;;  %v5229_v35 = vld [vmem:[%s12061_s1 + $0x9b8] sm:$0xff] }
 0x5c7   :  { %5294 = vmatpush.msra.mxu0 %v5229_v35  ;;  %v10054_v35 = vld [vmem:[%s12061_s1 + $0x5f8] sm:$0xff] }
 0x5c8   :  { %4637 = vst.msk [vmem:[#allocation3 + $0x18] sm:$0x1e] %vm4608_vm2, %v4635_v52  ;;  %v9849_v52 = vld [vmem:[%s12061_s1 + $0x5b0] sm:$0xff] }
 0x5c9   :  { %4894 = vmatpush.msrb.mxu2 %v9849_v52  ;;  %5295 = vmatpush.msra.mxu0 %v5228_v23  ;;  %v10072_v23 = vld [vmem:[%s12061_s1 + $0x5f0] sm:$0xff] }
 0x5cb   :  { %4895 = vmatpush.msrb.mxu2 %v9863_v51  ;;  %5296 = vmatpush.msra.mxu0 %v5227_v59 }
 0x5cd   :  { %v9697_v19 = vpop.f32.mrf.mxu1  ;;  %4896 = vmatpush.msrb.mxu2 %v9882_v9 }
 0x5ce   :  { %v4644_v55 = vrot.slane %v9697_v19, 7  ;;  %v4648_v59 = vrot.slane %v9697_v19, 3  ;;  %v5236_v19 = vld [vmem:[%s12061_s1 + $0x9f0] sm:$0xff] }
 0x5cf   :  { %4897 = vmatpush.msrb.mxu2 %v9898_v13 }
 0x5d0   :  { %4647 = vst.msk [vmem:[#allocation3 + $0x20] sm:$0x1e] %vm4608_vm2, %v4644_v55  ;;  %v9858_v55 = vld [vmem:[%s12061_s1 + $0x648] sm:$0xff] }
 0x5d1   :  { %4911 = vmatpush.msra.mxu3 %v9858_v55  ;;  %4898 = vmatpush.msrb.mxu2 %v9916_v22 }
 0x5d3   :  { %4899 = vmatpush.msrb.mxu2 %v9934_v60 }
 0x5d5   :  { %v9701_v5 = vpop.f32.mrf.mxu1  ;;  %4900 = vmatpush.msrb.mxu2 %v9950_v6 }
 0x5d6   :  { %v4654_v61 = vrot.slane %v9701_v5, 7 }
 0x5d7   :  { %4901 = vmatpush.msrb.mxu2 %v9970_v40 }
 0x5d8   :  { %4656 = vst.msk [vmem:[#allocation3 + $0x28] sm:$0x1e] %vm4608_vm2, %v4654_v61 }
 0x5d9   :  { %4902 = vmatpush.msrb.mxu2 %v9990_v0 }
 0x5dd   :  { %v9717_v47 = vpop.f32.mrf.mxu1 }
 0x5de   :  { %v4663_v53 = vrot.slane %v9717_v47, 7 }
 0x5e0   :  { %4665 = vst.msk [vmem:[#allocation3 + $0x30] sm:$0x1e] %vm4608_vm2, %v4663_v53  ;;  %v9874_v53 = vld [vmem:[%s12061_s1 + $0x640] sm:$0xff] }
 0x5e1   :  { %4912 = vmatpush.msra.mxu3 %v9874_v53 }
 0x5e3   :  { %4913 = vmatpush.msra.mxu3 %v9903_v41 }
 0x5e5   :  { %v9745_v58 = vpop.f32.mrf.mxu1  ;;  %4914 = vmatpush.msra.mxu3 %v9921_v8 }
 0x5e6   :  { %v4672_v29 = vrot.slane %v9745_v58, 7  ;;  %v4675_v27 = vrot.slane %v9745_v58, 3  ;;  %v5243_v58 = vld [vmem:[%s12061_s1 + $0xa28] sm:$0xff] }
 0x5e8   :  { %4674 = vst.msk [vmem:[#allocation3 + $0x38] sm:$0x1e] %vm4608_vm2, %v4672_v29  ;;  %v5226_v29 = vld [vmem:[%s12061_s1 + $0x9a0] sm:$0xff] }
 0x5e9   :  { %5297 = vmatpush.msra.mxu0 %v5226_v29  ;;  %v10091_v29 = vld [vmem:[%s12061_s1 + $0x5e8] sm:$0xff] }
 0x5eb   :  { %5298 = vmatpush.msra.mxu0 %v5225_v2  ;;  %v10110_v2 = vld [vmem:[%s12061_s1 + $0x5e0] sm:$0xff] }
 0x5ed   :  { %v4581_v48 = vpop.f32.mrf.mxu1 }
 0x5ee   :  { %v4681_v24 = vrot.slane %v4581_v48, 7  ;;  %v4685_v3 = vrot.slane %v4581_v48, 3  ;;  %v9939_v48 = vld [vmem:[%s12061_s1 + $0x628] sm:$0xff] }
 0x5ef   :  { %4915 = vmatpush.msra.mxu3 %v9939_v48 }
 0x5f0   :  { %4686 = vrot.lane.b32.xlu0 %v4685_v3, %s7096_s0  ;;  %4684 = vst.msk [vmem:[#allocation3 + $0x40] sm:$0x1e] %vm4608_vm2, %v4681_v24  ;;  %v5224_v24 = vld [vmem:[%s12061_s1 + $0x990] sm:$0xff] }
 0x5f1   :  { %v5244_v3 = vld [vmem:[%s12061_s1 + $0xa30] sm:$0xff]  ;;  %5299 = vmatpush.msra.mxu0 %v5224_v24  ;;  %4916 = vmatpush.msra.mxu3 %v9958_v15  ;;  %v5391_v24 = vld [vmem:[%s12061_s1 + $0xbc0] sm:$0xff] }
 0x5f2   :  { %5315 = vmatpush.msrb.mxu1 %v5244_v3  ;;  %v10125_v3 = vld [vmem:[%s12061_s1 + $0x5d8] sm:$0xff] }
 0x5f3   :  { %5300 = vmatpush.msra.mxu0 %v5223_v16  ;;  %v5233_v16 = vld [vmem:[%s12061_s1 + $0x9d8] sm:$0xff] }
 0x5f4   :  { %5316 = vmatpush.msrb.mxu1 %v5243_v58  ;;  %v4657_v58 = vrot.slane %v9701_v5, 3  ;;  %v5232_v5 = vld [vmem:[%s12061_s1 + $0x9d0] sm:$0xff] }
 0x5f5   :  { %v4584_v28 = vpop.f32.mrf.mxu1 }
 0x5f6   :  { %v4691_v62 = vrot.slane %v4584_v28, 7  ;;  %v4694_v36 = vrot.slane %v4584_v28, 3  ;;  %v9978_v28 = vld [vmem:[%s12061_s1 + $0x618] sm:$0xff] }
 0x5f7   :  { %4917 = vmatpush.msra.mxu3 %v9978_v28 }
 0x5f8   :  { %4695 = vrot.lane.b32.xlu0 %v4694_v36, %s7096_s0  ;;  %4693 = vst.msk [vmem:[#allocation3 + $0x48] sm:$0x1e] %vm4608_vm2, %v4691_v62  ;;  %v5222_v62 = vld [vmem:[%s12061_s1 + $0x980] sm:$0xff] }
 0x5f9   :  { %v5242_v36 = vld [vmem:[%s12061_s1 + $0xa20] sm:$0xff]  ;;  %5301 = vmatpush.msra.mxu0 %v5222_v62  ;;  %4918 = vmatpush.msra.mxu3 %v9996_v10  ;;  %v4870_v62 = vld [vmem:[%s12061_s1 + $0x6a8] sm:$0xff] }
 0x5fa   :  { %5317 = vmatpush.msrb.mxu1 %v5242_v36  ;;  %v4890_v36 = vld [vmem:[%s12061_s1 + $0x748] sm:$0xff] }
 0x5fb   :  { %5302 = vmatpush.msra.mxu0 %v5221_v45  ;;  %v5389_v45 = vld [vmem:[%s12061_s1 + $0xbb0] sm:$0xff] }
 0x5fc   :  { %5318 = vmatpush.msrb.mxu1 %v5241_v26  ;;  %v4869_v26 = vld [vmem:[%s12061_s1 + $0x6a0] sm:$0xff] }
 0x5fd   :  { %v4587_v32 = vpop.f32.mrf.mxu1 }
 0x5fe   :  { %v4700_v49 = vrot.slane %v4587_v32, 7  ;;  %v4703_v33 = vrot.slane %v4587_v32, 3  ;;  %v10008_v32 = vld [vmem:[%s12061_s1 + $0x568] sm:$0xff]  ;;  %5319 = vmatpush.msrb.mxu1 %v5240_v11  ;;  %v5387_v11 = vld [vmem:[%s12061_s1 + $0xba0] sm:$0xff] }
 0x5ff   :  { %4903 = vmatpush.msrb.mxu2 %v10008_v32 }
 0x600   :  { %4630 = vrot.lane.b32.xlu0 %v4629_v18, %s7096_s0  ;;  %4704 = vrot.lane.b32.xlu1 %v4703_v33, %s7096_s0  ;;  %4702 = vst.msk [vmem:[#allocation3 + $0x50] sm:$0x1e] %vm4608_vm2, %v4700_v49  ;;  %v10015_v49 = vld [vmem:[%s12061_s1 + $0x608] sm:$0xff]  ;;  %v5220_v33 = vld [vmem:[%s12061_s1 + $0x970] sm:$0xff] }
 0x601   :  { %4919 = vmatpush.msra.mxu3 %v10015_v49  ;;  %5303 = vmatpush.msra.mxu0 %v5220_v33  ;;  %v5388_v33 = vld [vmem:[%s12061_s1 + $0xba8] sm:$0xff] }
 0x605   :  { %v4590_v4 = vpop.f32.mrf.mxu1 }
 0x606   :  { %v4709_v14 = vrot.slane %v4590_v4, 7  ;;  %v4712_v25 = vrot.slane %v4590_v4, 3 }
 0x608   :  { %4713 = vrot.lane.b32.xlu1 %v4712_v25, %s7096_s0  ;;  %4711 = vst.msk [vmem:[#allocation3 + $0x58] sm:$0x1e] %vm4608_vm2, %v4709_v14 }
 0x60a   :  { %v4612_v54 = vpop.permute.xlu2 %4611 }
 0x60b   :  { %4615 = vst.msk [vmem:[#allocation3] sm:$0x1e] %vm4614_vm3, %v4612_v54  ;;  %v10028_v54 = vld [vmem:[%s12061_s1 + $0x560] sm:$0xff] }
 0x60c   :  { %4904 = vmatpush.msrb.mxu2 %v10028_v54 }
 0x60d   :  { %v4593_v56 = vpop.f32.mrf.mxu1 }
 0x60e   :  { %v4718_v7 = vrot.slane %v4593_v56, 7  ;;  %v4722_v12 = vrot.slane %v4593_v56, 3  ;;  %v10034_v56 = vld [vmem:[%s12061_s1 + $0x600] sm:$0xff]  ;;  %4905 = vmatpush.msrb.mxu2 %v10048_v21 }
 0x60f   :  { %4920 = vmatpush.msra.mxu3 %v10034_v56 }
 0x610   :  { %4721 = vst.msk [vmem:[#allocation3 + $0x60] sm:$0x1e] %vm4608_vm2, %v4718_v7  ;;  %4639 = vrot.lane.b32.xlu1 %v4638_v1, %s7096_s0  ;;  %v5219_v1 = vld [vmem:[%s12061_s1 + $0x968] sm:$0xff] }
 0x611   :  { %v5239_v7 = vld [vmem:[%s12061_s1 + $0xa08] sm:$0xff]  ;;  %5304 = vmatpush.msra.mxu0 %v5219_v1  ;;  %4921 = vmatpush.msra.mxu3 %v10054_v35  ;;  %v5407_v1 = vld [vmem:[%s12061_s1 + $0xc40] sm:$0xff] }
 0x612   :  { %v4622_v61 = vpop.permute.xlu2 %4621  ;;  %v5051_v34 = vld [vmem:[#allocation3] sm:$0x1e]  ;;  %5320 = vmatpush.msrb.mxu1 %v5239_v7  ;;  %v4867_v7 = vld [vmem:[%s12061_s1 + $0x690] sm:$0xff] }
 0x613   :  { %4624 = vst.msk [vmem:[#allocation3 + $0x8] sm:$0x1e] %vm4614_vm3, %v4622_v61  ;;  %v5123_v42 = vrot.slane %v5051_v34, 1  ;;  %v5218_v61 = vld [vmem:[%s12061_s1 + $0x960] sm:$0xff]  ;;  %4922 = vmatpush.msra.mxu3 %v10072_v23 }
 0x614   :  { %v5238_v34 = vld [vmem:[%s12061_s1 + $0xa00] sm:$0xff]  ;;  %5305 = vmatpush.msra.mxu0 %v5218_v61  ;;  %v4887_v61 = vld [vmem:[%s12061_s1 + $0x730] sm:$0xff] }
 0x615   :  { %v9885_v57 = vpop.f32.mrf.mxu1  ;;  %5147 = vmatmul.f32.vlgmr.msrb.gmra.mxu0 %v5123_v42  ;;  %v10066_v42 = vld [vmem:[%s12061_s1 + $0x550] sm:$0xff]  ;;  %5321 = vmatpush.msrb.mxu1 %v5238_v34  ;;  %v5386_v34 = vld [vmem:[%s12061_s1 + $0xb98] sm:$0xff] }
 0x616   :  { %v4728_v20 = vrot.slane %v9885_v57, 7  ;;  %v4731_v18 = vrot.slane %v9885_v57, 3  ;;  %v4874_v57 = vld [vmem:[%s12061_s1 + $0x6c8] sm:$0xff]  ;;  %4906 = vmatpush.msrb.mxu2 %v10066_v42  ;;  %5306 = vmatpush.msra.mxu0 %v5217_v30  ;;  %v5406_v30 = vld [vmem:[%s12061_s1 + $0xc38] sm:$0xff] }
 0x617   :  { %4923 = vmatpush.msra.mxu3 %v10091_v29 }
 0x618   :  { %4730 = vst.msk [vmem:[#allocation3 + $0x68] sm:$0x1e] %vm4608_vm2, %v4728_v20  ;;  %4723 = vrot.lane.b32.xlu1 %v4722_v12, %s7096_s0  ;;  %v5237_v12 = vld [vmem:[%s12061_s1 + $0x9f8] sm:$0xff]  ;;  %v4666_v20 = vrot.slane %v9717_v47, 3  ;;  %4931 = vmatpush.msra.mxu2 %v4874_v57  ;;  %v4873_v47 = vld [vmem:[%s12061_s1 + $0x6c0] sm:$0xff]  ;;  %v4886_v57 = vld [vmem:[%s12061_s1 + $0x728] sm:$0xff] }
 0x619   :  { %5322 = vmatpush.msrb.mxu1 %v5237_v12  ;;  %5307 = vmatpush.msra.mxu0 %v5216_v63  ;;  %v4866_v12 = vld [vmem:[%s12061_s1 + $0x688] sm:$0xff]  ;;  %v4865_v63 = vld [vmem:[%s12061_s1 + $0x680] sm:$0xff] }
 0x61a   :  { %v5052_v17 = vld [vmem:[#allocation3 + $0x8] sm:$0x1e]  ;;  %4932 = vmatpush.msra.mxu2 %v4873_v47  ;;  %4924 = vmatpush.msra.mxu3 %v10110_v2  ;;  %v5384_v47 = vld [vmem:[%s12061_s1 + $0xb88] sm:$0xff] }
 0x61b   :  { %v5124_v46 = vrot.slane %v5052_v17, 1  ;;  %v5392_v17 = vld [vmem:[%s12061_s1 + $0xbc8] sm:$0xff]  ;;  %5323 = vmatpush.msrb.mxu1 %v5236_v19  ;;  %v4885_v19 = vld [vmem:[%s12061_s1 + $0x720] sm:$0xff] }
 0x61c   :  { %5453 = vmatpush.msrb.mxu0 %v5392_v17  ;;  %4925 = vmatpush.msra.mxu3 %v10125_v3  ;;  %v5404_v17 = vld [vmem:[%s12061_s1 + $0xc28] sm:$0xff] }
 0x61d   :  { %v4599_v43 = vpop.f32.mrf.mxu1  ;;  %5167 = vmatmul.f32.vlgmr.msra.gmra.mxu1 %v5124_v46  ;;  %v4872_v46 = vld [vmem:[%s12061_s1 + $0x6b8] sm:$0xff] }
 0x61e   :  { %v4737_v31 = vrot.slane %v4599_v43, 7  ;;  %v4740_v37 = vrot.slane %v4599_v43, 3  ;;  %v5234_v43 = vld [vmem:[%s12061_s1 + $0x9e0] sm:$0xff]  ;;  %5324 = vmatpush.msrb.mxu1 %v5235_v50  ;;  %4933 = vmatpush.msra.mxu2 %v4872_v46  ;;  %v4864_v50 = vld [vmem:[%s12061_s1 + $0x678] sm:$0xff] }
 0x61f   :  { %5454 = vmatpush.msrb.mxu0 %v5391_v24  ;;  %v4884_v46 = vld [vmem:[%s12061_s1 + $0x718] sm:$0xff]  ;;  %v5383_v24 = vld [vmem:[%s12061_s1 + $0xb80] sm:$0xff] }
 0x620   :  { %4739 = vst.msk [vmem:[#allocation3 + $0x70] sm:$0x1e] %vm4608_vm2, %v4737_v31  ;;  %4676 = vrot.lane.b32.xlu1 %v4675_v27, %s7096_s0  ;;  %4741 = vrot.lane.b32.xlu2 %v4740_v37, %s7096_s0  ;;  %v4871_v27 = vld [vmem:[%s12061_s1 + $0x6b0] sm:$0xff]  ;;  %v5390_v31 = vld [vmem:[%s12061_s1 + $0xbb8] sm:$0xff] }
 0x621   :  { %v10140_v37 = vld [vmem:[%s12061_s1 + $0x5d0] sm:$0xff]  ;;  %5325 = vmatpush.msrb.mxu1 %v5234_v43  ;;  %4934 = vmatpush.msra.mxu2 %v4871_v27  ;;  %v5403_v43 = vld [vmem:[%s12061_s1 + $0xc20] sm:$0xff] }
 0x622   :  { %5455 = vmatpush.msrb.mxu0 %v5390_v31  ;;  %4926 = vmatpush.msra.mxu3 %v10140_v37  ;;  %v4863_v27 = vld [vmem:[%s12061_s1 + $0x670] sm:$0xff] }
 0x623   :  { %5326 = vmatpush.msrb.mxu1 %v5233_v16  ;;  %4935 = vmatpush.msra.mxu2 %v4870_v62  ;;  %v4883_v31 = vld [vmem:[%s12061_s1 + $0x710] sm:$0xff]  ;;  %v5382_v16 = vld [vmem:[%s12061_s1 + $0xb78] sm:$0xff]  ;;  %v4862_v62 = vld [vmem:[%s12061_s1 + $0x668] sm:$0xff] }
 0x624   :  { %4951 = vmatpush.msrb.mxu3 %v4890_v36  ;;  %5456 = vmatpush.msrb.mxu0 %v5389_v45  ;;  %v4882_v36 = vld [vmem:[%s12061_s1 + $0x708] sm:$0xff]  ;;  %v5381_v45 = vld [vmem:[%s12061_s1 + $0xb70] sm:$0xff] }
 0x625   :  { %v4602_v4 = vpop.f32.mrf.mxu1  ;;  %5327 = vmatpush.msrb.mxu1 %v5232_v5  ;;  %4936 = vmatpush.msra.mxu2 %v4869_v26  ;;  %v5401_v5 = vld [vmem:[%s12061_s1 + $0xc10] sm:$0xff]  ;;  %v4861_v26 = vld [vmem:[%s12061_s1 + $0x660] sm:$0xff] }
 0x626   :  { %v4746_v14 = vrot.slane %v4602_v4, 7  ;;  %v4749_v25 = vrot.slane %v4602_v4, 3  ;;  %v5408_v4 = vld [vmem:[%s12061_s1 + $0xc48] sm:$0xff]  ;;  %5457 = vmatpush.msrb.mxu0 %v5388_v33 }
 0x627   :  { %5473 = vmatpush.msra.mxu1 %v5408_v4  ;;  %v5380_v33 = vld [vmem:[%s12061_s1 + $0xb68] sm:$0xff] }
 0x628   :  { %4748 = vst.msk [vmem:[#allocation3 + $0x78] sm:$0x1e] %vm4608_vm2, %v4746_v14  ;;  %4732 = vrot.lane.b32.xlu2 %v4731_v18, %s7096_s0  ;;  %4750 = vrot.lane.b32.xlu0 %v4749_v25, %s7096_s0  ;;  %v4889_v18 = vld [vmem:[%s12061_s1 + $0x740] sm:$0xff]  ;;  %v4868_v14 = vld [vmem:[%s12061_s1 + $0x698] sm:$0xff] }
 0x629   :  { %v4888_v25 = vld [vmem:[%s12061_s1 + $0x738] sm:$0xff]  ;;  %4952 = vmatpush.msrb.mxu3 %v4889_v18  ;;  %4937 = vmatpush.msra.mxu2 %v4868_v14  ;;  %v4881_v18 = vld [vmem:[%s12061_s1 + $0x700] sm:$0xff]  ;;  %v5400_v4 = vld [vmem:[%s12061_s1 + $0xc08] sm:$0xff] }
 0x62a   :  { %5458 = vmatpush.msrb.mxu0 %v5387_v11  ;;  %5474 = vmatpush.msra.mxu1 %v5407_v1  ;;  %v4860_v14 = vld [vmem:[%s12061_s1 + $0x658] sm:$0xff]  ;;  %v5379_v11 = vld [vmem:[%s12061_s1 + $0xb60] sm:$0xff] }
 0x62b   :  { %4953 = vmatpush.msrb.mxu3 %v4888_v25  ;;  %4938 = vmatpush.msra.mxu2 %v4867_v7  ;;  %v4880_v25 = vld [vmem:[%s12061_s1 + $0x6f8] sm:$0xff]  ;;  %v5399_v1 = vld [vmem:[%s12061_s1 + $0xc00] sm:$0xff]  ;;  %v4859_v7 = vld [vmem:[%s12061_s1 + $0x650] sm:$0xff] }
 0x62c   :  { %5459 = vmatpush.msrb.mxu0 %v5386_v34  ;;  %5475 = vmatpush.msra.mxu1 %v5406_v30  ;;  %v5378_v34 = vld [vmem:[%s12061_s1 + $0xb58] sm:$0xff] }
 0x62d   :  { %4954 = vmatpush.msrb.mxu3 %v4887_v61  ;;  %4939 = vmatpush.msra.mxu2 %v4866_v12  ;;  %v4879_v61 = vld [vmem:[%s12061_s1 + $0x6f0] sm:$0xff]  ;;  %v5398_v30 = vld [vmem:[%s12061_s1 + $0xbf8] sm:$0xff]  ;;  %v4878_v12 = vld [vmem:[%s12061_s1 + $0x6e8] sm:$0xff] }
 0x62f   :  { %4955 = vmatpush.msrb.mxu3 %v4886_v57  ;;  %4940 = vmatpush.msra.mxu2 %v4865_v63  ;;  %v5377_v57 = vld [vmem:[%s12061_s1 + $0xb50] sm:$0xff]  ;;  %v5396_v63 = vld [vmem:[%s12061_s1 + $0xbe8] sm:$0xff] }
 0x630   :  { %4649 = vrot.lane.b32.xlu2 %v4648_v59, %s7096_s0  ;;  %4667 = vrot.lane.b32.xlu0 %v4666_v20, %s7096_s0  ;;  %v5385_v59 = vld [vmem:[%s12061_s1 + $0xb90] sm:$0xff] }
 0x631   :  { %v5405_v20 = vld [vmem:[%s12061_s1 + $0xc30] sm:$0xff]  ;;  %5460 = vmatpush.msrb.mxu0 %v5385_v59  ;;  %4956 = vmatpush.msrb.mxu3 %v4885_v19  ;;  %v4876_v19 = vld [vmem:[%s12061_s1 + $0x6d8] sm:$0xff] }
 0x632   :  { %5476 = vmatpush.msra.mxu1 %v5405_v20  ;;  %4941 = vmatpush.msra.mxu2 %v4864_v50  ;;  %v5397_v59 = vld [vmem:[%s12061_s1 + $0xbf0] sm:$0xff]  ;;  %v4877_v20 = vld [vmem:[%s12061_s1 + $0x6e0] sm:$0xff]  ;;  %v5394_v50 = vld [vmem:[%s12061_s1 + $0xbd8] sm:$0xff] }
 0x633   :  { %5461 = vmatpush.msrb.mxu0 %v5384_v47  ;;  %4957 = vmatpush.msrb.mxu3 %v4884_v46  ;;  %v5395_v47 = vld [vmem:[%s12061_s1 + $0xbe0] sm:$0xff]  ;;  %v5393_v46 = vld [vmem:[%s12061_s1 + $0xbd0] sm:$0xff] }
 0x634   :  { %5477 = vmatpush.msra.mxu1 %v5404_v17  ;;  %4942 = vmatpush.msra.mxu2 %v4863_v27  ;;  %v4875_v17 = vld [vmem:[%s12061_s1 + $0x6d0] sm:$0xff] }
 0x635   :  { %5462 = vmatpush.msrb.mxu0 %v5383_v24  ;;  %4958 = vmatpush.msrb.mxu3 %v4883_v31 }
 0x636   :  { %5478 = vmatpush.msra.mxu1 %v5403_v43  ;;  %4943 = vmatpush.msra.mxu2 %v4862_v62  ;;  %v10327_v43 = vld [vmem:[%s12061_s1 + $0x3c8] sm:$0xff] }
 0x637   :  { %5463 = vmatpush.msrb.mxu0 %v5382_v16  ;;  %4959 = vmatpush.msrb.mxu3 %v4882_v36  ;;  %v10339_v36 = vld [vmem:[%s12061_s1 + $0x3b8] sm:$0xff] }
 0x638   :  { %4658 = vrot.lane.b32.xlu0 %v4657_v58, %s7096_s0  ;;  %v5402_v58 = vld [vmem:[%s12061_s1 + $0xc18] sm:$0xff]  ;;  %4944 = vmatpush.msra.mxu2 %v4861_v26  ;;  %v10358_v26 = vld [vmem:[%s12061_s1 + $0x448] sm:$0xff] }
 0x639   :  { %5479 = vmatpush.msra.mxu1 %v5402_v58  ;;  %5464 = vmatpush.msrb.mxu0 %v5381_v45  ;;  %v10333_v58 = vld [vmem:[%s12061_s1 + $0x3c0] sm:$0xff]  ;;  %v10346_v45 = vld [vmem:[%s12061_s1 + $0x3b0] sm:$0xff] }
 0x63a   :  { %4960 = vmatpush.msrb.mxu3 %v4881_v18  ;;  %4945 = vmatpush.msra.mxu2 %v4860_v14  ;;  %v5373_v14 = vld [vmem:[#allocation3] sm:$0x3c] }
 0x63b   :  { %5480 = vmatpush.msra.mxu1 %v5401_v5  ;;  %5465 = vmatpush.msrb.mxu0 %v5380_v33  ;;  %v10353_v5 = vld [vmem:[%s12061_s1 + $0x3a8] sm:$0xff] }
 0x63c   :  { %4961 = vmatpush.msrb.mxu3 %v4880_v25  ;;  %4946 = vmatpush.msra.mxu2 %v4859_v7  ;;  %v10371_v25 = vld [vmem:[%s12061_s1 + $0x440] sm:$0xff]  ;;  %v10387_v7 = vld [vmem:[%s12061_s1 + $0x438] sm:$0xff] }
 0x63d   :  { %5481 = vmatpush.msra.mxu1 %v5400_v4  ;;  %5466 = vmatpush.msrb.mxu0 %v5379_v11 }
 0x63e   :  { %4962 = vmatpush.msrb.mxu3 %v4879_v61  ;;  %v10400_v61 = vld [vmem:[%s12061_s1 + $0x430] sm:$0xff] }
 0x63f   :  { %5482 = vmatpush.msra.mxu1 %v5399_v1  ;;  %5467 = vmatpush.msrb.mxu0 %v5378_v34  ;;  %v10380_v1 = vld [vmem:[%s12061_s1 + $0x398] sm:$0xff] }
 0x640   :  { %4963 = vmatpush.msrb.mxu3 %v4878_v12  ;;  %v10424_v12 = vld [vmem:[%s12061_s1 + $0x380] sm:$0xff] }
 0x641   :  { %5483 = vmatpush.msra.mxu1 %v5398_v30  ;;  %5468 = vmatpush.msrb.mxu0 %v5377_v57  ;;  %v10414_v30 = vld [vmem:[%s12061_s1 + $0x428] sm:$0xff]  ;;  %v10429_v57 = vld [vmem:[%s12061_s1 + $0x420] sm:$0xff] }
 0x642   :  { %4964 = vmatpush.msrb.mxu3 %v4877_v20 }
 0x643   :  { %5484 = vmatpush.msra.mxu1 %v5397_v59  ;;  %v10445_v59 = vld [vmem:[%s12061_s1 + $0x418] sm:$0xff] }
 0x644   :  { %4965 = vmatpush.msrb.mxu3 %v4876_v19  ;;  %v10473_v19 = vld [vmem:[%s12061_s1 + $0x408] sm:$0xff] }
 0x645   :  { %5485 = vmatpush.msra.mxu1 %v5396_v63 }
 0x646   :  { %4966 = vmatpush.msrb.mxu3 %v4875_v17 }
 0x647   :  { %5486 = vmatpush.msra.mxu1 %v5395_v47 }
 0x649   :  { %5487 = vmatpush.msra.mxu1 %v5394_v50  ;;  %v10542_v50 = vld [vmem:[%s12061_s1 + $0x3e0] sm:$0xff] }
 0x64b   :  { %5488 = vmatpush.msra.mxu1 %v5393_v46 }
 0x662   :  { %v4687_v24 = vpop.permute.xlu0 %4686 }
 0x663   :  { %4689 = vst.msk [vmem:[#allocation3 + $0x40] sm:$0x1e] %vm4614_vm3, %v4687_v24  ;;  %v4822_v24 = vld [vmem:[%s12061_s1 + $0x548] sm:$0xff] }
 0x66a   :  { %v4696_v27 = vpop.permute.xlu0 %4695  ;;  %v4823_v31 = vld [vmem:[#allocation3 + $0x40] sm:$0xf] }
 0x66b   :  { %v5212_v16 = vld [vmem:[#allocation3 + $0x40] sm:$0x1e]  ;;  %4698 = vst.msk [vmem:[#allocation3 + $0x48] sm:$0x1e] %vm4614_vm3, %v4696_v27  ;;  %4907 = vmatmul.f32.vlgmr.msrb.gmra.mxu2 %v4823_v31  ;;  %v4821_v27 = vld [vmem:[%s12061_s1 + $0x540] sm:$0xff]  ;;  %v4800_v31 = vld [vmem:[%s12061_s1 + $0x498] sm:$0xff] }
 0x66c   :  { %v5284_v62 = vrot.slane %v5212_v16, 1  ;;  %4971 = vmatpush.msrb.mxu2 %v10327_v43  ;;  %v4799_v16 = vld [vmem:[%s12061_s1 + $0x490] sm:$0xff] }
 0x66e   :  { %5308 = vmatmul.f32.vlgmr.msra.gmra.mxu0 %v5284_v62  ;;  %4972 = vmatpush.msrb.mxu2 %v10333_v58  ;;  %v4798_v62 = vld [vmem:[%s12061_s1 + $0x488] sm:$0xff] }
 0x66f   :  { %5691 = vmatpush.msra.mxu0 %v9822_v38 }
 0x670   :  { %4973 = vmatpush.msrb.mxu2 %v10339_v36 }
 0x671   :  { %5692 = vmatpush.msra.mxu0 %v9827_v44  ;;  %v10366_v44 = vld [vmem:[%s12061_s1 + $0x3a0] sm:$0xff] }
 0x672   :  { %4974 = vmatpush.msrb.mxu2 %v10346_v45  ;;  %v4631_v38 = vpop.permute.xlu0 %4630  ;;  %v4705_v18 = vpop.permute.xlu1 %4704  ;;  %v4824_v33 = vld [vmem:[#allocation3 + $0x48] sm:$0xf] }
 0x673   :  { %5693 = vmatpush.msra.mxu0 %v9841_v39  ;;  %v5213_v4 = vld [vmem:[#allocation3 + $0x48] sm:$0x1e]  ;;  %4633 = vst.msk [vmem:[#allocation3 + $0x10] sm:$0x1e] %vm4614_vm3, %v4631_v38  ;;  %4927 = vmatmul.f32.vlgmr.msra.gmra.mxu3 %v4824_v33  ;;  %v5445_v39 = vrot.slane %v5373_v14, 2  ;;  %v4816_v38 = vld [vmem:[%s12061_s1 + $0x518] sm:$0xff] }
 0x674   :  { %v5285_v11 = vrot.slane %v5213_v4, 1  ;;  %4707 = vst.msk [vmem:[#allocation3 + $0x50] sm:$0x1e] %vm4614_vm3, %v4705_v18  ;;  %4975 = vmatpush.msrb.mxu2 %v10353_v5  ;;  %4991 = vmatpush.msra.mxu3 %v10358_v26  ;;  %v4795_v18 = vld [vmem:[%s12061_s1 + $0x470] sm:$0xff]  ;;  %v4794_v14 = vld [vmem:[%s12061_s1 + $0x468] sm:$0xff] }
 0x675   :  { %5694 = vmatpush.msra.mxu0 %v9849_v52  ;;  %v10393_v52 = vld [vmem:[%s12061_s1 + $0x390] sm:$0xff] }
 0x676   :  { %5328 = vmatmul.f32.vlgmr.msrb.gmra.mxu1 %v5285_v11  ;;  %4976 = vmatpush.msrb.mxu2 %v10366_v44  ;;  %v4815_v33 = vld [vmem:[%s12061_s1 + $0x510] sm:$0xff]  ;;  %v4793_v11 = vld [vmem:[%s12061_s1 + $0x460] sm:$0xff] }
 0x677   :  { %4992 = vmatpush.msra.mxu3 %v10371_v25  ;;  %5469 = vmatmul.f32.vlgmr.msrb.gmra.mxu0 %v5445_v39  ;;  %v4813_v39 = vld [vmem:[%s12061_s1 + $0x500] sm:$0xff] }
 0x678   :  { %5711 = vmatpush.msrb.mxu1 %v9858_v55  ;;  %5695 = vmatpush.msra.mxu0 %v9863_v51  ;;  %v10409_v51 = vld [vmem:[%s12061_s1 + $0x388] sm:$0xff] }
 0x679   :  { %4977 = vmatpush.msrb.mxu2 %v10380_v1  ;;  %4993 = vmatpush.msra.mxu3 %v10387_v7 }
 0x67a   :  { %5712 = vmatpush.msrb.mxu1 %v9874_v53  ;;  %5696 = vmatpush.msra.mxu0 %v9882_v9  ;;  %v4714_v55 = vpop.permute.xlu1 %4713  ;;  %v4742_v34 = vpop.permute.xlu2 %4741  ;;  %v5374_v9 = vld [vmem:[#allocation3 + $0x8] sm:$0x3c] }
 0x67b   :  { %4978 = vmatpush.msrb.mxu2 %v10393_v52  ;;  %4994 = vmatpush.msra.mxu3 %v10400_v61  ;;  %4716 = vst.msk [vmem:[#allocation3 + $0x58] sm:$0x1e] %vm4614_vm3, %v4714_v55  ;;  %v4825_v53 = vld [vmem:[#allocation3 + $0x50] sm:$0xf]  ;;  %v4811_v55 = vld [vmem:[%s12061_s1 + $0x4f0] sm:$0xff] }
 0x67c   :  { %5713 = vmatpush.msrb.mxu1 %v9903_v41  ;;  %5697 = vmatpush.msra.mxu0 %v9898_v13  ;;  %4744 = vst.msk [vmem:[#allocation3 + $0x70] sm:$0x1e] %vm4614_vm3, %v4742_v34  ;;  %v5446_v13 = vrot.slane %v5374_v9, 2  ;;  %v10438_v41 = vld [vmem:[%s12061_s1 + $0x378] sm:$0xff]  ;;  %v5102_v34 = vld [vmem:[%s12061_s1 + $0x8c8] sm:$0xff] }
 0x67d   :  { %4947 = vmatmul.f32.vlgmr.msra.gmra.mxu2 %v4825_v53  ;;  %4995 = vmatpush.msra.mxu3 %v10414_v30  ;;  %v5101_v53 = vld [vmem:[%s12061_s1 + $0x8c0] sm:$0xff] }
 0x67e   :  { %4979 = vmatpush.msrb.mxu2 %v10409_v51  ;;  %5698 = vmatpush.msra.mxu0 %v9916_v22  ;;  %v10451_v22 = vld [vmem:[%s12061_s1 + $0x370] sm:$0xff] }
 0x67f   :  { %5714 = vmatpush.msrb.mxu1 %v9921_v8  ;;  %4996 = vmatpush.msra.mxu3 %v10429_v57  ;;  %v10458_v8 = vld [vmem:[%s12061_s1 + $0x410] sm:$0xff] }
 0x680   :  { %4980 = vmatpush.msrb.mxu2 %v10424_v12  ;;  %5489 = vmatmul.f32.vlgmr.msra.gmra.mxu1 %v5446_v13 }
 0x681   :  { %5699 = vmatpush.msra.mxu0 %v9934_v60  ;;  %5715 = vmatpush.msrb.mxu1 %v9939_v48  ;;  %v10468_v48 = vld [vmem:[%s12061_s1 + $0x368] sm:$0xff] }
 0x682   :  { %4981 = vmatpush.msrb.mxu2 %v10438_v41  ;;  %4997 = vmatpush.msra.mxu3 %v10445_v59  ;;  %v4640_v20 = vpop.permute.xlu1 %4639  ;;  %v4733_v60 = vpop.permute.xlu2 %4732  ;;  %v4826_v63 = vld [vmem:[#allocation3 + $0x58] sm:$0xf] }
 0x683   :  { %5700 = vmatpush.msra.mxu0 %v9950_v6  ;;  %5716 = vmatpush.msrb.mxu1 %v9958_v15  ;;  %4642 = vst.msk [vmem:[#allocation3 + $0x18] sm:$0x1e] %vm4614_vm3, %v4640_v20  ;;  %v10482_v6 = vld [vmem:[%s12061_s1 + $0x360] sm:$0xff]  ;;  %v4807_v20 = vld [vmem:[%s12061_s1 + $0x4d0] sm:$0xff] }
 0x684   :  { %4982 = vmatpush.msrb.mxu2 %v10451_v22  ;;  %4998 = vmatpush.msra.mxu3 %v10458_v8  ;;  %4735 = vst.msk [vmem:[#allocation3 + $0x68] sm:$0x1e] %vm4614_vm3, %v4733_v60  ;;  %v10487_v15 = vld [vmem:[%s12061_s1 + $0x400] sm:$0xff]  ;;  %v5868_v60 = vld [vmem:[%s12061_s1 + $0x7b8] sm:$0xff] }
 0x685   :  { %5701 = vmatpush.msra.mxu0 %v9970_v40  ;;  %5717 = vmatpush.msrb.mxu1 %v9978_v28  ;;  %v10496_v40 = vld [vmem:[%s12061_s1 + $0x358] sm:$0xff] }
 0x686   :  { %4967 = vmatmul.f32.vlgmr.msrb.gmra.mxu3 %v4826_v63  ;;  %4983 = vmatpush.msrb.mxu2 %v10468_v48  ;;  %v10501_v28 = vld [vmem:[%s12061_s1 + $0x3f8] sm:$0xff]  ;;  %v5098_v63 = vld [vmem:[%s12061_s1 + $0x8a8] sm:$0xff] }
 0x687   :  { %4999 = vmatpush.msra.mxu3 %v10473_v19  ;;  %5702 = vmatpush.msra.mxu0 %v9990_v0  ;;  %v10510_v0 = vld [vmem:[%s12061_s1 + $0x350] sm:$0xff] }
 0x688   :  { %5718 = vmatpush.msrb.mxu1 %v9996_v10  ;;  %4984 = vmatpush.msrb.mxu2 %v10482_v6  ;;  %v10515_v10 = vld [vmem:[%s12061_s1 + $0x3f0] sm:$0xff] }
 0x689   :  { %5000 = vmatpush.msra.mxu3 %v10487_v15  ;;  %5703 = vmatpush.msra.mxu0 %v10008_v32  ;;  %v10525_v32 = vld [vmem:[%s12061_s1 + $0x3e8] sm:$0xff] }
 0x68a   :  { %5719 = vmatpush.msrb.mxu1 %v10015_v49  ;;  %4985 = vmatpush.msrb.mxu2 %v10496_v40  ;;  %v4724_v47 = vpop.permute.xlu1 %4723  ;;  %v4650_v17 = vpop.permute.xlu2 %4649  ;;  %v4806_v49 = vld [vmem:[%s12061_s1 + $0x4c8] sm:$0xff] }
 0x68b   :  { %5001 = vmatpush.msra.mxu3 %v10501_v28  ;;  %5704 = vmatpush.msra.mxu0 %v10028_v54  ;;  %4726 = vst.msk [vmem:[#allocation3 + $0x60] sm:$0x1e] %vm4614_vm3, %v4724_v47  ;;  %v4755_v54 = vld [vmem:[#allocation3] sm:$0xf]  ;;  %v5624_v9 = vld [vmem:[#allocation3 + $0x68] sm:$0xf] }
 0x68c   :  { %5720 = vmatpush.msrb.mxu1 %v10034_v56  ;;  %4986 = vmatpush.msrb.mxu2 %v10510_v0  ;;  %4652 = vst.msk [vmem:[#allocation3 + $0x20] sm:$0x1e] %vm4614_vm3, %v4650_v17  ;;  %v4805_v56 = vld [vmem:[%s12061_s1 + $0x4c0] sm:$0xff]  ;;  %v5096_v47 = vld [vmem:[%s12061_s1 + $0x898] sm:$0xff] }
 0x68d   :  { %5002 = vmatpush.msra.mxu3 %v10515_v10  ;;  %5705 = vmatpush.msra.mxu0 %v10048_v21  ;;  %v4804_v21 = vld [vmem:[%s12061_s1 + $0x4b8] sm:$0xff] }
 0x68e   :  { %5721 = vmatpush.msrb.mxu1 %v10054_v35  ;;  %4987 = vmatmul.f32.vlgmr.msrb.gmra.mxu2 %v4755_v54  ;;  %v10553_v35 = vld [vmem:[%s12061_s1 + $0x3d8] sm:$0xff]  ;;  %v5095_v54 = vld [vmem:[%s12061_s1 + $0x890] sm:$0xff] }
 0x68f   :  { %5003 = vmatpush.msra.mxu3 %v10525_v32  ;;  %5011 = vmatpush.msra.mxu2 %v4806_v49  ;;  %v5116_v17 = vld [vmem:[%s12061_s1 + $0x938] sm:$0xff]  ;;  %v5885_v49 = vld [vmem:[%s12061_s1 + $0x840] sm:$0xff] }
 0x690   :  { %5706 = vmatpush.msra.mxu0 %v10066_v42  ;;  %5722 = vmatpush.msrb.mxu1 %v10072_v23  ;;  %v4803_v42 = vld [vmem:[%s12061_s1 + $0x4b0] sm:$0xff] }
 0x691   :  { %5012 = vmatpush.msra.mxu2 %v4805_v56  ;;  %5004 = vmatpush.msra.mxu3 %v10542_v50  ;;  %v10564_v23 = vld [vmem:[%s12061_s1 + $0x3d0] sm:$0xff] }
 0x692   :  { %5771 = vmatpush.msrb.mxu0 %v10327_v43  ;;  %5723 = vmatpush.msrb.mxu1 %v10091_v29  ;;  %v4677_v46 = vpop.permute.xlu1 %4676  ;;  %v4802_v29 = vld [vmem:[%s12061_s1 + $0x4a8] sm:$0xff]  ;;  %v4756_v43 = vld [vmem:[#allocation3 + $0x8] sm:$0xf] }
 0x693   :  { %5013 = vmatpush.msra.mxu2 %v4804_v21  ;;  %5005 = vmatpush.msra.mxu3 %v10553_v35  ;;  %4679 = vst.msk [vmem:[#allocation3 + $0x38] sm:$0x1e] %vm4614_vm3, %v4677_v46  ;;  %v5555_v13 = vld [vmem:[#allocation3 + $0x20] sm:$0xf]  ;;  %v5115_v56 = vld [vmem:[%s12061_s1 + $0x930] sm:$0xff]  ;;  %v5884_v21 = vld [vmem:[%s12061_s1 + $0x838] sm:$0xff] }
 0x694   :  { %5772 = vmatpush.msrb.mxu0 %v10333_v58  ;;  %5724 = vmatpush.msrb.mxu1 %v10110_v2  ;;  %v4801_v2 = vld [vmem:[%s12061_s1 + $0x4a0] sm:$0xff]  ;;  %v5883_v46 = vld [vmem:[%s12061_s1 + $0x830] sm:$0xff] }
 0x695   :  { %5014 = vmatpush.msra.mxu2 %v4803_v42  ;;  %5006 = vmatpush.msra.mxu3 %v10564_v23  ;;  %v5114_v42 = vld [vmem:[%s12061_s1 + $0x928] sm:$0xff] }
 0x696   :  { %5773 = vmatpush.msrb.mxu0 %v10339_v36  ;;  %5725 = vmatpush.msrb.mxu1 %v10125_v3  ;;  %v4820_v3 = vld [vmem:[%s12061_s1 + $0x538] sm:$0xff]  ;;  %v4818_v36 = vld [vmem:[%s12061_s1 + $0x528] sm:$0xff] }
 0x697   :  { %5007 = vmatmul.f32.vlgmr.msra.gmra.mxu3 %v4756_v43  ;;  %5015 = vmatpush.msra.mxu2 %v4802_v29  ;;  %v5093_v29 = vld [vmem:[%s12061_s1 + $0x880] sm:$0xff]  ;;  %v5862_v43 = vld [vmem:[%s12061_s1 + $0x788] sm:$0xff] }
 0x698   :  { %5031 = vmatpush.msrb.mxu3 %v4822_v24  ;;  %5774 = vmatpush.msrb.mxu0 %v10346_v45  ;;  %v4797_v45 = vld [vmem:[%s12061_s1 + $0x480] sm:$0xff] }
 0x699   :  { %5726 = vmatpush.msrb.mxu1 %v10140_v37  ;;  %5016 = vmatpush.msra.mxu2 %v4801_v2  ;;  %v4819_v37 = vld [vmem:[%s12061_s1 + $0x530] sm:$0xff]  ;;  %v5113_v24 = vld [vmem:[%s12061_s1 + $0x920] sm:$0xff]  ;;  %v5882_v2 = vld [vmem:[%s12061_s1 + $0x828] sm:$0xff] }
 0x69a   :  { %5032 = vmatpush.msrb.mxu3 %v4821_v27  ;;  %5775 = vmatpush.msrb.mxu0 %v10353_v5  ;;  %v4751_v58 = vpop.permute.xlu0 %4750  ;;  %v4817_v5 = vld [vmem:[%s12061_s1 + $0x520] sm:$0xff]  ;;  %v5092_v27 = vld [vmem:[%s12061_s1 + $0x878] sm:$0xff] }
 0x69b   :  { %5791 = vmatpush.msra.mxu1 %v10358_v26  ;;  %5017 = vmatpush.msra.mxu2 %v4800_v31  ;;  %4753 = vst.msk [vmem:[#allocation3 + $0x78] sm:$0x1e] %vm4614_vm3, %v4751_v58  ;;  %v4796_v26 = vld [vmem:[%s12061_s1 + $0x478] sm:$0xff]  ;;  %v5111_v58 = vld [vmem:[%s12061_s1 + $0x910] sm:$0xff] }
 0x69c   :  { %5033 = vmatpush.msrb.mxu3 %v4820_v3  ;;  %5776 = vmatpush.msrb.mxu0 %v10366_v44  ;;  %v4814_v44 = vld [vmem:[%s12061_s1 + $0x508] sm:$0xff]  ;;  %v5112_v31 = vld [vmem:[%s12061_s1 + $0x918] sm:$0xff]  ;;  %v5861_v3 = vld [vmem:[%s12061_s1 + $0x780] sm:$0xff] }
 0x69d   :  { %5792 = vmatpush.msra.mxu1 %v10371_v25  ;;  %5018 = vmatpush.msra.mxu2 %v4799_v16  ;;  %v5623_v25 = vld [vmem:[#allocation3 + $0x60] sm:$0xf]  ;;  %v5881_v16 = vld [vmem:[%s12061_s1 + $0x820] sm:$0xff] }
 0x69e   :  { %5034 = vmatpush.msrb.mxu3 %v4819_v37  ;;  %5777 = vmatpush.msrb.mxu0 %v10380_v1  ;;  %v4792_v1 = vld [vmem:[%s12061_s1 + $0x458] sm:$0xff]  ;;  %v5091_v37 = vld [vmem:[%s12061_s1 + $0x870] sm:$0xff] }
 0x69f   :  { %5793 = vmatpush.msra.mxu1 %v10387_v7  ;;  %5019 = vmatpush.msra.mxu2 %v4798_v62  ;;  %v4812_v7 = vld [vmem:[%s12061_s1 + $0x4f8] sm:$0xff] }
 0x6a0   :  { %5035 = vmatpush.msrb.mxu3 %v4818_v36  ;;  %5778 = vmatpush.msrb.mxu0 %v10393_v52  ;;  %v4791_v52 = vld [vmem:[%s12061_s1 + $0x450] sm:$0xff]  ;;  %v5860_v62 = vld [vmem:[%s12061_s1 + $0x778] sm:$0xff] }
 0x6a1   :  { %5794 = vmatpush.msra.mxu1 %v10400_v61  ;;  %5020 = vmatpush.msra.mxu2 %v4797_v45  ;;  %v5880_v36 = vld [vmem:[%s12061_s1 + $0x818] sm:$0xff]  ;;  %v5090_v45 = vld [vmem:[%s12061_s1 + $0x868] sm:$0xff] }
 0x6a2   :  { %5036 = vmatpush.msrb.mxu3 %v4817_v5  ;;  %5779 = vmatpush.msrb.mxu0 %v10409_v51  ;;  %v4668_v4 = vpop.permute.xlu0 %4667  ;;  %v4810_v51 = vld [vmem:[%s12061_s1 + $0x4e8] sm:$0xff] }
 0x6a3   :  { %5795 = vmatpush.msra.mxu1 %v10414_v30  ;;  %5021 = vmatpush.msra.mxu2 %v4796_v26  ;;  %4670 = vst.msk [vmem:[#allocation3 + $0x30] sm:$0x1e] %vm4614_vm3, %v4668_v4  ;;  %v4757_v30 = vld [vmem:[#allocation3 + $0x10] sm:$0xf]  ;;  %v5110_v5 = vld [vmem:[%s12061_s1 + $0x908] sm:$0xff]  ;;  %v5859_v26 = vld [vmem:[%s12061_s1 + $0x770] sm:$0xff] }
 0x6a4   :  { %5037 = vmatpush.msrb.mxu3 %v4816_v38  ;;  %5780 = vmatpush.msrb.mxu0 %v10424_v12  ;;  %v4809_v12 = vld [vmem:[%s12061_s1 + $0x4e0] sm:$0xff]  ;;  %v5879_v38 = vld [vmem:[%s12061_s1 + $0x810] sm:$0xff]  ;;  %v5858_v4 = vld [vmem:[%s12061_s1 + $0x768] sm:$0xff] }
 0x6a5   :  { %5796 = vmatpush.msra.mxu1 %v10429_v57  ;;  %5022 = vmatpush.msra.mxu2 %v4795_v18  ;;  %v5870_v57 = vld [vmem:[%s12061_s1 + $0x7c8] sm:$0xff]  ;;  %v5089_v18 = vld [vmem:[%s12061_s1 + $0x860] sm:$0xff] }
 0x6a6   :  { %5038 = vmatpush.msrb.mxu3 %v4815_v33  ;;  %5781 = vmatpush.msrb.mxu0 %v10438_v41  ;;  %v5100_v41 = vld [vmem:[%s12061_s1 + $0x8b8] sm:$0xff]  ;;  %v5109_v33 = vld [vmem:[%s12061_s1 + $0x900] sm:$0xff] }
 0x6a7   :  { %5797 = vmatpush.msra.mxu1 %v10445_v59  ;;  %5023 = vmatpush.msra.mxu2 %v4794_v14  ;;  %v4808_v59 = vld [vmem:[%s12061_s1 + $0x4d8] sm:$0xff]  ;;  %v5878_v14 = vld [vmem:[%s12061_s1 + $0x808] sm:$0xff] }
 0x6a8   :  { %5039 = vmatpush.msrb.mxu3 %v4814_v44  ;;  %5782 = vmatpush.msrb.mxu0 %v10451_v22  ;;  %v5869_v22 = vld [vmem:[%s12061_s1 + $0x7c0] sm:$0xff]  ;;  %v5088_v44 = vld [vmem:[%s12061_s1 + $0x858] sm:$0xff] }
 0x6a9   :  { %5798 = vmatpush.msra.mxu1 %v10458_v8  ;;  %5707 = vmatmul.f32.vlgmr.msra.gmra.mxu0 %v5623_v25  ;;  %v5099_v8 = vld [vmem:[%s12061_s1 + $0x8b0] sm:$0xff]  ;;  %v5108_v25 = vld [vmem:[%s12061_s1 + $0x8f8] sm:$0xff] }
 0x6aa   :  { %5024 = vmatpush.msra.mxu2 %v4793_v11  ;;  %5040 = vmatpush.msrb.mxu3 %v4813_v39  ;;  %v4659_v61 = vpop.permute.xlu0 %4658  ;;  %v5857_v11 = vld [vmem:[%s12061_s1 + $0x760] sm:$0xff] }
 0x6ab   :  { %5783 = vmatpush.msrb.mxu0 %v10468_v48  ;;  %5799 = vmatpush.msra.mxu1 %v10473_v19  ;;  %4661 = vst.msk [vmem:[#allocation3 + $0x28] sm:$0x1e] %vm4614_vm3, %v4659_v61  ;;  %v5118_v48 = vld [vmem:[%s12061_s1 + $0x948] sm:$0xff]  ;;  %v5867_v19 = vld [vmem:[%s12061_s1 + $0x7b0] sm:$0xff]  ;;  %v5877_v39 = vld [vmem:[%s12061_s1 + $0x800] sm:$0xff] }
 0x6ac   :  { %5025 = vmatpush.msra.mxu2 %v4792_v1  ;;  %5041 = vmatpush.msrb.mxu3 %v4812_v7  ;;  %v5087_v1 = vld [vmem:[%s12061_s1 + $0x850] sm:$0xff]  ;;  %v5856_v61 = vld [vmem:[%s12061_s1 + $0x758] sm:$0xff] }
 0x6ad   :  { %5784 = vmatpush.msrb.mxu0 %v10482_v6  ;;  %5800 = vmatpush.msra.mxu1 %v10487_v15  ;;  %v4758_v6 = vld [vmem:[#allocation3 + $0x18] sm:$0xf]  ;;  %v5107_v7 = vld [vmem:[%s12061_s1 + $0x8f0] sm:$0xff] }
 0x6ae   :  { %5026 = vmatpush.msra.mxu2 %v4791_v52  ;;  %5042 = vmatpush.msrb.mxu3 %v4811_v55  ;;  %v5097_v15 = vld [vmem:[%s12061_s1 + $0x8a0] sm:$0xff]  ;;  %v5053_v52 = vld [vmem:[#allocation3 + $0x10] sm:$0x1e] }
 0x6af   :  { %5785 = vmatpush.msrb.mxu0 %v10496_v40  ;;  %5801 = vmatpush.msra.mxu1 %v10501_v28  ;;  %v5117_v40 = vld [vmem:[%s12061_s1 + $0x940] sm:$0xff]  ;;  %v5876_v55 = vld [vmem:[%s12061_s1 + $0x7f8] sm:$0xff] }
 0x6b0   :  { %5027 = vmatmul.f32.vlgmr.msra.gmra.mxu2 %v4757_v30  ;;  %5043 = vmatpush.msrb.mxu3 %v4810_v51  ;;  %v5851_v51 = vld [vmem:[#allocation3 + $0x20] sm:$0x1e]  ;;  %v5125_v30 = vrot.slane %v5053_v52, 1 }
 0x6b1   :  { %5171 = vmatpush.msrb.mxu2 %v5102_v34  ;;  %5786 = vmatpush.msrb.mxu0 %v10510_v0  ;;  %v5866_v0 = vld [vmem:[%s12061_s1 + $0x7a8] sm:$0xff] }
 0x6b2   :  { %5802 = vmatpush.msra.mxu1 %v10515_v10  ;;  %5787 = vmatmul.f32.vlgmr.msrb.gmra.mxu0 %v5555_v13  ;;  %v5556_v28 = vld [vmem:[#allocation3 + $0x28] sm:$0xf]  ;;  %v5886_v10 = vld [vmem:[%s12061_s1 + $0x848] sm:$0xff]  ;;  %v5923_v13 = vrot.slane %v5851_v51, 1  ;;  %v6018_v51 = vld [vmem:[%s12061_s1 + $0x960] sm:$0xff] }
 0x6b3   :  { %5172 = vmatpush.msrb.mxu2 %v5101_v53  ;;  %5727 = vmatmul.f32.vlgmr.msrb.gmra.mxu1 %v5624_v9  ;;  %v5106_v34 = vld [vmem:[%s12061_s1 + $0x8e8] sm:$0xff]  ;;  %v5855_v9 = vld [vmem:[%s12061_s1 + $0x750] sm:$0xff] }
 0x6b4   :  { %5044 = vmatpush.msrb.mxu3 %v4809_v12  ;;  %5931 = vmatpush.msra.mxu0 %v5870_v57  ;;  %v5263_v53 = vld [vmem:[%s12061_s1 + $0xac8] sm:$0xff]  ;;  %v5875_v12 = vld [vmem:[%s12061_s1 + $0x7f0] sm:$0xff]  ;;  %v5262_v57 = vld [vmem:[%s12061_s1 + $0xac0] sm:$0xff] }
 0x6b5   :  { %5803 = vmatpush.msra.mxu1 %v10525_v32  ;;  %5173 = vmatpush.msrb.mxu2 %v5100_v41  ;;  %v5865_v32 = vld [vmem:[%s12061_s1 + $0x7a0] sm:$0xff]  ;;  %v6031_v41 = vld [vmem:[%s12061_s1 + $0x9c8] sm:$0xff] }
 0x6b6   :  { %5045 = vmatpush.msrb.mxu3 %v4808_v59  ;;  %5932 = vmatpush.msra.mxu0 %v5869_v22  ;;  %v5105_v59 = vld [vmem:[%s12061_s1 + $0x8e0] sm:$0xff]  ;;  %v5874_v22 = vld [vmem:[%s12061_s1 + $0x7e8] sm:$0xff] }
 0x6b7   :  { %5804 = vmatpush.msra.mxu1 %v10542_v50  ;;  %5174 = vmatpush.msrb.mxu2 %v5099_v8  ;;  %v5864_v50 = vld [vmem:[%s12061_s1 + $0x798] sm:$0xff]  ;;  %v6019_v52 = vld [vmem:[%s12061_s1 + $0x968] sm:$0xff] }
 0x6b8   :  { %5046 = vmatpush.msrb.mxu3 %v4807_v20  ;;  %5933 = vmatpush.msra.mxu0 %v5868_v60  ;;  %v5261_v8 = vld [vmem:[%s12061_s1 + $0xab8] sm:$0xff]  ;;  %v6030_v20 = vld [vmem:[%s12061_s1 + $0x9c0] sm:$0xff] }
 0x6b9   :  { %5805 = vmatpush.msra.mxu1 %v10553_v35  ;;  %5047 = vmatmul.f32.vlgmr.msrb.gmra.mxu3 %v4758_v6  ;;  %v5094_v35 = vld [vmem:[%s12061_s1 + $0x888] sm:$0xff]  ;;  %v5104_v60 = vld [vmem:[%s12061_s1 + $0x8d8] sm:$0xff]  ;;  %v5054_v6 = vld [vmem:[#allocation3 + $0x18] sm:$0x1e] }
 0x6ba   :  { %5175 = vmatpush.msrb.mxu2 %v5098_v63  ;;  %5191 = vmatpush.msra.mxu3 %v5118_v48  ;;  %v5873_v63 = vld [vmem:[%s12061_s1 + $0x7e0] sm:$0xff]  ;;  %v5260_v48 = vld [vmem:[%s12061_s1 + $0xab0] sm:$0xff] }
 0x6bb   :  { %5934 = vmatpush.msra.mxu0 %v5867_v19  ;;  %5806 = vmatpush.msra.mxu1 %v10564_v23  ;;  %v5863_v23 = vld [vmem:[%s12061_s1 + $0x790] sm:$0xff]  ;;  %v6029_v19 = vld [vmem:[%s12061_s1 + $0x9b8] sm:$0xff] }
 0x6bc   :  { %5176 = vmatpush.msrb.mxu2 %v5097_v15  ;;  %5192 = vmatpush.msra.mxu3 %v5117_v40  ;;  %v5103_v15 = vld [vmem:[%s12061_s1 + $0x8d0] sm:$0xff]  ;;  %v5872_v40 = vld [vmem:[%s12061_s1 + $0x7d8] sm:$0xff] }
 0x6bd   :  { %5807 = vmatmul.f32.vlgmr.msra.gmra.mxu1 %v5556_v28  ;;  %5935 = vmatpush.msra.mxu0 %v5866_v0  ;;  %v5259_v28 = vld [vmem:[%s12061_s1 + $0xaa8] sm:$0xff]  ;;  %v5126_v0 = vrot.slane %v5054_v6, 1  ;;  %v6191_v6 = vld [vmem:[%s12061_s1 + $0xbc0] sm:$0xff] }
 0x6be   :  { %5951 = vmatpush.msrb.mxu1 %v5886_v10  ;;  %5177 = vmatpush.msrb.mxu2 %v5096_v47  ;;  %v5279_v10 = vld [vmem:[%s12061_s1 + $0xb48] sm:$0xff]  ;;  %v6028_v47 = vld [vmem:[%s12061_s1 + $0x9b0] sm:$0xff] }
 0x6bf   :  { %5193 = vmatpush.msra.mxu3 %v5116_v17  ;;  %5936 = vmatpush.msra.mxu0 %v5865_v32  ;;  %v5852_v17 = vld [vmem:[#allocation3 + $0x28] sm:$0x1e] }
 0x6c0   :  { %5952 = vmatpush.msrb.mxu1 %v5885_v49  ;;  %5178 = vmatpush.msrb.mxu2 %v5095_v54  ;;  %v5871_v32 = vld [vmem:[%s12061_s1 + $0x7d0] sm:$0xff]  ;;  %v5258_v49 = vld [vmem:[%s12061_s1 + $0xaa0] sm:$0xff] }
 0x6c1   :  { %5194 = vmatpush.msra.mxu3 %v5115_v56  ;;  %5937 = vmatpush.msra.mxu0 %v5864_v50  ;;  %v5278_v54 = vld [vmem:[%s12061_s1 + $0xb40] sm:$0xff]  ;;  %v5924_v56 = vrot.slane %v5852_v17, 1  ;;  %v6027_v50 = vld [vmem:[%s12061_s1 + $0x9a8] sm:$0xff]  ;;  %v11166_v17 = vld [vmem:[%s12061_s1 + $0xad0] sm:$0xff] }
 0x6c2   :  { %5953 = vmatpush.msrb.mxu1 %v5884_v21  ;;  %5179 = vmatpush.msrb.mxu2 %v5094_v35  ;;  %v6047_v21 = vld [vmem:[%s12061_s1 + $0xa48] sm:$0xff]  ;;  %v10926_v35 = vld [vmem:[%s12061_s1 + $0xa98] sm:$0xff] }
 0x6c3   :  { %5195 = vmatpush.msra.mxu3 %v5114_v42  ;;  %5938 = vmatpush.msra.mxu0 %v5863_v23  ;;  %v10931_v42 = vld [vmem:[%s12061_s1 + $0xb38] sm:$0xff]  ;;  %v6026_v23 = vld [vmem:[%s12061_s1 + $0x9a0] sm:$0xff] }
 0x6c4   :  { %5954 = vmatpush.msrb.mxu1 %v5883_v46  ;;  %5180 = vmatpush.msrb.mxu2 %v5093_v29  ;;  %v6046_v46 = vld [vmem:[%s12061_s1 + $0xa40] sm:$0xff]  ;;  %v10942_v29 = vld [vmem:[%s12061_s1 + $0xa90] sm:$0xff] }
 0x6c5   :  { %5196 = vmatpush.msra.mxu3 %v5113_v24  ;;  %5939 = vmatpush.msra.mxu0 %v5862_v43  ;;  %v10947_v24 = vld [vmem:[%s12061_s1 + $0xb30] sm:$0xff]  ;;  %v6025_v43 = vld [vmem:[%s12061_s1 + $0x998] sm:$0xff] }
 0x6c6   :  { %5955 = vmatpush.msrb.mxu1 %v5882_v2  ;;  %5181 = vmatpush.msrb.mxu2 %v5092_v27  ;;  %v6045_v2 = vld [vmem:[%s12061_s1 + $0xa38] sm:$0xff]  ;;  %v10960_v27 = vld [vmem:[%s12061_s1 + $0xa88] sm:$0xff] }
 0x6c7   :  { %5197 = vmatpush.msra.mxu3 %v5112_v31  ;;  %5940 = vmatpush.msra.mxu0 %v5861_v3  ;;  %v10965_v31 = vld [vmem:[%s12061_s1 + $0xb28] sm:$0xff]  ;;  %v6024_v3 = vld [vmem:[%s12061_s1 + $0x990] sm:$0xff] }
 0x6c8   :  { %5956 = vmatpush.msrb.mxu1 %v5881_v16  ;;  %5182 = vmatpush.msrb.mxu2 %v5091_v37  ;;  %v6044_v16 = vld [vmem:[%s12061_s1 + $0xa30] sm:$0xff]  ;;  %v10978_v37 = vld [vmem:[%s12061_s1 + $0xa80] sm:$0xff] }
 0x6c9   :  { %5198 = vmatpush.msra.mxu3 %v5111_v58  ;;  %5941 = vmatpush.msra.mxu0 %v5860_v62  ;;  %v10983_v58 = vld [vmem:[%s12061_s1 + $0xb20] sm:$0xff]  ;;  %v6023_v62 = vld [vmem:[%s12061_s1 + $0x988] sm:$0xff] }
 0x6ca   :  { %5957 = vmatpush.msrb.mxu1 %v5880_v36  ;;  %5183 = vmatpush.msrb.mxu2 %v5090_v45  ;;  %v6043_v36 = vld [vmem:[%s12061_s1 + $0xa28] sm:$0xff]  ;;  %v10996_v45 = vld [vmem:[%s12061_s1 + $0xa78] sm:$0xff] }
 0x6cb   :  { %5199 = vmatpush.msra.mxu3 %v5110_v5  ;;  %5942 = vmatpush.msra.mxu0 %v5859_v26  ;;  %v11001_v5 = vld [vmem:[%s12061_s1 + $0xb18] sm:$0xff]  ;;  %v6022_v26 = vld [vmem:[%s12061_s1 + $0x980] sm:$0xff] }
 0x6cc   :  { %5958 = vmatpush.msrb.mxu1 %v5879_v38  ;;  %5184 = vmatpush.msrb.mxu2 %v5089_v18  ;;  %v6042_v38 = vld [vmem:[%s12061_s1 + $0xa20] sm:$0xff]  ;;  %v11014_v18 = vld [vmem:[%s12061_s1 + $0xa70] sm:$0xff] }
 0x6cd   :  { %5200 = vmatpush.msra.mxu3 %v5109_v33  ;;  %5943 = vmatpush.msra.mxu0 %v5858_v4  ;;  %v11019_v33 = vld [vmem:[%s12061_s1 + $0xb10] sm:$0xff]  ;;  %v6021_v4 = vld [vmem:[%s12061_s1 + $0x978] sm:$0xff] }
 0x6ce   :  { %5959 = vmatpush.msrb.mxu1 %v5878_v14  ;;  %5185 = vmatpush.msrb.mxu2 %v5088_v44  ;;  %v6041_v14 = vld [vmem:[%s12061_s1 + $0xa18] sm:$0xff]  ;;  %v11032_v44 = vld [vmem:[%s12061_s1 + $0xa68] sm:$0xff] }
 0x6cf   :  { %5201 = vmatpush.msra.mxu3 %v5108_v25  ;;  %5944 = vmatpush.msra.mxu0 %v5857_v11  ;;  %v11037_v25 = vld [vmem:[%s12061_s1 + $0xb08] sm:$0xff]  ;;  %v6020_v11 = vld [vmem:[%s12061_s1 + $0x970] sm:$0xff] }
 0x6d0   :  { %5960 = vmatpush.msrb.mxu1 %v5877_v39  ;;  %5186 = vmatpush.msrb.mxu2 %v5087_v1  ;;  %v6040_v39 = vld [vmem:[%s12061_s1 + $0xa10] sm:$0xff]  ;;  %v11050_v1 = vld [vmem:[%s12061_s1 + $0xa60] sm:$0xff] }
 0x6d1   :  { %5202 = vmatpush.msra.mxu3 %v5107_v7  ;;  %5945 = vmatpush.msra.mxu0 %v5856_v61  ;;  %v11055_v7 = vld [vmem:[%s12061_s1 + $0xb00] sm:$0xff]  ;;  %v6039_v61 = vld [vmem:[%s12061_s1 + $0xa08] sm:$0xff] }
 0x6d2   :  { %5961 = vmatpush.msrb.mxu1 %v5876_v55  ;;  %5187 = vmatmul.f32.vlgmr.msrb.gmra.mxu2 %v5125_v30  ;;  %v11068_v55 = vld [vmem:[%s12061_s1 + $0xa58] sm:$0xff]  ;;  %v6038_v30 = vld [vmem:[%s12061_s1 + $0xa00] sm:$0xff] }
 0x6d3   :  { %5203 = vmatpush.msra.mxu3 %v5106_v34  ;;  %5332 = vmatpush.msra.mxu2 %v5263_v53  ;;  %v11073_v34 = vld [vmem:[%s12061_s1 + $0xaf8] sm:$0xff]  ;;  %v11086_v53 = vld [vmem:[%s12061_s1 + $0xa50] sm:$0xff] }
 0x6d4   :  { %5946 = vmatpush.msra.mxu0 %v5855_v9  ;;  %5962 = vmatpush.msrb.mxu1 %v5875_v12  ;;  %v11091_v9 = vld [vmem:[%s12061_s1 + $0xaf0] sm:$0xff]  ;;  %v5214_v12 = vld [vmem:[#allocation3 + $0x50] sm:$0x1e] }
 0x6d5   :  { %5947 = vmatmul.f32.vlgmr.msra.gmra.mxu0 %v5923_v13  ;;  %5333 = vmatpush.msra.mxu2 %v5262_v57  ;;  %v6017_v57 = vld [vmem:[%s12061_s1 + $0x958] sm:$0xff] }
 0x6d6   :  { %6092 = vmatpush.msrb.mxu0 %v6031_v41  ;;  %5204 = vmatpush.msra.mxu3 %v5105_v59  ;;  %v6037_v13 = vld [vmem:[%s12061_s1 + $0x9f8] sm:$0xff]  ;;  %v11104_v41 = vld [vmem:[%s12061_s1 + $0xae8] sm:$0xff]  ;;  %v5286_v59 = vrot.slane %v5214_v12, 1 }
 0x6d7   :  { %5963 = vmatpush.msrb.mxu1 %v5874_v22  ;;  %5334 = vmatpush.msra.mxu2 %v5261_v8  ;;  %v11111_v22 = vld [vmem:[%s12061_s1 + $0xcc8] sm:$0xff]  ;;  %v6016_v8 = vld [vmem:[%s12061_s1 + $0x950] sm:$0xff] }
 0x6d8   :  { %6093 = vmatpush.msrb.mxu0 %v6030_v20  ;;  %5205 = vmatpush.msra.mxu3 %v5104_v60  ;;  %v6036_v20 = vld [vmem:[%s12061_s1 + $0x9f0] sm:$0xff]  ;;  %v6192_v60 = vld [vmem:[%s12061_s1 + $0xbc8] sm:$0xff] }
 0x6d9   :  { %5964 = vmatpush.msrb.mxu1 %v5873_v63  ;;  %5335 = vmatpush.msra.mxu2 %v5260_v48  ;;  %v11126_v63 = vld [vmem:[%s12061_s1 + $0xcc0] sm:$0xff]  ;;  %v6184_v12 = vld [vmem:[%s12061_s1 + $0xb88] sm:$0xff] }
 0x6da   :  { %6094 = vmatpush.msrb.mxu0 %v6029_v19  ;;  %5206 = vmatpush.msra.mxu3 %v5103_v15  ;;  %v11131_v48 = vld [vmem:[%s12061_s1 + $0xae0] sm:$0xff]  ;;  %v6035_v19 = vld [vmem:[%s12061_s1 + $0x9e8] sm:$0xff]  ;;  %v11143_v15 = vld [vmem:[%s12061_s1 + $0xcb8] sm:$0xff] }
 0x6db   :  { %5965 = vmatpush.msrb.mxu1 %v5872_v40  ;;  %5207 = vmatmul.f32.vlgmr.msra.gmra.mxu3 %v5126_v0  ;;  %v11148_v40 = vld [vmem:[%s12061_s1 + $0xad8] sm:$0xff] }
 0x6dc   :  { %5336 = vmatpush.msra.mxu2 %v5259_v28  ;;  %5352 = vmatpush.msrb.mxu3 %v5279_v10  ;;  %v6034_v28 = vld [vmem:[%s12061_s1 + $0x9e0] sm:$0xff]  ;;  %v6190_v0 = vld [vmem:[%s12061_s1 + $0xbb8] sm:$0xff] }
 0x6dd   :  { %6095 = vmatpush.msrb.mxu0 %v6028_v47  ;;  %5966 = vmatpush.msrb.mxu1 %v5871_v32  ;;  %v5215_v10 = vld [vmem:[#allocation3 + $0x58] sm:$0x1e]  ;;  %v11161_v47 = vld [vmem:[%s12061_s1 + $0xcb0] sm:$0xff]  ;;  %v6033_v32 = vld [vmem:[%s12061_s1 + $0x9d8] sm:$0xff] }
 0x6de   :  { %5337 = vmatpush.msra.mxu2 %v5258_v49  ;;  %5353 = vmatpush.msrb.mxu3 %v5278_v54  ;;  %v5287_v49 = vrot.slane %v5215_v10, 1  ;;  %v11176_v54 = vld [vmem:[%s12061_s1 + $0xca8] sm:$0xff] }
 0x6df   :  { %5967 = vmatmul.f32.vlgmr.msrb.gmra.mxu1 %v5924_v56  ;;  %6096 = vmatpush.msrb.mxu0 %v6027_v50  ;;  %v11181_v56 = vld [vmem:[%s12061_s1 + $0xd48] sm:$0xff]  ;;  %v6189_v50 = vld [vmem:[%s12061_s1 + $0xbb0] sm:$0xff] }
 0x6e0   :  { %6112 = vmatpush.msra.mxu1 %v6047_v21  ;;  %5338 = vmatpush.msra.mxu2 %v10926_v35  ;;  %v6032_v21 = vld [vmem:[%s12061_s1 + $0x9d0] sm:$0xff]  ;;  %v11320_v10 = vld [vmem:[%s12061_s1 + $0xc68] sm:$0xff] }
 0x6e1   :  { %5354 = vmatpush.msrb.mxu3 %v10931_v42  ;;  %6097 = vmatpush.msrb.mxu0 %v6026_v23  ;;  %v11194_v23 = vld [vmem:[%s12061_s1 + $0xca0] sm:$0xff] }
 0x6e2   :  { %6113 = vmatpush.msra.mxu1 %v6046_v46  ;;  %5339 = vmatpush.msra.mxu2 %v10942_v29  ;;  %v11199_v46 = vld [vmem:[%s12061_s1 + $0xd40] sm:$0xff] }
 0x6e3   :  { %5355 = vmatpush.msrb.mxu3 %v10947_v24  ;;  %6098 = vmatpush.msrb.mxu0 %v6025_v43  ;;  %v6188_v43 = vld [vmem:[%s12061_s1 + $0xba8] sm:$0xff] }
 0x6e4   :  { %6114 = vmatpush.msra.mxu1 %v6045_v2  ;;  %5340 = vmatpush.msra.mxu2 %v10960_v27  ;;  %v6208_v2 = vld [vmem:[%s12061_s1 + $0xc48] sm:$0xff] }
 0x6e5   :  { %5356 = vmatpush.msrb.mxu3 %v10965_v31  ;;  %6099 = vmatpush.msrb.mxu0 %v6024_v3  ;;  %v11212_v3 = vld [vmem:[%s12061_s1 + $0xc98] sm:$0xff] }
 0x6e6   :  { %6115 = vmatpush.msra.mxu1 %v6044_v16  ;;  %5341 = vmatpush.msra.mxu2 %v10978_v37  ;;  %v11217_v16 = vld [vmem:[%s12061_s1 + $0xd38] sm:$0xff] }
 0x6e7   :  { %5357 = vmatpush.msrb.mxu3 %v10983_v58  ;;  %6100 = vmatpush.msrb.mxu0 %v6023_v62  ;;  %v6187_v62 = vld [vmem:[%s12061_s1 + $0xba0] sm:$0xff] }
 0x6e8   :  { %6116 = vmatpush.msra.mxu1 %v6043_v36  ;;  %5342 = vmatpush.msra.mxu2 %v10996_v45  ;;  %v6207_v36 = vld [vmem:[%s12061_s1 + $0xc40] sm:$0xff] }
 0x6e9   :  { %5358 = vmatpush.msrb.mxu3 %v11001_v5  ;;  %6101 = vmatpush.msrb.mxu0 %v6022_v26  ;;  %v11230_v26 = vld [vmem:[%s12061_s1 + $0xc90] sm:$0xff] }
 0x6ea   :  { %6117 = vmatpush.msra.mxu1 %v6042_v38  ;;  %5343 = vmatpush.msra.mxu2 %v11014_v18  ;;  %v11235_v38 = vld [vmem:[%s12061_s1 + $0xd30] sm:$0xff] }
 0x6eb   :  { %5359 = vmatpush.msrb.mxu3 %v11019_v33  ;;  %6102 = vmatpush.msrb.mxu0 %v6021_v4  ;;  %v6186_v4 = vld [vmem:[%s12061_s1 + $0xb98] sm:$0xff] }
 0x6ec   :  { %6118 = vmatpush.msra.mxu1 %v6041_v14  ;;  %5344 = vmatpush.msra.mxu2 %v11032_v44  ;;  %v6206_v14 = vld [vmem:[%s12061_s1 + $0xc38] sm:$0xff] }
 0x6ed   :  { %5360 = vmatpush.msrb.mxu3 %v11037_v25  ;;  %6103 = vmatpush.msrb.mxu0 %v6020_v11  ;;  %v11248_v11 = vld [vmem:[%s12061_s1 + $0xc88] sm:$0xff] }
 0x6ee   :  { %6119 = vmatpush.msra.mxu1 %v6040_v39  ;;  %5345 = vmatpush.msra.mxu2 %v11050_v1  ;;  %v11253_v39 = vld [vmem:[%s12061_s1 + $0xd28] sm:$0xff] }
 0x6ef   :  { %5361 = vmatpush.msrb.mxu3 %v11055_v7  ;;  %6104 = vmatpush.msrb.mxu0 %v6019_v52  ;;  %v6185_v52 = vld [vmem:[%s12061_s1 + $0xb90] sm:$0xff] }
 0x6f0   :  { %6120 = vmatpush.msra.mxu1 %v6039_v61  ;;  %5346 = vmatpush.msra.mxu2 %v11068_v55  ;;  %v6205_v61 = vld [vmem:[%s12061_s1 + $0xc30] sm:$0xff] }
 0x6f1   :  { %5362 = vmatpush.msrb.mxu3 %v11073_v34  ;;  %6105 = vmatpush.msrb.mxu0 %v6018_v51  ;;  %v11266_v51 = vld [vmem:[%s12061_s1 + $0xc80] sm:$0xff] }
 0x6f2   :  { %6121 = vmatpush.msra.mxu1 %v6038_v30  ;;  %5347 = vmatpush.msra.mxu2 %v11086_v53  ;;  %v11271_v30 = vld [vmem:[%s12061_s1 + $0xd20] sm:$0xff] }
 0x6f3   :  { %5363 = vmatpush.msrb.mxu3 %v11091_v9  ;;  %6106 = vmatpush.msrb.mxu0 %v6017_v57  ;;  %v6204_v57 = vld [vmem:[%s12061_s1 + $0xc28] sm:$0xff] }
 0x6f4   :  { %6122 = vmatpush.msra.mxu1 %v6037_v13  ;;  %5348 = vmatmul.f32.vlgmr.msra.gmra.mxu2 %v5286_v59  ;;  %v11284_v13 = vld [vmem:[%s12061_s1 + $0xc78] sm:$0xff] }
 0x6f5   :  { %5364 = vmatpush.msrb.mxu3 %v11104_v41  ;;  %5493 = vmatpush.msrb.mxu2 %v11111_v22  ;;  %v11289_v59 = vld [vmem:[%s12061_s1 + $0xd18] sm:$0xff] }
 0x6f6   :  { %6107 = vmatpush.msrb.mxu0 %v6016_v8  ;;  %6123 = vmatpush.msra.mxu1 %v6036_v20  ;;  %v6183_v8 = vld [vmem:[%s12061_s1 + $0xb80] sm:$0xff] }
 0x6f7   :  { %5494 = vmatpush.msrb.mxu2 %v11126_v63  ;;  %5365 = vmatpush.msrb.mxu3 %v11131_v48  ;;  %v6203_v20 = vld [vmem:[%s12061_s1 + $0xc20] sm:$0xff] }
 0x6f8   :  { %6253 = vmatpush.msra.mxu0 %v6192_v60  ;;  %6124 = vmatpush.msra.mxu1 %v6035_v19  ;;  %v11302_v60 = vld [vmem:[%s12061_s1 + $0xc70] sm:$0xff] }
 0x6f9   :  { %5495 = vmatpush.msrb.mxu2 %v11143_v15  ;;  %5366 = vmatpush.msrb.mxu3 %v11148_v40  ;;  %v11307_v19 = vld [vmem:[%s12061_s1 + $0xd10] sm:$0xff] }
 0x6fa   :  { %6254 = vmatpush.msra.mxu0 %v6191_v6  ;;  %6125 = vmatpush.msra.mxu1 %v6034_v28  ;;  %v6012_v6 = vld [vmem:[#allocation3 + $0x60] sm:$0x1e]  ;;  %v6182_v28 = vld [vmem:[%s12061_s1 + $0xb78] sm:$0xff] }
 0x6fb   :  { %5496 = vmatpush.msrb.mxu2 %v11161_v47  ;;  %5367 = vmatpush.msrb.mxu3 %v11166_v17 }
 0x6fc   :  { %6255 = vmatpush.msra.mxu0 %v6190_v0  ;;  %6126 = vmatpush.msra.mxu1 %v6033_v32  ;;  %v6202_v0 = vld [vmem:[%s12061_s1 + $0xc18] sm:$0xff]  ;;  %v11325_v32 = vld [vmem:[%s12061_s1 + $0xd08] sm:$0xff] }
 0x6fd   :  { %5368 = vmatmul.f32.vlgmr.msrb.gmra.mxu3 %v5287_v49  ;;  %5497 = vmatpush.msrb.mxu2 %v11176_v54  ;;  %v6181_v49 = vld [vmem:[%s12061_s1 + $0xb70] sm:$0xff] }
 0x6fe   :  { %5513 = vmatpush.msra.mxu3 %v11181_v56  ;;  %6256 = vmatpush.msra.mxu0 %v6189_v50  ;;  %v6201_v50 = vld [vmem:[%s12061_s1 + $0xc10] sm:$0xff] }
 0x6ff   :  { %6127 = vmatpush.msra.mxu1 %v6032_v21  ;;  %5498 = vmatpush.msrb.mxu2 %v11194_v23  ;;  %v6084_v21 = vrot.slane %v6012_v6, 1  ;;  %v6013_v6 = vld [vmem:[#allocation3 + $0x68] sm:$0x1e] }
 0x700   :  { %5514 = vmatpush.msra.mxu3 %v11199_v46  ;;  %6257 = vmatpush.msra.mxu0 %v6188_v43  ;;  %v11338_v43 = vld [vmem:[%s12061_s1 + $0xc60] sm:$0xff] }
 0x701   :  { %6273 = vmatpush.msrb.mxu1 %v6208_v2  ;;  %5499 = vmatpush.msrb.mxu2 %v11212_v3  ;;  %v11345_v2 = vld [vmem:[%s12061_s1 + $0xd00] sm:$0xff] }
 0x702   :  { %5515 = vmatpush.msra.mxu3 %v11217_v16  ;;  %6258 = vmatpush.msra.mxu0 %v6187_v62  ;;  %v6180_v62 = vld [vmem:[%s12061_s1 + $0xb68] sm:$0xff] }
 0x703   :  { %6274 = vmatpush.msrb.mxu1 %v6207_v36  ;;  %5500 = vmatpush.msrb.mxu2 %v11230_v26  ;;  %v6200_v36 = vld [vmem:[%s12061_s1 + $0xc08] sm:$0xff] }
 0x704   :  { %5516 = vmatpush.msra.mxu3 %v11235_v38  ;;  %6259 = vmatpush.msra.mxu0 %v6186_v4  ;;  %v11356_v4 = vld [vmem:[%s12061_s1 + $0xc58] sm:$0xff] }
 0x705   :  { %6275 = vmatpush.msrb.mxu1 %v6206_v14  ;;  %5501 = vmatpush.msrb.mxu2 %v11248_v11  ;;  %v11362_v14 = vld [vmem:[%s12061_s1 + $0xcf8] sm:$0xff] }
 0x706   :  { %5517 = vmatpush.msra.mxu3 %v11253_v39  ;;  %6260 = vmatpush.msra.mxu0 %v6185_v52  ;;  %v6179_v52 = vld [vmem:[%s12061_s1 + $0xb60] sm:$0xff] }
 0x707   :  { %6276 = vmatpush.msrb.mxu1 %v6205_v61  ;;  %5502 = vmatpush.msrb.mxu2 %v11266_v51  ;;  %v6199_v61 = vld [vmem:[%s12061_s1 + $0xc00] sm:$0xff] }
 0x708   :  { %5518 = vmatpush.msra.mxu3 %v11271_v30  ;;  %6261 = vmatpush.msra.mxu0 %v6184_v12  ;;  %v11374_v12 = vld [vmem:[%s12061_s1 + $0xc50] sm:$0xff] }
 0x709   :  { %6277 = vmatpush.msrb.mxu1 %v6204_v57  ;;  %5503 = vmatpush.msrb.mxu2 %v11284_v13  ;;  %12317 = vst [vmem:[#allocation63_spill] sm:$0xff] %v11374_v12  ;;  %v5375_v57 = vld [vmem:[#allocation3 + $0x10] sm:$0x3c] }
 0x70a   :  { %5519 = vmatpush.msra.mxu3 %v11289_v59  ;;  %6262 = vmatpush.msra.mxu0 %v6183_v8  ;;  %v11380_v8 = vld [vmem:[%s12061_s1 + $0xcf0] sm:$0xff] }
 0x70b   :  { %6278 = vmatpush.msrb.mxu1 %v6203_v20  ;;  %5504 = vmatpush.msrb.mxu2 %v11302_v60  ;;  %12318 = vst [vmem:[#allocation32_spill] sm:$0xff] %v11380_v8  ;;  %v6178_v20 = vld [vmem:[%s12061_s1 + $0xb58] sm:$0xff] }
 0x70c   :  { %5520 = vmatpush.msra.mxu3 %v11307_v19  ;;  %6263 = vmatpush.msra.mxu0 %v6182_v28  ;;  %v6198_v28 = vld [vmem:[%s12061_s1 + $0xbf8] sm:$0xff] }
 0x70d   :  { %6279 = vmatpush.msrb.mxu1 %v6202_v0  ;;  %5505 = vmatpush.msrb.mxu2 %v11320_v10  ;;  %v5447_v0 = vrot.slane %v5375_v57, 2  ;;  %v11412_v57 = vld [vmem:[%s12061_s1 + $0xce0] sm:$0xff] }
 0x70e   :  { %5521 = vmatpush.msra.mxu3 %v11325_v32  ;;  %6264 = vmatpush.msra.mxu0 %v6181_v49  ;;  %v5674_v49 = vld [vmem:[%s12061_s1 + $0x6c8] sm:$0xff]  ;;  %12320 = vst [vmem:[#allocation37_spill] sm:$0xff] %v11412_v57 }
 0x70f   :  { %6280 = vmatpush.msrb.mxu1 %v6201_v50  ;;  %6108 = vmatmul.f32.vlgmr.msrb.gmra.mxu0 %v6084_v21  ;;  %v11396_v50 = vld [vmem:[%s12061_s1 + $0xce8] sm:$0xff]  ;;  %v6177_v21 = vld [vmem:[%s12061_s1 + $0xb50] sm:$0xff] }
 0x710   :  { %5506 = vmatpush.msrb.mxu2 %v11338_v43  ;;  %5522 = vmatpush.msra.mxu3 %v11345_v2  ;;  %12319 = vst [vmem:[#allocation12_spill] sm:$0xff] %v11396_v50 }
 0x711   :  { %6265 = vmatpush.msra.mxu0 %v6180_v62  ;;  %6281 = vmatpush.msrb.mxu1 %v6200_v36  ;;  %v6197_v62 = vld [vmem:[%s12061_s1 + $0xbf0] sm:$0xff]  ;;  %v6085_v36 = vrot.slane %v6013_v6, 1  ;;  %v6196_v6 = vld [vmem:[%s12061_s1 + $0xbe8] sm:$0xff] }
 0x712   :  { %5507 = vmatpush.msrb.mxu2 %v11356_v4  ;;  %5523 = vmatpush.msra.mxu3 %v11362_v14 }
 0x713   :  { %6266 = vmatpush.msra.mxu0 %v6179_v52  ;;  %6282 = vmatpush.msrb.mxu1 %v6199_v61  ;;  %v6173_v52 = vld [vmem:[#allocation3 + $0x20] sm:$0x3c]  ;;  %v5673_v61 = vld [vmem:[%s12061_s1 + $0x6c0] sm:$0xff] }
 0x714   :  { %5508 = vmatpush.msrb.mxu2 %v11374_v12  ;;  %5524 = vmatpush.msra.mxu3 %v11380_v8  ;;  %v6059_v8 = vld [vmem:[%s12061_s1 + $0xaa8] sm:$0xff]  ;;  %v6058_v12 = vld [vmem:[%s12061_s1 + $0xaa0] sm:$0xff] }
 0x715   :  { %6267 = vmatpush.msra.mxu0 %v6178_v20  ;;  %6283 = vmatpush.msrb.mxu1 %v6198_v28  ;;  %v6245_v20 = vrot.slane %v6173_v52, 2  ;;  %v5672_v28 = vld [vmem:[%s12061_s1 + $0x6b8] sm:$0xff] }
 0x716   :  { %5509 = vmatmul.f32.vlgmr.msrb.gmra.mxu2 %v5447_v0  ;;  %5525 = vmatpush.msra.mxu3 %v11396_v50  ;;  %v11423_v0 = vld [vmem:[%s12061_s1 + $0xcd8] sm:$0xff]  ;;  %v6062_v50 = vld [vmem:[%s12061_s1 + $0xac0] sm:$0xff] }
 0x717   :  { %5731 = vmatpush.msra.mxu2 %v5674_v49  ;;  %6268 = vmatpush.msra.mxu0 %v6177_v21  ;;  %12321 = vst [vmem:[#allocation33_spill] sm:$0xff] %v11423_v0  ;;  %v6195_v49 = vld [vmem:[%s12061_s1 + $0xbe0] sm:$0xff]  ;;  %v5671_v21 = vld [vmem:[%s12061_s1 + $0x6b0] sm:$0xff]  ;;  %v6194_v52 = vld [vmem:[%s12061_s1 + $0xbd8] sm:$0xff] }
 0x718   :  { %6284 = vmatpush.msrb.mxu1 %v6197_v62  ;;  %6269 = vmatmul.f32.vlgmr.msra.gmra.mxu0 %v6245_v20  ;;  %v5376_v62 = vld [vmem:[#allocation3 + $0x18] sm:$0x3c]  ;;  %v5670_v20 = vld [vmem:[%s12061_s1 + $0x6a8] sm:$0xff] }
 0x719   :  { %5732 = vmatpush.msra.mxu2 %v5673_v61  ;;  %6128 = vmatmul.f32.vlgmr.msra.gmra.mxu1 %v6085_v36  ;;  %v11435_v36 = vld [vmem:[%s12061_s1 + $0xcd0] sm:$0xff]  ;;  %v5448_v61 = vrot.slane %v5376_v62, 2 }
 0x71a   :  { %5526 = vmatpush.msra.mxu3 %v11412_v57  ;;  %6285 = vmatpush.msrb.mxu1 %v6196_v6  ;;  %12322 = vst [vmem:[#allocation66_spill] sm:$0xff] %v11435_v36  ;;  %v5690_v6 = vld [vmem:[%s12061_s1 + $0x748] sm:$0xff] }
 0x71b   :  { %5733 = vmatpush.msra.mxu2 %v5672_v28  ;;  %v6193_v28 = vld [vmem:[%s12061_s1 + $0xbd0] sm:$0xff]  ;;  %v6063_v57 = vld [vmem:[%s12061_s1 + $0xac8] sm:$0xff] }
 0x71c   :  { %5527 = vmatpush.msra.mxu3 %v11423_v0  ;;  %6286 = vmatpush.msrb.mxu1 %v6195_v49  ;;  %v6174_v0 = vld [vmem:[#allocation3 + $0x28] sm:$0x3c]  ;;  %v5669_v49 = vld [vmem:[%s12061_s1 + $0x6a0] sm:$0xff] }
 0x71d   :  { %5734 = vmatpush.msra.mxu2 %v5671_v21  ;;  %v5689_v21 = vld [vmem:[%s12061_s1 + $0x740] sm:$0xff]  ;;  %v6246_v62 = vrot.slane %v6174_v0, 2  ;;  %v5666_v0 = vld [vmem:[%s12061_s1 + $0x688] sm:$0xff] }
 0x71e   :  { %5528 = vmatpush.msra.mxu3 %v11435_v36  ;;  %6287 = vmatpush.msrb.mxu1 %v6194_v52  ;;  %v5668_v36 = vld [vmem:[%s12061_s1 + $0x698] sm:$0xff] }
 0x71f   :  { %5529 = vmatmul.f32.vlgmr.msra.gmra.mxu3 %v5448_v61  ;;  %5735 = vmatpush.msra.mxu2 %v5670_v20  ;;  %v5688_v52 = vld [vmem:[%s12061_s1 + $0x738] sm:$0xff]  ;;  %v5667_v61 = vld [vmem:[%s12061_s1 + $0x690] sm:$0xff] }
 0x720   :  { %5751 = vmatpush.msrb.mxu3 %v5690_v6  ;;  %6288 = vmatpush.msrb.mxu1 %v6193_v28  ;;  %v5687_v20 = vld [vmem:[%s12061_s1 + $0x730] sm:$0xff]  ;;  %v5686_v6 = vld [vmem:[%s12061_s1 + $0x728] sm:$0xff]  ;;  %v5665_v28 = vld [vmem:[%s12061_s1 + $0x680] sm:$0xff] }
 0x721   :  { %5736 = vmatpush.msra.mxu2 %v5669_v49  ;;  %6289 = vmatmul.f32.vlgmr.msrb.gmra.mxu1 %v6246_v62  ;;  %v5685_v49 = vld [vmem:[%s12061_s1 + $0x720] sm:$0xff]  ;;  %v5663_v62 = vld [vmem:[%s12061_s1 + $0x670] sm:$0xff] }
 0x722   :  { %5752 = vmatpush.msrb.mxu3 %v5689_v21  ;;  %v5684_v21 = vld [vmem:[%s12061_s1 + $0x718] sm:$0xff] }
 0x723   :  { %5737 = vmatpush.msra.mxu2 %v5668_v36  ;;  %v5664_v36 = vld [vmem:[%s12061_s1 + $0x678] sm:$0xff] }
 0x724   :  { %5753 = vmatpush.msrb.mxu3 %v5688_v52  ;;  %v5683_v52 = vld [vmem:[%s12061_s1 + $0x710] sm:$0xff] }
 0x725   :  { %5738 = vmatpush.msra.mxu2 %v5667_v61  ;;  %v5662_v61 = vld [vmem:[%s12061_s1 + $0x668] sm:$0xff] }
 0x726   :  { %5754 = vmatpush.msrb.mxu3 %v5687_v20  ;;  %v5682_v20 = vld [vmem:[%s12061_s1 + $0x708] sm:$0xff] }
 0x727   :  { %5739 = vmatpush.msra.mxu2 %v5666_v0  ;;  %v5661_v0 = vld [vmem:[%s12061_s1 + $0x660] sm:$0xff] }
 0x728   :  { %5755 = vmatpush.msrb.mxu3 %v5686_v6  ;;  %v5681_v6 = vld [vmem:[%s12061_s1 + $0x700] sm:$0xff] }
 0x729   :  { %5740 = vmatpush.msra.mxu2 %v5665_v28  ;;  %v5660_v28 = vld [vmem:[%s12061_s1 + $0x658] sm:$0xff] }
 0x72a   :  { %5756 = vmatpush.msrb.mxu3 %v5685_v49  ;;  %v5680_v49 = vld [vmem:[%s12061_s1 + $0x6f8] sm:$0xff] }
 0x72b   :  { %5741 = vmatpush.msra.mxu2 %v5664_v36  ;;  %v5659_v36 = vld [vmem:[%s12061_s1 + $0x650] sm:$0xff] }
 0x72c   :  { %5757 = vmatpush.msrb.mxu3 %v5684_v21  ;;  %v5679_v21 = vld [vmem:[%s12061_s1 + $0x6f0] sm:$0xff] }
 0x72d   :  { %5742 = vmatpush.msra.mxu2 %v5663_v62  ;;  %v5625_v62 = vld [vmem:[#allocation3 + $0x70] sm:$0xf] }
 0x72e   :  { %5758 = vmatpush.msrb.mxu3 %v5683_v52  ;;  %v5606_v52 = vld [vmem:[%s12061_s1 + $0x4c8] sm:$0xff] }
 0x72f   :  { %5743 = vmatpush.msra.mxu2 %v5662_v61  ;;  %v5678_v61 = vld [vmem:[%s12061_s1 + $0x6e8] sm:$0xff] }
 0x730   :  { %5759 = vmatpush.msrb.mxu3 %v5682_v20  ;;  %v5605_v20 = vld [vmem:[%s12061_s1 + $0x4c0] sm:$0xff] }
 0x731   :  { %5744 = vmatpush.msra.mxu2 %v5661_v0  ;;  %v5677_v0 = vld [vmem:[%s12061_s1 + $0x6e0] sm:$0xff] }
 0x732   :  { %5760 = vmatpush.msrb.mxu3 %v5681_v6  ;;  %v5604_v6 = vld [vmem:[%s12061_s1 + $0x4b8] sm:$0xff] }
 0x733   :  { %5745 = vmatpush.msra.mxu2 %v5660_v28  ;;  %v5676_v28 = vld [vmem:[%s12061_s1 + $0x6d8] sm:$0xff] }
 0x734   :  { %5761 = vmatpush.msrb.mxu3 %v5680_v49  ;;  %v5603_v49 = vld [vmem:[%s12061_s1 + $0x4b0] sm:$0xff] }
 0x735   :  { %5746 = vmatpush.msra.mxu2 %v5659_v36  ;;  %v5675_v36 = vld [vmem:[%s12061_s1 + $0x6d0] sm:$0xff] }
 0x736   :  { %5762 = vmatpush.msrb.mxu3 %v5679_v21  ;;  %5747 = vmatmul.f32.vlgmr.msra.gmra.mxu2 %v5625_v62  ;;  %v5626_v21 = vld [vmem:[#allocation3 + $0x78] sm:$0xf]  ;;  %v5602_v62 = vld [vmem:[%s12061_s1 + $0x4a8] sm:$0xff] }
 0x737   :  { %5811 = vmatpush.msrb.mxu2 %v5606_v52  ;;  %v5622_v52 = vld [vmem:[%s12061_s1 + $0x548] sm:$0xff] }
 0x738   :  { %5763 = vmatpush.msrb.mxu3 %v5678_v61  ;;  %v5601_v61 = vld [vmem:[%s12061_s1 + $0x4a0] sm:$0xff] }
 0x739   :  { %5812 = vmatpush.msrb.mxu2 %v5605_v20  ;;  %v5621_v20 = vld [vmem:[%s12061_s1 + $0x540] sm:$0xff] }
 0x73a   :  { %5764 = vmatpush.msrb.mxu3 %v5677_v0  ;;  %v5600_v0 = vld [vmem:[%s12061_s1 + $0x498] sm:$0xff] }
 0x73b   :  { %5813 = vmatpush.msrb.mxu2 %v5604_v6  ;;  %v5620_v6 = vld [vmem:[%s12061_s1 + $0x538] sm:$0xff] }
 0x73c   :  { %5765 = vmatpush.msrb.mxu3 %v5676_v28  ;;  %v5599_v28 = vld [vmem:[%s12061_s1 + $0x490] sm:$0xff] }
 0x73d   :  { %5814 = vmatpush.msrb.mxu2 %v5603_v49  ;;  %v5619_v49 = vld [vmem:[%s12061_s1 + $0x530] sm:$0xff] }
 0x73e   :  { %5766 = vmatpush.msrb.mxu3 %v5675_v36  ;;  %v5598_v36 = vld [vmem:[%s12061_s1 + $0x488] sm:$0xff] }
 0x73f   :  { %5767 = vmatmul.f32.vlgmr.msrb.gmra.mxu3 %v5626_v21  ;;  %5815 = vmatpush.msrb.mxu2 %v5602_v62  ;;  %v5618_v21 = vld [vmem:[%s12061_s1 + $0x528] sm:$0xff]  ;;  %v5597_v62 = vld [vmem:[%s12061_s1 + $0x480] sm:$0xff] }
 0x740   :  { %5831 = vmatpush.msra.mxu3 %v5622_v52  ;;  %v5617_v52 = vld [vmem:[%s12061_s1 + $0x520] sm:$0xff] }
 0x741   :  { %5816 = vmatpush.msrb.mxu2 %v5601_v61  ;;  %v5596_v61 = vld [vmem:[%s12061_s1 + $0x478] sm:$0xff] }
 0x742   :  { %5832 = vmatpush.msra.mxu3 %v5621_v20  ;;  %v5616_v20 = vld [vmem:[%s12061_s1 + $0x518] sm:$0xff] }
 0x743   :  { %5817 = vmatpush.msrb.mxu2 %v5600_v0  ;;  %v5595_v0 = vld [vmem:[%s12061_s1 + $0x470] sm:$0xff] }
 0x744   :  { %5833 = vmatpush.msra.mxu3 %v5620_v6  ;;  %v5615_v6 = vld [vmem:[%s12061_s1 + $0x510] sm:$0xff] }
 0x745   :  { %5818 = vmatpush.msrb.mxu2 %v5599_v28  ;;  %v5594_v28 = vld [vmem:[%s12061_s1 + $0x468] sm:$0xff] }
 0x746   :  { %5834 = vmatpush.msra.mxu3 %v5619_v49  ;;  %v5614_v49 = vld [vmem:[%s12061_s1 + $0x508] sm:$0xff] }
 0x747   :  { %5819 = vmatpush.msrb.mxu2 %v5598_v36  ;;  %v5593_v36 = vld [vmem:[%s12061_s1 + $0x460] sm:$0xff] }
 0x748   :  { %5835 = vmatpush.msra.mxu3 %v5618_v21  ;;  %v5613_v21 = vld [vmem:[%s12061_s1 + $0x500] sm:$0xff] }
 0x749   :  { %5820 = vmatpush.msrb.mxu2 %v5597_v62  ;;  %v5592_v62 = vld [vmem:[%s12061_s1 + $0x458] sm:$0xff] }
 0x74a   :  { %5836 = vmatpush.msra.mxu3 %v5617_v52  ;;  %v5612_v52 = vld [vmem:[%s12061_s1 + $0x4f8] sm:$0xff] }
 0x74b   :  { %5821 = vmatpush.msrb.mxu2 %v5596_v61  ;;  %v5591_v61 = vld [vmem:[%s12061_s1 + $0x450] sm:$0xff] }
 0x74c   :  { %5837 = vmatpush.msra.mxu3 %v5616_v20  ;;  %v5611_v20 = vld [vmem:[%s12061_s1 + $0x4f0] sm:$0xff] }
 0x74d   :  { %5822 = vmatpush.msrb.mxu2 %v5595_v0  ;;  %v5902_v0 = vld [vmem:[%s12061_s1 + $0x8c8] sm:$0xff] }
 0x74e   :  { %5838 = vmatpush.msra.mxu3 %v5615_v6  ;;  %v5610_v6 = vld [vmem:[%s12061_s1 + $0x4e8] sm:$0xff] }
 0x74f   :  { %5823 = vmatpush.msrb.mxu2 %v5594_v28  ;;  %v5557_v28 = vld [vmem:[#allocation3 + $0x30] sm:$0xf] }
 0x750   :  { %5839 = vmatpush.msra.mxu3 %v5614_v49  ;;  %v5901_v49 = vld [vmem:[%s12061_s1 + $0x8c0] sm:$0xff] }
 0x751   :  { %5824 = vmatpush.msrb.mxu2 %v5593_v36  ;;  %v5609_v36 = vld [vmem:[%s12061_s1 + $0x4e0] sm:$0xff] }
 0x752   :  { %5840 = vmatpush.msra.mxu3 %v5613_v21  ;;  %v5900_v21 = vld [vmem:[%s12061_s1 + $0x8b8] sm:$0xff] }
 0x753   :  { %5825 = vmatpush.msrb.mxu2 %v5592_v62  ;;  %v5608_v62 = vld [vmem:[%s12061_s1 + $0x4d8] sm:$0xff] }
 0x754   :  { %5841 = vmatpush.msra.mxu3 %v5612_v52  ;;  %v5899_v52 = vld [vmem:[%s12061_s1 + $0x8b0] sm:$0xff] }
 0x755   :  { %5826 = vmatpush.msrb.mxu2 %v5591_v61  ;;  %v5607_v61 = vld [vmem:[%s12061_s1 + $0x4d0] sm:$0xff] }
 0x756   :  { %5842 = vmatpush.msra.mxu3 %v5611_v20  ;;  %5827 = vmatmul.f32.vlgmr.msrb.gmra.mxu2 %v5557_v28  ;;  %v5898_v20 = vld [vmem:[%s12061_s1 + $0x8a8] sm:$0xff]  ;;  %v5897_v28 = vld [vmem:[%s12061_s1 + $0x8a0] sm:$0xff] }
 0x757   :  { %5971 = vmatpush.msra.mxu2 %v5902_v0  ;;  %v5918_v0 = vld [vmem:[%s12061_s1 + $0x948] sm:$0xff] }
 0x758   :  { %5843 = vmatpush.msra.mxu3 %v5610_v6  ;;  %v5558_v6 = vld [vmem:[#allocation3 + $0x38] sm:$0xf] }
 0x759   :  { %5972 = vmatpush.msra.mxu2 %v5901_v49  ;;  %v5917_v49 = vld [vmem:[%s12061_s1 + $0x940] sm:$0xff] }
 0x75a   :  { %5844 = vmatpush.msra.mxu3 %v5609_v36  ;;  %v5896_v36 = vld [vmem:[%s12061_s1 + $0x898] sm:$0xff] }
 0x75b   :  { %5973 = vmatpush.msra.mxu2 %v5900_v21  ;;  %v5916_v21 = vld [vmem:[%s12061_s1 + $0x938] sm:$0xff] }
 0x75c   :  { %5845 = vmatpush.msra.mxu3 %v5608_v62  ;;  %v5895_v62 = vld [vmem:[%s12061_s1 + $0x890] sm:$0xff] }
 0x75d   :  { %5974 = vmatpush.msra.mxu2 %v5899_v52  ;;  %v5915_v52 = vld [vmem:[%s12061_s1 + $0x930] sm:$0xff] }
 0x75e   :  { %5846 = vmatpush.msra.mxu3 %v5607_v61  ;;  %v5894_v61 = vld [vmem:[%s12061_s1 + $0x888] sm:$0xff] }
 0x75f   :  { %5847 = vmatmul.f32.vlgmr.msra.gmra.mxu3 %v5558_v6  ;;  %5975 = vmatpush.msra.mxu2 %v5898_v20  ;;  %v5914_v20 = vld [vmem:[%s12061_s1 + $0x928] sm:$0xff]  ;;  %v5913_v6 = vld [vmem:[%s12061_s1 + $0x920] sm:$0xff] }
 0x760   :  { %5991 = vmatpush.msrb.mxu3 %v5918_v0  ;;  %v5893_v0 = vld [vmem:[%s12061_s1 + $0x880] sm:$0xff] }
 0x761   :  { %5976 = vmatpush.msra.mxu2 %v5897_v28  ;;  %v5892_v28 = vld [vmem:[%s12061_s1 + $0x878] sm:$0xff] }
 0x762   :  { %5992 = vmatpush.msrb.mxu3 %v5917_v49  ;;  %v5912_v49 = vld [vmem:[%s12061_s1 + $0x918] sm:$0xff] }
 0x763   :  { %5977 = vmatpush.msra.mxu2 %v5896_v36  ;;  %v5891_v36 = vld [vmem:[%s12061_s1 + $0x870] sm:$0xff] }
 0x764   :  { %5993 = vmatpush.msrb.mxu3 %v5916_v21  ;;  %v5911_v21 = vld [vmem:[%s12061_s1 + $0x910] sm:$0xff] }
 0x765   :  { %5978 = vmatpush.msra.mxu2 %v5895_v62  ;;  %v5890_v62 = vld [vmem:[%s12061_s1 + $0x868] sm:$0xff] }
 0x766   :  { %5994 = vmatpush.msrb.mxu3 %v5915_v52  ;;  %v5910_v52 = vld [vmem:[%s12061_s1 + $0x908] sm:$0xff] }
 0x767   :  { %5979 = vmatpush.msra.mxu2 %v5894_v61  ;;  %v11691_v61 = vpop.f32.mrf.mxu2 }
 0x768   :  { %5995 = vmatpush.msrb.mxu3 %v5914_v20  ;;  %v5889_v20 = vld [vmem:[%s12061_s1 + $0x860] sm:$0xff] }
 0x769   :  { %5980 = vmatpush.msra.mxu2 %v5893_v0  ;;  %v5909_v0 = vld [vmem:[%s12061_s1 + $0x900] sm:$0xff] }
 0x76a   :  { %5996 = vmatpush.msrb.mxu3 %v5913_v6  ;;  %v5888_v6 = vld [vmem:[%s12061_s1 + $0x858] sm:$0xff] }
 0x76b   :  { %5981 = vmatpush.msra.mxu2 %v5892_v28  ;;  %v5908_v28 = vld [vmem:[%s12061_s1 + $0x8f8] sm:$0xff] }
 0x76c   :  { %5997 = vmatpush.msrb.mxu3 %v5912_v49  ;;  %v11705_v49 = vpop.f32.mrf.mxu3 }
 0x76d   :  { %5982 = vmatpush.msra.mxu2 %v5891_v36  ;;  %v5853_v36 = vld [vmem:[#allocation3 + $0x30] sm:$0x1e] }
 0x76e   :  { %5998 = vmatpush.msrb.mxu3 %v5911_v21  ;;  %v5887_v21 = vld [vmem:[%s12061_s1 + $0x850] sm:$0xff] }
 0x76f   :  { %5983 = vmatpush.msra.mxu2 %v5890_v62  ;;  %v5907_v62 = vld [vmem:[%s12061_s1 + $0x8f0] sm:$0xff] }
 0x770   :  { %5999 = vmatpush.msrb.mxu3 %v5910_v52  ;;  %v5925_v52 = vrot.slane %v5853_v36, 1  ;;  %v5904_v36 = vld [vmem:[%s12061_s1 + $0x8d8] sm:$0xff] }
 0x771   :  { %5984 = vmatpush.msra.mxu2 %v5889_v20  ;;  %v5906_v20 = vld [vmem:[%s12061_s1 + $0x8e8] sm:$0xff] }
 0x772   :  { %6000 = vmatpush.msrb.mxu3 %v5909_v0  ;;  %v4948_v0 = vpop.f32.mrf.mxu2 }
 0x773   :  { %5985 = vmatpush.msra.mxu2 %v5888_v6  ;;  %v5905_v6 = vld [vmem:[%s12061_s1 + $0x8e0] sm:$0xff] }
 0x774   :  { %6001 = vmatpush.msrb.mxu3 %v5908_v28  ;;  %v6061_v28 = vld [vmem:[%s12061_s1 + $0xab8] sm:$0xff] }
 0x775   :  { %5986 = vmatpush.msra.mxu2 %v5887_v21  ;;  %v4968_v21 = vpop.f32.mrf.mxu3 }
 0x776   :  { %6002 = vmatpush.msrb.mxu3 %v5907_v62  ;;  %5987 = vmatmul.f32.vlgmr.msra.gmra.mxu2 %v5925_v52  ;;  %v5854_v62 = vld [vmem:[#allocation3 + $0x38] sm:$0x1e]  ;;  %v6060_v52 = vld [vmem:[%s12061_s1 + $0xab0] sm:$0xff] }
 0x777   :  { %6132 = vmatpush.msrb.mxu2 %v6063_v57  ;;  %v5903_v57 = vld [vmem:[%s12061_s1 + $0x8d0] sm:$0xff] }
 0x778   :  { %6003 = vmatpush.msrb.mxu3 %v5906_v20  ;;  %v5926_v20 = vrot.slane %v5854_v62, 1 }
 0x779   :  { %6133 = vmatpush.msrb.mxu2 %v6062_v50  ;;  %v6079_v50 = vld [vmem:[%s12061_s1 + $0xb48] sm:$0xff] }
 0x77a   :  { %6004 = vmatpush.msrb.mxu3 %v5905_v6  ;;  %v4988_v6 = vpop.f32.mrf.mxu2 }
 0x77b   :  { %6134 = vmatpush.msrb.mxu2 %v6061_v28  ;;  %v6078_v28 = vld [vmem:[%s12061_s1 + $0xb40] sm:$0xff] }
 0x77c   :  { %6005 = vmatpush.msrb.mxu3 %v5904_v36 }
 0x77d   :  { %6135 = vmatpush.msrb.mxu2 %v6060_v52  ;;  %v5008_v36 = vpop.f32.mrf.mxu3  ;;  %v5168_v52 = vpop.f32.mrf.mxu1 }
 0x77e   :  { %6006 = vmatpush.msrb.mxu3 %v5903_v57 }
 0x77f   :  { %6007 = vmatmul.f32.vlgmr.msrb.gmra.mxu3 %v5926_v20  ;;  %6136 = vmatpush.msrb.mxu2 %v6059_v8 }
 0x780   :  { %6152 = vmatpush.msra.mxu3 %v6079_v50 }
 0x781   :  { %6137 = vmatpush.msrb.mxu2 %v6058_v12  ;;  %v5148_v12 = vpop.f32.mrf.mxu0 }
 0x782   :  { %6153 = vmatpush.msra.mxu3 %v6078_v28  ;;  %v5028_v62 = vpop.f32.mrf.mxu2 }
 0x783   :  { %6138 = vmatpush.msrb.mxu2 %v10926_v35 }
 0x784   :  { %6154 = vmatpush.msra.mxu3 %v10931_v42 }
 0x785   :  { %6139 = vmatpush.msrb.mxu2 %v10942_v29  ;;  %v5048_v57 = vpop.f32.mrf.mxu3  ;;  %v5329_v42 = vpop.f32.mrf.mxu1 }
 0x786   :  { %6155 = vmatpush.msra.mxu3 %v10947_v24  ;;  %v6014_v24 = vld [vmem:[#allocation3 + $0x70] sm:$0x1e] }
 0x787   :  { %6140 = vmatpush.msrb.mxu2 %v10960_v27  ;;  %v4929_v27 = vadd.f32 %v11705_v49, %v11691_v61 }
 0x788   :  { %6156 = vmatpush.msra.mxu3 %v10965_v31 }
 0x789   :  { %6141 = vmatpush.msrb.mxu2 %v10978_v37  ;;  %v5309_v31 = vpop.f32.mrf.mxu0  ;;  %v4949_v37 = vadd.f32 %v4948_v0, %v4929_v27 }
 0x78a   :  { %6157 = vmatpush.msra.mxu3 %v10983_v58  ;;  %v5188_v35 = vpop.f32.mrf.mxu2  ;;  %v6086_v58 = vrot.slane %v6014_v24, 1 }
 0x78b   :  { %6142 = vmatpush.msrb.mxu2 %v10996_v45 }
 0x78c   :  { %6158 = vmatpush.msra.mxu3 %v11001_v5  ;;  %v4969_v5 = vadd.f32 %v4968_v21, %v4949_v37 }
 0x78d   :  { %6143 = vmatpush.msrb.mxu2 %v11014_v18  ;;  %v5208_v29 = vpop.f32.mrf.mxu3  ;;  %v5169_v18 = vadd.f32 %v5168_v52, %v5148_v12 }
 0x78e   :  { %6159 = vmatpush.msra.mxu3 %v11019_v33  ;;  %v4989_v33 = vadd.f32 %v4988_v6, %v4969_v5 }
 0x78f   :  { %6144 = vmatpush.msrb.mxu2 %v11032_v44 }
 0x790   :  { %6160 = vmatpush.msra.mxu3 %v11037_v25  ;;  %v6015_v25 = vld [vmem:[#allocation3 + $0x78] sm:$0x1e] }
 0x791   :  { %6145 = vmatpush.msrb.mxu2 %v11050_v1  ;;  %v5330_v1 = vadd.f32 %v5329_v42, %v5309_v31  ;;  %v5470_v8 = vpop.f32.mrf.mxu0 }
 0x792   :  { %6161 = vmatpush.msra.mxu3 %v11055_v7  ;;  %v5349_v45 = vpop.f32.mrf.mxu2  ;;  %v5009_v7 = vadd.f32 %v5008_v36, %v4989_v33 }
 0x793   :  { %6146 = vmatpush.msrb.mxu2 %v11068_v55  ;;  %v5189_v55 = vadd.f32 %v5188_v35, %v5169_v18 }
 0x794   :  { %6162 = vmatpush.msra.mxu3 %v11073_v34  ;;  %v5490_v34 = vpop.f32.mrf.mxu1 }
 0x795   :  { %6147 = vmatpush.msrb.mxu2 %v11086_v53  ;;  %v5369_v44 = vpop.f32.mrf.mxu3  ;;  %v5029_v53 = vadd.f32 %v5028_v62, %v5009_v7 }
 0x796   :  { %6163 = vmatpush.msra.mxu3 %v11091_v9  ;;  %6148 = vmatmul.f32.vlgmr.msrb.gmra.mxu2 %v6086_v58  ;;  %v5209_v9 = vadd.f32 %v5208_v29, %v5189_v55 }
 0x797   :  { %6293 = vmatpush.msra.mxu2 %v11111_v22  ;;  %v5350_v22 = vadd.f32 %v5349_v45, %v5330_v1 }
 0x798   :  { %6164 = vmatpush.msra.mxu3 %v11104_v41  ;;  %v6087_v41 = vrot.slane %v6015_v25, 1 }
 0x799   :  { %6294 = vmatpush.msra.mxu2 %v11126_v63  ;;  %v5491_v63 = vadd.f32 %v5490_v34, %v5470_v8  ;;  %v5370_v49 = vadd.f32 %v5369_v44, %v5350_v22  ;;  %v6370_v8 = vld [vmem:[%s12061_s1 + $0xe50] sm:$0xff] }
 0x79a   :  { %6165 = vmatpush.msra.mxu3 %v11131_v48  ;;  %v5510_v61 = vpop.f32.mrf.mxu2  ;;  %v5049_v48 = vadd.f32 %v5048_v57, %v5029_v53  ;;  %6431 = vmatpush.msrb.mxu0 %v6370_v8  ;;  %v6356_v8 = vld [vmem:[%s12061_s1 + $0xde0] sm:$0xff] }
 0x79b   :  { %6295 = vmatpush.msra.mxu2 %v11143_v15 }
 0x79c   :  { %6166 = vmatpush.msra.mxu3 %v11148_v40  ;;  %v5211_v15 = vadd.f32 %v5209_v9, %v5049_v48  ;;  %v5511_v40 = vadd.f32 %v5510_v61, %v5491_v63  ;;  %v6386_v61 = vld [vmem:[%s12061_s1 + $0xed0] sm:$0xff] }
 0x79d   :  { %6296 = vmatpush.msra.mxu2 %v11161_v47  ;;  %v6402_v63 = vld [vmem:[%s12061_s1 + $0xf50] sm:$0xff]  ;;  %6451 = vmatpush.msra.mxu1 %v6386_v61  ;;  %v6372_v61 = vld [vmem:[%s12061_s1 + $0xe60] sm:$0xff] }
 0x79e   :  { %6167 = vmatpush.msra.mxu3 %v11166_v17  ;;  %v5372_v21 = vadd.f32 %v5370_v49, %v5211_v15  ;;  %v11786_v17 = vld [vmem:[%s12061_s1 + $0xd50] ss:$0 sm:$0xff] }
 0x79f   :  { %6168 = vmatmul.f32.vlgmr.msra.gmra.mxu3 %v6087_v41  ;;  %6297 = vmatpush.msra.mxu2 %v11176_v54  ;;  %v6418_v15 = vld [vmem:[%s12061_s1 + $0xfd0] sm:$0xff] }
 0x7a0   :  { %6313 = vmatpush.msrb.mxu3 %v11181_v56 }
 0x7a1   :  { %6298 = vmatpush.msra.mxu2 %v11194_v23 }
 0x7a2   :  { %6314 = vmatpush.msrb.mxu3 %v11199_v46  ;;  %v5530_v0 = vpop.f32.mrf.mxu3 }
 0x7a3   :  { %v5531_v47 = vadd.f32 %v5530_v0, %v5511_v40  ;;  %6299 = vmatpush.msra.mxu2 %v11212_v3  ;;  %v6175_v3 = vld [vmem:[#allocation3 + $0x30] sm:$0x3c]  ;;  %v6369_v40 = vld [vmem:[%s12061_s1 + $0xe48] sm:$0xff] }
 0x7a4   :  { %6315 = vmatpush.msrb.mxu3 %v11217_v16  ;;  %v6385_v0 = vld [vmem:[%s12061_s1 + $0xec8] sm:$0xff]  ;;  %6432 = vmatpush.msrb.mxu0 %v6369_v40  ;;  %v6371_v40 = vld [vmem:[%s12061_s1 + $0xe58] sm:$0xff] }
 0x7a5   :  { %v5533_v54 = vadd.f32 %v5531_v47, %v5372_v21  ;;  %6300 = vmatpush.msra.mxu2 %v11230_v26  ;;  %v6247_v26 = vrot.slane %v6175_v3, 2  ;;  %v6401_v21 = vld [vmem:[%s12061_s1 + $0xf48] sm:$0xff]  ;;  %6452 = vmatpush.msra.mxu1 %v6385_v0  ;;  %v6387_v0 = vld [vmem:[%s12061_s1 + $0xed8] sm:$0xff] }
 0x7a6   :  { %6316 = vmatpush.msrb.mxu3 %v11235_v38  ;;  %v12323_v38 = vld [vmem:[#allocation63_spill] sm:$0xff] }
 0x7a7   :  { %v5535_v56 = vadd.f32 %v11786_v17, %v5533_v54  ;;  %6301 = vmatpush.msra.mxu2 %v11248_v11  ;;  %v12324_v11 = vld [vmem:[#allocation32_spill] sm:$0xff] }
 0x7a8   :  { %6317 = vmatpush.msrb.mxu3 %v11253_v39  ;;  %v12325_v39 = vld [vmem:[#allocation12_spill] sm:$0xff] }
 0x7a9   :  { %v5536_v23 = vmax.f32 %v5535_v56, 0.0  ;;  %6302 = vmatpush.msra.mxu2 %v11266_v51  ;;  %v12326_v51 = vld [vmem:[#allocation37_spill] sm:$0xff]  ;;  %v6417_v54 = vld [vmem:[%s12061_s1 + $0xfc8] sm:$0xff]  ;;  %v6368_v56 = vld [vmem:[%s12061_s1 + $0xe40] sm:$0xff] }
 0x7aa   :  { %6318 = vmatpush.msrb.mxu3 %v11271_v30  ;;  %v6176_v30 = vld [vmem:[#allocation3 + $0x38] sm:$0x3c]  ;;  %6433 = vmatpush.msrb.mxu0 %v6368_v56 }
 0x7ab   :  { %5537 = vst [vmem:[#allocation4] sm:$0x1] %v5536_v23  ;;  %v7074_v46 = vrot.slane %v5536_v23, 9  ;;  %6303 = vmatpush.msra.mxu2 %v11284_v13  ;;  %v12327_v13 = vld [vmem:[#allocation33_spill] sm:$0xff] }
 0x7ac   :  { %5543 = vst.sshfl [vmem:[#allocation1] sm:$0xff pattern:$0x73625140] %v5536_v23  ;;  %6319 = vmatpush.msrb.mxu3 %v11289_v59 }
 0x7ad   :  { %5542 = vst [vmem:[#allocation4 + $0x2] sm:$0x1] %v7074_v46  ;;  %6304 = vmatpush.msra.mxu2 %v11302_v60  ;;  %v6248_v60 = vrot.slane %v6176_v30, 2  ;;  %v6400_v46 = vld [vmem:[%s12061_s1 + $0xf40] sm:$0xff]  ;;  %v6382_v30 = vld [vmem:[%s12061_s1 + $0xeb0] sm:$0xff] }
 0x7ae   :  { %6320 = vmatpush.msrb.mxu3 %v11307_v19 }
 0x7af   :  { %6305 = vmatpush.msra.mxu2 %v11320_v10  ;;  %v12328_v10 = vld [vmem:[#allocation66_spill] sm:$0xff] }
 0x7b0   :  { %6321 = vmatpush.msrb.mxu3 %v11325_v32  ;;  %v5728_v32 = vpop.f32.mrf.mxu1 }
 0x7b1   :  { %6306 = vmatpush.msra.mxu2 %v11338_v43  ;;  %v5708_v43 = vpop.f32.mrf.mxu0 }
 0x7b2   :  { %6322 = vmatpush.msrb.mxu3 %v11345_v2  ;;  %v5729_v52 = vadd.f32 %v5728_v32, %v5708_v43  ;;  %v6397_v32 = vld [vmem:[%s12061_s1 + $0xf28] sm:$0xff] }
 0x7b3   :  { %v5545_v16 = vld [vmem:[#allocation1 + $0x1] ss:$4 sm:$0xff]  ;;  %6307 = vmatpush.msra.mxu2 %v11356_v4 }
 0x7b4   :  { %5547 = vst [vmem:[#allocation4 + $0x4] sm:$0x1] %v5545_v16  ;;  %6323 = vmatpush.msrb.mxu3 %v11362_v14  ;;  %v6416_v16 = vld [vmem:[%s12061_s1 + $0xfc0] sm:$0xff]  ;;  %v6413_v43 = vld [vmem:[%s12061_s1 + $0xfa8] sm:$0xff] }
 0x7b5   :  { %5548 = vst.sshfl [vmem:[#allocation1] sm:$0xff pattern:$0x73625140] %v5536_v23  ;;  %6308 = vmatpush.msra.mxu2 %v12323_v38  ;;  %v6384_v23 = vld [vmem:[%s12061_s1 + $0xec0] sm:$0xff]  ;;  %v6383_v38 = vld [vmem:[%s12061_s1 + $0xeb8] sm:$0xff] }
 0x7b6   :  { %6324 = vmatpush.msrb.mxu3 %v12324_v11  ;;  %6309 = vmatmul.f32.vlgmr.msra.gmra.mxu2 %v6247_v26  ;;  %v6367_v26 = vld [vmem:[%s12061_s1 + $0xe38] sm:$0xff] }
 0x7b7   :  { %6471 = vmatpush.msrb.mxu2 %v6402_v63  ;;  %6453 = vmatpush.msra.mxu1 %v6384_v23  ;;  %v6415_v11 = vld [vmem:[%s12061_s1 + $0xfb8] sm:$0xff] }
 0x7b8   :  { %6325 = vmatpush.msrb.mxu3 %v12325_v39  ;;  %v5808_v4 = vpop.f32.mrf.mxu1  ;;  %v6366_v39 = vld [vmem:[%s12061_s1 + $0xe30] sm:$0xff]  ;;  %6434 = vmatpush.msrb.mxu0 %v6367_v26  ;;  %v6517_v26 = vld [vmem:[%s12061_s1 + $0x1008] sm:$0xff] }
 0x7b9   :  { %v5748_v2 = vpop.f32.mrf.mxu2  ;;  %v5788_v20 = vpop.f32.mrf.mxu0  ;;  %6472 = vmatpush.msrb.mxu2 %v6401_v21  ;;  %6454 = vmatpush.msra.mxu1 %v6383_v38  ;;  %v6403_v21 = vld [vmem:[%s12061_s1 + $0xf58] sm:$0xff]  ;;  %v6516_v38 = vld [vmem:[%s12061_s1 + $0x1000] sm:$0xff] }
 0x7ba   :  { %6326 = vmatpush.msrb.mxu3 %v12326_v51  ;;  %v5749_v57 = vadd.f32 %v5748_v2, %v5729_v52  ;;  %6435 = vmatpush.msrb.mxu0 %v6366_v39  ;;  %v6364_v2 = vld [vmem:[%s12061_s1 + $0xe20] sm:$0xff]  ;;  %v6378_v52 = vld [vmem:[%s12061_s1 + $0xe90] sm:$0xff]  ;;  %v6513_v39 = vld [vmem:[%s12061_s1 + $0xfe8] sm:$0xff] }
 0x7bb   :  { %6473 = vmatpush.msrb.mxu2 %v6400_v46  ;;  %6455 = vmatpush.msra.mxu1 %v6382_v30  ;;  %v6549_v30 = vld [vmem:[%s12061_s1 + $0x1038] sm:$0xff] }
 0x7bc   :  { %6327 = vmatpush.msrb.mxu3 %v12327_v13  ;;  %v5550_v59 = vld [vmem:[#allocation1 + $0x1] ss:$4 sm:$0xff] }
 0x7bd   :  { %v7075_v19 = vrot.slane %v5550_v59, 9  ;;  %v6398_v13 = vld [vmem:[%s12061_s1 + $0xf30] sm:$0xff] }
 0x7be   :  { %6328 = vmatpush.msrb.mxu3 %v12328_v10  ;;  %v6414_v59 = vld [vmem:[%s12061_s1 + $0xfb0] sm:$0xff] }
 0x7bf   :  { %6329 = vmatmul.f32.vlgmr.msrb.gmra.mxu3 %v6248_v60  ;;  %5554 = vst [vmem:[#allocation4 + $0x6] sm:$0x1] %v7075_v19  ;;  %v6365_v60 = vld [vmem:[%s12061_s1 + $0xe28] sm:$0xff] }
 0x7c0   :  { %v5968_v6 = vpop.f32.mrf.mxu1  ;;  %6491 = vmatpush.msra.mxu3 %v6418_v15  ;;  %v6381_v19 = vld [vmem:[%s12061_s1 + $0xea8] sm:$0xff]  ;;  %6436 = vmatpush.msrb.mxu0 %v6365_v60  ;;  %v6355_v15 = vld [vmem:[%s12061_s1 + $0xdd8] sm:$0xff] }
 0x7c1   :  { %v5948_v36 = vpop.f32.mrf.mxu0  ;;  %6456 = vmatpush.msra.mxu1 %v6381_v19 }
 0x7c2   :  { %v5768_v14 = vpop.f32.mrf.mxu3  ;;  %v5969_v31 = vadd.f32 %v5968_v6, %v5948_v36  ;;  %6492 = vmatpush.msra.mxu3 %v6417_v54  ;;  %v6379_v6 = vld [vmem:[%s12061_s1 + $0xe98] sm:$0xff]  ;;  %6437 = vmatpush.msrb.mxu0 %v6364_v2 }
 0x7c3   :  { %v5769_v42 = vadd.f32 %v5768_v14, %v5749_v57  ;;  %v6396_v14 = vld [vmem:[%s12061_s1 + $0xf20] sm:$0xff]  ;;  %v6411_v36 = vld [vmem:[%s12061_s1 + $0xf98] sm:$0xff]  ;;  %v6394_v57 = vld [vmem:[%s12061_s1 + $0xf10] sm:$0xff] }
 0x7c4   :  { %6493 = vmatpush.msra.mxu3 %v6416_v16  ;;  %v6518_v16 = vld [vmem:[%s12061_s1 + $0x1010] sm:$0xff] }
 0x7c5   :  { %v5789_v27 = vadd.f32 %v5788_v20, %v5769_v42  ;;  %v6412_v20 = vld [vmem:[%s12061_s1 + $0xfa0] sm:$0xff]  ;;  %v6377_v42 = vld [vmem:[%s12061_s1 + $0xe88] sm:$0xff] }
 0x7c6   :  { %6494 = vmatpush.msra.mxu3 %v6415_v11  ;;  %v6514_v11 = vld [vmem:[%s12061_s1 + $0xff0] sm:$0xff] }
 0x7c7   :  { %v5809_v45 = vadd.f32 %v5808_v4, %v5789_v27  ;;  %v6380_v4 = vld [vmem:[%s12061_s1 + $0xea0] sm:$0xff]  ;;  %v6409_v27 = vld [vmem:[%s12061_s1 + $0xf88] sm:$0xff] }
 0x7c8   :  { %v6129_v12 = vpop.f32.mrf.mxu1  ;;  %6495 = vmatpush.msra.mxu3 %v6414_v59  ;;  %6457 = vmatpush.msra.mxu1 %v6380_v4  ;;  %v7090_v59 = vld [vmem:[%s12061_s1 + $0xfd8] ss:$0 sm:$0xff] }
 0x7c9   :  { %v6109_v29 = vpop.f32.mrf.mxu0 }
 0x7ca   :  { %v6130_v58 = vadd.f32 %v6129_v12, %v6109_v29  ;;  %6496 = vmatpush.msra.mxu3 %v6413_v43  ;;  %6458 = vmatpush.msra.mxu1 %v6379_v6  ;;  %v6410_v12 = vld [vmem:[%s12061_s1 + $0xf90] sm:$0xff]  ;;  %v6547_v6 = vld [vmem:[%s12061_s1 + $0x1028] sm:$0xff] }
 0x7cc   :  { %6497 = vmatpush.msra.mxu3 %v6412_v20  ;;  %6459 = vmatpush.msra.mxu1 %v6378_v52 }
 0x7ce   :  { %6498 = vmatpush.msra.mxu3 %v6411_v36  ;;  %6460 = vmatpush.msra.mxu1 %v6377_v42  ;;  %v7091_v36 = vld [vmem:[%s12061_s1 + $0x1020] ss:$0 sm:$0xff] }
 0x7d0   :  { %v6290_v18 = vpop.f32.mrf.mxu1  ;;  %6499 = vmatpush.msra.mxu3 %v6410_v12  ;;  %v7092_v12 = vld [vmem:[%s12061_s1 + $0x1048] ss:$0 sm:$0xff] }
 0x7d1   :  { %v6270_v1 = vpop.f32.mrf.mxu0 }
 0x7d2   :  { %v6291_v55 = vadd.f32 %v6290_v18, %v6270_v1  ;;  %6500 = vmatpush.msra.mxu3 %v6409_v27  ;;  %v6375_v18 = vld [vmem:[%s12061_s1 + $0xe78] sm:$0xff]  ;;  %v6374_v1 = vld [vmem:[%s12061_s1 + $0xe70] sm:$0xff] }
 0x7d9   :  { %v5828_v50 = vpop.f32.mrf.mxu2 }
 0x7da   :  { %v5829_v33 = vadd.f32 %v5828_v50, %v5809_v45  ;;  %v6363_v50 = vld [vmem:[%s12061_s1 + $0xe18] sm:$0xff]  ;;  %v6408_v45 = vld [vmem:[%s12061_s1 + $0xf80] sm:$0xff] }
 0x7db   :  { %6438 = vmatpush.msrb.mxu0 %v6363_v50  ;;  %6501 = vmatpush.msra.mxu3 %v6408_v45  ;;  %v6548_v50 = vld [vmem:[%s12061_s1 + $0x1030] sm:$0xff] }
 0x7e2   :  { %v5848_v28 = vpop.f32.mrf.mxu3 }
 0x7e3   :  { %v5849_v34 = vadd.f32 %v5848_v28, %v5829_v33  ;;  %v6395_v28 = vld [vmem:[%s12061_s1 + $0xf18] sm:$0xff] }
 0x7e4   :  { %v6391_v33 = vld [vmem:[%s12061_s1 + $0xef8] sm:$0xff] }
 0x7f9   :  { %v5988_v62 = vpop.f32.mrf.mxu2 }
 0x7fa   :  { %v5989_v5 = vadd.f32 %v5988_v62, %v5969_v31  ;;  %v6362_v62 = vld [vmem:[%s12061_s1 + $0xe10] sm:$0xff]  ;;  %v6360_v31 = vld [vmem:[%s12061_s1 + $0xe00] sm:$0xff] }
 0x7fb   :  { %6439 = vmatpush.msrb.mxu0 %v6362_v62 }
 0x802   :  { %v6008_v35 = vpop.f32.mrf.mxu3 }
 0x803   :  { %v6009_v44 = vadd.f32 %v6008_v35, %v5989_v5  ;;  %v6361_v35 = vld [vmem:[%s12061_s1 + $0xe08] sm:$0xff]  ;;  %v6359_v5 = vld [vmem:[%s12061_s1 + $0xdf8] sm:$0xff] }
 0x804   :  { %6440 = vmatpush.msrb.mxu0 %v6361_v35 }
 0x805   :  { %v6011_v9 = vadd.f32 %v6009_v44, %v5849_v34  ;;  %v6407_v44 = vld [vmem:[%s12061_s1 + $0xf78] sm:$0xff]  ;;  %v6357_v34 = vld [vmem:[%s12061_s1 + $0xde8] sm:$0xff] }
 0x806   :  { %6441 = vmatpush.msrb.mxu0 %v6360_v31  ;;  %6502 = vmatpush.msra.mxu3 %v6407_v44 }
 0x808   :  { %6442 = vmatpush.msrb.mxu0 %v6359_v5 }
 0x819   :  { %v6149_v24 = vpop.f32.mrf.mxu2 }
 0x81a   :  { %v6150_v25 = vadd.f32 %v6149_v24, %v6130_v58  ;;  %v6393_v24 = vld [vmem:[%s12061_s1 + $0xf08] sm:$0xff]  ;;  %v6392_v58 = vld [vmem:[%s12061_s1 + $0xf00] sm:$0xff] }
 0x822   :  { %v6169_v37 = vpop.f32.mrf.mxu3 }
 0x823   :  { %v6170_v53 = vadd.f32 %v6169_v37, %v6150_v25  ;;  %v6376_v37 = vld [vmem:[%s12061_s1 + $0xe80] sm:$0xff]  ;;  %v6358_v25 = vld [vmem:[%s12061_s1 + $0xdf0] sm:$0xff] }
 0x824   :  { %6461 = vmatpush.msra.mxu1 %v6376_v37  ;;  %6443 = vmatpush.msrb.mxu0 %v6358_v25 }
 0x825   :  { %v6172_v48 = vadd.f32 %v6170_v53, %v6011_v9  ;;  %v6373_v53 = vld [vmem:[%s12061_s1 + $0xe68] sm:$0xff] }
 0x826   :  { %6462 = vmatpush.msra.mxu1 %v6375_v18  ;;  %v6389_v9 = vld [vmem:[%s12061_s1 + $0xee8] sm:$0xff]  ;;  %6444 = vmatpush.msrb.mxu0 %v6357_v34 }
 0x828   :  { %6463 = vmatpush.msra.mxu1 %v6374_v1  ;;  %6445 = vmatpush.msrb.mxu0 %v6356_v8 }
 0x82a   :  { %6464 = vmatpush.msra.mxu1 %v6373_v53  ;;  %6446 = vmatpush.msrb.mxu0 %v6355_v15 }
 0x82c   :  { %6465 = vmatpush.msra.mxu1 %v6372_v61 }
 0x82e   :  { %6466 = vmatpush.msra.mxu1 %v6371_v40 }
 0x839   :  { %v6310_v7 = vpop.f32.mrf.mxu2 }
 0x83a   :  { %v6311_v22 = vadd.f32 %v6310_v7, %v6291_v55  ;;  %v6390_v7 = vld [vmem:[%s12061_s1 + $0xef0] sm:$0xff] }
 0x83b   :  { %v6406_v55 = vld [vmem:[%s12061_s1 + $0xf70] sm:$0xff] }
 0x83c   :  { %6503 = vmatpush.msra.mxu3 %v6406_v55 }
 0x842   :  { %v6330_v41 = vpop.f32.mrf.mxu3 }
 0x843   :  { %v6331_v49 = vadd.f32 %v6330_v41, %v6311_v22  ;;  %v6405_v22 = vld [vmem:[%s12061_s1 + $0xf68] sm:$0xff] }
 0x844   :  { %6504 = vmatpush.msra.mxu3 %v6405_v22 }
 0x845   :  { %v6333_v47 = vadd.f32 %v6331_v49, %v6172_v48  ;;  %v6388_v48 = vld [vmem:[%s12061_s1 + $0xee0] sm:$0xff] }
 0x846   :  { %v6404_v49 = vld [vmem:[%s12061_s1 + $0xf60] sm:$0xff] }
 0x847   :  { %v6334_v3 = vadd.f32 %v11786_v17, %v6333_v47  ;;  %v6399_v17 = vld [vmem:[%s12061_s1 + $0xf38] sm:$0xff]  ;;  %6505 = vmatpush.msra.mxu3 %v6404_v49 }
 0x848   :  { %6474 = vmatpush.msrb.mxu2 %v6399_v17  ;;  %v6519_v47 = vld [vmem:[%s12061_s1 + $0x1018] sm:$0xff] }
 0x849   :  { %v6335_v51 = vmax.f32 %v6334_v3, 0.0  ;;  %6506 = vmatpush.msra.mxu3 %v6403_v21  ;;  %6534 = vmatpush.msra.mxu0 %v6519_v47  ;;  %v6515_v17 = vld [vmem:[%s12061_s1 + $0xff8] sm:$0xff] }
 0x84a   :  { %6475 = vmatpush.msrb.mxu2 %v6398_v13  ;;  %v6512_v13 = vld [vmem:[%s12061_s1 + $0xfe0] sm:$0xff] }
 0x84b   :  { %6336 = vst [vmem:[#allocation4 + $0x1] sm:$0x1] %v6335_v51  ;;  %v7076_v10 = vrot.slane %v6335_v51, 9  ;;  %6535 = vmatpush.msra.mxu0 %v6518_v16 }
 0x84c   :  { %6342 = vst.sshfl [vmem:[#allocation1] sm:$0xff pattern:$0x73625140] %v6335_v51  ;;  %6476 = vmatpush.msrb.mxu2 %v6397_v32 }
 0x84d   :  { %6341 = vst [vmem:[#allocation4 + $0x3] sm:$0x1] %v7076_v10  ;;  %6536 = vmatpush.msra.mxu0 %v6517_v26 }
 0x84e   :  { %6477 = vmatpush.msrb.mxu2 %v6396_v14 }
 0x84f   :  { %6537 = vmatpush.msra.mxu0 %v6516_v38 }
 0x850   :  { %6478 = vmatpush.msrb.mxu2 %v6395_v28  ;;  %v6577_v28 = vld [vmem:[%s12061_s1 + $0x1050] sm:$0xff] }
 0x851   :  { %6538 = vmatpush.msra.mxu0 %v6515_v17 }
 0x852   :  { %6479 = vmatpush.msrb.mxu2 %v6394_v57 }
 0x853   :  { %v6344_v29 = vld [vmem:[#allocation1 + $0x1] ss:$4 sm:$0xff]  ;;  %6539 = vmatpush.msra.mxu0 %v6514_v11 }
 0x854   :  { %6346 = vst [vmem:[#allocation4 + $0x5] sm:$0x1] %v6344_v29  ;;  %6480 = vmatpush.msrb.mxu2 %v6393_v24  ;;  %v7093_v24 = vld [vmem:[%s12061_s1 + $0x1058] ss:$0 sm:$0xff] }
 0x855   :  { %6347 = vst.sshfl [vmem:[#allocation1] sm:$0xff pattern:$0x73625140] %v6335_v51  ;;  %v6550_v51 = vld [vmem:[%s12061_s1 + $0x1040] sm:$0xff]  ;;  %6540 = vmatpush.msra.mxu0 %v6513_v39 }
 0x856   :  { %6481 = vmatpush.msrb.mxu2 %v6392_v58  ;;  %6568 = vmatpush.msrb.mxu1 %v6550_v51 }
 0x857   :  { %6541 = vmatpush.msra.mxu0 %v6512_v13 }
 0x858   :  { %6482 = vmatpush.msrb.mxu2 %v6391_v33  ;;  %6569 = vmatpush.msrb.mxu1 %v6549_v30 }
 0x85a   :  { %6483 = vmatpush.msrb.mxu2 %v6390_v7  ;;  %6570 = vmatpush.msrb.mxu1 %v6548_v50 }
 0x85c   :  { %v6349_v41 = vld [vmem:[#allocation1 + $0x1] ss:$4 sm:$0xff]  ;;  %6484 = vmatpush.msrb.mxu2 %v6389_v9  ;;  %6571 = vmatpush.msrb.mxu1 %v6547_v6 }
 0x85d   :  { %v7077_v63 = vrot.slane %v6349_v41, 9 }
 0x85e   :  { %6485 = vmatpush.msrb.mxu2 %v6388_v48 }
 0x85f   :  { %6353 = vst [vmem:[#allocation4 + $0x7] sm:$0x1] %v7077_v63 }
 0x860   :  { %6486 = vmatpush.msrb.mxu2 %v6387_v0 }
 0x862   :  { %6599 = vmatpush.msra.mxu2 %v6577_v28 }
 0x866   :  { %v6354_v54 = vld [vmem:[#allocation4] sm:$0xff] }
 0x867   :  { %6422 = vst [vmem:[#allocation1] ss:$4 sm:$0xff] %v6354_v54 }
 0x86e   :  { %v6423_v56 = vld.sshfl [vmem:[#allocation1] sm:$0xff pattern:$0x73625140]  ;;  %v6424_v23 = vld.sshfl [vmem:[#allocation1 + $0x8] sm:$0xff pattern:$0x73625140] }
 0x86f   :  { %6447 = vmatmul.f32.vlgmr.msrb.gmra.mxu0 %v6423_v56  ;;  %6467 = vmatmul.f32.vlgmr.msra.gmra.mxu1 %v6424_v23  ;;  %v6425_v46 = vld.sshfl [vmem:[#allocation1 + $0x10] sm:$0xff pattern:$0x73625140]  ;;  %v6426_v3 = vld.sshfl [vmem:[#allocation1 + $0x18] sm:$0xff pattern:$0x73625140] }
 0x870   :  { %6487 = vmatmul.f32.vlgmr.msrb.gmra.mxu2 %v6425_v46  ;;  %6507 = vmatmul.f32.vlgmr.msra.gmra.mxu3 %v6426_v3 }
 0x8ec   :  { %v6448_v60 = vpop.f32.mrf.mxu0  ;;  %v6468_v10 = vpop.f32.mrf.mxu1 }
 0x8ed   :  { %v6449_v19 = vadd.f32 %v7090_v59, %v6448_v60 }
 0x8ef   :  { %v6469_v32 = vadd.f32 %v6468_v10, %v6449_v19 }
 0x8f3   :  { %v6488_v43 = vpop.f32.mrf.mxu2  ;;  %v6508_v4 = vpop.f32.mrf.mxu3 }
 0x8f4   :  { %v6489_v2 = vadd.f32 %v6488_v43, %v6469_v32 }
 0x8f6   :  { %v6509_v14 = vadd.f32 %v6508_v4, %v6489_v2 }
 0x8f8   :  { %v6511_v20 = vmax.f32 %v6509_v14, 0.0 }
 0x8fa   :  { %7078 = vmatmul.msk.f32.vlgmr.msra.gmra.mxu0 %vm6522_vm4, %v6511_v20 }
 0x977   :  { %v6543_v62 = vpop.f32.mrf.mxu0 }
 0x978   :  { %v6544_v52 = vadd.f32 %v7091_v36, %v6543_v62 }
 0x97a   :  { %v6546_v57 = vmax.f32 %v6544_v52, 0.0 }
 0x97c   :  { %7079 = vmatmul.msk.f32.vlgmr.msrb.gmra.mxu1 %vm11_vm0, %v6546_v57 }
 0x9f9   :  { %v6573_v35 = vpop.f32.mrf.mxu1 }
 0x9fa   :  { %v6574_v42 = vadd.f32 %v7092_v12, %v6573_v35 }
 0x9fc   :  { %v6576_v29 = vmax.f32 %v6574_v42, 0.0 }
 0x9fe   :  { %7080 = vmatmul.msk.f32.vlgmr.msra.gmra.mxu2 %vm6580_vm5, %v6576_v29 }
 0xa81   :  { %v6601_v27 = vpop.f32.mrf.mxu2 }
 0xa82   :  { %v6602_v31 = vadd.f32 %v7093_v24, %v6601_v27 }
 0xa84   :  { %6605 = vst.msk [vmem:[%s12063_s2] sm:$0x3] %vm6604_vm6, %v6602_v31 }

</bundles_post_ra>
